<compile_context>
chip_gen: v7x
topology: tpu7x:2x2x1
jax: 0.10.0
libtpu: 0.0.40
codegen_flags: <defaults>
</compile_context>

<pallas_src>
import functools

import numpy as np

import jax
import jax.numpy as jnp
from jax import lax
from jax.experimental import pallas as pl
from jax.experimental.pallas import tpu as pltpu

_LANES = 128  # TPU lane width; fc widths / logits are zero-padded to this.


# --------------------------------------------------------------------------
# small helpers
# --------------------------------------------------------------------------
def _round_up(x, m):
    return ((x + m - 1) // m) * m


def _batch_tile(n8):
    """Batch-row tile: full padded batch when tiny (block == full dim is always
    legal), otherwise a multiple of 16 (bf16 sublane tiling) capped at 256 and
    sized for >=2 grid steps (v7x dual-TC)."""
    if n8 <= 16:
        return n8
    return min(256, _round_up(n8, 32) // 2)


# --------------------------------------------------------------------------
# fused kernel: whole LeNet forward on one batch tile, all VMEM-resident
# --------------------------------------------------------------------------
def _lenet_fused_kernel(x_ref, t1_ref, b1_ref, t2_ref, b2_ref,
                        fw1_ref, fb1_ref, fw2_ref, fb2_ref, fw3_ref, fb3_ref,
                        o_ref):
    def conv_relu_pool(h, t_ref, b_ref):
        # 4 pool-phase block-Toeplitz matmuls; the 2x2 max-pool is an
        # elementwise max of the phase results; bias+ReLU hoisted out of the
        # max (exact: ReLU monotone, bias phase-invariant).
        m = jnp.dot(h, t_ref[0], preferred_element_type=jnp.float32)
        for p in range(1, 4):
            m = jnp.maximum(
                m, jnp.dot(h, t_ref[p], preferred_element_type=jnp.float32))
        return jnp.maximum(m + b_ref[...], 0.0).astype(jnp.bfloat16)

    def fc(h, w_ref, b_ref, relu):
        y = jnp.dot(h, w_ref[...], preferred_element_type=jnp.float32) + b_ref[...]
        return jnp.maximum(y, 0.0).astype(jnp.bfloat16) if relu else y

    h = conv_relu_pool(x_ref[...], t1_ref, b1_ref)     # (TB, 12*12*6) NHWC-flat
    h = conv_relu_pool(h, t2_ref, b2_ref)              # (TB, 4*4*16)  NHWC-flat
    h = fc(h, fw1_ref, fb1_ref, relu=True)             # (TB, 128)  (120 live)
    h = fc(h, fw2_ref, fb2_ref, relu=True)             # (TB, 128)  (84 live)
    o_ref[...] = fc(h, fw3_ref, fb3_ref, relu=False)   # (TB, 128)  (out_dims live)


# --------------------------------------------------------------------------
# pallas wrapper (the whole forward pass)
# --------------------------------------------------------------------------
def lenet_forward(pp, x, *, out_dims):
    """x: (N, Cin, 28, 28) float32 NCHW -> (N, out_dims) float32 logits."""
    n = x.shape[0]
    k1 = x.shape[1] * x.shape[2] * x.shape[3]
    xf = x.reshape(n, k1).astype(jnp.bfloat16)     # NCHW flatten + bf16 stream
    n8 = _round_up(n, 8)
    tb = _batch_tile(n8)
    npad = _round_up(n8, tb)
    if npad != n:
        xf = jnp.pad(xf, ((0, npad - n), (0, 0)))

    t1, cb1 = pp["conv1_t"], pp["conv1_b"]
    t2, cb2 = pp["conv2_t"], pp["conv2_b"]
    fw1, fb1 = pp["fc1_w"], pp["fc1_b"]
    fw2, fb2 = pp["fc2_w"], pp["fc2_b"]
    fw3, fb3 = pp["out_w"], pp["out_b"]
    weights = (t1, cb1, t2, cb2, fw1, fb1, fw2, fb2, fw3, fb3)

    n1 = t1.shape[2]                      # 12*12*6 = 864
    k2, n2 = t2.shape[1], t2.shape[2]     # 864, 4*4*16 = 256
    flops = 2 * npad * (4 * k1 * n1 + 4 * k2 * n2
                        + n2 * _LANES + 2 * _LANES * _LANES)
    w_bytes = sum(int(np.prod(a.shape)) * a.dtype.itemsize for a in weights)
    bytes_acc = int(xf.size) * 2 + npad * _LANES * 4 + w_bytes

    const2 = lambda i: (0, 0)
    const3 = lambda i: (0, 0, 0)
    in_specs = [pl.BlockSpec((tb, k1), lambda i: (i, 0)),
                pl.BlockSpec(t1.shape, const3), pl.BlockSpec(cb1.shape, const2),
                pl.BlockSpec(t2.shape, const3), pl.BlockSpec(cb2.shape, const2),
                pl.BlockSpec(fw1.shape, const2), pl.BlockSpec(fb1.shape, const2),
                pl.BlockSpec(fw2.shape, const2), pl.BlockSpec(fb2.shape, const2),
                pl.BlockSpec(fw3.shape, const2), pl.BlockSpec(fb3.shape, const2)]

    out = pl.pallas_call(
        _lenet_fused_kernel,
        out_shape=jax.ShapeDtypeStruct((npad, _LANES), jnp.float32),
        grid=(npad // tb,),
        in_specs=in_specs,
        out_specs=pl.BlockSpec((tb, _LANES), lambda i: (i, 0)),
        compiler_params=pltpu.CompilerParams(
            dimension_semantics=("parallel",),
            # weights (double-buffered) + tiles + spill scratch ~= 20 MiB;
            # a 48 MiB cap leaves headroom and stays v7x (64 MiB VMEM) safe.
            vmem_limit_bytes=48 * 1024 * 1024),
        cost_estimate=pl.CostEstimate(flops=int(flops), transcendentals=0,
                                      bytes_accessed=int(bytes_acc)),
    )(xf, *weights)

    # the only post-kernel slice: the tiny final logits
    return out[:n, :out_dims]


# --------------------------------------------------------------------------
# parameter init (PyTorch layout) and one-time host-side weight prep
# --------------------------------------------------------------------------
def init_lenet_params(key, in_channels, out_dims):
    """PyTorch-style uniform(-1/sqrt(fan_in), 1/sqrt(fan_in)) init."""
    def uni(k, shape, fan_in):
        b = 1.0 / jnp.sqrt(jnp.float32(fan_in))
        return jax.random.uniform(k, shape, jnp.float32, -b, b)

    ks = jax.random.split(key, 10)
    return {
        "conv1_w": uni(ks[0], (6, in_channels, 5, 5), in_channels * 25),
        "conv1_b": uni(ks[1], (6,), in_channels * 25),
        "conv2_w": uni(ks[2], (16, 6, 5, 5), 6 * 25),
        "conv2_b": uni(ks[3], (16,), 6 * 25),
        "fc1_w": uni(ks[4], (120, 16 * 4 * 4), 16 * 4 * 4),
        "fc1_b": uni(ks[5], (120,), 16 * 4 * 4),
        "fc2_w": uni(ks[6], (84, 120), 120),
        "fc2_b": uni(ks[7], (84,), 120),
        "out_w": uni(ks[8], (out_dims, 84), 84),
        "out_b": uni(ks[9], (out_dims,), 84),
    }


def _conv_pool_toeplitz(w, b, in_h, in_w, channels_first_rows):
    """Expand a 5x5 'valid' conv + 2x2 max-pool into 4 pool-phase matmuls.

    w: (Cout, Cin, KH, KW), b: (Cout,), numpy float32.
    Returns (t, bias) with t: (4, Cin*H*W, Hp*Wp*Cout), bias: (1, Hp*Wp*Cout)
    such that for a flattened input row x (NCHW-flat if channels_first_rows
    else NHWC-flat),  relu(max_p (x @ t[p]) + bias)  equals the layer's
    ReLU+2x2-pooled output flattened NHWC ((hp, wp, co), co minor).
    """
    cout, cin, kh, kw = w.shape
    ho, wo = in_h - kh + 1, in_w - kw + 1
    assert ho % 2 == 0 and wo % 2 == 0, "2x2 pool assumes even conv output dims"
    hp, wp = ho // 2, wo // 2
    t = np.zeros((4, cin * in_h * in_w, hp * wp * cout), np.float32)

    def row(ci, hi, wi):
        if channels_first_rows:
            return (ci * in_h + hi) * in_w + wi       # NCHW-flat input rows
        return (hi * in_w + wi) * cin + ci            # NHWC-flat input rows

    for dh in range(2):
        for dw in range(2):
            ph = dh * 2 + dw
            for hp_i in range(hp):
                for wp_i in range(wp):
                    col0 = (hp_i * wp + wp_i) * cout
                    h0, w0 = 2 * hp_i + dh, 2 * wp_i + dw
                    for ci in range(cin):
                        for ki in range(kh):
                            for kj in range(kw):
                                t[ph, row(ci, h0 + ki, w0 + kj),
                                  col0:col0 + cout] = w[:, ci, ki, kj]
    bias = np.tile(b, hp * wp).reshape(1, hp * wp * cout)
    return t, bias


def prepare_params(params, out_dims):
    """One-time host-side weight prep (outside the jitted forward)."""
    assert out_dims <= _LANES

    def npf(a):
        return np.asarray(jax.device_get(a), np.float32)

    def pad_to(a, shape):
        out = np.zeros(shape, np.float32)
        out[tuple(slice(0, d) for d in a.shape)] = a
        return out

    p = {}
    # conv1: input rows NCHW-flat (matches x.reshape(N, -1), no transpose)
    t1, cb1 = _conv_pool_toeplitz(npf(params["conv1_w"]), npf(params["conv1_b"]),
                                  28, 28, channels_first_rows=True)
    # conv2: input rows NHWC-flat (matches conv1's output column order)
    t2, cb2 = _conv_pool_toeplitz(npf(params["conv2_w"]), npf(params["conv2_b"]),
                                  12, 12, channels_first_rows=False)
    p["conv1_t"] = jnp.asarray(t1, jnp.bfloat16)
    p["conv1_b"] = jnp.asarray(cb1, jnp.float32)
    p["conv2_t"] = jnp.asarray(t2, jnp.bfloat16)
    p["conv2_b"] = jnp.asarray(cb2, jnp.float32)

    # fc1: permute rows from PyTorch's NCHW flatten (c*16+h*4+w) to the NHWC
    # flatten ((h*4+w)*16+c) produced by the conv2 stage -> no transpose.
    w1t = npf(params["fc1_w"]).T                        # (256, 120), NCHW rows
    perm = np.zeros(16 * 4 * 4, np.int32)
    for c in range(16):
        for hh in range(4):
            for ww in range(4):
                perm[(hh * 4 + ww) * 16 + c] = c * 16 + hh * 4 + ww
    p["fc1_w"] = jnp.asarray(pad_to(w1t[perm], (256, _LANES)), jnp.bfloat16)
    p["fc1_b"] = jnp.asarray(pad_to(npf(params["fc1_b"])[None, :], (1, _LANES)),
                             jnp.float32)
    p["fc2_w"] = jnp.asarray(pad_to(npf(params["fc2_w"]).T, (_LANES, _LANES)),
                             jnp.bfloat16)
    p["fc2_b"] = jnp.asarray(pad_to(npf(params["fc2_b"])[None, :], (1, _LANES)),
                             jnp.float32)
    p["out_w"] = jnp.asarray(pad_to(npf(params["out_w"]).T, (_LANES, _LANES)),
                             jnp.bfloat16)
    p["out_b"] = jnp.asarray(pad_to(npf(params["out_b"])[None, :], (1, _LANES)),
                             jnp.float32)
    return p


# --------------------------------------------------------------------------
# pure-JAX reference (mirrors PyTorch forward + the kernel's bf16 rounding)
# --------------------------------------------------------------------------
def lenet_reference(params, x):
    f32, bf16 = jnp.float32, jnp.bfloat16
    hi = lax.Precision.HIGHEST

    def q(a):                       # bf16 stream rounding, f32 accumulation
        return a.astype(bf16).astype(f32)

    def conv_relu_pool(h, w, b):
        y = lax.conv_general_dilated(
            q(h), q(w), window_strides=(1, 1), padding="VALID",
            dimension_numbers=("NCHW", "OIHW", "NCHW"), precision=hi)
        y = jnp.maximum(y + b.reshape(1, -1, 1, 1), 0.0)
        n_, c_, hh, ww = y.shape
        return y.reshape(n_, c_, hh // 2, 2, ww // 2, 2).max(axis=(3, 5))

    h = conv_relu_pool(x, params["conv1_w"], params["conv1_b"])
    h = conv_relu_pool(h, params["conv2_w"], params["conv2_b"])
    h = h.reshape(h.shape[0], -1)                  # PyTorch .view -> NCHW flat

    def fc(h, w, b, relu=True):
        y = jnp.dot(q(h), q(w).T, precision=hi) + b
        return jnp.maximum(y, 0.0) if relu else y

    h = fc(h, params["fc1_w"], params["fc1_b"])
    h = fc(h, params["fc2_w"], params["fc2_b"])
    return fc(h, params["out_w"], params["out_b"], relu=False)


# --------------------------------------------------------------------------
if __name__ == "__main__":
    key = jax.random.PRNGKey(0)
    k_param, k_x = jax.random.split(key)

    batch, in_channels, out_dims = 2, 1, 10
    # 28x28 input so the flattened feature size is 16*4*4 (LeNet / MNIST).
    x = jax.random.normal(k_x, (batch, in_channels, 28, 28), jnp.float32)

    params = init_lenet_params(k_param, in_channels, out_dims)
    pparams = prepare_params(params, out_dims)       # hoisted, one-time prep

    fwd = jax.jit(functools.partial(lenet_forward, out_dims=out_dims))
    logits = fwd(pparams, x)
    jax.block_until_ready(logits)

    assert logits.shape == (batch, out_dims)
    assert logits.dtype == jnp.float32

    # correctness check against a pure-JAX mirror of the PyTorch forward
    ref = lenet_reference(params, x)
    err = float(jnp.max(jnp.abs(logits - ref)))
    assert err < 5e-2, f"max |pallas - reference| = {err}"

    print("KERNEL_OK")
</pallas_src>

<mosaic_0001>
module attributes {stable_mosaic.version = 11 : i64} {
  func.func @_lenet_fused_kernel(%arg0: i32, %arg1: memref<8x784xbf16, #tpu.memory_space<vmem>>, %arg2: memref<4x784x864xbf16, #tpu.memory_space<vmem>>, %arg3: memref<1x864xf32, #tpu.memory_space<vmem>>, %arg4: memref<4x864x256xbf16, #tpu.memory_space<vmem>>, %arg5: memref<1x256xf32, #tpu.memory_space<vmem>>, %arg6: memref<256x128xbf16, #tpu.memory_space<vmem>>, %arg7: memref<1x128xf32, #tpu.memory_space<vmem>>, %arg8: memref<128x128xbf16, #tpu.memory_space<vmem>>, %arg9: memref<1x128xf32, #tpu.memory_space<vmem>>, %arg10: memref<128x128xbf16, #tpu.memory_space<vmem>>, %arg11: memref<1x128xf32, #tpu.memory_space<vmem>>, %arg12: memref<8x128xf32, #tpu.memory_space<vmem>>) attributes {dimension_semantics = [#tpu.dimension_semantics<parallel>], iteration_bounds = array<i64: 1>, scalar_prefetch = 0 : i64, scratch_operands = 0 : i64, tpu.core_type = #tpu.core_type<tc>, window_params = [{transform_indices = @transform_0, window_bounds = array<i64: 8, 784>}, {pipeline_mode = #tpu.pipeline_mode<synchronous>, transform_indices = @transform_1, window_bounds = array<i64: 4, 784, 864>}, {pipeline_mode = #tpu.pipeline_mode<synchronous>, transform_indices = @transform_2, window_bounds = array<i64: 1, 864>}, {pipeline_mode = #tpu.pipeline_mode<synchronous>, transform_indices = @transform_3, window_bounds = array<i64: 4, 864, 256>}, {pipeline_mode = #tpu.pipeline_mode<synchronous>, transform_indices = @transform_4, window_bounds = array<i64: 1, 256>}, {pipeline_mode = #tpu.pipeline_mode<synchronous>, transform_indices = @transform_5, window_bounds = array<i64: 256, 128>}, {pipeline_mode = #tpu.pipeline_mode<synchronous>, transform_indices = @transform_6, window_bounds = array<i64: 1, 128>}, {pipeline_mode = #tpu.pipeline_mode<synchronous>, transform_indices = @transform_7, window_bounds = array<i64: 128, 128>}, {pipeline_mode = #tpu.pipeline_mode<synchronous>, transform_indices = @transform_8, window_bounds = array<i64: 1, 128>}, {pipeline_mode = #tpu.pipeline_mode<synchronous>, transform_indices = @transform_9, window_bounds = array<i64: 128, 128>}, {pipeline_mode = #tpu.pipeline_mode<synchronous>, transform_indices = @transform_10, window_bounds = array<i64: 1, 128>}, {transform_indices = @transform_11, window_bounds = array<i64: 8, 128>}]} {
    %c0 = arith.constant 0 : index
    %c0_0 = arith.constant 0 : index
    %0 = vector.load %arg1[%c0, %c0_0] : memref<8x784xbf16, #tpu.memory_space<vmem>>, vector<8x784xbf16>
    %c0_1 = arith.constant 0 : index
    %c0_2 = arith.constant 0 : index
    %c0_3 = arith.constant 0 : index
    %1 = vector.load %arg2[%c0_1, %c0_2, %c0_3] : memref<4x784x864xbf16, #tpu.memory_space<vmem>>, vector<1x784x864xbf16>
    %2 = vector.shape_cast %1 : vector<1x784x864xbf16> to vector<784x864xbf16>
    %cst = arith.constant dense<0.000000e+00> : vector<8x864xf32>
    %3 = tpu.matmul %0, %2, %cst {dimension_numbers = #tpu.dot_dimension_numbers<[1], [0], [0], [1], [0, 0, 1, 1], [], []>} : vector<8x784xbf16>, vector<784x864xbf16>, vector<8x864xf32> -> vector<8x864xf32>
    %c1 = arith.constant 1 : index
    %c0_4 = arith.constant 0 : index
    %c0_5 = arith.constant 0 : index
    %4 = vector.load %arg2[%c1, %c0_4, %c0_5] : memref<4x784x864xbf16, #tpu.memory_space<vmem>>, vector<1x784x864xbf16>
    %5 = vector.shape_cast %4 : vector<1x784x864xbf16> to vector<784x864xbf16>
    %cst_6 = arith.constant dense<0.000000e+00> : vector<8x864xf32>
    %6 = tpu.matmul %0, %5, %cst_6 {dimension_numbers = #tpu.dot_dimension_numbers<[1], [0], [0], [1], [0, 0, 1, 1], [], []>} : vector<8x784xbf16>, vector<784x864xbf16>, vector<8x864xf32> -> vector<8x864xf32>
    %7 = arith.maximumf %3, %6 : vector<8x864xf32>
    %c2 = arith.constant 2 : index
    %c0_7 = arith.constant 0 : index
    %c0_8 = arith.constant 0 : index
    %8 = vector.load %arg2[%c2, %c0_7, %c0_8] : memref<4x784x864xbf16, #tpu.memory_space<vmem>>, vector<1x784x864xbf16>
    %9 = vector.shape_cast %8 : vector<1x784x864xbf16> to vector<784x864xbf16>
    %cst_9 = arith.constant dense<0.000000e+00> : vector<8x864xf32>
    %10 = tpu.matmul %0, %9, %cst_9 {dimension_numbers = #tpu.dot_dimension_numbers<[1], [0], [0], [1], [0, 0, 1, 1], [], []>} : vector<8x784xbf16>, vector<784x864xbf16>, vector<8x864xf32> -> vector<8x864xf32>
    %11 = arith.maximumf %7, %10 : vector<8x864xf32>
    %c3 = arith.constant 3 : index
    %c0_10 = arith.constant 0 : index
    %c0_11 = arith.constant 0 : index
    %12 = vector.load %arg2[%c3, %c0_10, %c0_11] : memref<4x784x864xbf16, #tpu.memory_space<vmem>>, vector<1x784x864xbf16>
    %13 = vector.shape_cast %12 : vector<1x784x864xbf16> to vector<784x864xbf16>
    %cst_12 = arith.constant dense<0.000000e+00> : vector<8x864xf32>
    %14 = tpu.matmul %0, %13, %cst_12 {dimension_numbers = #tpu.dot_dimension_numbers<[1], [0], [0], [1], [0, 0, 1, 1], [], []>} : vector<8x784xbf16>, vector<784x864xbf16>, vector<8x864xf32> -> vector<8x864xf32>
    %15 = arith.maximumf %11, %14 : vector<8x864xf32>
    %c0_13 = arith.constant 0 : index
    %c0_14 = arith.constant 0 : index
    %16 = vector.load %arg3[%c0_13, %c0_14] : memref<1x864xf32, #tpu.memory_space<vmem>>, vector<1x864xf32>
    %17 = vector.broadcast %16 : vector<1x864xf32> to vector<8x864xf32>
    %18 = arith.addf %15, %17 : vector<8x864xf32>
    %cst_15 = arith.constant 0.000000e+00 : f32
    %19 = vector.broadcast %cst_15 : f32 to vector<8x864xf32>
    %20 = arith.maximumf %18, %19 : vector<8x864xf32>
    %21 = arith.truncf %20 : vector<8x864xf32> to vector<8x864xbf16>
    %c0_16 = arith.constant 0 : index
    %c0_17 = arith.constant 0 : index
    %c0_18 = arith.constant 0 : index
    %22 = vector.load %arg4[%c0_16, %c0_17, %c0_18] : memref<4x864x256xbf16, #tpu.memory_space<vmem>>, vector<1x864x256xbf16>
    %23 = vector.shape_cast %22 : vector<1x864x256xbf16> to vector<864x256xbf16>
    %cst_19 = arith.constant dense<0.000000e+00> : vector<8x256xf32>
    %24 = tpu.matmul %21, %23, %cst_19 {dimension_numbers = #tpu.dot_dimension_numbers<[1], [0], [0], [1], [0, 0, 1, 1], [], []>} : vector<8x864xbf16>, vector<864x256xbf16>, vector<8x256xf32> -> vector<8x256xf32>
    %c1_20 = arith.constant 1 : index
    %c0_21 = arith.constant 0 : index
    %c0_22 = arith.constant 0 : index
    %25 = vector.load %arg4[%c1_20, %c0_21, %c0_22] : memref<4x864x256xbf16, #tpu.memory_space<vmem>>, vector<1x864x256xbf16>
    %26 = vector.shape_cast %25 : vector<1x864x256xbf16> to vector<864x256xbf16>
    %cst_23 = arith.constant dense<0.000000e+00> : vector<8x256xf32>
    %27 = tpu.matmul %21, %26, %cst_23 {dimension_numbers = #tpu.dot_dimension_numbers<[1], [0], [0], [1], [0, 0, 1, 1], [], []>} : vector<8x864xbf16>, vector<864x256xbf16>, vector<8x256xf32> -> vector<8x256xf32>
    %28 = arith.maximumf %24, %27 : vector<8x256xf32>
    %c2_24 = arith.constant 2 : index
    %c0_25 = arith.constant 0 : index
    %c0_26 = arith.constant 0 : index
    %29 = vector.load %arg4[%c2_24, %c0_25, %c0_26] : memref<4x864x256xbf16, #tpu.memory_space<vmem>>, vector<1x864x256xbf16>
    %30 = vector.shape_cast %29 : vector<1x864x256xbf16> to vector<864x256xbf16>
    %cst_27 = arith.constant dense<0.000000e+00> : vector<8x256xf32>
    %31 = tpu.matmul %21, %30, %cst_27 {dimension_numbers = #tpu.dot_dimension_numbers<[1], [0], [0], [1], [0, 0, 1, 1], [], []>} : vector<8x864xbf16>, vector<864x256xbf16>, vector<8x256xf32> -> vector<8x256xf32>
    %32 = arith.maximumf %28, %31 : vector<8x256xf32>
    %c3_28 = arith.constant 3 : index
    %c0_29 = arith.constant 0 : index
    %c0_30 = arith.constant 0 : index
    %33 = vector.load %arg4[%c3_28, %c0_29, %c0_30] : memref<4x864x256xbf16, #tpu.memory_space<vmem>>, vector<1x864x256xbf16>
    %34 = vector.shape_cast %33 : vector<1x864x256xbf16> to vector<864x256xbf16>
    %cst_31 = arith.constant dense<0.000000e+00> : vector<8x256xf32>
    %35 = tpu.matmul %21, %34, %cst_31 {dimension_numbers = #tpu.dot_dimension_numbers<[1], [0], [0], [1], [0, 0, 1, 1], [], []>} : vector<8x864xbf16>, vector<864x256xbf16>, vector<8x256xf32> -> vector<8x256xf32>
    %36 = arith.maximumf %32, %35 : vector<8x256xf32>
    %c0_32 = arith.constant 0 : index
    %c0_33 = arith.constant 0 : index
    %37 = vector.load %arg5[%c0_32, %c0_33] : memref<1x256xf32, #tpu.memory_space<vmem>>, vector<1x256xf32>
    %38 = vector.broadcast %37 : vector<1x256xf32> to vector<8x256xf32>
    %39 = arith.addf %36, %38 : vector<8x256xf32>
    %cst_34 = arith.constant 0.000000e+00 : f32
    %40 = vector.broadcast %cst_34 : f32 to vector<8x256xf32>
    %41 = arith.maximumf %39, %40 : vector<8x256xf32>
    %42 = arith.truncf %41 : vector<8x256xf32> to vector<8x256xbf16>
    %c0_35 = arith.constant 0 : index
    %c0_36 = arith.constant 0 : index
    %43 = vector.load %arg6[%c0_35, %c0_36] : memref<256x128xbf16, #tpu.memory_space<vmem>>, vector<256x128xbf16>
    %cst_37 = arith.constant dense<0.000000e+00> : vector<8x128xf32>
    %44 = tpu.matmul %42, %43, %cst_37 {dimension_numbers = #tpu.dot_dimension_numbers<[1], [0], [0], [1], [0, 0, 1, 1], [], []>} : vector<8x256xbf16>, vector<256x128xbf16>, vector<8x128xf32> -> vector<8x128xf32>
    %c0_38 = arith.constant 0 : index
    %c0_39 = arith.constant 0 : index
    %45 = vector.load %arg7[%c0_38, %c0_39] : memref<1x128xf32, #tpu.memory_space<vmem>>, vector<1x128xf32>
    %46 = vector.broadcast %45 : vector<1x128xf32> to vector<8x128xf32>
    %47 = arith.addf %44, %46 : vector<8x128xf32>
    %cst_40 = arith.constant 0.000000e+00 : f32
    %48 = vector.broadcast %cst_40 : f32 to vector<8x128xf32>
    %49 = arith.maximumf %47, %48 : vector<8x128xf32>
    %50 = arith.truncf %49 : vector<8x128xf32> to vector<8x128xbf16>
    %c0_41 = arith.constant 0 : index
    %c0_42 = arith.constant 0 : index
    %51 = vector.load %arg8[%c0_41, %c0_42] : memref<128x128xbf16, #tpu.memory_space<vmem>>, vector<128x128xbf16>
    %cst_43 = arith.constant dense<0.000000e+00> : vector<8x128xf32>
    %52 = tpu.matmul %50, %51, %cst_43 {dimension_numbers = #tpu.dot_dimension_numbers<[1], [0], [0], [1], [0, 0, 1, 1], [], []>} : vector<8x128xbf16>, vector<128x128xbf16>, vector<8x128xf32> -> vector<8x128xf32>
    %c0_44 = arith.constant 0 : index
    %c0_45 = arith.constant 0 : index
    %53 = vector.load %arg9[%c0_44, %c0_45] : memref<1x128xf32, #tpu.memory_space<vmem>>, vector<1x128xf32>
    %54 = vector.broadcast %53 : vector<1x128xf32> to vector<8x128xf32>
    %55 = arith.addf %52, %54 : vector<8x128xf32>
    %cst_46 = arith.constant 0.000000e+00 : f32
    %56 = vector.broadcast %cst_46 : f32 to vector<8x128xf32>
    %57 = arith.maximumf %55, %56 : vector<8x128xf32>
    %58 = arith.truncf %57 : vector<8x128xf32> to vector<8x128xbf16>
    %c0_47 = arith.constant 0 : index
    %c0_48 = arith.constant 0 : index
    %59 = vector.load %arg10[%c0_47, %c0_48] : memref<128x128xbf16, #tpu.memory_space<vmem>>, vector<128x128xbf16>
    %cst_49 = arith.constant dense<0.000000e+00> : vector<8x128xf32>
    %60 = tpu.matmul %58, %59, %cst_49 {dimension_numbers = #tpu.dot_dimension_numbers<[1], [0], [0], [1], [0, 0, 1, 1], [], []>} : vector<8x128xbf16>, vector<128x128xbf16>, vector<8x128xf32> -> vector<8x128xf32>
    %c0_50 = arith.constant 0 : index
    %c0_51 = arith.constant 0 : index
    %61 = vector.load %arg11[%c0_50, %c0_51] : memref<1x128xf32, #tpu.memory_space<vmem>>, vector<1x128xf32>
    %62 = vector.broadcast %61 : vector<1x128xf32> to vector<8x128xf32>
    %63 = arith.addf %60, %62 : vector<8x128xf32>
    %c0_52 = arith.constant 0 : index
    %c0_53 = arith.constant 0 : index
    %64 = vector.load %arg12[%c0_52, %c0_53] : memref<8x128xf32, #tpu.memory_space<vmem>>, vector<8x128xf32>
    tpu.vector_store %arg12[%c0_52, %c0_53], %63 {strides = array<i32>} : memref<8x128xf32, #tpu.memory_space<vmem>>, vector<8x128xf32>,
    return
  }
  func.func @transform_0(%arg0: i32) -> (i32, i32) {
    %c0_i32 = arith.constant 0 : i32
    %c0_i32_0 = arith.constant 0 : i32
    return %arg0, %c0_i32 : i32, i32
  }
  func.func @transform_1(%arg0: i32) -> (i32, i32, i32) {
    %c0_i32 = arith.constant 0 : i32
    %c0_i32_0 = arith.constant 0 : i32
    %c0_i32_1 = arith.constant 0 : i32
    %c0_i32_2 = arith.constant 0 : i32
    return %c0_i32, %c0_i32_0, %c0_i32_1 : i32, i32, i32
  }
  func.func @transform_2(%arg0: i32) -> (i32, i32) {
    %c0_i32 = arith.constant 0 : i32
    %c0_i32_0 = arith.constant 0 : i32
    %c0_i32_1 = arith.constant 0 : i32
    return %c0_i32, %c0_i32_0 : i32, i32
  }
  func.func @transform_3(%arg0: i32) -> (i32, i32, i32) {
    %c0_i32 = arith.constant 0 : i32
    %c0_i32_0 = arith.constant 0 : i32
    %c0_i32_1 = arith.constant 0 : i32
    %c0_i32_2 = arith.constant 0 : i32
    return %c0_i32, %c0_i32_0, %c0_i32_1 : i32, i32, i32
  }
  func.func @transform_4(%arg0: i32) -> (i32, i32) {
    %c0_i32 = arith.constant 0 : i32
    %c0_i32_0 = arith.constant 0 : i32
    %c0_i32_1 = arith.constant 0 : i32
    return %c0_i32, %c0_i32_0 : i32, i32
  }
  func.func @transform_5(%arg0: i32) -> (i32, i32) {
    %c0_i32 = arith.constant 0 : i32
    %c0_i32_0 = arith.constant 0 : i32
    %c0_i32_1 = arith.constant 0 : i32
    return %c0_i32, %c0_i32_0 : i32, i32
  }
  func.func @transform_6(%arg0: i32) -> (i32, i32) {
    %c0_i32 = arith.constant 0 : i32
    %c0_i32_0 = arith.constant 0 : i32
    %c0_i32_1 = arith.constant 0 : i32
    return %c0_i32, %c0_i32_0 : i32, i32
  }
  func.func @transform_7(%arg0: i32) -> (i32, i32) {
    %c0_i32 = arith.constant 0 : i32
    %c0_i32_0 = arith.constant 0 : i32
    %c0_i32_1 = arith.constant 0 : i32
    return %c0_i32, %c0_i32_0 : i32, i32
  }
  func.func @transform_8(%arg0: i32) -> (i32, i32) {
    %c0_i32 = arith.constant 0 : i32
    %c0_i32_0 = arith.constant 0 : i32
    %c0_i32_1 = arith.constant 0 : i32
    return %c0_i32, %c0_i32_0 : i32, i32
  }
  func.func @transform_9(%arg0: i32) -> (i32, i32) {
    %c0_i32 = arith.constant 0 : i32
    %c0_i32_0 = arith.constant 0 : i32
    %c0_i32_1 = arith.constant 0 : i32
    return %c0_i32, %c0_i32_0 : i32, i32
  }
  func.func @transform_10(%arg0: i32) -> (i32, i32) {
    %c0_i32 = arith.constant 0 : i32
    %c0_i32_0 = arith.constant 0 : i32
    %c0_i32_1 = arith.constant 0 : i32
    return %c0_i32, %c0_i32_0 : i32, i32
  }
  func.func @transform_11(%arg0: i32) -> (i32, i32) {
    %c0_i32 = arith.constant 0 : i32
    %c0_i32_0 = arith.constant 0 : i32
    return %arg0, %c0_i32 : i32, i32
  }
}

</mosaic_0001>

<bundles_post_ra>
// kernel: lenet_forward.1
= control target key start
LH: loop header
LB: loop body
LE: loop exit
PB: predicated region body
PF: predicated region fallthrough
CT: control target
= control target key end

     0   :  { %16 = vsyncpa [#allocation3], 0  ;;  %s21201_s0 = inlined_call_operand.vmem [shape: bf16[8,784], index: 0, kind: input, shape index: {}]   ;;  %s21202_s1 = inlined_call_operand.hbm [shape: bf16[4,784,864], index: 1, kind: input, shape index: {}]   ;;  %s21203_s2 = inlined_call_operand.hbm [shape: f32[1,864], index: 2, kind: input, shape index: {}]   ;;  %s21204_s3 = inlined_call_operand.hbm [shape: bf16[4,864,256], index: 3, kind: input, shape index: {}]   ;;  %s21205_s4 = inlined_call_operand.hbm [shape: f32[1,256], index: 4, kind: input, shape index: {}]   ;;  %s21206_s5 = inlined_call_operand.hbm [shape: bf16[256,128], index: 5, kind: input, shape index: {}]   ;;  %s21207_s6 = inlined_call_operand.hbm [shape: f32[1,128], index: 6, kind: input, shape index: {}]   ;;  %s21208_s7 = inlined_call_operand.hbm [shape: bf16[128,128], index: 7, kind: input, shape index: {}]   ;;  %s21209_s8 = inlined_call_operand.hbm [shape: f32[1,128], index: 8, kind: input, shape index: {}]   ;;  %s21210_s9 = inlined_call_operand.hbm [shape: bf16[128,128], index: 9, kind: input, shape index: {}]   ;;  %s21211_s10 = inlined_call_operand.hbm [shape: f32[1,128], index: 10, kind: input, shape index: {}]   ;;  %s21212_s11 = inlined_call_operand.vmem [shape: f32[8,128], index: 11, kind: output, shape index: {}]  }
   0x1   :  { %17 = vsyncpa [#allocation5], 0 }
   0x2   :  { %18 = vsyncpa [#allocation8], 0 }
   0x3   :  { %19 = vsyncpa [#allocation11], 0 }
   0x4   :  { %20 = vsyncpa [#allocation14], 0 }
   0x5   :  { %21 = vsyncpa [#allocation17], 0  ;;  %s20536_s17 = smov [#allocation4]   ;;  %s20537_s19 = smov [#allocation7]  }
   0x6   :  { %s42_s18 = sshll.u32 %s20536_s17, 4  ;;  %s64_s20 = sshll.u32 %s20537_s19, 4  ;;  %s43_s18 = int_to_ptr.vmem [resolvable:$true] %s42_s18  ;;  %s65_s20 = int_to_ptr.vmem [resolvable:$true] %s64_s20 }
   0x7   :  { %s20304_s23 = scalar_lea.hbm %s21203_s2, 112 }
   0x8   :  { %p20305_p0 = scmp.ne.s32.totalorder %s21203_s2, %s20304_s23  ;;  %p20308_p1 = scmp.lt.u32.totalorder %s20304_s23, %s21203_s2 }
   0xa   :  { %p20310_p2 = pnand %p20308_p1, %p20305_p0 }
   0xc   :  { %20313 = shalt.err (!%p20310_p2)
}
   0xd   :  { %s20314_s28 = scalar_lea.vmem %s43_s18, 112  ;;  %s20318_s29 = scalar_lea.vmem %s43_s18, 128 }
   0xe   :  { %p20315_p3 = scmp.ne.s32.totalorder %s43_s18, %s20314_s28  ;;  %p20319_p4 = scmp.lt.s32.totalorder %s43_s18, %s43_s18 }
   0xf   :  { %p20320_p5 = scmp.lt.s32.totalorder %s20318_s29, %s20314_s28 }
  0x11   :  { %p20321_p6 = por %p20320_p5, %p20319_p4 }
  0x13   :  { %p20322_p7 = pnand %p20321_p6, %p20315_p3 }
  0x15   :  { %20325 = shalt.err (!%p20322_p7)
}
  0x16   :  { %45 = dma.hbm_to_vmem [thread:$0]  %s21203_s2, 112, %s43_s18, [#allocation5]  }
  0x17   :  { %s20326_s15 = scalar_lea.hbm %s21205_s4, 32 }
  0x18   :  { %p20327_p8 = scmp.ne.s32.totalorder %s21205_s4, %s20326_s15  ;;  %p20330_p9 = scmp.lt.u32.totalorder %s20326_s15, %s21205_s4 }
  0x1a   :  { %p20332_p10 = pnand %p20330_p9, %p20327_p8 }
  0x1c   :  { %20335 = shalt.err (!%p20332_p10)
}
  0x1d   :  { %s20336_s22 = scalar_lea.vmem %s65_s20, 32  ;;  %p20341_p12 = scmp.lt.s32.totalorder %s65_s20, %s65_s20 }
  0x1e   :  { %p20337_p11 = scmp.ne.s32.totalorder %s65_s20, %s20336_s22  ;;  %p20342_p13 = scmp.lt.s32.totalorder %s20336_s22, %s20336_s22 }
  0x20   :  { %p20343_p0 = por %p20342_p13, %p20341_p12 }
  0x22   :  { %p20344_p1 = pnand %p20343_p0, %p20337_p11 }
  0x24   :  { %20347 = shalt.err (!%p20344_p1)
}
  0x25   :  { %67 = dma.hbm_to_vmem [thread:$0]  %s21205_s4, 32, %s65_s20, [#allocation8]  }
  0x26   :  { %s20538_s23 = smov [#allocation10]   ;;  %s20539_s25 = smov [#allocation13]  }
  0x27   :  { %s86_s24 = sshll.u32 %s20538_s23, 4  ;;  %s108_s26 = sshll.u32 %s20539_s25, 4  ;;  %s87_s24 = int_to_ptr.vmem [resolvable:$true] %s86_s24  ;;  %s109_s26 = int_to_ptr.vmem [resolvable:$true] %s108_s26 }
  0x28   :  { %s20348_s29 = scalar_lea.hbm %s21207_s6, 16 }
  0x29   :  { %p20349_p2 = scmp.ne.s32.totalorder %s21207_s6, %s20348_s29  ;;  %p20352_p3 = scmp.lt.u32.totalorder %s20348_s29, %s21207_s6 }
  0x2b   :  { %p20354_p4 = pnand %p20352_p3, %p20349_p2 }
  0x2d   :  { %20357 = shalt.err (!%p20354_p4)
}
  0x2e   :  { %s20358_s4 = scalar_lea.vmem %s87_s24, 16  ;;  %s20362_s20 = scalar_lea.vmem %s87_s24, 32 }
  0x2f   :  { %p20359_p5 = scmp.ne.s32.totalorder %s87_s24, %s20358_s4  ;;  %p20363_p6 = scmp.lt.s32.totalorder %s87_s24, %s87_s24 }
  0x30   :  { %p20364_p7 = scmp.lt.s32.totalorder %s20362_s20, %s20358_s4 }
  0x32   :  { %p20365_p8 = por %p20364_p7, %p20363_p6 }
  0x34   :  { %p20366_p9 = pnand %p20365_p8, %p20359_p5 }
  0x36   :  { %20369 = shalt.err (!%p20366_p9)
}
  0x37   :  { %89 = dma.hbm_to_vmem [thread:$0]  %s21207_s6, 16, %s87_s24, [#allocation11]  }
  0x38   :  { %s20370_s21 = scalar_lea.hbm %s21209_s8, 16 }
  0x39   :  { %p20371_p10 = scmp.ne.s32.totalorder %s21209_s8, %s20370_s21  ;;  %p20374_p11 = scmp.lt.u32.totalorder %s20370_s21, %s21209_s8 }
  0x3b   :  { %p20376_p12 = pnand %p20374_p11, %p20371_p10 }
  0x3d   :  { %20379 = shalt.err (!%p20376_p12)
}
  0x3e   :  { %s20380_s25 = scalar_lea.vmem %s109_s26, 16  ;;  %s20384_s27 = scalar_lea.vmem %s109_s26, 32 }
  0x3f   :  { %p20381_p13 = scmp.ne.s32.totalorder %s109_s26, %s20380_s25  ;;  %p20385_p0 = scmp.lt.s32.totalorder %s109_s26, %s109_s26 }
  0x40   :  { %p20386_p1 = scmp.lt.s32.totalorder %s20384_s27, %s20380_s25 }
  0x42   :  { %p20387_p2 = por %p20386_p1, %p20385_p0 }
  0x44   :  { %p20388_p3 = pnand %p20387_p2, %p20381_p13 }
  0x46   :  { %20391 = shalt.err (!%p20388_p3)
}
  0x47   :  { %111 = dma.hbm_to_vmem [thread:$0]  %s21209_s8, 16, %s109_s26, [#allocation14]  }
  0x48   :  { %s20540_s28 = smov [#allocation2]   ;;  %s20392_s13 = scalar_lea.hbm %s21202_s1, 175616 }
  0x49   :  { %s29_s29 = sshll.u32 %s20540_s28, 4  ;;  %p20393_p4 = scmp.ne.s32.totalorder %s21202_s1, %s20392_s13  ;;  %s30_s29 = int_to_ptr.vmem [resolvable:$true] %s29_s29 }
  0x4a   :  { %p20396_p5 = scmp.lt.u32.totalorder %s20392_s13, %s21202_s1 }
  0x4c   :  { %p20398_p6 = pnand %p20396_p5, %p20393_p4 }
  0x4e   :  { %20401 = shalt.err (!%p20398_p6)
}
  0x4f   :  { %s20402_s16 = scalar_lea.vmem %s30_s29, 175616  ;;  %p20407_p8 = scmp.lt.s32.totalorder %s30_s29, %s30_s29 }
  0x50   :  { %p20403_p7 = scmp.ne.s32.totalorder %s30_s29, %s20402_s16  ;;  %p20408_p9 = scmp.lt.s32.totalorder %s20402_s16, %s20402_s16 }
  0x52   :  { %p20409_p10 = por %p20408_p9, %p20407_p8 }
  0x54   :  { %p20410_p11 = pnand %p20409_p10, %p20403_p7 }
  0x56   :  { %20413 = shalt.err (!%p20410_p11)
}
  0x57   :  { %s20541_s8 = smov 448   ;;  %s20542_s26 = smov 28  }
  0x58   :  { %35 = dma.hbm_to_vmem [thread:$0]  %s21202_s1, 175616, %s30_s29, [#allocation3], %s20541_s8, %s20541_s8, %s20542_s26  }
  0x59   :  { %s20543_s21 = smov [#allocation6]   ;;  %s20414_s23 = scalar_lea.hbm %s21204_s3, 55296 }
  0x5a   :  { %s51_s22 = sshll.u32 %s20543_s21, 4  ;;  %p20415_p12 = scmp.ne.s32.totalorder %s21204_s3, %s20414_s23  ;;  %s52_s22 = int_to_ptr.vmem [resolvable:$true] %s51_s22 }
  0x5b   :  { %p20418_p13 = scmp.lt.u32.totalorder %s20414_s23, %s21204_s3 }
  0x5d   :  { %p20420_p0 = pnand %p20418_p13, %p20415_p12 }
  0x5f   :  { %20423 = shalt.err (!%p20420_p0)
}
  0x60   :  { %s20424_s28 = scalar_lea.vmem %s52_s22, 55296  ;;  %p20429_p2 = scmp.lt.s32.totalorder %s52_s22, %s52_s22 }
  0x61   :  { %p20425_p1 = scmp.ne.s32.totalorder %s52_s22, %s20424_s28  ;;  %p20430_p3 = scmp.lt.s32.totalorder %s20424_s28, %s20424_s28 }
  0x63   :  { %p20431_p4 = por %p20430_p3, %p20429_p2 }
  0x65   :  { %p20432_p5 = pnand %p20431_p4, %p20425_p1 }
  0x67   :  { %20435 = shalt.err (!%p20432_p5)
}
  0x68   :  { %s20544_s1 = smov 128   ;;  %s20545_s29 = smov 8  }
  0x69   :  { %57 = dma.hbm_to_vmem [thread:$0]  %s21204_s3, 55296, %s52_s22, [#allocation5], %s20544_s1, %s20544_s1, %s20545_s29  }
  0x6a   :  { %s20546_s13 = smov [#allocation9]   ;;  %s20436_s15 = scalar_lea.hbm %s21206_s5, 2048 }
  0x6b   :  { %s73_s14 = sshll.u32 %s20546_s13, 4  ;;  %p20437_p6 = scmp.ne.s32.totalorder %s21206_s5, %s20436_s15  ;;  %s74_s14 = int_to_ptr.vmem [resolvable:$true] %s73_s14 }
  0x6c   :  { %p20440_p7 = scmp.lt.u32.totalorder %s20436_s15, %s21206_s5 }
  0x6e   :  { %p20442_p8 = pnand %p20440_p7, %p20437_p6 }
  0x70   :  { %20445 = shalt.err (!%p20442_p8)
}
  0x71   :  { %s20446_s19 = scalar_lea.vmem %s74_s14, 2048  ;;  %p20451_p10 = scmp.lt.s32.totalorder %s74_s14, %s74_s14 }
  0x72   :  { %p20447_p9 = scmp.ne.s32.totalorder %s74_s14, %s20446_s19  ;;  %p20452_p11 = scmp.lt.s32.totalorder %s20446_s19, %s20446_s19 }
  0x74   :  { %p20453_p12 = por %p20452_p11, %p20451_p10 }
  0x76   :  { %p20454_p13 = pnand %p20453_p12, %p20447_p9 }
  0x78   :  { %20457 = shalt.err (!%p20454_p13)
}
  0x79   :  { %s20547_s3 = smov 64   ;;  %s20548_s21 = smov 4  }
  0x7a   :  { %79 = dma.hbm_to_vmem [thread:$0]  %s21206_s5, 2048, %s74_s14, [#allocation8], %s20547_s3, %s20547_s3, %s20548_s21  }
  0x7b   :  { %s20549_s18 = smov [#allocation12]   ;;  %s20550_s25 = smov [#allocation15]  }
  0x7c   :  { %s95_s23 = sshll.u32 %s20549_s18, 4  ;;  %s117_s27 = sshll.u32 %s20550_s25, 4  ;;  %s96_s23 = int_to_ptr.vmem [resolvable:$true] %s95_s23  ;;  %s118_s27 = int_to_ptr.vmem [resolvable:$true] %s117_s27 }
  0x7d   :  { %s20458_s28 = scalar_lea.hbm %s21208_s7, 1024 }
  0x7e   :  { %p20459_p0 = scmp.ne.s32.totalorder %s21208_s7, %s20458_s28  ;;  %p20462_p1 = scmp.lt.u32.totalorder %s20458_s28, %s21208_s7 }
  0x80   :  { %p20464_p2 = pnand %p20462_p1, %p20459_p0 }
  0x82   :  { %20467 = shalt.err (!%p20464_p2)
}
  0x83   :  { %s20468_s5 = scalar_lea.vmem %s96_s23, 1024  ;;  %p20473_p4 = scmp.lt.s32.totalorder %s96_s23, %s96_s23 }
  0x84   :  { %p20469_p3 = scmp.ne.s32.totalorder %s96_s23, %s20468_s5  ;;  %p20474_p5 = scmp.lt.s32.totalorder %s20468_s5, %s20468_s5 }
  0x86   :  { %p20475_p6 = por %p20474_p5, %p20473_p4 }
  0x88   :  { %p20476_p7 = pnand %p20475_p6, %p20469_p3 }
  0x8a   :  { %20479 = shalt.err (!%p20476_p7)
}
  0x8b   :  { %101 = dma.hbm_to_vmem [thread:$0]  %s21208_s7, 1024, %s96_s23, [#allocation11], %s20547_s3, %s20547_s3, %s20548_s21  }
  0x8c   :  { %s20480_s15 = scalar_lea.hbm %s21210_s9, 1024 }
  0x8d   :  { %p20481_p8 = scmp.ne.s32.totalorder %s21210_s9, %s20480_s15  ;;  %p20484_p9 = scmp.lt.u32.totalorder %s20480_s15, %s21210_s9 }
  0x8f   :  { %p20486_p10 = pnand %p20484_p9, %p20481_p8 }
  0x91   :  { %20489 = shalt.err (!%p20486_p10)
}
  0x92   :  { %s20490_s19 = scalar_lea.vmem %s118_s27, 1024  ;;  %p20495_p12 = scmp.lt.s32.totalorder %s118_s27, %s118_s27 }
  0x93   :  { %p20491_p11 = scmp.ne.s32.totalorder %s118_s27, %s20490_s19  ;;  %p20496_p13 = scmp.lt.s32.totalorder %s20490_s19, %s20490_s19 }
  0x95   :  { %p20497_p0 = por %p20496_p13, %p20495_p12 }
  0x97   :  { %p20498_p1 = pnand %p20497_p0, %p20491_p11 }
  0x99   :  { %20501 = shalt.err (!%p20498_p1)
}
  0x9a   :  { %123 = dma.hbm_to_vmem [thread:$0]  %s21210_s9, 1024, %s118_s27, [#allocation14], %s20547_s3, %s20547_s3, %s20548_s21  }
  0x9b   :  { %s20551_s2 = smov [#allocation16]   ;;  %s20502_s6 = scalar_lea.hbm %s21211_s10, 16 }
  0x9c   :  { %s130_s18 = sshll.u32 %s20551_s2, 4  ;;  %p20503_p2 = scmp.ne.s32.totalorder %s21211_s10, %s20502_s6  ;;  %s131_s18 = int_to_ptr.vmem [resolvable:$true] %s130_s18 }
  0x9d   :  { %p20506_p3 = scmp.lt.u32.totalorder %s20502_s6, %s21211_s10 }
  0x9f   :  { %p20508_p4 = pnand %p20506_p3, %p20503_p2 }
  0xa1   :  { %20511 = shalt.err (!%p20508_p4)
}
  0xa2   :  { %s20512_s30 = scalar_lea.vmem %s131_s18, 16  ;;  %s20516_s9 = scalar_lea.vmem %s131_s18, 32 }
  0xa3   :  { %p20513_p5 = scmp.ne.s32.totalorder %s131_s18, %s20512_s30  ;;  %p20517_p6 = scmp.lt.s32.totalorder %s131_s18, %s131_s18 }
  0xa4   :  { %p20518_p7 = scmp.lt.s32.totalorder %s20516_s9, %s20512_s30 }
  0xa6   :  { %p20519_p8 = por %p20518_p7, %p20517_p6 }
  0xa8   :  { %p20520_p9 = pnand %p20519_p8, %p20513_p5 }
  0xaa   :  { %20523 = shalt.err (!%p20520_p9)
}
  0xab   :  { %133 = dma.hbm_to_vmem [thread:$0]  %s21211_s10, 16, %s131_s18, [#allocation17]  }
  0xac   :  { %20524 = dma.done.wait [#allocation3], 175616  }
  0xad   :  { %20525 = vsyncadd [#allocation3], 4294791680 }
  0xae   :  { %20526 = dma.done.wait [#allocation5], 55408  }
  0xaf   :  { %20527 = vsyncadd [#allocation5], 4294911888 }
  0xb0   :  { %20528 = dma.done.wait [#allocation8], 2080  }
  0xb1   :  { %20529 = vsyncadd [#allocation8], 4294965216 }
  0xb2   :  { %20530 = dma.done.wait [#allocation11], 1040  }
  0xb3   :  { %20531 = vsyncadd [#allocation11], 4294966256 }
  0xb4   :  { %20532 = dma.done.wait [#allocation14], 1040  }
  0xb5   :  { %20533 = vsyncadd [#allocation14], 4294966256 }
  0xb6   :  { %20534 = dma.done.wait [#allocation17], 16  }
  0xb7   :  { %20535 = vsyncadd [#allocation17], 4294967280  ;;  %v20552_v0 = vmov 0   ;;  %v17651_v1 = vld [vmem:[#allocation2 + $0x4] ss:$28 sps:$4 sm:$0xff]   ;;  %vm2349_vm0 = vcmask 130048  }
  0xb8   :  { %2508 = vmatprep.mubr.bf16.mxu1 %v20552_v0  ;;  %v17653_v2 = vld [vmem:[#allocation2 + $0xa84] ss:$28 sps:$4 sm:$0xff]   ;;  %2353 = vmatprep.subr.bf16.mxu0 %v17651_v1  ;;  %v17657_v5 = vld [vmem:[#allocation2 + $0x3c] ss:$28 sps:$4 sm:$0xff]   ;;  %v17662_v8 = vld [vmem:[#allocation2 + $0xc] ss:$28 sps:$4 sm:$0xff]  }
  0xb9   :  { %v17655_v3 = vld [vmem:[#allocation2] ss:$28 sps:$4 sm:$0xff]   ;;  %2476 = vmatprep.subr.bf16.mxu1 %v17653_v2  ;;  %v17659_v6 = vld [vmem:[%s21201_s0 + $0x18] ss:$0 sps:$4 sm:$0xff]   ;;  %v17660_v7 = vld [vmem:[#allocation2 + $0x8] ss:$28 sps:$4 sm:$0xff]  }
  0xba   :  { %v17656_v4 = vld [vmem:[#allocation2 + $0xa80] ss:$28 sps:$4 sm:$0xff]   ;;  %2354 = vmatpush1.bf16.msra.mxu0 %v17655_v3  ;;  %v17663_v9 = vld [vmem:[#allocation2 + $0x38] ss:$28 sps:$4 sm:$0xff]   ;;  %v17669_v13 = vld [vmem:[#allocation2 + $0x70] ss:$28 sps:$4 sm:$0xff]  }
  0xbb   :  { %2477 = vmatpush1.bf16.msra.mxu1 %v17656_v4  ;;  %2355 = vmatprep.subr.bf16.mxu0 %v17657_v5  ;;  %v17664_v10 = vld [vmem:[#allocation2 + $0x74] ss:$28 sps:$4 sm:$0xff]   ;;  %v17666_v11 = vld [vmem:[#allocation2 + $0x40] ss:$28 sps:$4 sm:$0xff]   ;;  %v17670_v14 = vld [vmem:[#allocation2 + $0xac] ss:$28 sps:$4 sm:$0xff]  }
  0xbc   :  { %2517 = vmatprep.subr.bf16.mxu1 %v17662_v8  ;;  %v17668_v12 = vld [vmem:[#allocation2 + $0x44] ss:$28 sps:$4 sm:$0xff]   ;;  %v17674_v15 = vld [vmem:[#allocation2 + $0x7c] ss:$28 sps:$4 sm:$0xff]   ;;  %v17680_v19 = vld [vmem:[#allocation2 + $0xb4] ss:$28 sps:$4 sm:$0xff]  }
  0xbd   :  { %v17672_v16 = vld [vmem:[#allocation2 + $0x78] ss:$28 sps:$4 sm:$0xff]   ;;  %v17675_v17 = vld [vmem:[#allocation2 + $0xa8] ss:$28 sps:$4 sm:$0xff]   ;;  %v17678_v20 = vld [vmem:[#allocation2 + $0xb0] ss:$28 sps:$4 sm:$0xff]  }
  0xbe   :  { %15552 = vmatmul.mubr.msk.bf16.vlgmr.msra.gmra.mrb[0].mxu1 %vm2349_vm0, %v17659_v6  ;;  %2356 = vmatpush1.bf16.msra.mxu0 %v17663_v9  ;;  %v17676_v18 = vld [vmem:[#allocation2 + $0xe4] ss:$28 sps:$4 sm:$0xff]   ;;  %v17682_v22 = vld [vmem:[#allocation2 + $0x11c] ss:$28 sps:$4 sm:$0xff]   ;;  %v17686_v23 = vld [vmem:[#allocation2 + $0xec] ss:$28 sps:$4 sm:$0xff]  }
  0xbf   :  { %2518 = vmatpush1.bf16.msra.mxu1 %v17660_v7  ;;  %2357 = vmatprep.subr.bf16.mxu0 %v17664_v10  ;;  %v17681_v21 = vld [vmem:[#allocation2 + $0xe0] ss:$28 sps:$4 sm:$0xff]   ;;  %v17684_v24 = vld [vmem:[#allocation2 + $0xe8] ss:$28 sps:$4 sm:$0xff]   ;;  %v17687_v25 = vld [vmem:[#allocation2 + $0x118] ss:$28 sps:$4 sm:$0xff]  }
  0xc0   :  { %2519 = vmatprep.subr.bf16.mxu1 %v17668_v12  ;;  %v17688_v26 = vld [vmem:[#allocation2 + $0x154] ss:$28 sps:$4 sm:$0xff]   ;;  %v17692_v27 = vld [vmem:[#allocation2 + $0x124] ss:$28 sps:$4 sm:$0xff]   ;;  %v17694_v30 = vld [vmem:[#allocation2 + $0x18c] ss:$28 sps:$4 sm:$0xff]  }
  0xc1   :  { %v17690_v28 = vld [vmem:[#allocation2 + $0x120] ss:$28 sps:$4 sm:$0xff]   ;;  %v17693_v29 = vld [vmem:[#allocation2 + $0x150] ss:$28 sps:$4 sm:$0xff]   ;;  %v17696_v32 = vld [vmem:[#allocation2 + $0x158] ss:$28 sps:$4 sm:$0xff]  }
  0xc2   :  { %2358 = vmatpush1.bf16.msra.mxu0 %v17669_v13  ;;  %v17698_v31 = vld [vmem:[#allocation2 + $0x15c] ss:$28 sps:$4 sm:$0xff]   ;;  %v17699_v33 = vld [vmem:[#allocation2 + $0x188] ss:$28 sps:$4 sm:$0xff]   ;;  %v17704_v35 = vld [vmem:[#allocation2 + $0x194] ss:$28 sps:$4 sm:$0xff]  }
  0xc3   :  { %2520 = vmatpush1.bf16.msra.mxu1 %v17666_v11  ;;  %2359 = vmatprep.subr.bf16.mxu0 %v17670_v14  ;;  %v17700_v34 = vld [vmem:[#allocation2 + $0x1c4] ss:$28 sps:$4 sm:$0xff]   ;;  %v17702_v36 = vld [vmem:[#allocation2 + $0x190] ss:$28 sps:$4 sm:$0xff]   ;;  %v17706_v38 = vld [vmem:[#allocation2 + $0x1fc] ss:$28 sps:$4 sm:$0xff]  }
  0xc4   :  { %2521 = vmatprep.subr.bf16.mxu1 %v17674_v15  ;;  %v17705_v37 = vld [vmem:[#allocation2 + $0x1c0] ss:$28 sps:$4 sm:$0xff]   ;;  %v17710_v39 = vld [vmem:[#allocation2 + $0x1cc] ss:$28 sps:$4 sm:$0xff]   ;;  %v17711_v41 = vld [vmem:[#allocation2 + $0x1f8] ss:$28 sps:$4 sm:$0xff]  }
  0xc5   :  { %v17708_v40 = vld [vmem:[#allocation2 + $0x1c8] ss:$28 sps:$4 sm:$0xff]   ;;  %v17712_v42 = vld [vmem:[#allocation2 + $0x234] ss:$28 sps:$4 sm:$0xff]   ;;  %v17714_v44 = vld [vmem:[#allocation2 + $0x200] ss:$28 sps:$4 sm:$0xff]  }
  0xc6   :  { %2360 = vmatpush1.bf16.msra.mxu0 %v17675_v17  ;;  %v17716_v43 = vld [vmem:[#allocation2 + $0x204] ss:$28 sps:$4 sm:$0xff]   ;;  %v17717_v45 = vld [vmem:[#allocation2 + $0x230] ss:$28 sps:$4 sm:$0xff]   ;;  %v17722_v47 = vld [vmem:[#allocation2 + $0x23c] ss:$28 sps:$4 sm:$0xff]  }
  0xc7   :  { %2522 = vmatpush1.bf16.msra.mxu1 %v17672_v16  ;;  %2361 = vmatprep.subr.bf16.mxu0 %v17676_v18  ;;  %v17718_v46 = vld [vmem:[#allocation2 + $0x26c] ss:$28 sps:$4 sm:$0xff]   ;;  %v17720_v48 = vld [vmem:[#allocation2 + $0x238] ss:$28 sps:$4 sm:$0xff]   ;;  %v165_v49 = vld [vmem:[%s21201_s0] sm:$0xff]  ;;  %vm20554_vm1 = vmmov 0  }
  0xc8   :  { %2523 = vmatprep.subr.bf16.mxu1 %v17680_v19  ;;  %v17723_v50 = vld [vmem:[#allocation2 + $0x268] ss:$28 sps:$4 sm:$0xff]   ;;  %v20752_v52 = vcombine.high %v165_v49, %v165_v49  ;;  %v17728_v53 = vld [vmem:[#allocation2 + $0x274] ss:$28 sps:$4 sm:$0xff]   ;;  %v17729_v55 = vld [vmem:[#allocation2 + $0x2a0] ss:$28 sps:$4 sm:$0xff]   ;;  %v20756_v8 = vcombine.low %v165_v49, %v165_v49 }
  0xc9   :  { %v17724_v51 = vld [vmem:[#allocation2 + $0x2a4] ss:$28 sps:$4 sm:$0xff]   ;;  %v17726_v54 = vld [vmem:[#allocation2 + $0x270] ss:$28 sps:$4 sm:$0xff]   ;;  %v17730_v56 = vld [vmem:[#allocation2 + $0x2dc] ss:$28 sps:$4 sm:$0xff]  }
  0xca   :  { %2362 = vmatpush1.bf16.msra.mxu0 %v17681_v21  ;;  %2385 = vmatprep.mubr.bf16.mxu0 %v20752_v52  ;;  %v17734_v57 = vld [vmem:[#allocation2 + $0x2ac] ss:$28 sps:$4 sm:$0xff]   ;;  %v17735_v59 = vld [vmem:[#allocation2 + $0x2d8] ss:$28 sps:$4 sm:$0xff]   ;;  %v17740_v61 = vld [vmem:[#allocation2 + $0x2e4] ss:$28 sps:$4 sm:$0xff]  }
  0xcb   :  { %2524 = vmatpush1.bf16.msra.mxu1 %v17678_v20  ;;  %2363 = vmatprep.subr.bf16.mxu0 %v17682_v22  ;;  %v17732_v58 = vld [vmem:[#allocation2 + $0x2a8] ss:$28 sps:$4 sm:$0xff]   ;;  %v17736_v60 = vld [vmem:[#allocation2 + $0x314] ss:$28 sps:$4 sm:$0xff]   ;;  %v17738_v62 = vld [vmem:[#allocation2 + $0x2e0] ss:$28 sps:$4 sm:$0xff]  }
  0xcc   :  { %2525 = vmatprep.subr.bf16.mxu1 %v17686_v23  ;;  %2549 = vmatprep.mubr.bf16.mxu1 %v20752_v52  ;;  %v17741_v63 = vld [vmem:[#allocation2 + $0x310] ss:$28 sps:$4 sm:$0xff]   ;;  %v17746_v2 = vld [vmem:[#allocation2 + $0x31c] ss:$28 sps:$4 sm:$0xff]   ;;  %v17747_v4 = vld [vmem:[#allocation2 + $0x348] ss:$28 sps:$4 sm:$0xff]  }
  0xcd   :  { %v17742_v1 = vld [vmem:[#allocation2 + $0x34c] ss:$28 sps:$4 sm:$0xff]   ;;  %v17744_v3 = vld [vmem:[#allocation2 + $0x318] ss:$28 sps:$4 sm:$0xff]   ;;  %v17751_v5 = vld [vmem:[#allocation2 + $0x384] ss:$28 sps:$4 sm:$0xff]  }
  0xce   :  { %2364 = vmatpush1.bf16.msra.mxu0 %v17687_v25  ;;  %v17754_v6 = vld [vmem:[#allocation2 + $0x354] ss:$28 sps:$4 sm:$0xff]   ;;  %v17749_v7 = vld [vmem:[#allocation2 + $0x380] ss:$28 sps:$4 sm:$0xff]   ;;  %v17761_v11 = vld [vmem:[#allocation2 + $0x38c] ss:$28 sps:$4 sm:$0xff]  }
  0xcf   :  { %2526 = vmatpush1.bf16.msra.mxu1 %v17684_v24  ;;  %2365 = vmatprep.subr.bf16.mxu0 %v17688_v26  ;;  %v17752_v9 = vld [vmem:[#allocation2 + $0x350] ss:$28 sps:$4 sm:$0xff]   ;;  %v17758_v10 = vld [vmem:[#allocation2 + $0x3bc] ss:$28 sps:$4 sm:$0xff]   ;;  %v17759_v13 = vld [vmem:[#allocation2 + $0x388] ss:$28 sps:$4 sm:$0xff]  }
  0xd0   :  { %2527 = vmatprep.subr.bf16.mxu1 %v17692_v27  ;;  %v17756_v12 = vld [vmem:[#allocation2 + $0x3b8] ss:$28 sps:$4 sm:$0xff]   ;;  %v17767_v15 = vld [vmem:[#allocation2 + $0x3c4] ss:$28 sps:$4 sm:$0xff]   ;;  %v17762_v16 = vld [vmem:[#allocation2 + $0x3f0] ss:$28 sps:$4 sm:$0xff]  }
  0xd1   :  { %v17764_v14 = vld [vmem:[#allocation2 + $0x3f4] ss:$28 sps:$4 sm:$0xff]   ;;  %v17765_v17 = vld [vmem:[#allocation2 + $0x3c0] ss:$28 sps:$4 sm:$0xff]   ;;  %v17770_v18 = vld [vmem:[#allocation2 + $0x42c] ss:$28 sps:$4 sm:$0xff]  }
  0xd2   :  { %2366 = vmatpush1.bf16.msra.mxu0 %v17693_v29  ;;  %v17773_v19 = vld [vmem:[#allocation2 + $0x3fc] ss:$28 sps:$4 sm:$0xff]   ;;  %v17768_v20 = vld [vmem:[#allocation2 + $0x428] ss:$28 sps:$4 sm:$0xff]   ;;  %v17779_v23 = vld [vmem:[#allocation2 + $0x434] ss:$28 sps:$4 sm:$0xff]  }
  0xd3   :  { %2528 = vmatpush1.bf16.msra.mxu1 %v17690_v28  ;;  %2367 = vmatprep.subr.bf16.mxu0 %v17694_v30  ;;  %v17771_v21 = vld [vmem:[#allocation2 + $0x3f8] ss:$28 sps:$4 sm:$0xff]   ;;  %v17776_v22 = vld [vmem:[#allocation2 + $0x464] ss:$28 sps:$4 sm:$0xff]   ;;  %v17777_v25 = vld [vmem:[#allocation2 + $0x430] ss:$28 sps:$4 sm:$0xff]  }
  0xd4   :  { %2529 = vmatprep.subr.bf16.mxu1 %v17698_v31  ;;  %v17774_v24 = vld [vmem:[#allocation2 + $0x460] ss:$28 sps:$4 sm:$0xff]   ;;  %v17785_v27 = vld [vmem:[#allocation2 + $0x46c] ss:$28 sps:$4 sm:$0xff]   ;;  %v17780_v28 = vld [vmem:[#allocation2 + $0x498] ss:$28 sps:$4 sm:$0xff]  }
  0xd5   :  { %v17782_v26 = vld [vmem:[#allocation2 + $0x49c] ss:$28 sps:$4 sm:$0xff]   ;;  %v17783_v29 = vld [vmem:[#allocation2 + $0x468] ss:$28 sps:$4 sm:$0xff]   ;;  %v17788_v30 = vld [vmem:[#allocation2 + $0x4d4] ss:$28 sps:$4 sm:$0xff]  }
  0xd6   :  { %2368 = vmatpush1.bf16.msra.mxu0 %v17699_v33  ;;  %v17791_v31 = vld [vmem:[#allocation2 + $0x4a4] ss:$28 sps:$4 sm:$0xff]   ;;  %v17786_v33 = vld [vmem:[#allocation2 + $0x4d0] ss:$28 sps:$4 sm:$0xff]   ;;  %vm12159_vm2 = vcmask 785408  }
  0xd7   :  { %2530 = vmatpush1.bf16.msra.mxu1 %v17696_v32  ;;  %2369 = vmatprep.subr.bf16.mxu0 %v17700_v34  ;;  %v20763_v32 = vld [vmem:[%s21201_s0 + $0x8] sm:$0xff]  ;;  %v17789_v34 = vld [vmem:[#allocation2 + $0x4a0] ss:$28 sps:$4 sm:$0xff]  }
  0xd8   :  { %2531 = vmatprep.subr.bf16.mxu1 %v17704_v35  ;;  %v20767_v35 = vcombine.high %v20763_v32, %v20763_v32  ;;  %v17815_v49 = vld [vmem:[#allocation2 + $0x584] ss:$28 sps:$4 sm:$0xff]  }
  0xda   :  { %2370 = vmatpush1.bf16.msra.mxu0 %v17705_v37  ;;  %v17797_v37 = vld [vmem:[#allocation2 + $0x4dc] ss:$28 sps:$4 sm:$0xff]  }
  0xdb   :  { %2532 = vmatpush1.bf16.msra.mxu1 %v17702_v36  ;;  %2371 = vmatprep.subr.bf16.mxu0 %v17706_v38  ;;  %v17794_v36 = vld [vmem:[#allocation2 + $0x50c] ss:$28 sps:$4 sm:$0xff]  }
  0xdc   :  { %2533 = vmatprep.subr.bf16.mxu1 %v17710_v39  ;;  %v17792_v38 = vld [vmem:[#allocation2 + $0x508] ss:$28 sps:$4 sm:$0xff]   ;;  %v17795_v39 = vld [vmem:[#allocation2 + $0x4d8] ss:$28 sps:$4 sm:$0xff]  }
  0xde   :  { %2372 = vmatpush1.bf16.msra.mxu0 %v17711_v41  ;;  %v17803_v41 = vld [vmem:[#allocation2 + $0x514] ss:$28 sps:$4 sm:$0xff]  }
  0xdf   :  { %2534 = vmatpush1.bf16.msra.mxu1 %v17708_v40  ;;  %2373 = vmatprep.subr.bf16.mxu0 %v17712_v42  ;;  %v17800_v40 = vld [vmem:[#allocation2 + $0x544] ss:$28 sps:$4 sm:$0xff]  }
  0xe0   :  { %2535 = vmatprep.subr.bf16.mxu1 %v17716_v43  ;;  %v17798_v42 = vld [vmem:[#allocation2 + $0x540] ss:$28 sps:$4 sm:$0xff]   ;;  %v17801_v43 = vld [vmem:[#allocation2 + $0x510] ss:$28 sps:$4 sm:$0xff]  }
  0xe2   :  { %2374 = vmatpush1.bf16.msra.mxu0 %v17717_v45  ;;  %v17809_v45 = vld [vmem:[#allocation2 + $0x54c] ss:$28 sps:$4 sm:$0xff]  }
  0xe3   :  { %2536 = vmatpush1.bf16.msra.mxu1 %v17714_v44  ;;  %2375 = vmatprep.subr.bf16.mxu0 %v17718_v46  ;;  %v17806_v44 = vld [vmem:[#allocation2 + $0x57c] ss:$28 sps:$4 sm:$0xff]  }
  0xe4   :  { %2537 = vmatprep.subr.bf16.mxu1 %v17722_v47  ;;  %v17804_v46 = vld [vmem:[#allocation2 + $0x578] ss:$28 sps:$4 sm:$0xff]   ;;  %v17807_v47 = vld [vmem:[#allocation2 + $0x548] ss:$28 sps:$4 sm:$0xff]  }
  0xe6   :  { %2376 = vmatpush1.bf16.msra.mxu0 %v17723_v50  ;;  %v17810_v50 = vld [vmem:[#allocation2 + $0x5b0] ss:$28 sps:$4 sm:$0xff]  }
  0xe7   :  { %2538 = vmatpush1.bf16.msra.mxu1 %v17720_v48  ;;  %2377 = vmatprep.subr.bf16.mxu0 %v17724_v51  ;;  %v17812_v48 = vld [vmem:[#allocation2 + $0x5b4] ss:$28 sps:$4 sm:$0xff]   ;;  %v17813_v51 = vld [vmem:[#allocation2 + $0x580] ss:$28 sps:$4 sm:$0xff]  }
  0xe8   :  { %2539 = vmatprep.subr.bf16.mxu1 %v17728_v53  ;;  %v17818_v53 = vld [vmem:[#allocation2 + $0x5ec] ss:$28 sps:$4 sm:$0xff]  }
  0xea   :  { %2378 = vmatpush1.bf16.msra.mxu0 %v17729_v55  ;;  %v17816_v55 = vld [vmem:[#allocation2 + $0x5e8] ss:$28 sps:$4 sm:$0xff]  }
  0xeb   :  { %2540 = vmatpush1.bf16.msra.mxu1 %v17726_v54  ;;  %2379 = vmatprep.subr.bf16.mxu0 %v17730_v56  ;;  %v17821_v54 = vld [vmem:[#allocation2 + $0x5bc] ss:$28 sps:$4 sm:$0xff]  }
  0xec   :  { %2541 = vmatprep.subr.bf16.mxu1 %v17734_v57  ;;  %v17819_v56 = vld [vmem:[#allocation2 + $0x5b8] ss:$28 sps:$4 sm:$0xff]   ;;  %v17824_v57 = vld [vmem:[#allocation2 + $0x624] ss:$28 sps:$4 sm:$0xff]  }
  0xee   :  { %2380 = vmatpush1.bf16.msra.mxu0 %v17735_v59  ;;  %v17822_v59 = vld [vmem:[#allocation2 + $0x620] ss:$28 sps:$4 sm:$0xff]  }
  0xef   :  { %2542 = vmatpush1.bf16.msra.mxu1 %v17732_v58  ;;  %2381 = vmatprep.subr.bf16.mxu0 %v17736_v60  ;;  %v17827_v58 = vld [vmem:[#allocation2 + $0x5f4] ss:$28 sps:$4 sm:$0xff]  }
  0xf0   :  { %2543 = vmatprep.subr.bf16.mxu1 %v17740_v61  ;;  %v17825_v60 = vld [vmem:[#allocation2 + $0x5f0] ss:$28 sps:$4 sm:$0xff]   ;;  %v17830_v61 = vld [vmem:[#allocation2 + $0x65c] ss:$28 sps:$4 sm:$0xff]  }
  0xf2   :  { %2382 = vmatpush1.bf16.msra.mxu0 %v17741_v63  ;;  %v17828_v63 = vld [vmem:[#allocation2 + $0x658] ss:$28 sps:$4 sm:$0xff]  }
  0xf3   :  { %2544 = vmatpush1.bf16.msra.mxu1 %v17738_v62  ;;  %2383 = vmatprep.subr.bf16.mxu0 %v17742_v1  ;;  %v17833_v62 = vld [vmem:[#allocation2 + $0x62c] ss:$28 sps:$4 sm:$0xff]  }
  0xf4   :  { %2545 = vmatprep.subr.bf16.mxu1 %v17746_v2  ;;  %v17831_v1 = vld [vmem:[#allocation2 + $0x628] ss:$28 sps:$4 sm:$0xff]   ;;  %v17836_v2 = vld [vmem:[#allocation2 + $0x694] ss:$28 sps:$4 sm:$0xff]  }
  0xf6   :  { %2384 = vmatpush1.bf16.msra.mxu0 %v17747_v4  ;;  %v17834_v4 = vld [vmem:[#allocation2 + $0x690] ss:$28 sps:$4 sm:$0xff]  }
  0xf7   :  { %2546 = vmatpush1.bf16.msra.mxu1 %v17744_v3  ;;  %2394 = vmatprep.subr.bf16.mxu0 %v17751_v5  ;;  %v17839_v3 = vld [vmem:[#allocation2 + $0x664] ss:$28 sps:$4 sm:$0xff]  }
  0xf8   :  { %2547 = vmatprep.subr.bf16.mxu1 %v17754_v6  ;;  %v17837_v5 = vld [vmem:[#allocation2 + $0x660] ss:$28 sps:$4 sm:$0xff]   ;;  %v17842_v6 = vld [vmem:[#allocation2 + $0x6cc] ss:$28 sps:$4 sm:$0xff]  }
  0xf9   :  { %2386 = vmatmul.mubr.bf16.vlgmr.msra.gmra.mrb[0].mxu0 %v20756_v8 }
  0xfa   :  { %2395 = vmatpush1.bf16.msra.mxu0 %v17749_v7  ;;  %2426 = vmatprep.mubr.bf16.mxu0 %v20767_v35  ;;  %v17845_v7 = vld [vmem:[#allocation2 + $0x69c] ss:$28 sps:$4 sm:$0xff]  }
  0xfb   :  { %2548 = vmatpush1.bf16.msra.mxu1 %v17752_v9  ;;  %2396 = vmatprep.subr.bf16.mxu0 %v17758_v10  ;;  %v17840_v9 = vld [vmem:[#allocation2 + $0x6c8] ss:$28 sps:$4 sm:$0xff]   ;;  %v17843_v10 = vld [vmem:[#allocation2 + $0x698] ss:$28 sps:$4 sm:$0xff]  }
  0xfc   :  { %2558 = vmatprep.subr.bf16.mxu1 %v17761_v11  ;;  %v17849_v11 = vld [vmem:[#allocation2 + $0x704] ss:$28 sps:$4 sm:$0xff]  }
  0xfe   :  { %2550 = vmatmul.mubr.bf16.vlgmr.msra.gmra.mrb[4].mxu1 %v20756_v8  ;;  %2397 = vmatpush1.bf16.msra.mxu0 %v17756_v12  ;;  %v17852_v12 = vld [vmem:[#allocation2 + $0x6d4] ss:$28 sps:$4 sm:$0xff]  }
  0xff   :  { %2559 = vmatpush1.bf16.msra.mxu1 %v17759_v13  ;;  %2398 = vmatprep.subr.bf16.mxu0 %v17764_v14  ;;  %v17847_v13 = vld [vmem:[#allocation2 + $0x700] ss:$28 sps:$4 sm:$0xff]   ;;  %v17850_v14 = vld [vmem:[#allocation2 + $0x6d0] ss:$28 sps:$4 sm:$0xff]  }
 0x100   :  { %2560 = vmatprep.subr.bf16.mxu1 %v17767_v15  ;;  %2590 = vmatprep.mubr.bf16.mxu1 %v20767_v35  ;;  %v20773_v15 = vcombine.low %v20763_v32, %v20763_v32  ;;  %v17872_v32 = vld [vmem:[#allocation2 + $0x7e0] ss:$28 sps:$4 sm:$0xff]  }
 0x102   :  { %2399 = vmatpush1.bf16.msra.mxu0 %v17762_v16  ;;  %v17856_v16 = vld [vmem:[#allocation2 + $0x73c] ss:$28 sps:$4 sm:$0xff]  }
 0x103   :  { %2561 = vmatpush1.bf16.msra.mxu1 %v17765_v17  ;;  %2400 = vmatprep.subr.bf16.mxu0 %v17770_v18  ;;  %v17859_v17 = vld [vmem:[#allocation2 + $0x70c] ss:$28 sps:$4 sm:$0xff]   ;;  %v20778_v18 = vld [vmem:[%s21201_s0 + $0x10] sm:$0xff] }
 0x104   :  { %2562 = vmatprep.subr.bf16.mxu1 %v17773_v19  ;;  %v20782_v19 = vcombine.high %v20778_v18, %v20778_v18 }
 0x106   :  { %2401 = vmatpush1.bf16.msra.mxu0 %v17768_v20  ;;  %v17854_v20 = vld [vmem:[#allocation2 + $0x738] ss:$28 sps:$4 sm:$0xff]  }
 0x107   :  { %2563 = vmatpush1.bf16.msra.mxu1 %v17771_v21  ;;  %2402 = vmatprep.subr.bf16.mxu0 %v17776_v22  ;;  %v17857_v21 = vld [vmem:[#allocation2 + $0x708] ss:$28 sps:$4 sm:$0xff]   ;;  %v17862_v22 = vld [vmem:[#allocation2 + $0x774] ss:$28 sps:$4 sm:$0xff]  }
 0x108   :  { %2564 = vmatprep.subr.bf16.mxu1 %v17779_v23  ;;  %v17865_v23 = vld [vmem:[#allocation2 + $0x744] ss:$28 sps:$4 sm:$0xff]  }
 0x10a   :  { %2403 = vmatpush1.bf16.msra.mxu0 %v17774_v24  ;;  %v17860_v24 = vld [vmem:[#allocation2 + $0x770] ss:$28 sps:$4 sm:$0xff]  }
 0x10b   :  { %2565 = vmatpush1.bf16.msra.mxu1 %v17777_v25  ;;  %2404 = vmatprep.subr.bf16.mxu0 %v17782_v26  ;;  %v17863_v25 = vld [vmem:[#allocation2 + $0x740] ss:$28 sps:$4 sm:$0xff]   ;;  %v17868_v26 = vld [vmem:[#allocation2 + $0x7ac] ss:$28 sps:$4 sm:$0xff]  }
 0x10c   :  { %2566 = vmatprep.subr.bf16.mxu1 %v17785_v27  ;;  %v17871_v27 = vld [vmem:[#allocation2 + $0x77c] ss:$28 sps:$4 sm:$0xff]  }
 0x10e   :  { %2405 = vmatpush1.bf16.msra.mxu0 %v17780_v28  ;;  %v17866_v28 = vld [vmem:[#allocation2 + $0x7a8] ss:$28 sps:$4 sm:$0xff]  }
 0x10f   :  { %2567 = vmatpush1.bf16.msra.mxu1 %v17783_v29  ;;  %2406 = vmatprep.subr.bf16.mxu0 %v17788_v30  ;;  %v17869_v29 = vld [vmem:[#allocation2 + $0x778] ss:$28 sps:$4 sm:$0xff]   ;;  %v17874_v30 = vld [vmem:[#allocation2 + $0x7e4] ss:$28 sps:$4 sm:$0xff]  }
 0x110   :  { %2568 = vmatprep.subr.bf16.mxu1 %v17791_v31  ;;  %v17877_v31 = vld [vmem:[#allocation2 + $0x7b4] ss:$28 sps:$4 sm:$0xff]  }
 0x112   :  { %2407 = vmatpush1.bf16.msra.mxu0 %v17786_v33  ;;  %v17875_v33 = vld [vmem:[#allocation2 + $0x7b0] ss:$28 sps:$4 sm:$0xff]  }
 0x113   :  { %2569 = vmatpush1.bf16.msra.mxu1 %v17789_v34  ;;  %2408 = vmatprep.subr.bf16.mxu0 %v17794_v36  ;;  %v17880_v34 = vld [vmem:[#allocation2 + $0x81c] ss:$28 sps:$4 sm:$0xff]   ;;  %v17883_v36 = vld [vmem:[#allocation2 + $0x7ec] ss:$28 sps:$4 sm:$0xff]  }
 0x114   :  { %2570 = vmatprep.subr.bf16.mxu1 %v17797_v37  ;;  %v17878_v37 = vld [vmem:[#allocation2 + $0x818] ss:$28 sps:$4 sm:$0xff]  }
 0x116   :  { %2409 = vmatpush1.bf16.msra.mxu0 %v17792_v38  ;;  %v17881_v38 = vld [vmem:[#allocation2 + $0x7e8] ss:$28 sps:$4 sm:$0xff]  }
 0x117   :  { %2571 = vmatpush1.bf16.msra.mxu1 %v17795_v39  ;;  %2410 = vmatprep.subr.bf16.mxu0 %v17800_v40  ;;  %v17886_v39 = vld [vmem:[#allocation2 + $0x854] ss:$28 sps:$4 sm:$0xff]   ;;  %v17889_v40 = vld [vmem:[#allocation2 + $0x824] ss:$28 sps:$4 sm:$0xff]  }
 0x118   :  { %2572 = vmatprep.subr.bf16.mxu1 %v17803_v41  ;;  %v17884_v41 = vld [vmem:[#allocation2 + $0x850] ss:$28 sps:$4 sm:$0xff]  }
 0x11a   :  { %2411 = vmatpush1.bf16.msra.mxu0 %v17798_v42  ;;  %v17887_v42 = vld [vmem:[#allocation2 + $0x820] ss:$28 sps:$4 sm:$0xff]  }
 0x11b   :  { %2573 = vmatpush1.bf16.msra.mxu1 %v17801_v43  ;;  %2412 = vmatprep.subr.bf16.mxu0 %v17806_v44  ;;  %v17892_v43 = vld [vmem:[#allocation2 + $0x88c] ss:$28 sps:$4 sm:$0xff]   ;;  %v17895_v44 = vld [vmem:[#allocation2 + $0x85c] ss:$28 sps:$4 sm:$0xff]  }
 0x11c   :  { %2574 = vmatprep.subr.bf16.mxu1 %v17809_v45  ;;  %v17890_v45 = vld [vmem:[#allocation2 + $0x888] ss:$28 sps:$4 sm:$0xff]  }
 0x11e   :  { %2413 = vmatpush1.bf16.msra.mxu0 %v17804_v46  ;;  %v17893_v46 = vld [vmem:[#allocation2 + $0x858] ss:$28 sps:$4 sm:$0xff]  }
 0x11f   :  { %2575 = vmatpush1.bf16.msra.mxu1 %v17807_v47  ;;  %2414 = vmatprep.subr.bf16.mxu0 %v17812_v48  ;;  %v17898_v47 = vld [vmem:[#allocation2 + $0x8c4] ss:$28 sps:$4 sm:$0xff]   ;;  %v17901_v48 = vld [vmem:[#allocation2 + $0x894] ss:$28 sps:$4 sm:$0xff]  }
 0x120   :  { %2576 = vmatprep.subr.bf16.mxu1 %v17815_v49  ;;  %v17896_v49 = vld [vmem:[#allocation2 + $0x8c0] ss:$28 sps:$4 sm:$0xff]  }
 0x122   :  { %2415 = vmatpush1.bf16.msra.mxu0 %v17810_v50  ;;  %v17899_v50 = vld [vmem:[#allocation2 + $0x890] ss:$28 sps:$4 sm:$0xff]  }
 0x123   :  { %2577 = vmatpush1.bf16.msra.mxu1 %v17813_v51  ;;  %2416 = vmatprep.subr.bf16.mxu0 %v17818_v53  ;;  %v17904_v51 = vld [vmem:[#allocation2 + $0x8fc] ss:$28 sps:$4 sm:$0xff]   ;;  %v17907_v53 = vld [vmem:[#allocation2 + $0x8cc] ss:$28 sps:$4 sm:$0xff]  }
 0x124   :  { %2578 = vmatprep.subr.bf16.mxu1 %v17821_v54  ;;  %v17902_v54 = vld [vmem:[#allocation2 + $0x8f8] ss:$28 sps:$4 sm:$0xff]  }
 0x126   :  { %2417 = vmatpush1.bf16.msra.mxu0 %v17816_v55  ;;  %v17905_v55 = vld [vmem:[#allocation2 + $0x8c8] ss:$28 sps:$4 sm:$0xff]  }
 0x127   :  { %2579 = vmatpush1.bf16.msra.mxu1 %v17819_v56  ;;  %2418 = vmatprep.subr.bf16.mxu0 %v17824_v57  ;;  %v17910_v56 = vld [vmem:[#allocation2 + $0x934] ss:$28 sps:$4 sm:$0xff]   ;;  %v17913_v57 = vld [vmem:[#allocation2 + $0x904] ss:$28 sps:$4 sm:$0xff]  }
 0x128   :  { %2580 = vmatprep.subr.bf16.mxu1 %v17827_v58  ;;  %v17908_v58 = vld [vmem:[#allocation2 + $0x930] ss:$28 sps:$4 sm:$0xff]  }
 0x12a   :  { %2419 = vmatpush1.bf16.msra.mxu0 %v17822_v59  ;;  %v17911_v59 = vld [vmem:[#allocation2 + $0x900] ss:$28 sps:$4 sm:$0xff]  }
 0x12b   :  { %2581 = vmatpush1.bf16.msra.mxu1 %v17825_v60  ;;  %2420 = vmatprep.subr.bf16.mxu0 %v17830_v61  ;;  %v17916_v60 = vld [vmem:[#allocation2 + $0x96c] ss:$28 sps:$4 sm:$0xff]   ;;  %v17919_v61 = vld [vmem:[#allocation2 + $0x93c] ss:$28 sps:$4 sm:$0xff]  }
 0x12c   :  { %2582 = vmatprep.subr.bf16.mxu1 %v17833_v62  ;;  %v17914_v62 = vld [vmem:[#allocation2 + $0x968] ss:$28 sps:$4 sm:$0xff]  }
 0x12e   :  { %2421 = vmatpush1.bf16.msra.mxu0 %v17828_v63  ;;  %v17917_v63 = vld [vmem:[#allocation2 + $0x938] ss:$28 sps:$4 sm:$0xff]  }
 0x12f   :  { %2583 = vmatpush1.bf16.msra.mxu1 %v17831_v1  ;;  %2422 = vmatprep.subr.bf16.mxu0 %v17836_v2  ;;  %v17922_v1 = vld [vmem:[#allocation2 + $0x9a4] ss:$28 sps:$4 sm:$0xff]   ;;  %v17925_v2 = vld [vmem:[#allocation2 + $0x974] ss:$28 sps:$4 sm:$0xff]  }
 0x130   :  { %2584 = vmatprep.subr.bf16.mxu1 %v17839_v3  ;;  %v17920_v3 = vld [vmem:[#allocation2 + $0x9a0] ss:$28 sps:$4 sm:$0xff]  }
 0x132   :  { %2423 = vmatpush1.bf16.msra.mxu0 %v17834_v4  ;;  %v17923_v4 = vld [vmem:[#allocation2 + $0x970] ss:$28 sps:$4 sm:$0xff]  }
 0x133   :  { %2585 = vmatpush1.bf16.msra.mxu1 %v17837_v5  ;;  %2424 = vmatprep.subr.bf16.mxu0 %v17842_v6  ;;  %v17928_v5 = vld [vmem:[#allocation2 + $0x9dc] ss:$28 sps:$4 sm:$0xff]   ;;  %v17931_v6 = vld [vmem:[#allocation2 + $0x9ac] ss:$28 sps:$4 sm:$0xff]  }
 0x134   :  { %2586 = vmatprep.subr.bf16.mxu1 %v17845_v7  ;;  %v17926_v7 = vld [vmem:[#allocation2 + $0x9d8] ss:$28 sps:$4 sm:$0xff]  }
 0x136   :  { %2425 = vmatpush1.bf16.msra.mxu0 %v17840_v9  ;;  %v17929_v9 = vld [vmem:[#allocation2 + $0x9a8] ss:$28 sps:$4 sm:$0xff]  }
 0x137   :  { %2587 = vmatpush1.bf16.msra.mxu1 %v17843_v10  ;;  %2435 = vmatprep.subr.bf16.mxu0 %v17849_v11  ;;  %v17934_v10 = vld [vmem:[#allocation2 + $0xa14] ss:$28 sps:$4 sm:$0xff]   ;;  %v17937_v11 = vld [vmem:[#allocation2 + $0x9e4] ss:$28 sps:$4 sm:$0xff]  }
 0x138   :  { %2588 = vmatprep.subr.bf16.mxu1 %v17852_v12  ;;  %v17932_v12 = vld [vmem:[#allocation2 + $0xa10] ss:$28 sps:$4 sm:$0xff]  }
 0x139   :  { %2427 = vmatmul.mubr.bf16.vlgmr.msra.gmra.mrb[0].mxu0 %v20773_v15 }
 0x13a   :  { %2436 = vmatpush1.bf16.msra.mxu0 %v17847_v13  ;;  %2467 = vmatprep.mubr.bf16.mxu0 %v20782_v19  ;;  %v17935_v13 = vld [vmem:[#allocation2 + $0x9e0] ss:$28 sps:$4 sm:$0xff]  }
 0x13b   :  { %2589 = vmatpush1.bf16.msra.mxu1 %v17850_v14  ;;  %2437 = vmatprep.subr.bf16.mxu0 %v17856_v16  ;;  %v17940_v14 = vld [vmem:[#allocation2 + $0xa4c] ss:$28 sps:$4 sm:$0xff]   ;;  %v17943_v16 = vld [vmem:[#allocation2 + $0xa1c] ss:$28 sps:$4 sm:$0xff]  }
 0x13c   :  { %2599 = vmatprep.subr.bf16.mxu1 %v17859_v17  ;;  %v17938_v17 = vld [vmem:[#allocation2 + $0xa48] ss:$28 sps:$4 sm:$0xff]  }
 0x13e   :  { %2591 = vmatmul.mubr.bf16.vlgmr.msra.gmra.mrb[4].mxu1 %v20773_v15  ;;  %2438 = vmatpush1.bf16.msra.mxu0 %v17854_v20  ;;  %v17941_v20 = vld [vmem:[#allocation2 + $0xa18] ss:$28 sps:$4 sm:$0xff]  }
 0x13f   :  { %2600 = vmatpush1.bf16.msra.mxu1 %v17857_v21  ;;  %2439 = vmatprep.subr.bf16.mxu0 %v17862_v22  ;;  %v17948_v21 = vld [vmem:[#allocation2 + $0xa54] ss:$28 sps:$4 sm:$0xff]  }
 0x140   :  { %2601 = vmatprep.subr.bf16.mxu1 %v17865_v23  ;;  %2631 = vmatprep.mubr.bf16.mxu1 %v20782_v19  ;;  %v17951_v22 = vld [vmem:[#allocation2 + $0x14] ss:$28 sps:$4 sm:$0xff]   ;;  %v20790_v23 = vcombine.low %v20778_v18, %v20778_v18  ;;  %v17958_v18 = vld [vmem:[#allocation2 + $0x80] ss:$28 sps:$4 sm:$0xff]  }
 0x142   :  { %2440 = vmatpush1.bf16.msra.mxu0 %v17860_v24  ;;  %v17946_v24 = vld [vmem:[#allocation2 + $0xa50] ss:$28 sps:$4 sm:$0xff]  }
 0x143   :  { %2602 = vmatpush1.bf16.msra.mxu1 %v17863_v25  ;;  %2441 = vmatprep.subr.bf16.mxu0 %v17868_v26  ;;  %v17949_v25 = vld [vmem:[#allocation2 + $0x10] ss:$28 sps:$4 sm:$0xff]  }
 0x144   :  { %2603 = vmatprep.subr.bf16.mxu1 %v17871_v27  ;;  %v17954_v26 = vld [vmem:[#allocation2 + $0xa8c] ss:$28 sps:$4 sm:$0xff]  }
 0x145   :  { %v17957_v27 = vld [vmem:[#allocation2 + $0x4c] ss:$28 sps:$4 sm:$0xff]  }
 0x146   :  { %2442 = vmatpush1.bf16.msra.mxu0 %v17866_v28  ;;  %v17952_v28 = vld [vmem:[#allocation2 + $0xa88] ss:$28 sps:$4 sm:$0xff]  }
 0x147   :  { %2604 = vmatpush1.bf16.msra.mxu1 %v17869_v29  ;;  %2443 = vmatprep.subr.bf16.mxu0 %v17874_v30  ;;  %v17955_v29 = vld [vmem:[#allocation2 + $0x48] ss:$28 sps:$4 sm:$0xff]  }
 0x148   :  { %2605 = vmatprep.subr.bf16.mxu1 %v17877_v31  ;;  %v17960_v30 = vld [vmem:[#allocation2 + $0x84] ss:$28 sps:$4 sm:$0xff]   ;;  %v17969_v31 = vld [vmem:[#allocation2 + $0xa94] ss:$28 sps:$4 sm:$0xff]  }
 0x14a   :  { %2444 = vmatpush1.bf16.msra.mxu0 %v17872_v32  ;;  %v17963_v32 = vld [vmem:[#allocation2 + $0xbc] ss:$28 sps:$4 sm:$0xff]  }
 0x14b   :  { %2606 = vmatpush1.bf16.msra.mxu1 %v17875_v33  ;;  %2445 = vmatprep.subr.bf16.mxu0 %v17880_v34  ;;  %v17961_v33 = vld [vmem:[#allocation2 + $0xb8] ss:$28 sps:$4 sm:$0xff]  }
 0x14c   :  { %2607 = vmatprep.subr.bf16.mxu1 %v17883_v36  ;;  %v17966_v34 = vld [vmem:[#allocation2 + $0xf4] ss:$28 sps:$4 sm:$0xff]  }
 0x14d   :  { %v17964_v36 = vld [vmem:[#allocation2 + $0xf0] ss:$28 sps:$4 sm:$0xff]  }
 0x14e   :  { %2446 = vmatpush1.bf16.msra.mxu0 %v17878_v37  ;;  %v17967_v37 = vld [vmem:[#allocation2 + $0xa90] ss:$28 sps:$4 sm:$0xff]  }
 0x14f   :  { %2608 = vmatpush1.bf16.msra.mxu1 %v17881_v38  ;;  %2447 = vmatprep.subr.bf16.mxu0 %v17886_v39  ;;  %v17972_v38 = vld [vmem:[#allocation2 + $0x12c] ss:$28 sps:$4 sm:$0xff]   ;;  %v17973_v39 = vld [vmem:[#allocation2 + $0x1d8] ss:$28 sps:$4 sm:$0xff]  }
 0x150   :  { %2609 = vmatprep.subr.bf16.mxu1 %v17889_v40  ;;  %v20799_v40 = vld [vmem:[%s21201_s0 + $0x18] ss:$0 sps:$4 sm:$0xff]  }
 0x152   :  { %2448 = vmatpush1.bf16.msra.mxu0 %v17884_v41  ;;  %v17970_v41 = vld [vmem:[#allocation2 + $0x128] ss:$28 sps:$4 sm:$0xff]  }
 0x153   :  { %2610 = vmatpush1.bf16.msra.mxu1 %v17887_v42  ;;  %2449 = vmatprep.subr.bf16.mxu0 %v17892_v43  ;;  %v17976_v42 = vld [vmem:[#allocation2 + $0x164] ss:$28 sps:$4 sm:$0xff]  }
 0x154   :  { %2611 = vmatprep.subr.bf16.mxu1 %v17895_v44  ;;  %v17974_v43 = vld [vmem:[#allocation2 + $0x160] ss:$28 sps:$4 sm:$0xff]   ;;  %v17977_v44 = vld [vmem:[#allocation2 + $0x18] ss:$28 sps:$4 sm:$0xff]  }
 0x156   :  { %2450 = vmatpush1.bf16.msra.mxu0 %v17890_v45  ;;  %v17978_v45 = vld [vmem:[#allocation2 + $0x210] ss:$28 sps:$4 sm:$0xff]  }
 0x157   :  { %2612 = vmatpush1.bf16.msra.mxu1 %v17893_v46  ;;  %2451 = vmatprep.subr.bf16.mxu0 %v17898_v47  ;;  %v17981_v46 = vld [vmem:[#allocation2 + $0x19c] ss:$28 sps:$4 sm:$0xff]  }
 0x158   :  { %2613 = vmatprep.subr.bf16.mxu1 %v17901_v48  ;;  %v17979_v48 = vld [vmem:[#allocation2 + $0x198] ss:$28 sps:$4 sm:$0xff]  }
 0x15a   :  { %2452 = vmatpush1.bf16.msra.mxu0 %v17896_v49 }
 0x15b   :  { %2614 = vmatpush1.bf16.msra.mxu1 %v17899_v50  ;;  %2453 = vmatprep.subr.bf16.mxu0 %v17904_v51  ;;  %v17982_v50 = vld [vmem:[#allocation2 + $0x50] ss:$28 sps:$4 sm:$0xff]  }
 0x15c   :  { %2615 = vmatprep.subr.bf16.mxu1 %v17907_v53  ;;  %v17983_v53 = vld [vmem:[#allocation2 + $0x248] ss:$28 sps:$4 sm:$0xff]  }
 0x15e   :  { %2454 = vmatpush1.bf16.msra.mxu0 %v17902_v54  ;;  %v17986_v54 = vld [vmem:[#allocation2 + $0x1d4] ss:$28 sps:$4 sm:$0xff]  }
 0x15f   :  { %2616 = vmatpush1.bf16.msra.mxu1 %v17905_v55  ;;  %2455 = vmatprep.subr.bf16.mxu0 %v17910_v56  ;;  %v17984_v56 = vld [vmem:[#allocation2 + $0x1d0] ss:$28 sps:$4 sm:$0xff]  }
 0x160   :  { %2617 = vmatprep.subr.bf16.mxu1 %v17913_v57  ;;  %v17987_v57 = vld [vmem:[#allocation2 + $0x88] ss:$28 sps:$4 sm:$0xff]  }
 0x162   :  { %2456 = vmatpush1.bf16.msra.mxu0 %v17908_v58  ;;  %v17988_v58 = vld [vmem:[#allocation2 + $0x280] ss:$28 sps:$4 sm:$0xff]  }
 0x163   :  { %2618 = vmatpush1.bf16.msra.mxu1 %v17911_v59  ;;  %2457 = vmatprep.subr.bf16.mxu0 %v17916_v60  ;;  %v17991_v59 = vld [vmem:[#allocation2 + $0x20c] ss:$28 sps:$4 sm:$0xff]  }
 0x164   :  { %2619 = vmatprep.subr.bf16.mxu1 %v17919_v61  ;;  %v17989_v60 = vld [vmem:[#allocation2 + $0x208] ss:$28 sps:$4 sm:$0xff]   ;;  %v17992_v61 = vld [vmem:[#allocation2 + $0xc0] ss:$28 sps:$4 sm:$0xff]  }
 0x166   :  { %2458 = vmatpush1.bf16.msra.mxu0 %v17914_v62  ;;  %v17993_v62 = vld [vmem:[#allocation2 + $0x2b8] ss:$28 sps:$4 sm:$0xff]  }
 0x167   :  { %2620 = vmatpush1.bf16.msra.mxu1 %v17917_v63  ;;  %2459 = vmatprep.subr.bf16.mxu0 %v17922_v1  ;;  %v17996_v63 = vld [vmem:[#allocation2 + $0x244] ss:$28 sps:$4 sm:$0xff]  }
 0x168   :  { %2621 = vmatprep.subr.bf16.mxu1 %v17925_v2  ;;  %v17994_v1 = vld [vmem:[#allocation2 + $0x240] ss:$28 sps:$4 sm:$0xff]   ;;  %v17997_v2 = vld [vmem:[#allocation2 + $0xf8] ss:$28 sps:$4 sm:$0xff]  }
 0x16a   :  { %2460 = vmatpush1.bf16.msra.mxu0 %v17920_v3  ;;  %v17998_v3 = vld [vmem:[#allocation2 + $0x2f0] ss:$28 sps:$4 sm:$0xff]  }
 0x16b   :  { %2622 = vmatpush1.bf16.msra.mxu1 %v17923_v4  ;;  %2461 = vmatprep.subr.bf16.mxu0 %v17928_v5  ;;  %v18001_v4 = vld [vmem:[#allocation2 + $0x27c] ss:$28 sps:$4 sm:$0xff]  }
 0x16c   :  { %2623 = vmatprep.subr.bf16.mxu1 %v17931_v6  ;;  %v17999_v5 = vld [vmem:[#allocation2 + $0x278] ss:$28 sps:$4 sm:$0xff]   ;;  %v18002_v6 = vld [vmem:[#allocation2 + $0x130] ss:$28 sps:$4 sm:$0xff]  }
 0x16e   :  { %2462 = vmatpush1.bf16.msra.mxu0 %v17926_v7  ;;  %v18003_v7 = vld [vmem:[#allocation2 + $0x328] ss:$28 sps:$4 sm:$0xff]  }
 0x16f   :  { %2624 = vmatpush1.bf16.msra.mxu1 %v17929_v9  ;;  %2463 = vmatprep.subr.bf16.mxu0 %v17934_v10  ;;  %v18006_v9 = vld [vmem:[#allocation2 + $0x2b4] ss:$28 sps:$4 sm:$0xff]  }
 0x170   :  { %2625 = vmatprep.subr.bf16.mxu1 %v17937_v11  ;;  %v18004_v10 = vld [vmem:[#allocation2 + $0x2b0] ss:$28 sps:$4 sm:$0xff]   ;;  %v18007_v11 = vld [vmem:[#allocation2 + $0x168] ss:$28 sps:$4 sm:$0xff]  }
 0x172   :  { %2464 = vmatpush1.bf16.msra.mxu0 %v17932_v12  ;;  %v18008_v12 = vld [vmem:[#allocation2 + $0x360] ss:$28 sps:$4 sm:$0xff]  }
 0x173   :  { %2626 = vmatpush1.bf16.msra.mxu1 %v17935_v13  ;;  %2465 = vmatprep.subr.bf16.mxu0 %v17940_v14  ;;  %v18011_v13 = vld [vmem:[#allocation2 + $0x2ec] ss:$28 sps:$4 sm:$0xff]  }
 0x174   :  { %2627 = vmatprep.subr.bf16.mxu1 %v17943_v16  ;;  %v18009_v14 = vld [vmem:[#allocation2 + $0x2e8] ss:$28 sps:$4 sm:$0xff]   ;;  %v18012_v16 = vld [vmem:[#allocation2 + $0x1a0] ss:$28 sps:$4 sm:$0xff]  }
 0x176   :  { %2466 = vmatpush1.bf16.msra.mxu0 %v17938_v17  ;;  %v18013_v17 = vld [vmem:[#allocation2 + $0x558] ss:$28 sps:$4 sm:$0xff]  }
 0x177   :  { %2628 = vmatpush1.bf16.msra.mxu1 %v17941_v20  ;;  %2681 = vmatprep.subr.bf16.mxu0 %v17951_v22  ;;  %v18016_v20 = vld [vmem:[#allocation2 + $0x324] ss:$28 sps:$4 sm:$0xff]   ;;  %v18017_v22 = vld [vmem:[#allocation2 + $0x398] ss:$28 sps:$4 sm:$0xff]  }
 0x178   :  { %2629 = vmatprep.subr.bf16.mxu1 %v17948_v21  ;;  %v18014_v21 = vld [vmem:[#allocation2 + $0x320] ss:$28 sps:$4 sm:$0xff]  }
 0x179   :  { %2468 = vmatmul.mubr.bf16.vlgmr.msra.gmra.mrb[0].mxu0 %v20790_v23 }
 0x17a   :  { %2682 = vmatpush1.bf16.msra.mxu0 %v17949_v25  ;;  %2713 = vmatprep.mubr.bf16.mxu0 %v20752_v52  ;;  %v18021_v25 = vld [vmem:[#allocation2 + $0x35c] ss:$28 sps:$4 sm:$0xff]  }
 0x17b   :  { %2630 = vmatpush1.bf16.msra.mxu1 %v17946_v24  ;;  %2683 = vmatprep.subr.bf16.mxu0 %v17957_v27  ;;  %v18018_v24 = vld [vmem:[#allocation2 + $0x590] ss:$28 sps:$4 sm:$0xff]  }
 0x17c   :  { %2640 = vmatprep.subr.bf16.mxu1 %v17954_v26  ;;  %v18019_v26 = vld [vmem:[#allocation2 + $0x358] ss:$28 sps:$4 sm:$0xff]   ;;  %v18022_v27 = vld [vmem:[#allocation2 + $0x3d0] ss:$28 sps:$4 sm:$0xff]  }
 0x17e   :  { %2632 = vmatmul.mubr.bf16.vlgmr.msra.gmra.mrb[4].mxu1 %v20790_v23  ;;  %2684 = vmatpush1.bf16.msra.mxu0 %v17955_v29  ;;  %v18026_v29 = vld [vmem:[#allocation2 + $0x394] ss:$28 sps:$4 sm:$0xff]  }
 0x17f   :  { %2641 = vmatpush1.bf16.msra.mxu1 %v17952_v28  ;;  %2685 = vmatprep.subr.bf16.mxu0 %v17960_v30  ;;  %v18023_v28 = vld [vmem:[#allocation2 + $0x5c8] ss:$28 sps:$4 sm:$0xff]   ;;  %v18024_v30 = vld [vmem:[#allocation2 + $0x390] ss:$28 sps:$4 sm:$0xff]  }
 0x180   :  { %2672 = vmatprep.mubr.bf16.mxu1 %v20552_v0  ;;  %2804 = vmatprep.subr.bf16.mxu1 %v17969_v31  ;;  %v18027_v31 = vld [vmem:[#allocation2 + $0x408] ss:$28 sps:$4 sm:$0xff]  }
 0x182   :  { %2686 = vmatpush1.bf16.msra.mxu0 %v17958_v18  ;;  %v18028_v18 = vld [vmem:[#allocation2 + $0x600] ss:$28 sps:$4 sm:$0xff]  }
 0x183   :  { %2687 = vmatprep.subr.bf16.mxu0 %v17963_v32  ;;  %v18031_v32 = vld [vmem:[#allocation2 + $0x3cc] ss:$28 sps:$4 sm:$0xff]  }
 0x186   :  { %2688 = vmatpush1.bf16.msra.mxu0 %v17961_v33  ;;  %v18029_v33 = vld [vmem:[#allocation2 + $0x3c8] ss:$28 sps:$4 sm:$0xff]  }
 0x187   :  { %2689 = vmatprep.subr.bf16.mxu0 %v17966_v34  ;;  %v18032_v34 = vld [vmem:[#allocation2 + $0x440] ss:$28 sps:$4 sm:$0xff]  }
 0x18a   :  { %15553 = vmatmul.mubr.msk.bf16.vlgmr.msra.gmra.mrb[4].mxu1 %vm2349_vm0, %v20799_v40  ;;  %2690 = vmatpush1.bf16.msra.mxu0 %v17964_v36  ;;  %v18033_v36 = vld [vmem:[#allocation2 + $0x638] ss:$28 sps:$4 sm:$0xff]  }
 0x18b   :  { %2805 = vmatpush1.bf16.msra.mxu1 %v17967_v37  ;;  %2691 = vmatprep.subr.bf16.mxu0 %v17972_v38  ;;  %v18036_v37 = vld [vmem:[#allocation2 + $0x404] ss:$28 sps:$4 sm:$0xff]  }
 0x18c   :  { %2836 = vmatprep.mubr.bf16.mxu1 %v20552_v0  ;;  %17068 = vmatprep.subr.bf16.mxu1 %v17973_v39  ;;  %v18034_v38 = vld [vmem:[#allocation2 + $0x400] ss:$28 sps:$4 sm:$0xff]   ;;  %v18037_v39 = vld [vmem:[#allocation2 + $0x478] ss:$28 sps:$4 sm:$0xff]  }
 0x18e   :  { %2692 = vmatpush1.bf16.msra.mxu0 %v17970_v41  ;;  %v18038_v41 = vld [vmem:[#allocation2 + $0x670] ss:$28 sps:$4 sm:$0xff]  }
 0x18f   :  { %2693 = vmatprep.subr.bf16.mxu0 %v17976_v42  ;;  %v18041_v42 = vld [vmem:[#allocation2 + $0x43c] ss:$28 sps:$4 sm:$0xff]  }
 0x191   :  { %v20804_v47 = vpop.f32.mrb[0].mxu1 }
 0x192   :  { %v20806_v49 = vpop.f32.mrb[1].mxu1  ;;  %15554 = vmatmul.mubr.msk.bf16.vlgmr.msra.gmra.mrb[8].mxu1 %vm2349_vm0, %v20799_v40  ;;  %2694 = vmatpush1.bf16.msra.mxu0 %v17974_v43  ;;  %v18039_v43 = vld [vmem:[#allocation2 + $0x438] ss:$28 sps:$4 sm:$0xff]  }
 0x193   :  { %17069 = vmatpush3.bf16.msra.mxu1 %v17977_v44  ;;  %v2514_v51 = vpop.f32.mrb[2].mxu1  ;;  %2695 = vmatprep.subr.bf16.mxu0 %v17981_v46  ;;  %v18042_v44 = vld [vmem:[#allocation2 + $0x4b0] ss:$28 sps:$4 sm:$0xff]  }
 0x194   :  { %v2515_v55 = vpop.f32.mrb[3].mxu1  ;;  %17070 = vmatprep.subr.bf16.mxu1 %v17978_v45  ;;  %2877 = vmatprep.mubr.bf16.mxu1 %v20752_v52  ;;  %v18043_v45 = vld [vmem:[#allocation2 + $0x6a8] ss:$28 sps:$4 sm:$0xff]   ;;  %v18046_v46 = vld [vmem:[#allocation2 + $0x474] ss:$28 sps:$4 sm:$0xff]  }
 0x195   :  { %v18048_v51 = vld [vmem:[#allocation2 + $0x6e0] ss:$28 sps:$4 sm:$0xff]  }
 0x196   :  { %2696 = vmatpush1.bf16.msra.mxu0 %v17979_v48  ;;  %v18044_v48 = vld [vmem:[#allocation2 + $0x470] ss:$28 sps:$4 sm:$0xff]   ;;  %v18052_v55 = vld [vmem:[#allocation2 + $0x520] ss:$28 sps:$4 sm:$0xff]  }
 0x197   :  { %17071 = vmatpush3.bf16.msra.mxu1 %v17982_v50  ;;  %2697 = vmatprep.subr.bf16.mxu0 %v17986_v54  ;;  %v18047_v50 = vld [vmem:[#allocation2 + $0x4e8] ss:$28 sps:$4 sm:$0xff]  }
 0x198   :  { %17072 = vmatprep.subr.bf16.mxu1 %v17983_v53  ;;  %v18051_v53 = vld [vmem:[#allocation2 + $0x4ac] ss:$28 sps:$4 sm:$0xff]  }
 0x199   :  { %v18049_v54 = vld [vmem:[#allocation2 + $0x4a8] ss:$28 sps:$4 sm:$0xff]  }
 0x19a   :  { %2698 = vmatpush1.bf16.msra.mxu0 %v17984_v56  ;;  %v18053_v56 = vld [vmem:[#allocation2 + $0x8d8] ss:$28 sps:$4 sm:$0xff]  }
 0x19b   :  { %17073 = vmatpush3.bf16.msra.mxu1 %v17987_v57  ;;  %2699 = vmatprep.subr.bf16.mxu0 %v17991_v59  ;;  %v18056_v57 = vld [vmem:[#allocation2 + $0x4e4] ss:$28 sps:$4 sm:$0xff]   ;;  %v18057_v59 = vld [vmem:[#allocation2 + $0x718] ss:$28 sps:$4 sm:$0xff]  }
 0x19c   :  { %17074 = vmatprep.subr.bf16.mxu1 %v17988_v58  ;;  %v18054_v58 = vld [vmem:[#allocation2 + $0x4e0] ss:$28 sps:$4 sm:$0xff]  }
 0x19e   :  { %2700 = vmatpush1.bf16.msra.mxu0 %v17989_v60  ;;  %v18058_v60 = vld [vmem:[#allocation2 + $0x910] ss:$28 sps:$4 sm:$0xff]  }
 0x19f   :  { %17075 = vmatpush3.bf16.msra.mxu1 %v17992_v61  ;;  %2701 = vmatprep.subr.bf16.mxu0 %v17996_v63  ;;  %v18061_v61 = vld [vmem:[#allocation2 + $0x51c] ss:$28 sps:$4 sm:$0xff]   ;;  %v18062_v63 = vld [vmem:[#allocation2 + $0x750] ss:$28 sps:$4 sm:$0xff]  }
 0x1a0   :  { %17076 = vmatprep.subr.bf16.mxu1 %v17993_v62  ;;  %v18059_v62 = vld [vmem:[#allocation2 + $0x518] ss:$28 sps:$4 sm:$0xff]  }
 0x1a2   :  { %2702 = vmatpush1.bf16.msra.mxu0 %v17994_v1  ;;  %v18063_v1 = vld [vmem:[#allocation2 + $0x948] ss:$28 sps:$4 sm:$0xff]  }
 0x1a3   :  { %17077 = vmatpush3.bf16.msra.mxu1 %v17997_v2  ;;  %2703 = vmatprep.subr.bf16.mxu0 %v18001_v4  ;;  %v18066_v2 = vld [vmem:[#allocation2 + $0x554] ss:$28 sps:$4 sm:$0xff]   ;;  %v18067_v4 = vld [vmem:[#allocation2 + $0x788] ss:$28 sps:$4 sm:$0xff]  }
 0x1a4   :  { %17078 = vmatprep.subr.bf16.mxu1 %v17998_v3  ;;  %v18064_v3 = vld [vmem:[#allocation2 + $0x550] ss:$28 sps:$4 sm:$0xff]  }
 0x1a6   :  { %2704 = vmatpush1.bf16.msra.mxu0 %v17999_v5  ;;  %v18068_v5 = vld [vmem:[#allocation2 + $0x980] ss:$28 sps:$4 sm:$0xff]  }
 0x1a7   :  { %17079 = vmatpush3.bf16.msra.mxu1 %v18002_v6  ;;  %2705 = vmatprep.subr.bf16.mxu0 %v18006_v9  ;;  %v18071_v6 = vld [vmem:[#allocation2 + $0x58c] ss:$28 sps:$4 sm:$0xff]   ;;  %v18072_v9 = vld [vmem:[#allocation2 + $0x7c0] ss:$28 sps:$4 sm:$0xff]  }
 0x1a8   :  { %17080 = vmatprep.subr.bf16.mxu1 %v18003_v7  ;;  %v18069_v7 = vld [vmem:[#allocation2 + $0x588] ss:$28 sps:$4 sm:$0xff]  }
 0x1aa   :  { %2706 = vmatpush1.bf16.msra.mxu0 %v18004_v10  ;;  %v18073_v10 = vld [vmem:[#allocation2 + $0x9b8] ss:$28 sps:$4 sm:$0xff]  }
 0x1ab   :  { %17081 = vmatpush3.bf16.msra.mxu1 %v18007_v11  ;;  %2707 = vmatprep.subr.bf16.mxu0 %v18011_v13  ;;  %v18076_v11 = vld [vmem:[#allocation2 + $0x5c4] ss:$28 sps:$4 sm:$0xff]   ;;  %v18077_v13 = vld [vmem:[#allocation2 + $0x7f8] ss:$28 sps:$4 sm:$0xff]  }
 0x1ac   :  { %17082 = vmatprep.subr.bf16.mxu1 %v18008_v12  ;;  %v18074_v12 = vld [vmem:[#allocation2 + $0x5c0] ss:$28 sps:$4 sm:$0xff]  }
 0x1ae   :  { %2708 = vmatpush1.bf16.msra.mxu0 %v18009_v14  ;;  %v18078_v14 = vld [vmem:[#allocation2 + $0x9f0] ss:$28 sps:$4 sm:$0xff]  }
 0x1af   :  { %17083 = vmatpush3.bf16.msra.mxu1 %v18012_v16  ;;  %2709 = vmatprep.subr.bf16.mxu0 %v18016_v20  ;;  %v18081_v16 = vld [vmem:[#allocation2 + $0x5fc] ss:$28 sps:$4 sm:$0xff]   ;;  %v18082_v20 = vld [vmem:[#allocation2 + $0x830] ss:$28 sps:$4 sm:$0xff]  }
 0x1b0   :  { %17090 = vmatprep.subr.bf16.mxu1 %v18013_v17  ;;  %v18079_v17 = vld [vmem:[#allocation2 + $0x5f8] ss:$28 sps:$4 sm:$0xff]  }
 0x1b2   :  { %2878 = vmatmul.mubr.bf16.vlgmr.msra.gmra.mrb[12].mxu1 %v20756_v8  ;;  %2710 = vmatpush1.bf16.msra.mxu0 %v18014_v21  ;;  %v18083_v21 = vld [vmem:[#allocation2 + $0xa28] ss:$28 sps:$4 sm:$0xff]  }
 0x1b3   :  { %17091 = vmatpush3.bf16.msra.mxu1 %v18017_v22  ;;  %2711 = vmatprep.subr.bf16.mxu0 %v18021_v25  ;;  %v18086_v22 = vld [vmem:[#allocation2 + $0x634] ss:$28 sps:$4 sm:$0xff]   ;;  %v18087_v25 = vld [vmem:[#allocation2 + $0x868] ss:$28 sps:$4 sm:$0xff]  }
 0x1b4   :  { %17092 = vmatprep.subr.bf16.mxu1 %v18018_v24  ;;  %2917 = vmatprep.mubr.bf16.mxu1 %v20767_v35  ;;  %v18084_v24 = vld [vmem:[#allocation2 + $0x630] ss:$28 sps:$4 sm:$0xff]  }
 0x1b6   :  { %2712 = vmatpush1.bf16.msra.mxu0 %v18019_v26  ;;  %v18088_v26 = vld [vmem:[#allocation2 + $0xa60] ss:$28 sps:$4 sm:$0xff]  }
 0x1b7   :  { %17093 = vmatpush3.bf16.msra.mxu1 %v18022_v27  ;;  %2722 = vmatprep.subr.bf16.mxu0 %v18026_v29  ;;  %v18091_v27 = vld [vmem:[#allocation2 + $0x66c] ss:$28 sps:$4 sm:$0xff]   ;;  %v18092_v29 = vld [vmem:[#allocation2 + $0x8a0] ss:$28 sps:$4 sm:$0xff]  }
 0x1b8   :  { %17094 = vmatprep.subr.bf16.mxu1 %v18023_v28  ;;  %v18089_v28 = vld [vmem:[#allocation2 + $0x668] ss:$28 sps:$4 sm:$0xff]  }
 0x1b9   :  { %2714 = vmatmul.mubr.bf16.vlgmr.msra.gmra.mrb[4].mxu0 %v20756_v8 }
 0x1ba   :  { %2723 = vmatpush1.bf16.msra.mxu0 %v18024_v30  ;;  %2754 = vmatprep.mubr.bf16.mxu0 %v20767_v35  ;;  %v18095_v30 = vld [vmem:[#allocation2 + $0x6a4] ss:$28 sps:$4 sm:$0xff]  }
 0x1bb   :  { %17095 = vmatpush3.bf16.msra.mxu1 %v18027_v31  ;;  %2724 = vmatprep.subr.bf16.mxu0 %v18031_v32  ;;  %v18093_v31 = vld [vmem:[#allocation2 + $0x6a0] ss:$28 sps:$4 sm:$0xff]  }
 0x1bc   :  { %17096 = vmatprep.subr.bf16.mxu1 %v18028_v18  ;;  %v18096_v18 = vld [vmem:[#allocation2 + $0xa98] ss:$28 sps:$4 sm:$0xff]  }
 0x1bd   :  { %v18099_v32 = vld [vmem:[#allocation2 + $0x6dc] ss:$28 sps:$4 sm:$0xff]  }
 0x1be   :  { %2725 = vmatpush1.bf16.msra.mxu0 %v18029_v33  ;;  %v18102_v33 = vld [vmem:[#allocation2 + $0xabc] ss:$28 sps:$4 sm:$0xff]  }
 0x1bf   :  { %17097 = vmatpush3.bf16.msra.mxu1 %v18032_v34  ;;  %2726 = vmatprep.subr.bf16.mxu0 %v18036_v37  ;;  %v20553_v34 = vmov 0.0   ;;  %v18105_v37 = vld [vmem:[#allocation2 + $0x714] ss:$28 sps:$4 sm:$0xff]  }
 0x1c0   :  { %17098 = vmatprep.subr.bf16.mxu1 %v18033_v36  ;;  %v18097_v36 = vld [vmem:[#allocation2 + $0x6d8] ss:$28 sps:$4 sm:$0xff]  }
 0x1c2   :  { %2727 = vmatpush1.bf16.msra.mxu0 %v18034_v38  ;;  %v18100_v38 = vld [vmem:[#allocation2 + $0xab8] ss:$28 sps:$4 sm:$0xff]  }
 0x1c3   :  { %17099 = vmatpush3.bf16.msra.mxu1 %v18037_v39  ;;  %2728 = vmatprep.subr.bf16.mxu0 %v18041_v42  ;;  %v18103_v39 = vld [vmem:[#allocation2 + $0x710] ss:$28 sps:$4 sm:$0xff]  }
 0x1c4   :  { %17100 = vmatprep.subr.bf16.mxu1 %v18038_v41  ;;  %v18108_v41 = vld [vmem:[#allocation2 + $0xaf4] ss:$28 sps:$4 sm:$0xff]   ;;  %v18111_v42 = vld [vmem:[#allocation2 + $0x74c] ss:$28 sps:$4 sm:$0xff]  }
 0x1c6   :  { %2729 = vmatpush1.bf16.msra.mxu0 %v18039_v43  ;;  %v18106_v43 = vld [vmem:[#allocation2 + $0xaf0] ss:$28 sps:$4 sm:$0xff]  }
 0x1c7   :  { %17101 = vmatpush3.bf16.msra.mxu1 %v18042_v44  ;;  %2730 = vmatprep.subr.bf16.mxu0 %v18046_v46  ;;  %v18109_v44 = vld [vmem:[#allocation2 + $0x748] ss:$28 sps:$4 sm:$0xff]  }
 0x1c8   :  { %17102 = vmatprep.subr.bf16.mxu1 %v18043_v45  ;;  %v18114_v45 = vld [vmem:[#allocation2 + $0xb2c] ss:$28 sps:$4 sm:$0xff]   ;;  %v18117_v46 = vld [vmem:[#allocation2 + $0x784] ss:$28 sps:$4 sm:$0xff]  }
 0x1ca   :  { %2731 = vmatpush1.bf16.msra.mxu0 %v18044_v48  ;;  %v18112_v48 = vld [vmem:[#allocation2 + $0xb28] ss:$28 sps:$4 sm:$0xff]  }
 0x1cb   :  { %17103 = vmatpush3.bf16.msra.mxu1 %v18047_v50  ;;  %2732 = vmatprep.subr.bf16.mxu0 %v18051_v53  ;;  %v18115_v50 = vld [vmem:[#allocation2 + $0x780] ss:$28 sps:$4 sm:$0xff]  }
 0x1cc   :  { %17104 = vmatprep.subr.bf16.mxu1 %v18048_v51  ;;  %v18120_v51 = vld [vmem:[#allocation2 + $0xb64] ss:$28 sps:$4 sm:$0xff]  }
 0x1cd   :  { %v18118_v53 = vld [vmem:[#allocation2 + $0xb60] ss:$28 sps:$4 sm:$0xff]  }
 0x1ce   :  { %2733 = vmatpush1.bf16.msra.mxu0 %v18049_v54  ;;  %v18121_v54 = vld [vmem:[#allocation2 + $0x7b8] ss:$28 sps:$4 sm:$0xff]  }
 0x1cf   :  { %17105 = vmatpush3.bf16.msra.mxu1 %v18052_v55  ;;  %2734 = vmatprep.subr.bf16.mxu0 %v18056_v57  ;;  %v18126_v55 = vld [vmem:[#allocation2 + $0xb9c] ss:$28 sps:$4 sm:$0xff]  }
 0x1d0   :  { %17112 = vmatprep.subr.bf16.mxu1 %v18053_v56  ;;  %v18129_v56 = vld [vmem:[#allocation2 + $0x7f4] ss:$28 sps:$4 sm:$0xff]  }
 0x1d1   :  { %v18124_v57 = vld [vmem:[#allocation2 + $0xb98] ss:$28 sps:$4 sm:$0xff]  }
 0x1d2   :  { %2918 = vmatmul.mubr.bf16.vlgmr.msra.gmra.mrb[16].mxu1 %v20773_v15  ;;  %2735 = vmatpush1.bf16.msra.mxu0 %v18054_v58  ;;  %v18127_v58 = vld [vmem:[#allocation2 + $0x7f0] ss:$28 sps:$4 sm:$0xff]  }
 0x1d3   :  { %17113 = vmatpush3.bf16.msra.mxu1 %v18057_v59  ;;  %2736 = vmatprep.subr.bf16.mxu0 %v18061_v61  ;;  %v18132_v59 = vld [vmem:[#allocation2 + $0xbd4] ss:$28 sps:$4 sm:$0xff]  }
 0x1d4   :  { %17114 = vmatprep.subr.bf16.mxu1 %v18058_v60  ;;  %2957 = vmatprep.mubr.bf16.mxu1 %v20782_v19  ;;  %v18135_v60 = vld [vmem:[#allocation2 + $0x82c] ss:$28 sps:$4 sm:$0xff]  }
 0x1d5   :  { %v18130_v61 = vld [vmem:[#allocation2 + $0xbd0] ss:$28 sps:$4 sm:$0xff]  }
 0x1d6   :  { %2737 = vmatpush1.bf16.msra.mxu0 %v18059_v62  ;;  %v18133_v62 = vld [vmem:[#allocation2 + $0x828] ss:$28 sps:$4 sm:$0xff]  }
 0x1d7   :  { %17115 = vmatpush3.bf16.msra.mxu1 %v18062_v63  ;;  %2738 = vmatprep.subr.bf16.mxu0 %v18066_v2  ;;  %v18138_v63 = vld [vmem:[#allocation2 + $0xc0c] ss:$28 sps:$4 sm:$0xff]  }
 0x1d8   :  { %17116 = vmatprep.subr.bf16.mxu1 %v18063_v1  ;;  %v18141_v1 = vld [vmem:[#allocation2 + $0x864] ss:$28 sps:$4 sm:$0xff]  }
 0x1d9   :  { %v18136_v2 = vld [vmem:[#allocation2 + $0xc08] ss:$28 sps:$4 sm:$0xff]  }
 0x1da   :  { %2739 = vmatpush1.bf16.msra.mxu0 %v18064_v3  ;;  %v18139_v3 = vld [vmem:[#allocation2 + $0x860] ss:$28 sps:$4 sm:$0xff]  }
 0x1db   :  { %17117 = vmatpush3.bf16.msra.mxu1 %v18067_v4  ;;  %2740 = vmatprep.subr.bf16.mxu0 %v18071_v6  ;;  %v18144_v4 = vld [vmem:[#allocation2 + $0xc44] ss:$28 sps:$4 sm:$0xff]  }
 0x1dc   :  { %17118 = vmatprep.subr.bf16.mxu1 %v18068_v5  ;;  %v18147_v5 = vld [vmem:[#allocation2 + $0x89c] ss:$28 sps:$4 sm:$0xff]  }
 0x1dd   :  { %v18142_v6 = vld [vmem:[#allocation2 + $0xc40] ss:$28 sps:$4 sm:$0xff]  }
 0x1de   :  { %2741 = vmatpush1.bf16.msra.mxu0 %v18069_v7  ;;  %v18145_v7 = vld [vmem:[#allocation2 + $0x898] ss:$28 sps:$4 sm:$0xff]  }
 0x1df   :  { %17119 = vmatpush3.bf16.msra.mxu1 %v18072_v9  ;;  %2742 = vmatprep.subr.bf16.mxu0 %v18076_v11  ;;  %v18150_v9 = vld [vmem:[#allocation2 + $0xc7c] ss:$28 sps:$4 sm:$0xff]  }
 0x1e0   :  { %17120 = vmatprep.subr.bf16.mxu1 %v18073_v10  ;;  %v18153_v10 = vld [vmem:[#allocation2 + $0x8d4] ss:$28 sps:$4 sm:$0xff]  }
 0x1e1   :  { %v18148_v11 = vld [vmem:[#allocation2 + $0xc78] ss:$28 sps:$4 sm:$0xff]  }
 0x1e2   :  { %2743 = vmatpush1.bf16.msra.mxu0 %v18074_v12  ;;  %v18151_v12 = vld [vmem:[#allocation2 + $0x8d0] ss:$28 sps:$4 sm:$0xff]  }
 0x1e3   :  { %17121 = vmatpush3.bf16.msra.mxu1 %v18077_v13  ;;  %2744 = vmatprep.subr.bf16.mxu0 %v18081_v16  ;;  %v18156_v13 = vld [vmem:[#allocation2 + $0xcb4] ss:$28 sps:$4 sm:$0xff]  }
 0x1e4   :  { %17122 = vmatprep.subr.bf16.mxu1 %v18078_v14  ;;  %v18159_v14 = vld [vmem:[#allocation2 + $0x90c] ss:$28 sps:$4 sm:$0xff]  }
 0x1e5   :  { %v18154_v16 = vld [vmem:[#allocation2 + $0xcb0] ss:$28 sps:$4 sm:$0xff]  }
 0x1e6   :  { %2745 = vmatpush1.bf16.msra.mxu0 %v18079_v17  ;;  %v18157_v17 = vld [vmem:[#allocation2 + $0x908] ss:$28 sps:$4 sm:$0xff]  }
 0x1e7   :  { %17123 = vmatpush3.bf16.msra.mxu1 %v18082_v20  ;;  %2746 = vmatprep.subr.bf16.mxu0 %v18086_v22  ;;  %v18162_v20 = vld [vmem:[#allocation2 + $0xcec] ss:$28 sps:$4 sm:$0xff]  }
 0x1e8   :  { %17124 = vmatprep.subr.bf16.mxu1 %v18083_v21  ;;  %v18165_v21 = vld [vmem:[#allocation2 + $0x944] ss:$28 sps:$4 sm:$0xff]  }
 0x1e9   :  { %v18160_v22 = vld [vmem:[#allocation2 + $0xce8] ss:$28 sps:$4 sm:$0xff]  }
 0x1ea   :  { %2747 = vmatpush1.bf16.msra.mxu0 %v18084_v24  ;;  %v18163_v24 = vld [vmem:[#allocation2 + $0x940] ss:$28 sps:$4 sm:$0xff]  }
 0x1eb   :  { %17125 = vmatpush3.bf16.msra.mxu1 %v18087_v25  ;;  %2748 = vmatprep.subr.bf16.mxu0 %v18091_v27  ;;  %v18168_v25 = vld [vmem:[#allocation2 + $0xd24] ss:$28 sps:$4 sm:$0xff]  }
 0x1ec   :  { %17126 = vmatprep.subr.bf16.mxu1 %v18088_v26  ;;  %v18171_v26 = vld [vmem:[#allocation2 + $0x97c] ss:$28 sps:$4 sm:$0xff]  }
 0x1ed   :  { %v18166_v27 = vld [vmem:[#allocation2 + $0xd20] ss:$28 sps:$4 sm:$0xff]  }
 0x1ee   :  { %2749 = vmatpush1.bf16.msra.mxu0 %v18089_v28  ;;  %v18169_v28 = vld [vmem:[#allocation2 + $0x978] ss:$28 sps:$4 sm:$0xff]  }
 0x1ef   :  { %17127 = vmatpush3.bf16.msra.mxu1 %v18092_v29  ;;  %2750 = vmatprep.subr.bf16.mxu0 %v18095_v30  ;;  %v18174_v29 = vld [vmem:[#allocation2 + $0xd5c] ss:$28 sps:$4 sm:$0xff]   ;;  %v18177_v30 = vld [vmem:[#allocation2 + $0x9b4] ss:$28 sps:$4 sm:$0xff]  }
 0x1f0   :  { %17380 = vmatprep.subr.bf16.mxu1 %v20553_v34 }
 0x1f2   :  { %2958 = vmatmul.mubr.bf16.vlgmr.msra.gmra.mrb[20].mxu1 %v20790_v23  ;;  %2751 = vmatpush1.bf16.msra.mxu0 %v18093_v31  ;;  %v18172_v31 = vld [vmem:[#allocation2 + $0xd58] ss:$28 sps:$4 sm:$0xff]  }
 0x1f3   :  { %17381 = vmatpush3.bf16.msra.mxu1 %v18096_v18  ;;  %2752 = vmatprep.subr.bf16.mxu0 %v18099_v32  ;;  %v18175_v18 = vld [vmem:[#allocation2 + $0x9b0] ss:$28 sps:$4 sm:$0xff]  }
 0x1f4   :  { %17382 = vmatprep.mubr.msk.bf16.mxu1 %vm20554_vm1, %v20553_v34  ;;  %5162 = vmatprep.subr.bf16.mxu1 %v18102_v33  ;;  %v18180_v32 = vld [vmem:[#allocation2 + $0xd94] ss:$28 sps:$4 sm:$0xff]   ;;  %v18183_v33 = vld [vmem:[#allocation2 + $0x9ec] ss:$28 sps:$4 sm:$0xff]  }
 0x1f6   :  { %2753 = vmatpush1.bf16.msra.mxu0 %v18097_v36  ;;  %v18178_v36 = vld [vmem:[#allocation2 + $0xd90] ss:$28 sps:$4 sm:$0xff]  }
 0x1f7   :  { %2763 = vmatprep.subr.bf16.mxu0 %v18105_v37  ;;  %v18181_v37 = vld [vmem:[#allocation2 + $0x9e8] ss:$28 sps:$4 sm:$0xff]  }
 0x1f9   :  { %2755 = vmatmul.mubr.bf16.vlgmr.msra.gmra.mrb[4].mxu0 %v20773_v15 }
 0x1fa   :  { %17383 = vmatmul.mubr.msk.bf16.vlgmr.msra.gmra.mrb[24].mxu1 %vm2349_vm0, %v20799_v40  ;;  %2764 = vmatpush1.bf16.msra.mxu0 %v18103_v39  ;;  %v18123_v40 = vld [vmem:[#allocation2 + $0x7bc] ss:$28 sps:$4 sm:$0xff]   ;;  %v18189_v39 = vld [vmem:[#allocation2 + $0xa24] ss:$28 sps:$4 sm:$0xff]  }
 0x1fb   :  { %5163 = vmatpush1.bf16.msra.mxu1 %v18100_v38  ;;  %2765 = vmatprep.subr.bf16.mxu0 %v18111_v42  ;;  %v18186_v38 = vld [vmem:[#allocation2 + $0xdcc] ss:$28 sps:$4 sm:$0xff]   ;;  %v18187_v42 = vld [vmem:[#allocation2 + $0xa20] ss:$28 sps:$4 sm:$0xff]  }
 0x1fc   :  { %5164 = vmatprep.subr.bf16.mxu1 %v18108_v41  ;;  %5194 = vmatprep.mubr.bf16.mxu1 %v20752_v52  ;;  %v18184_v41 = vld [vmem:[#allocation2 + $0xdc8] ss:$28 sps:$4 sm:$0xff]  }
 0x1fd   :  { %2795 = vmatprep.mubr.bf16.mxu0 %v20782_v19 }
 0x1fe   :  { %2766 = vmatpush1.bf16.msra.mxu0 %v18109_v44  ;;  %v18195_v44 = vld [vmem:[#allocation2 + $0xa5c] ss:$28 sps:$4 sm:$0xff]  }
 0x1ff   :  { %5165 = vmatpush1.bf16.msra.mxu1 %v18106_v43  ;;  %2767 = vmatprep.subr.bf16.mxu0 %v18117_v46  ;;  %v18192_v43 = vld [vmem:[#allocation2 + $0xe04] ss:$28 sps:$4 sm:$0xff]   ;;  %v18193_v46 = vld [vmem:[#allocation2 + $0xa58] ss:$28 sps:$4 sm:$0xff]  }
 0x200   :  { %5166 = vmatprep.subr.bf16.mxu1 %v18114_v45  ;;  %v18190_v45 = vld [vmem:[#allocation2 + $0xe00] ss:$28 sps:$4 sm:$0xff]  }
 0x202   :  { %2768 = vmatpush1.bf16.msra.mxu0 %v18115_v50  ;;  %v18201_v50 = vld [vmem:[#allocation2 + $0xac4] ss:$28 sps:$4 sm:$0xff]  }
 0x203   :  { %5167 = vmatpush1.bf16.msra.mxu1 %v18112_v48  ;;  %2769 = vmatprep.subr.bf16.mxu0 %v18123_v40  ;;  %v18198_v48 = vld [vmem:[#allocation2 + $0xe3c] ss:$28 sps:$4 sm:$0xff]  }
 0x204   :  { %5168 = vmatprep.subr.bf16.mxu1 %v18120_v51  ;;  %v18196_v51 = vld [vmem:[#allocation2 + $0xe38] ss:$28 sps:$4 sm:$0xff]   ;;  %v18199_v40 = vld [vmem:[#allocation2 + $0xac0] ss:$28 sps:$4 sm:$0xff]  }
 0x206   :  { %2770 = vmatpush1.bf16.msra.mxu0 %v18121_v54  ;;  %v18207_v54 = vld [vmem:[#allocation2 + $0xafc] ss:$28 sps:$4 sm:$0xff]  }
 0x207   :  { %5169 = vmatpush1.bf16.msra.mxu1 %v18118_v53  ;;  %2771 = vmatprep.subr.bf16.mxu0 %v18129_v56  ;;  %v18204_v53 = vld [vmem:[#allocation2 + $0xe74] ss:$28 sps:$4 sm:$0xff]  }
 0x208   :  { %5170 = vmatprep.subr.bf16.mxu1 %v18126_v55  ;;  %v18202_v55 = vld [vmem:[#allocation2 + $0xe70] ss:$28 sps:$4 sm:$0xff]   ;;  %v18205_v56 = vld [vmem:[#allocation2 + $0xaf8] ss:$28 sps:$4 sm:$0xff]  }
 0x20a   :  { %2772 = vmatpush1.bf16.msra.mxu0 %v18127_v58  ;;  %v18213_v58 = vld [vmem:[#allocation2 + $0xb34] ss:$28 sps:$4 sm:$0xff]  }
 0x20b   :  { %5171 = vmatpush1.bf16.msra.mxu1 %v18124_v57  ;;  %2773 = vmatprep.subr.bf16.mxu0 %v18135_v60  ;;  %v18210_v57 = vld [vmem:[#allocation2 + $0xeac] ss:$28 sps:$4 sm:$0xff]  }
 0x20c   :  { %5172 = vmatprep.subr.bf16.mxu1 %v18132_v59  ;;  %v18208_v59 = vld [vmem:[#allocation2 + $0xea8] ss:$28 sps:$4 sm:$0xff]   ;;  %v18211_v60 = vld [vmem:[#allocation2 + $0xb30] ss:$28 sps:$4 sm:$0xff]  }
 0x20e   :  { %2774 = vmatpush1.bf16.msra.mxu0 %v18133_v62  ;;  %v18219_v62 = vld [vmem:[#allocation2 + $0xb6c] ss:$28 sps:$4 sm:$0xff]  }
 0x20f   :  { %5173 = vmatpush1.bf16.msra.mxu1 %v18130_v61  ;;  %2775 = vmatprep.subr.bf16.mxu0 %v18141_v1  ;;  %v18216_v61 = vld [vmem:[#allocation2 + $0xee4] ss:$28 sps:$4 sm:$0xff]  }
 0x210   :  { %5174 = vmatprep.subr.bf16.mxu1 %v18138_v63  ;;  %v18214_v63 = vld [vmem:[#allocation2 + $0xee0] ss:$28 sps:$4 sm:$0xff]   ;;  %v18217_v1 = vld [vmem:[#allocation2 + $0xb68] ss:$28 sps:$4 sm:$0xff]  }
 0x212   :  { %2776 = vmatpush1.bf16.msra.mxu0 %v18139_v3  ;;  %v18225_v3 = vld [vmem:[#allocation2 + $0xba4] ss:$28 sps:$4 sm:$0xff]  }
 0x213   :  { %5175 = vmatpush1.bf16.msra.mxu1 %v18136_v2  ;;  %2777 = vmatprep.subr.bf16.mxu0 %v18147_v5  ;;  %v18222_v2 = vld [vmem:[#allocation2 + $0xf1c] ss:$28 sps:$4 sm:$0xff]  }
 0x214   :  { %5176 = vmatprep.subr.bf16.mxu1 %v18144_v4  ;;  %v18220_v4 = vld [vmem:[#allocation2 + $0xf18] ss:$28 sps:$4 sm:$0xff]   ;;  %v18223_v5 = vld [vmem:[#allocation2 + $0xba0] ss:$28 sps:$4 sm:$0xff]  }
 0x216   :  { %2778 = vmatpush1.bf16.msra.mxu0 %v18145_v7  ;;  %v18231_v7 = vld [vmem:[#allocation2 + $0xbdc] ss:$28 sps:$4 sm:$0xff]  }
 0x217   :  { %5177 = vmatpush1.bf16.msra.mxu1 %v18142_v6  ;;  %2779 = vmatprep.subr.bf16.mxu0 %v18153_v10  ;;  %v18228_v6 = vld [vmem:[#allocation2 + $0xf54] ss:$28 sps:$4 sm:$0xff]  }
 0x218   :  { %5178 = vmatprep.subr.bf16.mxu1 %v18150_v9  ;;  %v18226_v9 = vld [vmem:[#allocation2 + $0xf50] ss:$28 sps:$4 sm:$0xff]   ;;  %v18229_v10 = vld [vmem:[#allocation2 + $0xbd8] ss:$28 sps:$4 sm:$0xff]  }
 0x21a   :  { %2780 = vmatpush1.bf16.msra.mxu0 %v18151_v12  ;;  %v18237_v12 = vld [vmem:[#allocation2 + $0xc14] ss:$28 sps:$4 sm:$0xff]  }
 0x21b   :  { %5179 = vmatpush1.bf16.msra.mxu1 %v18148_v11  ;;  %2781 = vmatprep.subr.bf16.mxu0 %v18159_v14  ;;  %v18234_v11 = vld [vmem:[#allocation2 + $0xf8c] ss:$28 sps:$4 sm:$0xff]  }
 0x21c   :  { %5180 = vmatprep.subr.bf16.mxu1 %v18156_v13 }
 0x21e   :  { %2782 = vmatpush1.bf16.msra.mxu0 %v18157_v17 }
 0x21f   :  { %5181 = vmatpush1.bf16.msra.mxu1 %v18154_v16  ;;  %2783 = vmatprep.subr.bf16.mxu0 %v18165_v21  ;;  %v18232_v21 = vld [vmem:[#allocation2 + $0xf88] ss:$28 sps:$4 sm:$0xff]  }
 0x220   :  { %5182 = vmatprep.subr.bf16.mxu1 %v18162_v20 }
 0x222   :  { %2784 = vmatpush1.bf16.msra.mxu0 %v18163_v24 }
 0x223   :  { %5183 = vmatpush1.bf16.msra.mxu1 %v18160_v22  ;;  %2785 = vmatprep.subr.bf16.mxu0 %v18171_v26  ;;  %v18235_v22 = vld [vmem:[#allocation2 + $0xc10] ss:$28 sps:$4 sm:$0xff]  }
 0x224   :  { %5184 = vmatprep.subr.bf16.mxu1 %v18168_v25  ;;  %v18240_v25 = vld [vmem:[#allocation2 + $0xfc4] ss:$28 sps:$4 sm:$0xff]   ;;  %v18243_v26 = vld [vmem:[#allocation2 + $0xc4c] ss:$28 sps:$4 sm:$0xff]  }
 0x226   :  { %2786 = vmatpush1.bf16.msra.mxu0 %v18169_v28  ;;  %v18241_v28 = vld [vmem:[#allocation2 + $0xc48] ss:$28 sps:$4 sm:$0xff]  }
 0x227   :  { %5185 = vmatpush1.bf16.msra.mxu1 %v18166_v27  ;;  %2787 = vmatprep.subr.bf16.mxu0 %v18177_v30  ;;  %v18238_v27 = vld [vmem:[#allocation2 + $0xfc0] ss:$28 sps:$4 sm:$0xff]  }
 0x228   :  { %5186 = vmatprep.subr.bf16.mxu1 %v18174_v29  ;;  %v18249_v29 = vld [vmem:[#allocation2 + $0xc84] ss:$28 sps:$4 sm:$0xff]  }
 0x229   :  { %v18247_v30 = vld [vmem:[#allocation2 + $0xc80] ss:$28 sps:$4 sm:$0xff]  }
 0x22a   :  { %2788 = vmatpush1.bf16.msra.mxu0 %v18175_v18  ;;  %v18255_v18 = vld [vmem:[#allocation2 + $0xcbc] ss:$28 sps:$4 sm:$0xff]  }
 0x22b   :  { %5187 = vmatpush1.bf16.msra.mxu1 %v18172_v31  ;;  %2789 = vmatprep.subr.bf16.mxu0 %v18183_v33  ;;  %v18252_v31 = vld [vmem:[#allocation2 + $0x1034] ss:$28 sps:$4 sm:$0xff]  }
 0x22c   :  { %5188 = vmatprep.subr.bf16.mxu1 %v18180_v32  ;;  %v18250_v32 = vld [vmem:[#allocation2 + $0x1030] ss:$28 sps:$4 sm:$0xff]   ;;  %v18253_v33 = vld [vmem:[#allocation2 + $0xcb8] ss:$28 sps:$4 sm:$0xff]  }
 0x22e   :  { %2790 = vmatpush1.bf16.msra.mxu0 %v18181_v37  ;;  %v18261_v37 = vld [vmem:[#allocation2 + $0xcf4] ss:$28 sps:$4 sm:$0xff]  }
 0x22f   :  { %5189 = vmatpush1.bf16.msra.mxu1 %v18178_v36  ;;  %2791 = vmatprep.subr.bf16.mxu0 %v18189_v39  ;;  %v18258_v36 = vld [vmem:[#allocation2 + $0x106c] ss:$28 sps:$4 sm:$0xff]  }
 0x230   :  { %5190 = vmatprep.subr.bf16.mxu1 %v18186_v38 }
 0x232   :  { %2792 = vmatpush1.bf16.msra.mxu0 %v18187_v42  ;;  %v18256_v42 = vld [vmem:[#allocation2 + $0x1068] ss:$28 sps:$4 sm:$0xff]  }
 0x233   :  { %5191 = vmatpush1.bf16.msra.mxu1 %v18184_v41  ;;  %2793 = vmatprep.subr.bf16.mxu0 %v18195_v44 }
 0x234   :  { %5192 = vmatprep.subr.bf16.mxu1 %v18192_v43  ;;  %v18259_v43 = vld [vmem:[#allocation2 + $0xcf0] ss:$28 sps:$4 sm:$0xff]  }
 0x236   :  { %2794 = vmatpush1.bf16.msra.mxu0 %v18193_v46  ;;  %v18267_v46 = vld [vmem:[#allocation2 + $0xd2c] ss:$28 sps:$4 sm:$0xff]  }
 0x237   :  { %5193 = vmatpush1.bf16.msra.mxu1 %v18190_v45  ;;  %5326 = vmatprep.subr.bf16.mxu0 %v18201_v50  ;;  %v18264_v45 = vld [vmem:[#allocation2 + $0x10a4] ss:$28 sps:$4 sm:$0xff]  }
 0x238   :  { %5203 = vmatprep.subr.bf16.mxu1 %v18198_v48  ;;  %v18262_v48 = vld [vmem:[#allocation2 + $0x10a0] ss:$28 sps:$4 sm:$0xff]   ;;  %v18265_v50 = vld [vmem:[#allocation2 + $0xd28] ss:$28 sps:$4 sm:$0xff]  }
 0x239   :  { %2796 = vmatmul.mubr.bf16.vlgmr.msra.gmra.mrb[4].mxu0 %v20790_v23 }
 0x23a   :  { %5195 = vmatmul.mubr.bf16.vlgmr.msra.gmra.mrb[28].mxu1 %v20756_v8  ;;  %5327 = vmatpush1.bf16.msra.mxu0 %v18199_v40  ;;  %v18273_v40 = vld [vmem:[#allocation2 + $0xd64] ss:$28 sps:$4 sm:$0xff]  }
 0x23b   :  { %5204 = vmatpush1.bf16.msra.mxu1 %v18196_v51  ;;  %5328 = vmatprep.subr.bf16.mxu0 %v18207_v54  ;;  %v18270_v51 = vld [vmem:[#allocation2 + $0x10dc] ss:$28 sps:$4 sm:$0xff]  }
 0x23c   :  { %5205 = vmatprep.subr.bf16.mxu1 %v18204_v53  ;;  %5235 = vmatprep.mubr.bf16.mxu1 %v20767_v35 }
 0x23d   :  { %5358 = vmatprep.mubr.bf16.mxu0 %v20752_v52 }
 0x23e   :  { %5329 = vmatpush1.bf16.msra.mxu0 %v18205_v56  ;;  %v18268_v56 = vld [vmem:[#allocation2 + $0x10d8] ss:$28 sps:$4 sm:$0xff]  }
 0x23f   :  { %5206 = vmatpush1.bf16.msra.mxu1 %v18202_v55  ;;  %5330 = vmatprep.subr.bf16.mxu0 %v18213_v58 }
 0x240   :  { %5207 = vmatprep.subr.bf16.mxu1 %v18210_v57  ;;  %v18271_v57 = vld [vmem:[#allocation2 + $0xd60] ss:$28 sps:$4 sm:$0xff]  }
 0x242   :  { %5331 = vmatpush1.bf16.msra.mxu0 %v18211_v60  ;;  %v18279_v60 = vld [vmem:[#allocation2 + $0xd9c] ss:$28 sps:$4 sm:$0xff]  }
 0x243   :  { %5208 = vmatpush1.bf16.msra.mxu1 %v18208_v59  ;;  %5332 = vmatprep.subr.bf16.mxu0 %v18219_v62  ;;  %v18276_v59 = vld [vmem:[#allocation2 + $0x1114] ss:$28 sps:$4 sm:$0xff]  }
 0x244   :  { %5209 = vmatprep.subr.bf16.mxu1 %v18216_v61  ;;  %v18274_v61 = vld [vmem:[#allocation2 + $0x1110] ss:$28 sps:$4 sm:$0xff]   ;;  %v18277_v62 = vld [vmem:[#allocation2 + $0xd98] ss:$28 sps:$4 sm:$0xff]  }
 0x246   :  { %5333 = vmatpush1.bf16.msra.mxu0 %v18217_v1  ;;  %v18285_v1 = vld [vmem:[#allocation2 + $0xdd4] ss:$28 sps:$4 sm:$0xff]  }
 0x247   :  { %5210 = vmatpush1.bf16.msra.mxu1 %v18214_v63  ;;  %5334 = vmatprep.subr.bf16.mxu0 %v18225_v3  ;;  %v18282_v63 = vld [vmem:[#allocation2 + $0x114c] ss:$28 sps:$4 sm:$0xff]  }
 0x248   :  { %5211 = vmatprep.subr.bf16.mxu1 %v18222_v2  ;;  %v18280_v2 = vld [vmem:[#allocation2 + $0x1148] ss:$28 sps:$4 sm:$0xff]   ;;  %v18283_v3 = vld [vmem:[#allocation2 + $0xdd0] ss:$28 sps:$4 sm:$0xff]  }
 0x24a   :  { %5335 = vmatpush1.bf16.msra.mxu0 %v18223_v5  ;;  %v18291_v5 = vld [vmem:[#allocation2 + $0xe0c] ss:$28 sps:$4 sm:$0xff]  }
 0x24b   :  { %5212 = vmatpush1.bf16.msra.mxu1 %v18220_v4  ;;  %5336 = vmatprep.subr.bf16.mxu0 %v18231_v7  ;;  %v18288_v4 = vld [vmem:[#allocation2 + $0x1184] ss:$28 sps:$4 sm:$0xff]  }
 0x24c   :  { %5213 = vmatprep.subr.bf16.mxu1 %v18228_v6  ;;  %v2469_v13 = vpop.f32.mrb[0].mxu0  ;;  %v18286_v6 = vld [vmem:[#allocation2 + $0x1180] ss:$28 sps:$4 sm:$0xff]   ;;  %v18289_v7 = vld [vmem:[#allocation2 + $0xe08] ss:$28 sps:$4 sm:$0xff]  }
 0x24d   :  { %v20831_v14 = vadd.f32 %v20804_v47, %v2469_v13  ;;  %v2471_v16 = vpop.f32.mrb[1].mxu0  ;;  %v18246_v47 = vld [vmem:[#allocation2 + $0xffc] ss:$28 sps:$4 sm:$0xff]   ;;  %v18300_v13 = vld [vmem:[#allocation2 + $0x11f4] ss:$28 sps:$4 sm:$0xff]  }
 0x24e   :  { %v20834_v17 = vadd.f32 %v20806_v49, %v2471_v16  ;;  %v2473_v20 = vpop.f32.mrb[2].mxu0  ;;  %5337 = vmatpush1.bf16.msra.mxu0 %v18229_v10  ;;  %v18244_v49 = vld [vmem:[#allocation2 + $0xff8] ss:$28 sps:$4 sm:$0xff]   ;;  %v18297_v10 = vld [vmem:[#allocation2 + $0xe44] ss:$28 sps:$4 sm:$0xff]  }
 0x24f   :  { %5214 = vmatpush1.bf16.msra.mxu1 %v18226_v9  ;;  %v2474_v24 = vpop.f32.mrb[3].mxu0  ;;  %5338 = vmatprep.subr.bf16.mxu0 %v18237_v12  ;;  %v18294_v9 = vld [vmem:[#allocation2 + $0x11bc] ss:$28 sps:$4 sm:$0xff]   ;;  %v18298_v20 = vld [vmem:[#allocation2 + $0x11f0] ss:$28 sps:$4 sm:$0xff]  }
 0x250   :  { %5215 = vmatprep.subr.bf16.mxu1 %v18234_v11  ;;  %v18292_v11 = vld [vmem:[#allocation2 + $0x11b8] ss:$28 sps:$4 sm:$0xff]   ;;  %v18295_v12 = vld [vmem:[#allocation2 + $0xe40] ss:$28 sps:$4 sm:$0xff]  }
 0x251   :  { %v18303_v16 = vld [vmem:[#allocation2 + $0xe7c] ss:$28 sps:$4 sm:$0xff]   ;;  %v18309_v24 = vld [vmem:[#allocation2 + $0xeb4] ss:$28 sps:$4 sm:$0xff]  }
 0x252   :  { %5339 = vmatpush1.bf16.msra.mxu0 %v18235_v22  ;;  %v18306_v22 = vld [vmem:[#allocation2 + $0x122c] ss:$28 sps:$4 sm:$0xff]  }
 0x253   :  { %5216 = vmatpush1.bf16.msra.mxu1 %v18232_v21  ;;  %5340 = vmatprep.subr.bf16.mxu0 %v18243_v26  ;;  %v18301_v21 = vld [vmem:[#allocation2 + $0xe78] ss:$28 sps:$4 sm:$0xff]   ;;  %v18307_v26 = vld [vmem:[#allocation2 + $0xeb0] ss:$28 sps:$4 sm:$0xff]  }
 0x254   :  { %5217 = vmatprep.subr.bf16.mxu1 %v18240_v25  ;;  %v18304_v25 = vld [vmem:[#allocation2 + $0x1228] ss:$28 sps:$4 sm:$0xff]  }
 0x256   :  { %5341 = vmatpush1.bf16.msra.mxu0 %v18241_v28  ;;  %v18315_v28 = vld [vmem:[#allocation2 + $0xeec] ss:$28 sps:$4 sm:$0xff]  }
 0x257   :  { %5218 = vmatpush1.bf16.msra.mxu1 %v18238_v27  ;;  %5342 = vmatprep.subr.bf16.mxu0 %v18249_v29  ;;  %v18312_v27 = vld [vmem:[#allocation2 + $0x1264] ss:$28 sps:$4 sm:$0xff]  }
 0x258   :  { %5219 = vmatprep.subr.bf16.mxu1 %v18246_v47  ;;  %v18310_v47 = vld [vmem:[#allocation2 + $0x1260] ss:$28 sps:$4 sm:$0xff]   ;;  %v18313_v29 = vld [vmem:[#allocation2 + $0xee8] ss:$28 sps:$4 sm:$0xff]  }
 0x25a   :  { %5343 = vmatpush1.bf16.msra.mxu0 %v18247_v30  ;;  %v18321_v30 = vld [vmem:[#allocation2 + $0xf24] ss:$28 sps:$4 sm:$0xff]  }
 0x25b   :  { %5220 = vmatpush1.bf16.msra.mxu1 %v18244_v49  ;;  %5344 = vmatprep.subr.bf16.mxu0 %v18255_v18  ;;  %v18318_v49 = vld [vmem:[#allocation2 + $0x129c] ss:$28 sps:$4 sm:$0xff]  }
 0x25c   :  { %5221 = vmatprep.subr.bf16.mxu1 %v18252_v31 }
 0x25d   :  { %v20836_v38 = vpop.f32.mrb[4].mxu1 }
 0x25e   :  { %v20838_v39 = vpop.f32.mrb[5].mxu1  ;;  %5345 = vmatpush1.bf16.msra.mxu0 %v18253_v33 }
 0x25f   :  { %5222 = vmatpush1.bf16.msra.mxu1 %v18250_v32  ;;  %v2678_v41 = vpop.f32.mrb[6].mxu1  ;;  %5346 = vmatprep.subr.bf16.mxu0 %v18261_v37  ;;  %v18316_v32 = vld [vmem:[#allocation2 + $0x1298] ss:$28 sps:$4 sm:$0xff]   ;;  %v18319_v37 = vld [vmem:[#allocation2 + $0xf20] ss:$28 sps:$4 sm:$0xff]  }
 0x260   :  { %v2679_v44 = vpop.f32.mrb[7].mxu1  ;;  %5223 = vmatprep.subr.bf16.mxu1 %v18258_v36  ;;  %v18324_v41 = vld [vmem:[#allocation2 + $0x12d4] ss:$28 sps:$4 sm:$0xff]  }
 0x261   :  { %v18322_v44 = vld [vmem:[#allocation2 + $0x12d0] ss:$28 sps:$4 sm:$0xff]  }
 0x262   :  { %5347 = vmatpush1.bf16.msra.mxu0 %v18259_v43  ;;  %v18327_v43 = vld [vmem:[#allocation2 + $0xf5c] ss:$28 sps:$4 sm:$0xff]  }
 0x263   :  { %5224 = vmatpush1.bf16.msra.mxu1 %v18256_v42  ;;  %5348 = vmatprep.subr.bf16.mxu0 %v18267_v46  ;;  %v18330_v46 = vld [vmem:[#allocation2 + $0x130c] ss:$28 sps:$4 sm:$0xff]  }
 0x264   :  { %5225 = vmatprep.subr.bf16.mxu1 %v18264_v45  ;;  %v18325_v45 = vld [vmem:[#allocation2 + $0xf58] ss:$28 sps:$4 sm:$0xff]  }
 0x265   :  { %v20840_v53 = vpop.f32.mrb[8].mxu1 }
 0x266   :  { %v20842_v54 = vpop.f32.mrb[9].mxu1  ;;  %5349 = vmatpush1.bf16.msra.mxu0 %v18265_v50  ;;  %v18328_v50 = vld [vmem:[#allocation2 + $0x1308] ss:$28 sps:$4 sm:$0xff]  }
 0x267   :  { %5226 = vmatpush1.bf16.msra.mxu1 %v18262_v48  ;;  %v2842_v55 = vpop.f32.mrb[10].mxu1  ;;  %5350 = vmatprep.subr.bf16.mxu0 %v18273_v40  ;;  %v18333_v48 = vld [vmem:[#allocation2 + $0xf94] ss:$28 sps:$4 sm:$0xff]   ;;  %v18336_v40 = vld [vmem:[#allocation2 + $0x1344] ss:$28 sps:$4 sm:$0xff]  }
 0x268   :  { %v2843_v58 = vpop.f32.mrb[11].mxu1  ;;  %5227 = vmatprep.subr.bf16.mxu1 %v18270_v51  ;;  %v18331_v51 = vld [vmem:[#allocation2 + $0xf90] ss:$28 sps:$4 sm:$0xff]  }
 0x269   :  { %v18339_v55 = vld [vmem:[#allocation2 + $0xfcc] ss:$28 sps:$4 sm:$0xff]   ;;  %v18342_v58 = vld [vmem:[#allocation2 + $0x137c] ss:$28 sps:$4 sm:$0xff]  }
 0x26a   :  { %5351 = vmatpush1.bf16.msra.mxu0 %v18271_v57  ;;  %v18337_v57 = vld [vmem:[#allocation2 + $0xfc8] ss:$28 sps:$4 sm:$0xff]  }
 0x26b   :  { %5228 = vmatpush1.bf16.msra.mxu1 %v18268_v56  ;;  %5352 = vmatprep.subr.bf16.mxu0 %v18279_v60  ;;  %v18334_v56 = vld [vmem:[#allocation2 + $0x1340] ss:$28 sps:$4 sm:$0xff]   ;;  %v18340_v60 = vld [vmem:[#allocation2 + $0x1378] ss:$28 sps:$4 sm:$0xff]  }
 0x26c   :  { %5229 = vmatprep.subr.bf16.mxu1 %v18276_v59  ;;  %v18345_v59 = vld [vmem:[#allocation2 + $0x1004] ss:$28 sps:$4 sm:$0xff]  }
 0x26e   :  { %5353 = vmatpush1.bf16.msra.mxu0 %v18277_v62  ;;  %v18348_v62 = vld [vmem:[#allocation2 + $0x13b4] ss:$28 sps:$4 sm:$0xff]  }
 0x26f   :  { %5230 = vmatpush1.bf16.msra.mxu1 %v18274_v61  ;;  %5354 = vmatprep.subr.bf16.mxu0 %v18285_v1  ;;  %v18343_v61 = vld [vmem:[#allocation2 + $0x1000] ss:$28 sps:$4 sm:$0xff]   ;;  %v18346_v1 = vld [vmem:[#allocation2 + $0x13b0] ss:$28 sps:$4 sm:$0xff]  }
 0x270   :  { %5231 = vmatprep.subr.bf16.mxu1 %v18282_v63  ;;  %v18351_v63 = vld [vmem:[#allocation2 + $0x103c] ss:$28 sps:$4 sm:$0xff]  }
 0x272   :  { %5355 = vmatpush1.bf16.msra.mxu0 %v18283_v3  ;;  %v18354_v3 = vld [vmem:[#allocation2 + $0x13ec] ss:$28 sps:$4 sm:$0xff]  }
 0x273   :  { %5232 = vmatpush1.bf16.msra.mxu1 %v18280_v2  ;;  %5356 = vmatprep.subr.bf16.mxu0 %v18291_v5  ;;  %v18349_v2 = vld [vmem:[#allocation2 + $0x1038] ss:$28 sps:$4 sm:$0xff]   ;;  %v18352_v5 = vld [vmem:[#allocation2 + $0x13e8] ss:$28 sps:$4 sm:$0xff]  }
 0x274   :  { %5233 = vmatprep.subr.bf16.mxu1 %v18288_v4  ;;  %v18357_v4 = vld [vmem:[#allocation2 + $0x1074] ss:$28 sps:$4 sm:$0xff]  }
 0x276   :  { %5357 = vmatpush1.bf16.msra.mxu0 %v18289_v7  ;;  %v18360_v7 = vld [vmem:[#allocation2 + $0x1424] ss:$28 sps:$4 sm:$0xff]  }
 0x277   :  { %5234 = vmatpush1.bf16.msra.mxu1 %v18286_v6  ;;  %5367 = vmatprep.subr.bf16.mxu0 %v18297_v10  ;;  %v18355_v6 = vld [vmem:[#allocation2 + $0x1070] ss:$28 sps:$4 sm:$0xff]   ;;  %v18358_v10 = vld [vmem:[#allocation2 + $0x1420] ss:$28 sps:$4 sm:$0xff]  }
 0x278   :  { %5244 = vmatprep.subr.bf16.mxu1 %v18294_v9  ;;  %v18363_v9 = vld [vmem:[#allocation2 + $0x10ac] ss:$28 sps:$4 sm:$0xff]  }
 0x279   :  { %5359 = vmatmul.mubr.bf16.vlgmr.msra.gmra.mrb[8].mxu0 %v20756_v8 }
 0x27a   :  { %5236 = vmatmul.mubr.bf16.vlgmr.msra.gmra.mrb[28].mxu1 %v20773_v15  ;;  %5368 = vmatpush1.bf16.msra.mxu0 %v18295_v12  ;;  %v18366_v12 = vld [vmem:[#allocation2 + $0x145c] ss:$28 sps:$4 sm:$0xff]  }
 0x27b   :  { %5245 = vmatpush1.bf16.msra.mxu1 %v18292_v11  ;;  %5369 = vmatprep.subr.bf16.mxu0 %v18303_v16  ;;  %v18361_v11 = vld [vmem:[#allocation2 + $0x10a8] ss:$28 sps:$4 sm:$0xff]  }
 0x27c   :  { %5246 = vmatprep.subr.bf16.mxu1 %v18300_v13  ;;  %5276 = vmatprep.mubr.bf16.mxu1 %v20782_v19  ;;  %v18369_v13 = vld [vmem:[#allocation2 + $0x10e4] ss:$28 sps:$4 sm:$0xff]  }
 0x27d   :  { %5399 = vmatprep.mubr.bf16.mxu0 %v20767_v35 }
 0x27e   :  { %5370 = vmatpush1.bf16.msra.mxu0 %v18301_v21  ;;  %v18364_v21 = vld [vmem:[#allocation2 + $0x1458] ss:$28 sps:$4 sm:$0xff]  }
 0x27f   :  { %5247 = vmatpush1.bf16.msra.mxu1 %v18298_v20  ;;  %5371 = vmatprep.subr.bf16.mxu0 %v18309_v24 }
 0x280   :  { %5248 = vmatprep.subr.bf16.mxu1 %v18306_v22 }
 0x282   :  { %5372 = vmatpush1.bf16.msra.mxu0 %v18307_v26  ;;  %v18372_v26 = vld [vmem:[#allocation2 + $0x1494] ss:$28 sps:$4 sm:$0xff]  }
 0x283   :  { %5249 = vmatpush1.bf16.msra.mxu1 %v18304_v25  ;;  %5373 = vmatprep.subr.bf16.mxu0 %v18315_v28  ;;  %v18367_v25 = vld [vmem:[#allocation2 + $0x10e0] ss:$28 sps:$4 sm:$0xff]  }
 0x284   :  { %5250 = vmatprep.subr.bf16.mxu1 %v18312_v27  ;;  %v18375_v28 = vld [vmem:[#allocation2 + $0x111c] ss:$28 sps:$4 sm:$0xff]  }
 0x285   :  { %v17084_v31 = vpop.f32.mrb[12].mxu1 }
 0x286   :  { %v17085_v18 = vpop.f32.mrb[13].mxu1  ;;  %5374 = vmatpush1.bf16.msra.mxu0 %v18313_v29  ;;  %v18370_v29 = vld [vmem:[#allocation2 + $0x1490] ss:$28 sps:$4 sm:$0xff]  }
 0x287   :  { %v20848_v33 = vadd.f32 %v17085_v18, %v17084_v31  ;;  %5251 = vmatpush1.bf16.msra.mxu1 %v18310_v47  ;;  %v17087_v36 = vpop.f32.mrb[14].mxu1  ;;  %5375 = vmatprep.subr.bf16.mxu0 %v18321_v30  ;;  %v18378_v30 = vld [vmem:[#allocation2 + $0x14cc] ss:$28 sps:$4 sm:$0xff]   ;;  %v18381_v31 = vld [vmem:[#allocation2 + $0x1154] ss:$28 sps:$4 sm:$0xff]  }
 0x288   :  { %v17088_v42 = vpop.f32.mrb[15].mxu1  ;;  %5252 = vmatprep.subr.bf16.mxu1 %v18318_v49  ;;  %v18373_v49 = vld [vmem:[#allocation2 + $0x1118] ss:$28 sps:$4 sm:$0xff]   ;;  %v18376_v18 = vld [vmem:[#allocation2 + $0x14c8] ss:$28 sps:$4 sm:$0xff]  }
 0x289   :  { %v18384_v36 = vld [vmem:[#allocation2 + $0x1504] ss:$28 sps:$4 sm:$0xff]   ;;  %v18390_v42 = vld [vmem:[#allocation2 + $0x153c] ss:$28 sps:$4 sm:$0xff]  }
 0x28a   :  { %5376 = vmatpush1.bf16.msra.mxu0 %v18319_v37  ;;  %v18387_v37 = vld [vmem:[#allocation2 + $0x118c] ss:$28 sps:$4 sm:$0xff]  }
 0x28b   :  { %5253 = vmatpush1.bf16.msra.mxu1 %v18316_v32  ;;  %5377 = vmatprep.subr.bf16.mxu0 %v18327_v43  ;;  %v18379_v32 = vld [vmem:[#allocation2 + $0x1150] ss:$28 sps:$4 sm:$0xff]   ;;  %v18393_v43 = vld [vmem:[#allocation2 + $0x11c4] ss:$28 sps:$4 sm:$0xff]  }
 0x28c   :  { %5254 = vmatprep.subr.bf16.mxu1 %v18324_v41  ;;  %v18382_v41 = vld [vmem:[#allocation2 + $0x1500] ss:$28 sps:$4 sm:$0xff]  }
 0x28e   :  { %5378 = vmatpush1.bf16.msra.mxu0 %v18325_v45  ;;  %v18391_v45 = vld [vmem:[#allocation2 + $0x11c0] ss:$28 sps:$4 sm:$0xff]  }
 0x28f   :  { %5255 = vmatpush1.bf16.msra.mxu1 %v18322_v44  ;;  %5379 = vmatprep.subr.bf16.mxu0 %v18333_v48  ;;  %v18388_v44 = vld [vmem:[#allocation2 + $0x1538] ss:$28 sps:$4 sm:$0xff]   ;;  %v18402_v48 = vld [vmem:[#allocation2 + $0xacc] ss:$28 sps:$4 sm:$0xff]  }
 0x290   :  { %5256 = vmatprep.subr.bf16.mxu1 %v18330_v46  ;;  %v18396_v46 = vld [vmem:[#allocation2 + $0x11fc] ss:$28 sps:$4 sm:$0xff]  }
 0x292   :  { %5380 = vmatpush1.bf16.msra.mxu0 %v18331_v51  ;;  %v18399_v51 = vld [vmem:[#allocation2 + $0x1234] ss:$28 sps:$4 sm:$0xff]  }
 0x293   :  { %5257 = vmatpush1.bf16.msra.mxu1 %v18328_v50  ;;  %5381 = vmatprep.subr.bf16.mxu0 %v18339_v55  ;;  %v18394_v50 = vld [vmem:[#allocation2 + $0x11f8] ss:$28 sps:$4 sm:$0xff]   ;;  %v18405_v55 = vld [vmem:[#allocation2 + $0x126c] ss:$28 sps:$4 sm:$0xff]  }
 0x294   :  { %5258 = vmatprep.subr.bf16.mxu1 %v18336_v40  ;;  %v18397_v40 = vld [vmem:[#allocation2 + $0x1230] ss:$28 sps:$4 sm:$0xff]  }
 0x296   :  { %5382 = vmatpush1.bf16.msra.mxu0 %v18337_v57  ;;  %v18403_v57 = vld [vmem:[#allocation2 + $0x1268] ss:$28 sps:$4 sm:$0xff]  }
 0x297   :  { %5259 = vmatpush1.bf16.msra.mxu1 %v18334_v56  ;;  %5383 = vmatprep.subr.bf16.mxu0 %v18345_v59  ;;  %v18400_v56 = vld [vmem:[#allocation2 + $0xac8] ss:$28 sps:$4 sm:$0xff]  }
 0x298   :  { %5260 = vmatprep.subr.bf16.mxu1 %v18342_v58  ;;  %v18408_v58 = vld [vmem:[#allocation2 + $0xb04] ss:$28 sps:$4 sm:$0xff]  }
 0x299   :  { %v18411_v59 = vld [vmem:[#allocation2 + $0x12a4] ss:$28 sps:$4 sm:$0xff]  }
 0x29a   :  { %5384 = vmatpush1.bf16.msra.mxu0 %v18343_v61  ;;  %v20860_v61 = vld [vmem:[%s21201_s0 + $0x18] ss:$0 sps:$4 sm:$0xff]  }
 0x29b   :  { %5261 = vmatpush1.bf16.msra.mxu1 %v18340_v60  ;;  %5385 = vmatprep.subr.bf16.mxu0 %v18351_v63  ;;  %v18406_v63 = vld [vmem:[#allocation2 + $0xb00] ss:$28 sps:$4 sm:$0xff]  }
 0x29c   :  { %5262 = vmatprep.subr.bf16.mxu1 %v18348_v62 }
 0x29e   :  { %5386 = vmatpush1.bf16.msra.mxu0 %v18349_v2 }
 0x29f   :  { %5263 = vmatpush1.bf16.msra.mxu1 %v18346_v1  ;;  %5387 = vmatprep.subr.bf16.mxu0 %v18357_v4  ;;  %v18414_v4 = vld [vmem:[#allocation2 + $0xb3c] ss:$28 sps:$4 sm:$0xff]  }
 0x2a0   :  { %5264 = vmatprep.subr.bf16.mxu1 %v18354_v3  ;;  %v18409_v3 = vld [vmem:[#allocation2 + $0x12a0] ss:$28 sps:$4 sm:$0xff]  }
 0x2a2   :  { %5388 = vmatpush1.bf16.msra.mxu0 %v18355_v6  ;;  %v18417_v6 = vld [vmem:[#allocation2 + $0x12dc] ss:$28 sps:$4 sm:$0xff]  }
 0x2a3   :  { %5265 = vmatpush1.bf16.msra.mxu1 %v18352_v5  ;;  %5389 = vmatprep.subr.bf16.mxu0 %v18363_v9  ;;  %v18412_v9 = vld [vmem:[#allocation2 + $0xb38] ss:$28 sps:$4 sm:$0xff]  }
 0x2a4   :  { %5266 = vmatprep.subr.bf16.mxu1 %v18360_v7 }
 0x2a5   :  { %v17106_v16 = vpop.f32.mrb[16].mxu1 }
 0x2a6   :  { %v17107_v20 = vpop.f32.mrb[17].mxu1  ;;  %5390 = vmatpush1.bf16.msra.mxu0 %v18361_v11  ;;  %v18420_v11 = vld [vmem:[#allocation2 + $0xb74] ss:$28 sps:$4 sm:$0xff]  }
 0x2a7   :  { %v17108_v22 = vadd.f32 %v17107_v20, %v17106_v16  ;;  %5267 = vmatpush1.bf16.msra.mxu1 %v18358_v10  ;;  %v17109_v24 = vpop.f32.mrb[18].mxu1  ;;  %5391 = vmatprep.subr.bf16.mxu0 %v18369_v13  ;;  %v18415_v10 = vld [vmem:[#allocation2 + $0x12d8] ss:$28 sps:$4 sm:$0xff]  }
 0x2a8   :  { %v17110_v27 = vpop.f32.mrb[19].mxu1  ;;  %5268 = vmatprep.subr.bf16.mxu1 %v18366_v12  ;;  %v18423_v12 = vld [vmem:[#allocation2 + $0x1314] ss:$28 sps:$4 sm:$0xff]  }
 0x2a9   :  { %v20851_v47 = vadd.f32 %v17108_v22, %v20848_v33  ;;  %v18385_v33 = vld [vmem:[#allocation2 + $0x1188] ss:$28 sps:$4 sm:$0xff]   ;;  %v18421_v24 = vld [vmem:[#allocation2 + $0x1310] ss:$28 sps:$4 sm:$0xff]  }
 0x2aa   :  { %5392 = vmatpush1.bf16.msra.mxu0 %v18367_v25  ;;  %v18426_v25 = vld [vmem:[#allocation2 + $0xbac] ss:$28 sps:$4 sm:$0xff]  }
 0x2ab   :  { %5269 = vmatpush1.bf16.msra.mxu1 %v18364_v21  ;;  %5393 = vmatprep.subr.bf16.mxu0 %v18375_v28  ;;  %v18418_v21 = vld [vmem:[#allocation2 + $0xb70] ss:$28 sps:$4 sm:$0xff]   ;;  %v18424_v28 = vld [vmem:[#allocation2 + $0xba8] ss:$28 sps:$4 sm:$0xff]  }
 0x2ac   :  { %5270 = vmatprep.subr.bf16.mxu1 %v18372_v26  ;;  %v18429_v27 = vld [vmem:[#allocation2 + $0x134c] ss:$28 sps:$4 sm:$0xff]  }
 0x2ae   :  { %5394 = vmatpush1.bf16.msra.mxu0 %v18373_v49  ;;  %v18435_v49 = vld [vmem:[#allocation2 + $0x1384] ss:$28 sps:$4 sm:$0xff]  }
 0x2af   :  { %5271 = vmatpush1.bf16.msra.mxu1 %v18370_v29  ;;  %5395 = vmatprep.subr.bf16.mxu0 %v18381_v31  ;;  %v18432_v29 = vld [vmem:[#allocation2 + $0xbe4] ss:$28 sps:$4 sm:$0xff]  }
 0x2b0   :  { %5272 = vmatprep.subr.bf16.mxu1 %v18378_v30  ;;  %v18430_v30 = vld [vmem:[#allocation2 + $0xbe0] ss:$28 sps:$4 sm:$0xff]  }
 0x2b1   :  { %v18433_v31 = vld [vmem:[#allocation2 + $0x1380] ss:$28 sps:$4 sm:$0xff]  }
 0x2b2   :  { %5396 = vmatpush1.bf16.msra.mxu0 %v18379_v32  ;;  %v18441_v32 = vld [vmem:[#allocation2 + $0x13bc] ss:$28 sps:$4 sm:$0xff]  }
 0x2b3   :  { %5273 = vmatpush1.bf16.msra.mxu1 %v18376_v18  ;;  %5397 = vmatprep.subr.bf16.mxu0 %v18387_v37  ;;  %v18438_v18 = vld [vmem:[#allocation2 + $0xc1c] ss:$28 sps:$4 sm:$0xff]  }
 0x2b4   :  { %5274 = vmatprep.subr.bf16.mxu1 %v18384_v36  ;;  %v18436_v36 = vld [vmem:[#allocation2 + $0xc18] ss:$28 sps:$4 sm:$0xff]  }
 0x2b5   :  { %v18439_v37 = vld [vmem:[#allocation2 + $0x13b8] ss:$28 sps:$4 sm:$0xff]  }
 0x2b6   :  { %5398 = vmatpush1.bf16.msra.mxu0 %v18385_v33  ;;  %v18447_v33 = vld [vmem:[#allocation2 + $0x13f4] ss:$28 sps:$4 sm:$0xff]  }
 0x2b7   :  { %5275 = vmatpush1.bf16.msra.mxu1 %v18382_v41  ;;  %5408 = vmatprep.subr.bf16.mxu0 %v18393_v43  ;;  %v18444_v41 = vld [vmem:[#allocation2 + $0xc54] ss:$28 sps:$4 sm:$0xff]  }
 0x2b8   :  { %5285 = vmatprep.subr.bf16.mxu1 %v18390_v42  ;;  %v18442_v42 = vld [vmem:[#allocation2 + $0xc50] ss:$28 sps:$4 sm:$0xff]  }
 0x2b9   :  { %5400 = vmatmul.mubr.bf16.vlgmr.msra.gmra.mrb[8].mxu0 %v20773_v15  ;;  %v18445_v43 = vld [vmem:[#allocation2 + $0x13f0] ss:$28 sps:$4 sm:$0xff]  }
 0x2ba   :  { %5277 = vmatmul.mubr.bf16.vlgmr.msra.gmra.mrb[28].mxu1 %v20790_v23  ;;  %5409 = vmatpush1.bf16.msra.mxu0 %v18391_v45  ;;  %v18453_v45 = vld [vmem:[#allocation2 + $0x142c] ss:$28 sps:$4 sm:$0xff]  }
 0x2bb   :  { %5286 = vmatpush1.bf16.msra.mxu1 %v18388_v44  ;;  %5410 = vmatprep.subr.bf16.mxu0 %v18396_v46  ;;  %v18450_v44 = vld [vmem:[#allocation2 + $0xc8c] ss:$28 sps:$4 sm:$0xff]  }
 0x2bc   :  { %5317 = vmatprep.mubr.bf16.mxu1 %v20552_v0  ;;  %5490 = vmatprep.subr.bf16.mxu1 %v18402_v48  ;;  %v18448_v46 = vld [vmem:[#allocation2 + $0xc88] ss:$28 sps:$4 sm:$0xff]  }
 0x2bd   :  { %5440 = vmatprep.mubr.bf16.mxu0 %v20782_v19  ;;  %v18451_v48 = vld [vmem:[#allocation2 + $0x1428] ss:$28 sps:$4 sm:$0xff]  }
 0x2be   :  { %5411 = vmatpush1.bf16.msra.mxu0 %v18394_v50  ;;  %v18456_v50 = vld [vmem:[#allocation2 + $0xcc4] ss:$28 sps:$4 sm:$0xff]  }
 0x2bf   :  { %5412 = vmatprep.subr.bf16.mxu0 %v18399_v51  ;;  %v18459_v51 = vld [vmem:[#allocation2 + $0x1464] ss:$28 sps:$4 sm:$0xff]  }
 0x2c2   :  { %5413 = vmatpush1.bf16.msra.mxu0 %v18397_v40  ;;  %v18454_v40 = vld [vmem:[#allocation2 + $0xcc0] ss:$28 sps:$4 sm:$0xff]  }
 0x2c3   :  { %5414 = vmatprep.subr.bf16.mxu0 %v18405_v55  ;;  %v18457_v55 = vld [vmem:[#allocation2 + $0x1460] ss:$28 sps:$4 sm:$0xff]  }
 0x2c5   :  { %v17128_v60 = vpop.f32.mrb[20].mxu1 }
 0x2c6   :  { %15899 = vmatmul.mubr.msk.bf16.vlgmr.msra.gmra.mrb[28].mxu1 %vm2349_vm0, %v20860_v61  ;;  %v17129_v62 = vpop.f32.mrb[21].mxu1  ;;  %5415 = vmatpush1.bf16.msra.mxu0 %v18403_v57  ;;  %v18465_v57 = vld [vmem:[#allocation2 + $0x149c] ss:$28 sps:$4 sm:$0xff]  }
 0x2c7   :  { %5491 = vmatpush1.bf16.msra.mxu1 %v18400_v56  ;;  %v17130_v1 = vadd.f32 %v17129_v62, %v17128_v60  ;;  %v17131_v2 = vpop.f32.mrb[22].mxu1  ;;  %5416 = vmatprep.subr.bf16.mxu0 %v18411_v59  ;;  %v18462_v56 = vld [vmem:[#allocation2 + $0xcfc] ss:$28 sps:$4 sm:$0xff]   ;;  %v18468_v60 = vld [vmem:[#allocation2 + $0xd34] ss:$28 sps:$4 sm:$0xff]  }
 0x2c8   :  { %v17132_v5 = vpop.f32.mrb[23].mxu1  ;;  %5492 = vmatprep.subr.bf16.mxu1 %v18408_v58  ;;  %5522 = vmatprep.mubr.bf16.mxu1 %v20752_v52  ;;  %v18460_v58 = vld [vmem:[#allocation2 + $0xcf8] ss:$28 sps:$4 sm:$0xff]   ;;  %v18474_v2 = vld [vmem:[#allocation2 + $0xd6c] ss:$28 sps:$4 sm:$0xff]  }
 0x2c9   :  { %v2960_v7 = vadd.f32 %v17130_v1, %v20851_v47  ;;  %v18427_v47 = vld [vmem:[#allocation2 + $0x1348] ss:$28 sps:$4 sm:$0xff]   ;;  %v18463_v59 = vld [vmem:[#allocation2 + $0x1498] ss:$28 sps:$4 sm:$0xff]   ;;  %v18469_v1 = vld [vmem:[#allocation2 + $0x14d0] ss:$28 sps:$4 sm:$0xff]  }
 0x2ca   :  { %5417 = vmatpush1.bf16.msra.mxu0 %v18409_v3  ;;  %v18471_v62 = vld [vmem:[#allocation2 + $0x14d4] ss:$28 sps:$4 sm:$0xff]   ;;  %v18477_v3 = vld [vmem:[#allocation2 + $0x150c] ss:$28 sps:$4 sm:$0xff]  }
 0x2cb   :  { %5493 = vmatpush1.bf16.msra.mxu1 %v18406_v63  ;;  %5418 = vmatprep.subr.bf16.mxu0 %v18417_v6  ;;  %v18466_v63 = vld [vmem:[#allocation2 + $0xd30] ss:$28 sps:$4 sm:$0xff]   ;;  %v18475_v5 = vld [vmem:[#allocation2 + $0x1508] ss:$28 sps:$4 sm:$0xff]  }
 0x2cc   :  { %5494 = vmatprep.subr.bf16.mxu1 %v18414_v4  ;;  %v18472_v4 = vld [vmem:[#allocation2 + $0xd68] ss:$28 sps:$4 sm:$0xff]  }
 0x2cd   :  { %v2999_v13 = vpop.f32.mrb[24].mxu1  ;;  %v18480_v6 = vld [vmem:[#allocation2 + $0xda4] ss:$28 sps:$4 sm:$0xff]  }
 0x2ce   :  { %v20866_v16 = vadd.f32 %v2999_v13, %v2960_v7  ;;  %v17384_v20 = vpop.f32.mrb[25].mxu1  ;;  %5419 = vmatpush1.bf16.msra.mxu0 %v18415_v10  ;;  %v18489_v7 = vld [vmem:[#allocation2 + $0x1544] ss:$28 sps:$4 sm:$0xff]   ;;  %v18483_v10 = vld [vmem:[#allocation2 + $0xddc] ss:$28 sps:$4 sm:$0xff]  }
 0x2cf   :  { %5495 = vmatpush1.bf16.msra.mxu1 %v18412_v9  ;;  %v3002_v22 = vpop.f32.mrb[26].mxu1  ;;  %5420 = vmatprep.subr.bf16.mxu0 %v18423_v12  ;;  %v18478_v9 = vld [vmem:[#allocation2 + $0xda0] ss:$28 sps:$4 sm:$0xff]   ;;  %v18493_v12 = vld [vmem:[#allocation2 + $0xc90] ss:$28 sps:$4 sm:$0xff]  }
 0x2d0   :  { %v17385_v26 = vpop.f32.mrb[27].mxu1  ;;  %5496 = vmatprep.subr.bf16.mxu1 %v18420_v11  ;;  %v18487_v11 = vld [vmem:[#allocation2 + $0x1540] ss:$28 sps:$4 sm:$0xff]   ;;  %v18481_v13 = vld [vmem:[#allocation2 + $0xdd8] ss:$28 sps:$4 sm:$0xff]  }
 0x2d1   :  { %v18486_v20 = vld [vmem:[#allocation2 + $0xe14] ss:$28 sps:$4 sm:$0xff]   ;;  %v18492_v22 = vld [vmem:[#allocation2 + $0xe4c] ss:$28 sps:$4 sm:$0xff]   ;;  %v18497_v26 = vld [vmem:[#allocation2 + $0xe84] ss:$28 sps:$4 sm:$0xff]  }
 0x2d2   :  { %5421 = vmatpush1.bf16.msra.mxu0 %v18421_v24  ;;  %v18490_v24 = vld [vmem:[#allocation2 + $0xe48] ss:$28 sps:$4 sm:$0xff]  }
 0x2d3   :  { %5497 = vmatpush1.bf16.msra.mxu1 %v18418_v21  ;;  %5422 = vmatprep.subr.bf16.mxu0 %v18429_v27  ;;  %v18484_v21 = vld [vmem:[#allocation2 + $0xe10] ss:$28 sps:$4 sm:$0xff]   ;;  %v18498_v27 = vld [vmem:[#allocation2 + $0xcc8] ss:$28 sps:$4 sm:$0xff]  }
 0x2d4   :  { %5498 = vmatprep.subr.bf16.mxu1 %v18426_v25  ;;  %v18494_v25 = vld [vmem:[#allocation2 + $0xad0] ss:$28 sps:$4 sm:$0xff]  }
 0x2d6   :  { %5423 = vmatpush1.bf16.msra.mxu0 %v18427_v47  ;;  %v18499_v47 = vld [vmem:[#allocation2 + $0xb08] ss:$28 sps:$4 sm:$0xff]  }
 0x2d7   :  { %5499 = vmatpush1.bf16.msra.mxu1 %v18424_v28  ;;  %5424 = vmatprep.subr.bf16.mxu0 %v18435_v49  ;;  %v18495_v28 = vld [vmem:[#allocation2 + $0xe80] ss:$28 sps:$4 sm:$0xff]  }
 0x2d8   :  { %5500 = vmatprep.subr.bf16.mxu1 %v18432_v29  ;;  %v18502_v29 = vld [vmem:[#allocation2 + $0xebc] ss:$28 sps:$4 sm:$0xff]  }
 0x2d9   :  { %v18503_v49 = vld [vmem:[#allocation2 + $0xd00] ss:$28 sps:$4 sm:$0xff]  }
 0x2da   :  { %5425 = vmatpush1.bf16.msra.mxu0 %v18433_v31  ;;  %v18504_v31 = vld [vmem:[#allocation2 + $0xb40] ss:$28 sps:$4 sm:$0xff]  }
 0x2db   :  { %5501 = vmatpush1.bf16.msra.mxu1 %v18430_v30  ;;  %5426 = vmatprep.subr.bf16.mxu0 %v18441_v32  ;;  %v18500_v30 = vld [vmem:[#allocation2 + $0xeb8] ss:$28 sps:$4 sm:$0xff]  }
 0x2dc   :  { %5502 = vmatprep.subr.bf16.mxu1 %v18438_v18  ;;  %v18507_v18 = vld [vmem:[#allocation2 + $0xef4] ss:$28 sps:$4 sm:$0xff]  }
 0x2dd   :  { %v18508_v32 = vld [vmem:[#allocation2 + $0xd38] ss:$28 sps:$4 sm:$0xff]  }
 0x2de   :  { %5427 = vmatpush1.bf16.msra.mxu0 %v18439_v37  ;;  %v18509_v37 = vld [vmem:[#allocation2 + $0xb78] ss:$28 sps:$4 sm:$0xff]  }
 0x2df   :  { %5503 = vmatpush1.bf16.msra.mxu1 %v18436_v36  ;;  %5428 = vmatprep.subr.bf16.mxu0 %v18447_v33  ;;  %v18505_v36 = vld [vmem:[#allocation2 + $0xef0] ss:$28 sps:$4 sm:$0xff]  }
 0x2e0   :  { %5504 = vmatprep.subr.bf16.mxu1 %v18444_v41 }
 0x2e2   :  { %5429 = vmatpush1.bf16.msra.mxu0 %v18445_v43 }
 0x2e3   :  { %5505 = vmatpush1.bf16.msra.mxu1 %v18442_v42  ;;  %5430 = vmatprep.subr.bf16.mxu0 %v18453_v45  ;;  %v18513_v45 = vld [vmem:[#allocation2 + $0xd70] ss:$28 sps:$4 sm:$0xff]  }
 0x2e4   :  { %5506 = vmatprep.subr.bf16.mxu1 %v18450_v44  ;;  %v18512_v44 = vld [vmem:[#allocation2 + $0xf2c] ss:$28 sps:$4 sm:$0xff]  }
 0x2e6   :  { %5431 = vmatpush1.bf16.msra.mxu0 %v18451_v48  ;;  %v18510_v48 = vld [vmem:[#allocation2 + $0xf28] ss:$28 sps:$4 sm:$0xff]  }
 0x2e7   :  { %5507 = vmatpush1.bf16.msra.mxu1 %v18448_v46  ;;  %5432 = vmatprep.subr.bf16.mxu0 %v18459_v51  ;;  %v18517_v51 = vld [vmem:[#allocation2 + $0xf64] ss:$28 sps:$4 sm:$0xff]  }
 0x2e8   :  { %5508 = vmatprep.subr.bf16.mxu1 %v18456_v50  ;;  %v18514_v50 = vld [vmem:[#allocation2 + $0xbb0] ss:$28 sps:$4 sm:$0xff]  }
 0x2ea   :  { %5433 = vmatpush1.bf16.msra.mxu0 %v18457_v55  ;;  %v18522_v55 = vld [vmem:[#allocation2 + $0xf9c] ss:$28 sps:$4 sm:$0xff]  }
 0x2eb   :  { %5509 = vmatpush1.bf16.msra.mxu1 %v18454_v40  ;;  %5434 = vmatprep.subr.bf16.mxu0 %v18465_v57  ;;  %v18518_v40 = vld [vmem:[#allocation2 + $0xda8] ss:$28 sps:$4 sm:$0xff]   ;;  %v18520_v57 = vld [vmem:[#allocation2 + $0xf98] ss:$28 sps:$4 sm:$0xff]  }
 0x2ec   :  { %5510 = vmatprep.subr.bf16.mxu1 %v18462_v56  ;;  %v18523_v56 = vld [vmem:[#allocation2 + $0xde0] ss:$28 sps:$4 sm:$0xff]  }
 0x2ee   :  { %5435 = vmatpush1.bf16.msra.mxu0 %v18463_v59  ;;  %v18527_v59 = vld [vmem:[#allocation2 + $0xfd4] ss:$28 sps:$4 sm:$0xff]  }
 0x2ef   :  { %5511 = vmatpush1.bf16.msra.mxu1 %v18460_v58  ;;  %5436 = vmatprep.subr.bf16.mxu0 %v18471_v62  ;;  %v18524_v58 = vld [vmem:[#allocation2 + $0xc20] ss:$28 sps:$4 sm:$0xff]   ;;  %v18525_v62 = vld [vmem:[#allocation2 + $0xfd0] ss:$28 sps:$4 sm:$0xff]  }
 0x2f0   :  { %5512 = vmatprep.subr.bf16.mxu1 %v18468_v60  ;;  %v18528_v60 = vld [vmem:[#allocation2 + $0xe18] ss:$28 sps:$4 sm:$0xff]  }
 0x2f2   :  { %5437 = vmatpush1.bf16.msra.mxu0 %v18469_v1  ;;  %v18532_v1 = vld [vmem:[#allocation2 + $0x100c] ss:$28 sps:$4 sm:$0xff]  }
 0x2f3   :  { %5513 = vmatpush1.bf16.msra.mxu1 %v18466_v63  ;;  %5438 = vmatprep.subr.bf16.mxu0 %v18477_v3  ;;  %v18529_v63 = vld [vmem:[#allocation2 + $0xc58] ss:$28 sps:$4 sm:$0xff]   ;;  %v18530_v3 = vld [vmem:[#allocation2 + $0x1008] ss:$28 sps:$4 sm:$0xff]  }
 0x2f4   :  { %5514 = vmatprep.subr.bf16.mxu1 %v18474_v2  ;;  %v18533_v2 = vld [vmem:[#allocation2 + $0x1010] ss:$28 sps:$4 sm:$0xff]  }
 0x2f6   :  { %5439 = vmatpush1.bf16.msra.mxu0 %v18475_v5  ;;  %v18537_v5 = vld [vmem:[#allocation2 + $0x1044] ss:$28 sps:$4 sm:$0xff]  }
 0x2f7   :  { %5515 = vmatpush1.bf16.msra.mxu1 %v18472_v4  ;;  %5449 = vmatprep.subr.bf16.mxu0 %v18489_v7  ;;  %v18534_v4 = vld [vmem:[#allocation2 + $0xe50] ss:$28 sps:$4 sm:$0xff]   ;;  %v18535_v7 = vld [vmem:[#allocation2 + $0x1040] ss:$28 sps:$4 sm:$0xff]  }
 0x2f8   :  { %5516 = vmatprep.subr.bf16.mxu1 %v18480_v6  ;;  %v18538_v6 = vld [vmem:[#allocation2 + $0x1048] ss:$28 sps:$4 sm:$0xff]  }
 0x2f9   :  { %5441 = vmatmul.mubr.bf16.vlgmr.msra.gmra.mrb[8].mxu0 %v20790_v23 }
 0x2fa   :  { %5450 = vmatpush1.bf16.msra.mxu0 %v18487_v11  ;;  %5481 = vmatprep.mubr.bf16.mxu0 %v20552_v0  ;;  %v18543_v11 = vld [vmem:[#allocation2 + $0x1080] ss:$28 sps:$4 sm:$0xff]  }
 0x2fb   :  { %5517 = vmatpush1.bf16.msra.mxu1 %v18478_v9  ;;  %17136 = vmatprep.subr.bf16.mxu0 %v18493_v12  ;;  %v18539_v9 = vld [vmem:[#allocation2 + $0xe88] ss:$28 sps:$4 sm:$0xff]   ;;  %v18540_v12 = vld [vmem:[#allocation2 + $0x1078] ss:$28 sps:$4 sm:$0xff]  }
 0x2fc   :  { %5518 = vmatprep.subr.bf16.mxu1 %v18483_v10  ;;  %v18542_v10 = vld [vmem:[#allocation2 + $0x107c] ss:$28 sps:$4 sm:$0xff]  }
 0x2ff   :  { %5519 = vmatpush1.bf16.msra.mxu1 %v18481_v13  ;;  %v18544_v13 = vld [vmem:[#allocation2 + $0xec0] ss:$28 sps:$4 sm:$0xff]  }
 0x300   :  { %5520 = vmatprep.subr.bf16.mxu1 %v18486_v20  ;;  %v18547_v20 = vld [vmem:[#allocation2 + $0x10b4] ss:$28 sps:$4 sm:$0xff]  }
 0x303   :  { %5521 = vmatpush1.bf16.msra.mxu1 %v18484_v21  ;;  %v18548_v21 = vld [vmem:[#allocation2 + $0x10b8] ss:$28 sps:$4 sm:$0xff]  }
 0x304   :  { %5531 = vmatprep.subr.bf16.mxu1 %v18492_v22  ;;  %v18545_v22 = vld [vmem:[#allocation2 + $0x10b0] ss:$28 sps:$4 sm:$0xff]  }
 0x305   :  { %15900 = vmatmul.mubr.msk.bf16.vlgmr.msra.gmra.mrb[8].mxu0 %vm2349_vm0, %v20860_v61 }
 0x306   :  { %5523 = vmatmul.mubr.bf16.vlgmr.msra.gmra.mrb[32].mxu1 %v20756_v8  ;;  %17137 = vmatpush3.bf16.msra.mxu0 %v18494_v25  ;;  %v18552_v25 = vld [vmem:[#allocation2 + $0x10ec] ss:$28 sps:$4 sm:$0xff]  }
 0x307   :  { %5532 = vmatpush1.bf16.msra.mxu1 %v18490_v24  ;;  %17138 = vmatprep.subr.bf16.mxu0 %v18498_v27  ;;  %v18549_v24 = vld [vmem:[#allocation2 + $0xef8] ss:$28 sps:$4 sm:$0xff]   ;;  %v18550_v27 = vld [vmem:[#allocation2 + $0x10e8] ss:$28 sps:$4 sm:$0xff]  }
 0x308   :  { %5533 = vmatprep.subr.bf16.mxu1 %v18497_v26  ;;  %5686 = vmatprep.mubr.bf16.mxu0 %v20752_v52  ;;  %v18553_v26 = vld [vmem:[#allocation2 + $0x10f0] ss:$28 sps:$4 sm:$0xff]  }
 0x309   :  { %5563 = vmatprep.mubr.bf16.mxu1 %v20767_v35 }
 0x30a   :  { %17139 = vmatpush3.bf16.msra.mxu0 %v18499_v47  ;;  %v18557_v47 = vld [vmem:[#allocation2 + $0x1124] ss:$28 sps:$4 sm:$0xff]  }
 0x30b   :  { %5534 = vmatpush1.bf16.msra.mxu1 %v18495_v28  ;;  %17140 = vmatprep.subr.bf16.mxu0 %v18503_v49  ;;  %v18554_v28 = vld [vmem:[#allocation2 + $0xf30] ss:$28 sps:$4 sm:$0xff]   ;;  %v18555_v49 = vld [vmem:[#allocation2 + $0x1120] ss:$28 sps:$4 sm:$0xff]  }
 0x30c   :  { %5535 = vmatprep.subr.bf16.mxu1 %v18502_v29  ;;  %v2797_v61 = vpop.f32.mrb[4].mxu0  ;;  %v18558_v29 = vld [vmem:[#allocation2 + $0x1128] ss:$28 sps:$4 sm:$0xff]  }
 0x30d   :  { %v20876_v41 = vadd.f32 %v20840_v53, %v2797_v61  ;;  %v2799_v33 = vpop.f32.mrb[5].mxu0  ;;  %v18515_v53 = vld [vmem:[#allocation2 + $0xf60] ss:$28 sps:$4 sm:$0xff]  }
 0x30e   :  { %v20879_v42 = vadd.f32 %v20842_v54, %v2799_v33  ;;  %17141 = vmatpush3.bf16.msra.mxu0 %v18504_v31  ;;  %v2801_v43 = vpop.f32.mrb[6].mxu0  ;;  %v18519_v54 = vld [vmem:[#allocation2 + $0xbe8] ss:$28 sps:$4 sm:$0xff]   ;;  %v18562_v31 = vld [vmem:[#allocation2 + $0x115c] ss:$28 sps:$4 sm:$0xff]  }
 0x30f   :  { %5536 = vmatpush1.bf16.msra.mxu1 %v18500_v30  ;;  %v2802_v46 = vpop.f32.mrb[7].mxu0  ;;  %17142 = vmatprep.subr.bf16.mxu0 %v18508_v32  ;;  %v18559_v30 = vld [vmem:[#allocation2 + $0xf68] ss:$28 sps:$4 sm:$0xff]   ;;  %v18560_v32 = vld [vmem:[#allocation2 + $0x1158] ss:$28 sps:$4 sm:$0xff]  }
 0x310   :  { %5537 = vmatprep.subr.bf16.mxu1 %v18507_v18  ;;  %v18563_v18 = vld [vmem:[#allocation2 + $0x1160] ss:$28 sps:$4 sm:$0xff]   ;;  %v18565_v33 = vld [vmem:[#allocation2 + $0x1190] ss:$28 sps:$4 sm:$0xff]   ;;  %v18569_v43 = vld [vmem:[#allocation2 + $0xfd8] ss:$28 sps:$4 sm:$0xff]  }
 0x311   :  { %v18564_v61 = vld [vmem:[#allocation2 + $0xfa0] ss:$28 sps:$4 sm:$0xff]   ;;  %v18570_v46 = vld [vmem:[#allocation2 + $0x11c8] ss:$28 sps:$4 sm:$0xff]  }
 0x312   :  { %17143 = vmatpush3.bf16.msra.mxu0 %v18509_v37  ;;  %v18568_v37 = vld [vmem:[#allocation2 + $0x1198] ss:$28 sps:$4 sm:$0xff]  }
 0x313   :  { %5538 = vmatpush1.bf16.msra.mxu1 %v18505_v36  ;;  %17144 = vmatprep.subr.bf16.mxu0 %v18513_v45  ;;  %v18567_v36 = vld [vmem:[#allocation2 + $0x1194] ss:$28 sps:$4 sm:$0xff]  }
 0x314   :  { %5539 = vmatprep.subr.bf16.mxu1 %v18512_v44  ;;  %v18572_v44 = vld [vmem:[#allocation2 + $0x11cc] ss:$28 sps:$4 sm:$0xff]  }
 0x315   :  { %v18573_v45 = vld [vmem:[#allocation2 + $0x1390] ss:$28 sps:$4 sm:$0xff]  }
 0x316   :  { %17145 = vmatpush3.bf16.msra.mxu0 %v18514_v50  ;;  %v18577_v50 = vld [vmem:[#allocation2 + $0x1204] ss:$28 sps:$4 sm:$0xff]  }
 0x317   :  { %5540 = vmatpush1.bf16.msra.mxu1 %v18510_v48  ;;  %17146 = vmatprep.subr.bf16.mxu0 %v18518_v40  ;;  %v18574_v48 = vld [vmem:[#allocation2 + $0x11d0] ss:$28 sps:$4 sm:$0xff]   ;;  %v18575_v40 = vld [vmem:[#allocation2 + $0x1200] ss:$28 sps:$4 sm:$0xff]  }
 0x318   :  { %5541 = vmatprep.subr.bf16.mxu1 %v18517_v51  ;;  %v18578_v51 = vld [vmem:[#allocation2 + $0x13c8] ss:$28 sps:$4 sm:$0xff]  }
 0x31a   :  { %17147 = vmatpush3.bf16.msra.mxu0 %v18519_v54  ;;  %v18582_v54 = vld [vmem:[#allocation2 + $0x123c] ss:$28 sps:$4 sm:$0xff]  }
 0x31b   :  { %5542 = vmatpush1.bf16.msra.mxu1 %v18515_v53  ;;  %17148 = vmatprep.subr.bf16.mxu0 %v18523_v56  ;;  %v18579_v53 = vld [vmem:[#allocation2 + $0x1208] ss:$28 sps:$4 sm:$0xff]   ;;  %v18580_v56 = vld [vmem:[#allocation2 + $0x1238] ss:$28 sps:$4 sm:$0xff]  }
 0x31c   :  { %5543 = vmatprep.subr.bf16.mxu1 %v18522_v55  ;;  %v18583_v55 = vld [vmem:[#allocation2 + $0x1400] ss:$28 sps:$4 sm:$0xff]  }
 0x31e   :  { %17149 = vmatpush3.bf16.msra.mxu0 %v18524_v58  ;;  %v18587_v58 = vld [vmem:[#allocation2 + $0x1274] ss:$28 sps:$4 sm:$0xff]  }
 0x31f   :  { %5544 = vmatpush1.bf16.msra.mxu1 %v18520_v57  ;;  %17150 = vmatprep.subr.bf16.mxu0 %v18528_v60  ;;  %v18584_v57 = vld [vmem:[#allocation2 + $0x1240] ss:$28 sps:$4 sm:$0xff]   ;;  %v18585_v60 = vld [vmem:[#allocation2 + $0x1270] ss:$28 sps:$4 sm:$0xff]  }
 0x320   :  { %5545 = vmatprep.subr.bf16.mxu1 %v18527_v59  ;;  %v18588_v59 = vld [vmem:[#allocation2 + $0x1438] ss:$28 sps:$4 sm:$0xff]  }
 0x322   :  { %17151 = vmatpush3.bf16.msra.mxu0 %v18529_v63  ;;  %v18592_v63 = vld [vmem:[#allocation2 + $0x12ac] ss:$28 sps:$4 sm:$0xff]  }
 0x323   :  { %5546 = vmatpush1.bf16.msra.mxu1 %v18525_v62  ;;  %17158 = vmatprep.subr.bf16.mxu0 %v18533_v2  ;;  %v18589_v62 = vld [vmem:[#allocation2 + $0x1278] ss:$28 sps:$4 sm:$0xff]   ;;  %v18590_v2 = vld [vmem:[#allocation2 + $0x12a8] ss:$28 sps:$4 sm:$0xff]  }
 0x324   :  { %5547 = vmatprep.subr.bf16.mxu1 %v18532_v1  ;;  %v18593_v1 = vld [vmem:[#allocation2 + $0x1470] ss:$28 sps:$4 sm:$0xff]  }
 0x325   :  { %5687 = vmatmul.mubr.bf16.vlgmr.msra.gmra.mrb[12].mxu0 %v20756_v8 }
 0x326   :  { %17159 = vmatpush3.bf16.msra.mxu0 %v18534_v4  ;;  %5726 = vmatprep.mubr.bf16.mxu0 %v20767_v35  ;;  %v18597_v4 = vld [vmem:[#allocation2 + $0x12e4] ss:$28 sps:$4 sm:$0xff]  }
 0x327   :  { %5548 = vmatpush1.bf16.msra.mxu1 %v18530_v3  ;;  %17160 = vmatprep.subr.bf16.mxu0 %v18538_v6  ;;  %v18594_v3 = vld [vmem:[#allocation2 + $0x12b0] ss:$28 sps:$4 sm:$0xff]   ;;  %v18595_v6 = vld [vmem:[#allocation2 + $0x12e0] ss:$28 sps:$4 sm:$0xff]  }
 0x328   :  { %5549 = vmatprep.subr.bf16.mxu1 %v18537_v5  ;;  %v18598_v5 = vld [vmem:[#allocation2 + $0x14a8] ss:$28 sps:$4 sm:$0xff]  }
 0x32a   :  { %17161 = vmatpush3.bf16.msra.mxu0 %v18539_v9  ;;  %v18602_v9 = vld [vmem:[#allocation2 + $0x131c] ss:$28 sps:$4 sm:$0xff]  }
 0x32b   :  { %5550 = vmatpush1.bf16.msra.mxu1 %v18535_v7  ;;  %17162 = vmatprep.subr.bf16.mxu0 %v18543_v11  ;;  %v18599_v7 = vld [vmem:[#allocation2 + $0x12e8] ss:$28 sps:$4 sm:$0xff]   ;;  %v18600_v11 = vld [vmem:[#allocation2 + $0x1318] ss:$28 sps:$4 sm:$0xff]  }
 0x32c   :  { %5551 = vmatprep.subr.bf16.mxu1 %v18542_v10  ;;  %v18603_v10 = vld [vmem:[#allocation2 + $0x14e0] ss:$28 sps:$4 sm:$0xff]  }
 0x32e   :  { %17163 = vmatpush3.bf16.msra.mxu0 %v18544_v13  ;;  %v18607_v13 = vld [vmem:[#allocation2 + $0x1354] ss:$28 sps:$4 sm:$0xff]  }
 0x32f   :  { %5552 = vmatpush1.bf16.msra.mxu1 %v18540_v12  ;;  %17164 = vmatprep.subr.bf16.mxu0 %v18548_v21  ;;  %v18604_v12 = vld [vmem:[#allocation2 + $0x1320] ss:$28 sps:$4 sm:$0xff]   ;;  %v18605_v21 = vld [vmem:[#allocation2 + $0x1350] ss:$28 sps:$4 sm:$0xff]  }
 0x330   :  { %5553 = vmatprep.subr.bf16.mxu1 %v18547_v20  ;;  %v18608_v20 = vld [vmem:[#allocation2 + $0x1518] ss:$28 sps:$4 sm:$0xff]  }
 0x332   :  { %17165 = vmatpush3.bf16.msra.mxu0 %v18549_v24  ;;  %v18612_v24 = vld [vmem:[#allocation2 + $0x138c] ss:$28 sps:$4 sm:$0xff]  }
 0x333   :  { %5554 = vmatpush1.bf16.msra.mxu1 %v18545_v22  ;;  %17166 = vmatprep.subr.bf16.mxu0 %v18553_v26  ;;  %v18609_v22 = vld [vmem:[#allocation2 + $0x1358] ss:$28 sps:$4 sm:$0xff]   ;;  %v18615_v26 = vld [vmem:[#allocation2 + $0x13c4] ss:$28 sps:$4 sm:$0xff]  }
 0x334   :  { %5555 = vmatprep.subr.bf16.mxu1 %v18552_v25  ;;  %v18610_v25 = vld [vmem:[#allocation2 + $0x1388] ss:$28 sps:$4 sm:$0xff]  }
 0x336   :  { %17167 = vmatpush3.bf16.msra.mxu0 %v18554_v28  ;;  %v18622_v28 = vld [vmem:[#allocation2 + $0x1574] ss:$28 sps:$4 sm:$0xff]  }
 0x337   :  { %5556 = vmatpush1.bf16.msra.mxu1 %v18550_v27  ;;  %17168 = vmatprep.subr.bf16.mxu0 %v18558_v29  ;;  %v18616_v27 = vld [vmem:[#allocation2 + $0x1550] ss:$28 sps:$4 sm:$0xff]   ;;  %v18619_v29 = vld [vmem:[#allocation2 + $0x13fc] ss:$28 sps:$4 sm:$0xff]  }
 0x338   :  { %5557 = vmatprep.subr.bf16.mxu1 %v18557_v47  ;;  %v18613_v47 = vld [vmem:[#allocation2 + $0x13c0] ss:$28 sps:$4 sm:$0xff]  }
 0x33a   :  { %17169 = vmatpush3.bf16.msra.mxu0 %v18559_v30  ;;  %v18620_v30 = vld [vmem:[#allocation2 + $0x1570] ss:$28 sps:$4 sm:$0xff]  }
 0x33b   :  { %5558 = vmatpush1.bf16.msra.mxu1 %v18555_v49  ;;  %17170 = vmatprep.subr.bf16.mxu0 %v18563_v18  ;;  %v18617_v49 = vld [vmem:[#allocation2 + $0x13f8] ss:$28 sps:$4 sm:$0xff]   ;;  %v18628_v18 = vld [vmem:[#allocation2 + $0x15ac] ss:$28 sps:$4 sm:$0xff]  }
 0x33c   :  { %5559 = vmatprep.subr.bf16.mxu1 %v18562_v31  ;;  %v18625_v31 = vld [vmem:[#allocation2 + $0x1434] ss:$28 sps:$4 sm:$0xff]  }
 0x33e   :  { %17171 = vmatpush3.bf16.msra.mxu0 %v18564_v61  ;;  %v18623_v61 = vld [vmem:[#allocation2 + $0x1430] ss:$28 sps:$4 sm:$0xff]  }
 0x33f   :  { %5560 = vmatpush1.bf16.msra.mxu1 %v18560_v32  ;;  %17172 = vmatprep.subr.bf16.mxu0 %v18568_v37  ;;  %v20894_v32 = vld [vmem:[%s21201_s0 + $0x18] ss:$0 sps:$4 sm:$0xff]   ;;  %v18631_v37 = vld [vmem:[#allocation2 + $0x146c] ss:$28 sps:$4 sm:$0xff]  }
 0x340   :  { %5561 = vmatprep.subr.bf16.mxu1 %v18567_v36  ;;  %v18626_v36 = vld [vmem:[#allocation2 + $0x15a8] ss:$28 sps:$4 sm:$0xff]  }
 0x342   :  { %17173 = vmatpush3.bf16.msra.mxu0 %v18569_v43  ;;  %v18629_v43 = vld [vmem:[#allocation2 + $0x1468] ss:$28 sps:$4 sm:$0xff]  }
 0x343   :  { %5562 = vmatpush1.bf16.msra.mxu1 %v18565_v33  ;;  %17180 = vmatprep.subr.bf16.mxu0 %v18573_v45  ;;  %v18634_v33 = vld [vmem:[#allocation2 + $0x15e4] ss:$28 sps:$4 sm:$0xff]  }
 0x344   :  { %5572 = vmatprep.subr.bf16.mxu1 %v18572_v44  ;;  %v18632_v44 = vld [vmem:[#allocation2 + $0x15e0] ss:$28 sps:$4 sm:$0xff]  }
 0x345   :  { %5727 = vmatmul.mubr.bf16.vlgmr.msra.gmra.mrb[16].mxu0 %v20773_v15  ;;  %v18637_v45 = vld [vmem:[#allocation2 + $0x14a4] ss:$28 sps:$4 sm:$0xff]  }
 0x346   :  { %5564 = vmatmul.mubr.bf16.vlgmr.msra.gmra.mrb[32].mxu1 %v20773_v15  ;;  %17181 = vmatpush3.bf16.msra.mxu0 %v18574_v48  ;;  %v18635_v48 = vld [vmem:[#allocation2 + $0x14a0] ss:$28 sps:$4 sm:$0xff]  }
 0x347   :  { %5573 = vmatpush1.bf16.msra.mxu1 %v18570_v46  ;;  %17182 = vmatprep.subr.bf16.mxu0 %v18578_v51  ;;  %v18640_v46 = vld [vmem:[#allocation2 + $0x161c] ss:$28 sps:$4 sm:$0xff]  }
 0x348   :  { %5574 = vmatprep.subr.bf16.mxu1 %v18577_v50  ;;  %5766 = vmatprep.mubr.bf16.mxu0 %v20782_v19  ;;  %v18638_v50 = vld [vmem:[#allocation2 + $0x1618] ss:$28 sps:$4 sm:$0xff]  }
 0x349   :  { %5604 = vmatprep.mubr.bf16.mxu1 %v20782_v19  ;;  %v18643_v51 = vld [vmem:[#allocation2 + $0x14dc] ss:$28 sps:$4 sm:$0xff]  }
 0x34a   :  { %17183 = vmatpush3.bf16.msra.mxu0 %v18579_v53  ;;  %v18641_v53 = vld [vmem:[#allocation2 + $0x14d8] ss:$28 sps:$4 sm:$0xff]  }
 0x34b   :  { %5575 = vmatpush1.bf16.msra.mxu1 %v18575_v40  ;;  %17184 = vmatprep.subr.bf16.mxu0 %v18583_v55  ;;  %v18646_v40 = vld [vmem:[#allocation2 + $0x1654] ss:$28 sps:$4 sm:$0xff]  }
 0x34c   :  { %5576 = vmatprep.subr.bf16.mxu1 %v18582_v54  ;;  %v18644_v54 = vld [vmem:[#allocation2 + $0x1650] ss:$28 sps:$4 sm:$0xff]  }
 0x34d   :  { %v18649_v55 = vld [vmem:[#allocation2 + $0x1514] ss:$28 sps:$4 sm:$0xff]  }
 0x34e   :  { %17185 = vmatpush3.bf16.msra.mxu0 %v18584_v57  ;;  %v18647_v57 = vld [vmem:[#allocation2 + $0x1510] ss:$28 sps:$4 sm:$0xff]  }
 0x34f   :  { %5577 = vmatpush1.bf16.msra.mxu1 %v18580_v56  ;;  %17186 = vmatprep.subr.bf16.mxu0 %v18588_v59  ;;  %v18652_v56 = vld [vmem:[#allocation2 + $0x168c] ss:$28 sps:$4 sm:$0xff]  }
 0x350   :  { %5578 = vmatprep.subr.bf16.mxu1 %v18587_v58  ;;  %v18650_v58 = vld [vmem:[#allocation2 + $0x1688] ss:$28 sps:$4 sm:$0xff]  }
 0x351   :  { %v18655_v59 = vld [vmem:[#allocation2 + $0x154c] ss:$28 sps:$4 sm:$0xff]  }
 0x352   :  { %17187 = vmatpush3.bf16.msra.mxu0 %v18589_v62  ;;  %v18653_v62 = vld [vmem:[#allocation2 + $0x1548] ss:$28 sps:$4 sm:$0xff]  }
 0x353   :  { %5579 = vmatpush1.bf16.msra.mxu1 %v18585_v60  ;;  %17188 = vmatprep.subr.bf16.mxu0 %v18593_v1  ;;  %v18658_v60 = vld [vmem:[#allocation2 + $0x16c4] ss:$28 sps:$4 sm:$0xff]   ;;  %v18661_v1 = vld [vmem:[#allocation2 + $0x16fc] ss:$28 sps:$4 sm:$0xff]  }
 0x354   :  { %5580 = vmatprep.subr.bf16.mxu1 %v18592_v63  ;;  %v18656_v63 = vld [vmem:[#allocation2 + $0x16c0] ss:$28 sps:$4 sm:$0xff]  }
 0x356   :  { %17189 = vmatpush3.bf16.msra.mxu0 %v18594_v3  ;;  %v18659_v3 = vld [vmem:[#allocation2 + $0x16f8] ss:$28 sps:$4 sm:$0xff]  }
 0x357   :  { %5581 = vmatpush1.bf16.msra.mxu1 %v18590_v2  ;;  %17190 = vmatprep.subr.bf16.mxu0 %v18598_v5  ;;  %v18667_v2 = vld [vmem:[#allocation2 + $0x157c] ss:$28 sps:$4 sm:$0xff]   ;;  %v18662_v5 = vld [vmem:[#allocation2 + $0x1730] ss:$28 sps:$4 sm:$0xff]  }
 0x358   :  { %5582 = vmatprep.subr.bf16.mxu1 %v18597_v4  ;;  %v18664_v4 = vld [vmem:[#allocation2 + $0x1734] ss:$28 sps:$4 sm:$0xff]  }
 0x35a   :  { %17191 = vmatpush3.bf16.msra.mxu0 %v18599_v7  ;;  %v18665_v7 = vld [vmem:[#allocation2 + $0x1578] ss:$28 sps:$4 sm:$0xff]  }
 0x35b   :  { %5583 = vmatpush1.bf16.msra.mxu1 %v18595_v6  ;;  %17192 = vmatprep.subr.bf16.mxu0 %v18603_v10  ;;  %v18670_v6 = vld [vmem:[#allocation2 + $0x176c] ss:$28 sps:$4 sm:$0xff]   ;;  %v18673_v10 = vld [vmem:[#allocation2 + $0x15b4] ss:$28 sps:$4 sm:$0xff]  }
 0x35c   :  { %5584 = vmatprep.subr.bf16.mxu1 %v18602_v9  ;;  %v18668_v9 = vld [vmem:[#allocation2 + $0x1768] ss:$28 sps:$4 sm:$0xff]  }
 0x35e   :  { %17193 = vmatpush3.bf16.msra.mxu0 %v18604_v12  ;;  %v18671_v12 = vld [vmem:[#allocation2 + $0x15b0] ss:$28 sps:$4 sm:$0xff]  }
 0x35f   :  { %5585 = vmatpush1.bf16.msra.mxu1 %v18600_v11  ;;  %17194 = vmatprep.subr.bf16.mxu0 %v18608_v20  ;;  %v18676_v11 = vld [vmem:[#allocation2 + $0x17a4] ss:$28 sps:$4 sm:$0xff]   ;;  %v18679_v20 = vld [vmem:[#allocation2 + $0x15ec] ss:$28 sps:$4 sm:$0xff]  }
 0x360   :  { %5586 = vmatprep.subr.bf16.mxu1 %v18607_v13  ;;  %v18674_v13 = vld [vmem:[#allocation2 + $0x17a0] ss:$28 sps:$4 sm:$0xff]  }
 0x362   :  { %17195 = vmatpush3.bf16.msra.mxu0 %v18609_v22  ;;  %v18677_v22 = vld [vmem:[#allocation2 + $0x15e8] ss:$28 sps:$4 sm:$0xff]  }
 0x363   :  { %5587 = vmatpush1.bf16.msra.mxu1 %v18605_v21  ;;  %17386 = vmatprep.subr.bf16.mxu0 %v20553_v34  ;;  %v18682_v21 = vld [vmem:[#allocation2 + $0x17dc] ss:$28 sps:$4 sm:$0xff]  }
 0x364   :  { %5588 = vmatprep.subr.bf16.mxu1 %v18612_v24  ;;  %v18680_v24 = vld [vmem:[#allocation2 + $0x17d8] ss:$28 sps:$4 sm:$0xff]  }
 0x365   :  { %5767 = vmatmul.mubr.bf16.vlgmr.msra.gmra.mrb[20].mxu0 %v20790_v23 }
 0x366   :  { %17387 = vmatpush3.bf16.msra.mxu0 %v18616_v27  ;;  %17388 = vmatprep.mubr.msk.bf16.mxu0 %vm20554_vm1, %v20553_v34 }
 0x367   :  { %5589 = vmatpush1.bf16.msra.mxu1 %v18610_v25  ;;  %7978 = vmatprep.subr.bf16.mxu0 %v18622_v28  ;;  %v18685_v25 = vld [vmem:[#allocation2 + $0x1624] ss:$28 sps:$4 sm:$0xff]  }
 0x368   :  { %5590 = vmatprep.subr.bf16.mxu1 %v18615_v26  ;;  %v18688_v26 = vld [vmem:[#allocation2 + $0x1814] ss:$28 sps:$4 sm:$0xff]  }
 0x36b   :  { %5591 = vmatpush1.bf16.msra.mxu1 %v18613_v47 }
 0x36c   :  { %5592 = vmatprep.subr.bf16.mxu1 %v18619_v29  ;;  %v18683_v29 = vld [vmem:[#allocation2 + $0x1620] ss:$28 sps:$4 sm:$0xff]  }
 0x36d   :  { %17389 = vmatmul.mubr.msk.bf16.vlgmr.msra.gmra.mrb[24].mxu0 %vm2349_vm0, %v20894_v32 }
 0x36e   :  { %7979 = vmatpush1.bf16.msra.mxu0 %v18620_v30  ;;  %8010 = vmatprep.mubr.bf16.mxu0 %v20752_v52 }
 0x36f   :  { %5593 = vmatpush1.bf16.msra.mxu1 %v18617_v49  ;;  %7980 = vmatprep.subr.bf16.mxu0 %v18628_v18  ;;  %v18691_v18 = vld [vmem:[#allocation2 + $0x165c] ss:$28 sps:$4 sm:$0xff]  }
 0x370   :  { %5594 = vmatprep.subr.bf16.mxu1 %v18625_v31  ;;  %v18686_v31 = vld [vmem:[#allocation2 + $0x1810] ss:$28 sps:$4 sm:$0xff]  }
 0x372   :  { %7981 = vmatpush1.bf16.msra.mxu0 %v18626_v36  ;;  %v18689_v36 = vld [vmem:[#allocation2 + $0x1658] ss:$28 sps:$4 sm:$0xff]  }
 0x373   :  { %5595 = vmatpush1.bf16.msra.mxu1 %v18623_v61  ;;  %7982 = vmatprep.subr.bf16.mxu0 %v18634_v33  ;;  %v18694_v61 = vld [vmem:[#allocation2 + $0x184c] ss:$28 sps:$4 sm:$0xff]   ;;  %v18697_v33 = vld [vmem:[#allocation2 + $0x1694] ss:$28 sps:$4 sm:$0xff]  }
 0x374   :  { %5596 = vmatprep.subr.bf16.mxu1 %v18631_v37  ;;  %v18692_v37 = vld [vmem:[#allocation2 + $0x1848] ss:$28 sps:$4 sm:$0xff]  }
 0x376   :  { %7983 = vmatpush1.bf16.msra.mxu0 %v18632_v44  ;;  %v18695_v44 = vld [vmem:[#allocation2 + $0x1690] ss:$28 sps:$4 sm:$0xff]  }
 0x377   :  { %5597 = vmatpush1.bf16.msra.mxu1 %v18629_v43  ;;  %7984 = vmatprep.subr.bf16.mxu0 %v18640_v46  ;;  %v18700_v43 = vld [vmem:[#allocation2 + $0x1884] ss:$28 sps:$4 sm:$0xff]   ;;  %v18703_v46 = vld [vmem:[#allocation2 + $0x16cc] ss:$28 sps:$4 sm:$0xff]  }
 0x378   :  { %5598 = vmatprep.subr.bf16.mxu1 %v18637_v45  ;;  %v18698_v45 = vld [vmem:[#allocation2 + $0x1880] ss:$28 sps:$4 sm:$0xff]  }
 0x37a   :  { %7985 = vmatpush1.bf16.msra.mxu0 %v18638_v50  ;;  %v18701_v50 = vld [vmem:[#allocation2 + $0x16c8] ss:$28 sps:$4 sm:$0xff]  }
 0x37b   :  { %5599 = vmatpush1.bf16.msra.mxu1 %v18635_v48  ;;  %7986 = vmatprep.subr.bf16.mxu0 %v18646_v40  ;;  %v18706_v48 = vld [vmem:[#allocation2 + $0x18bc] ss:$28 sps:$4 sm:$0xff]   ;;  %v18709_v40 = vld [vmem:[#allocation2 + $0x1704] ss:$28 sps:$4 sm:$0xff]  }
 0x37c   :  { %5600 = vmatprep.subr.bf16.mxu1 %v18643_v51  ;;  %v18704_v51 = vld [vmem:[#allocation2 + $0x18b8] ss:$28 sps:$4 sm:$0xff]  }
 0x37e   :  { %7987 = vmatpush1.bf16.msra.mxu0 %v18644_v54  ;;  %v18707_v54 = vld [vmem:[#allocation2 + $0x1700] ss:$28 sps:$4 sm:$0xff]  }
 0x37f   :  { %5601 = vmatpush1.bf16.msra.mxu1 %v18641_v53  ;;  %7988 = vmatprep.subr.bf16.mxu0 %v18652_v56  ;;  %v18712_v53 = vld [vmem:[#allocation2 + $0x18f4] ss:$28 sps:$4 sm:$0xff]   ;;  %v18715_v56 = vld [vmem:[#allocation2 + $0x173c] ss:$28 sps:$4 sm:$0xff]  }
 0x380   :  { %5602 = vmatprep.subr.bf16.mxu1 %v18649_v55  ;;  %v18710_v55 = vld [vmem:[#allocation2 + $0x18f0] ss:$28 sps:$4 sm:$0xff]  }
 0x382   :  { %7989 = vmatpush1.bf16.msra.mxu0 %v18650_v58  ;;  %v18713_v58 = vld [vmem:[#allocation2 + $0x1738] ss:$28 sps:$4 sm:$0xff]  }
 0x383   :  { %5603 = vmatpush1.bf16.msra.mxu1 %v18647_v57  ;;  %7990 = vmatprep.subr.bf16.mxu0 %v18658_v60  ;;  %v18718_v57 = vld [vmem:[#allocation2 + $0x192c] ss:$28 sps:$4 sm:$0xff]   ;;  %v18721_v60 = vld [vmem:[#allocation2 + $0x1774] ss:$28 sps:$4 sm:$0xff]  }
 0x384   :  { %5613 = vmatprep.subr.bf16.mxu1 %v18655_v59  ;;  %v18716_v59 = vld [vmem:[#allocation2 + $0x1928] ss:$28 sps:$4 sm:$0xff]  }
 0x386   :  { %5605 = vmatmul.mubr.bf16.vlgmr.msra.gmra.mrb[32].mxu1 %v20790_v23  ;;  %7991 = vmatpush1.bf16.msra.mxu0 %v18656_v63  ;;  %v18719_v63 = vld [vmem:[#allocation2 + $0x1770] ss:$28 sps:$4 sm:$0xff]  }
 0x387   :  { %5614 = vmatpush1.bf16.msra.mxu1 %v18653_v62  ;;  %7992 = vmatprep.subr.bf16.mxu0 %v18661_v1  ;;  %v18724_v62 = vld [vmem:[#allocation2 + $0x1964] ss:$28 sps:$4 sm:$0xff]  }
 0x388   :  { %5645 = vmatprep.mubr.bf16.mxu1 %v20552_v0  ;;  %8142 = vmatprep.subr.bf16.mxu1 %v18667_v2  ;;  %v18722_v1 = vld [vmem:[#allocation2 + $0x1960] ss:$28 sps:$4 sm:$0xff]   ;;  %v18727_v2 = vld [vmem:[#allocation2 + $0x17ac] ss:$28 sps:$4 sm:$0xff]  }
 0x38a   :  { %7993 = vmatpush1.bf16.msra.mxu0 %v18659_v3  ;;  %v18730_v3 = vld [vmem:[#allocation2 + $0x199c] ss:$28 sps:$4 sm:$0xff]  }
 0x38b   :  { %7994 = vmatprep.subr.bf16.mxu0 %v18664_v4  ;;  %v18725_v4 = vld [vmem:[#allocation2 + $0x17a8] ss:$28 sps:$4 sm:$0xff]  }
 0x38e   :  { %7995 = vmatpush1.bf16.msra.mxu0 %v18662_v5  ;;  %v18728_v5 = vld [vmem:[#allocation2 + $0x1998] ss:$28 sps:$4 sm:$0xff]  }
 0x38f   :  { %7996 = vmatprep.subr.bf16.mxu0 %v18670_v6  ;;  %v18733_v6 = vld [vmem:[#allocation2 + $0x17e4] ss:$28 sps:$4 sm:$0xff]  }
 0x392   :  { %15901 = vmatmul.mubr.msk.bf16.vlgmr.msra.gmra.mrb[32].mxu1 %vm2349_vm0, %v20894_v32  ;;  %7997 = vmatpush1.bf16.msra.mxu0 %v18668_v9  ;;  %v18731_v9 = vld [vmem:[#allocation2 + $0x17e0] ss:$28 sps:$4 sm:$0xff]  }
 0x393   :  { %8143 = vmatpush1.bf16.msra.mxu1 %v18665_v7  ;;  %7998 = vmatprep.subr.bf16.mxu0 %v18676_v11  ;;  %v18736_v7 = vld [vmem:[#allocation2 + $0x19d4] ss:$28 sps:$4 sm:$0xff]   ;;  %v18739_v11 = vld [vmem:[#allocation2 + $0x181c] ss:$28 sps:$4 sm:$0xff]  }
 0x394   :  { %8144 = vmatprep.subr.bf16.mxu1 %v18673_v10  ;;  %8174 = vmatprep.mubr.bf16.mxu1 %v20752_v52  ;;  %v18734_v10 = vld [vmem:[#allocation2 + $0x19d0] ss:$28 sps:$4 sm:$0xff]  }
 0x396   :  { %7999 = vmatpush1.bf16.msra.mxu0 %v18674_v13  ;;  %v18737_v13 = vld [vmem:[#allocation2 + $0x1818] ss:$28 sps:$4 sm:$0xff]  }
 0x397   :  { %8145 = vmatpush1.bf16.msra.mxu1 %v18671_v12  ;;  %8000 = vmatprep.subr.bf16.mxu0 %v18682_v21  ;;  %v18742_v12 = vld [vmem:[#allocation2 + $0x1a0c] ss:$28 sps:$4 sm:$0xff]   ;;  %v18745_v21 = vld [vmem:[#allocation2 + $0x1854] ss:$28 sps:$4 sm:$0xff]  }
 0x398   :  { %8146 = vmatprep.subr.bf16.mxu1 %v18679_v20  ;;  %v18740_v20 = vld [vmem:[#allocation2 + $0x1a08] ss:$28 sps:$4 sm:$0xff]  }
 0x399   :  { %v20904_v27 = vpop.f32.mrb[28].mxu1 }
 0x39a   :  { %v5814_v28 = vmax.f32 %v20831_v14, %v20904_v27  ;;  %v20908_v47 = vpop.f32.mrb[29].mxu1  ;;  %8001 = vmatpush1.bf16.msra.mxu0 %v18680_v24  ;;  %v18743_v24 = vld [vmem:[#allocation2 + $0x1850] ss:$28 sps:$4 sm:$0xff]   ;;  %v19200_v14 = vld [vmem:[#allocation2 + $0x2488] ss:$28 sps:$4 sm:$0xff]  }
 0x39b   :  { %8147 = vmatpush1.bf16.msra.mxu1 %v18677_v22  ;;  %v5815_v49 = vmax.f32 %v20834_v17, %v20908_v47  ;;  %v5323_v30 = vpop.f32.mrb[30].mxu1  ;;  %8002 = vmatprep.subr.bf16.mxu0 %v18688_v26  ;;  %v18748_v22 = vld [vmem:[#allocation2 + $0x1a44] ss:$28 sps:$4 sm:$0xff]   ;;  %v18751_v26 = vld [vmem:[#allocation2 + $0x188c] ss:$28 sps:$4 sm:$0xff]  }
 0x39c   :  { %v5324_v32 = vpop.f32.mrb[31].mxu1  ;;  %8148 = vmatprep.subr.bf16.mxu1 %v18685_v25  ;;  %v18746_v25 = vld [vmem:[#allocation2 + $0x1a40] ss:$28 sps:$4 sm:$0xff]   ;;  %v18749_v30 = vld [vmem:[#allocation2 + $0x1888] ss:$28 sps:$4 sm:$0xff]  }
 0x39d   :  { %v18760_v32 = vld [vmem:[#allocation2 + $0x1ab4] ss:$28 sps:$4 sm:$0xff]   ;;  %v19206_v17 = vld [vmem:[#allocation2 + $0x24c0] ss:$28 sps:$4 sm:$0xff]   ;;  %v19209_v47 = vld [vmem:[#allocation2 + $0x2148] ss:$28 sps:$4 sm:$0xff]  }
 0x39e   :  { %8003 = vmatpush1.bf16.msra.mxu0 %v18686_v31  ;;  %v18752_v31 = vld [vmem:[#allocation2 + $0x1a78] ss:$28 sps:$4 sm:$0xff]   ;;  %v19203_v27 = vld [vmem:[#allocation2 + $0x2110] ss:$28 sps:$4 sm:$0xff]  }
 0x39f   :  { %8149 = vmatpush1.bf16.msra.mxu1 %v18683_v29  ;;  %8004 = vmatprep.subr.bf16.mxu0 %v18694_v61  ;;  %v18754_v29 = vld [vmem:[#allocation2 + $0x1a7c] ss:$28 sps:$4 sm:$0xff]  }
 0x3a0   :  { %8150 = vmatprep.subr.bf16.mxu1 %v18691_v18  ;;  %v18757_v18 = vld [vmem:[#allocation2 + $0x18c4] ss:$28 sps:$4 sm:$0xff]  }
 0x3a1   :  { %v18755_v61 = vld [vmem:[#allocation2 + $0x18c0] ss:$28 sps:$4 sm:$0xff]  }
 0x3a2   :  { %8005 = vmatpush1.bf16.msra.mxu0 %v18692_v37  ;;  %v18763_v37 = vld [vmem:[#allocation2 + $0x18fc] ss:$28 sps:$4 sm:$0xff]  }
 0x3a3   :  { %8151 = vmatpush1.bf16.msra.mxu1 %v18689_v36  ;;  %8006 = vmatprep.subr.bf16.mxu0 %v18700_v43  ;;  %v18758_v36 = vld [vmem:[#allocation2 + $0x1ab0] ss:$28 sps:$4 sm:$0xff]   ;;  %v18761_v43 = vld [vmem:[#allocation2 + $0x18f8] ss:$28 sps:$4 sm:$0xff]  }
 0x3a4   :  { %8152 = vmatprep.subr.bf16.mxu1 %v18697_v33  ;;  %v18766_v33 = vld [vmem:[#allocation2 + $0x1aec] ss:$28 sps:$4 sm:$0xff]  }
 0x3a6   :  { %8007 = vmatpush1.bf16.msra.mxu0 %v18698_v45  ;;  %v18769_v45 = vld [vmem:[#allocation2 + $0x1934] ss:$28 sps:$4 sm:$0xff]  }
 0x3a7   :  { %8153 = vmatpush1.bf16.msra.mxu1 %v18695_v44  ;;  %8008 = vmatprep.subr.bf16.mxu0 %v18706_v48  ;;  %v18764_v44 = vld [vmem:[#allocation2 + $0x1ae8] ss:$28 sps:$4 sm:$0xff]   ;;  %v18767_v48 = vld [vmem:[#allocation2 + $0x1930] ss:$28 sps:$4 sm:$0xff]  }
 0x3a8   :  { %8154 = vmatprep.subr.bf16.mxu1 %v18703_v46  ;;  %v18772_v46 = vld [vmem:[#allocation2 + $0x1b24] ss:$28 sps:$4 sm:$0xff]  }
 0x3aa   :  { %8009 = vmatpush1.bf16.msra.mxu0 %v18704_v51  ;;  %v18775_v51 = vld [vmem:[#allocation2 + $0x196c] ss:$28 sps:$4 sm:$0xff]  }
 0x3ab   :  { %8155 = vmatpush1.bf16.msra.mxu1 %v18701_v50  ;;  %8019 = vmatprep.subr.bf16.mxu0 %v18712_v53  ;;  %v18770_v50 = vld [vmem:[#allocation2 + $0x1b20] ss:$28 sps:$4 sm:$0xff]   ;;  %v18773_v53 = vld [vmem:[#allocation2 + $0x1968] ss:$28 sps:$4 sm:$0xff]  }
 0x3ac   :  { %8156 = vmatprep.subr.bf16.mxu1 %v18709_v40  ;;  %v18778_v40 = vld [vmem:[#allocation2 + $0x1b5c] ss:$28 sps:$4 sm:$0xff]  }
 0x3ad   :  { %8011 = vmatmul.mubr.bf16.vlgmr.msra.gmra.mrb[28].mxu0 %v20756_v8 }
 0x3ae   :  { %8020 = vmatpush1.bf16.msra.mxu0 %v18710_v55  ;;  %8051 = vmatprep.mubr.bf16.mxu0 %v20767_v35  ;;  %v18781_v55 = vld [vmem:[#allocation2 + $0x19a4] ss:$28 sps:$4 sm:$0xff]  }
 0x3af   :  { %8157 = vmatpush1.bf16.msra.mxu1 %v18707_v54  ;;  %8021 = vmatprep.subr.bf16.mxu0 %v18718_v57  ;;  %v18776_v54 = vld [vmem:[#allocation2 + $0x1b58] ss:$28 sps:$4 sm:$0xff]  }
 0x3b0   :  { %8158 = vmatprep.subr.bf16.mxu1 %v18715_v56  ;;  %v18784_v56 = vld [vmem:[#allocation2 + $0x1b94] ss:$28 sps:$4 sm:$0xff]  }
 0x3b2   :  { %8022 = vmatpush1.bf16.msra.mxu0 %v18716_v59  ;;  %v18782_v59 = vld [vmem:[#allocation2 + $0x1b90] ss:$28 sps:$4 sm:$0xff]  }
 0x3b3   :  { %8159 = vmatpush1.bf16.msra.mxu1 %v18713_v58  ;;  %8023 = vmatprep.subr.bf16.mxu0 %v18724_v62  ;;  %v18779_v58 = vld [vmem:[#allocation2 + $0x19a0] ss:$28 sps:$4 sm:$0xff]  }
 0x3b4   :  { %8160 = vmatprep.subr.bf16.mxu1 %v18721_v60 }
 0x3b6   :  { %8024 = vmatpush1.bf16.msra.mxu0 %v18722_v1 }
 0x3b7   :  { %8161 = vmatpush1.bf16.msra.mxu1 %v18719_v63  ;;  %8025 = vmatprep.subr.bf16.mxu0 %v18730_v3 }
 0x3b8   :  { %8162 = vmatprep.subr.bf16.mxu1 %v18727_v2  ;;  %v18787_v2 = vld [vmem:[#allocation2 + $0x19dc] ss:$28 sps:$4 sm:$0xff]  }
 0x3ba   :  { %8026 = vmatpush1.bf16.msra.mxu0 %v18728_v5  ;;  %v18785_v5 = vld [vmem:[#allocation2 + $0x19d8] ss:$28 sps:$4 sm:$0xff]  }
 0x3bb   :  { %8163 = vmatpush1.bf16.msra.mxu1 %v18725_v4  ;;  %8027 = vmatprep.subr.bf16.mxu0 %v18736_v7  ;;  %v18790_v4 = vld [vmem:[#allocation2 + $0x1bcc] ss:$28 sps:$4 sm:$0xff]   ;;  %v18793_v7 = vld [vmem:[#allocation2 + $0x1a14] ss:$28 sps:$4 sm:$0xff]  }
 0x3bc   :  { %8164 = vmatprep.subr.bf16.mxu1 %v18733_v6  ;;  %v18788_v6 = vld [vmem:[#allocation2 + $0x1bc8] ss:$28 sps:$4 sm:$0xff]  }
 0x3be   :  { %8028 = vmatpush1.bf16.msra.mxu0 %v18734_v10  ;;  %v18791_v10 = vld [vmem:[#allocation2 + $0x1a10] ss:$28 sps:$4 sm:$0xff]  }
 0x3bf   :  { %8165 = vmatpush1.bf16.msra.mxu1 %v18731_v9  ;;  %8029 = vmatprep.subr.bf16.mxu0 %v18742_v12  ;;  %v18796_v9 = vld [vmem:[#allocation2 + $0x1c04] ss:$28 sps:$4 sm:$0xff]   ;;  %v18799_v12 = vld [vmem:[#allocation2 + $0x1a4c] ss:$28 sps:$4 sm:$0xff]  }
 0x3c0   :  { %8166 = vmatprep.subr.bf16.mxu1 %v18739_v11  ;;  %v18794_v11 = vld [vmem:[#allocation2 + $0x1c00] ss:$28 sps:$4 sm:$0xff]  }
 0x3c2   :  { %8030 = vmatpush1.bf16.msra.mxu0 %v18740_v20  ;;  %v18797_v20 = vld [vmem:[#allocation2 + $0x1a48] ss:$28 sps:$4 sm:$0xff]  }
 0x3c3   :  { %8167 = vmatpush1.bf16.msra.mxu1 %v18737_v13  ;;  %8031 = vmatprep.subr.bf16.mxu0 %v18748_v22  ;;  %v18802_v13 = vld [vmem:[#allocation2 + $0x1c3c] ss:$28 sps:$4 sm:$0xff]   ;;  %v18805_v22 = vld [vmem:[#allocation2 + $0x1a84] ss:$28 sps:$4 sm:$0xff]  }
 0x3c4   :  { %8168 = vmatprep.subr.bf16.mxu1 %v18745_v21  ;;  %v18800_v21 = vld [vmem:[#allocation2 + $0x1c38] ss:$28 sps:$4 sm:$0xff]  }
 0x3c6   :  { %8032 = vmatpush1.bf16.msra.mxu0 %v18746_v25  ;;  %v18803_v25 = vld [vmem:[#allocation2 + $0x1a80] ss:$28 sps:$4 sm:$0xff]  }
 0x3c7   :  { %8169 = vmatpush1.bf16.msra.mxu1 %v18743_v24  ;;  %8033 = vmatprep.subr.bf16.mxu0 %v18754_v29  ;;  %v18808_v24 = vld [vmem:[#allocation2 + $0x1c74] ss:$28 sps:$4 sm:$0xff]   ;;  %v18811_v29 = vld [vmem:[#allocation2 + $0x1abc] ss:$28 sps:$4 sm:$0xff]  }
 0x3c8   :  { %8170 = vmatprep.subr.bf16.mxu1 %v18751_v26  ;;  %v18806_v26 = vld [vmem:[#allocation2 + $0x1c70] ss:$28 sps:$4 sm:$0xff]  }
 0x3ca   :  { %8034 = vmatpush1.bf16.msra.mxu0 %v18752_v31  ;;  %v18809_v31 = vld [vmem:[#allocation2 + $0x1ab8] ss:$28 sps:$4 sm:$0xff]  }
 0x3cb   :  { %8171 = vmatpush1.bf16.msra.mxu1 %v18749_v30  ;;  %8035 = vmatprep.subr.bf16.mxu0 %v18760_v32  ;;  %v18814_v30 = vld [vmem:[#allocation2 + $0x1cac] ss:$28 sps:$4 sm:$0xff]   ;;  %v18817_v32 = vld [vmem:[#allocation2 + $0x1af4] ss:$28 sps:$4 sm:$0xff]  }
 0x3cc   :  { %8172 = vmatprep.subr.bf16.mxu1 %v18757_v18  ;;  %v18812_v18 = vld [vmem:[#allocation2 + $0x1ca8] ss:$28 sps:$4 sm:$0xff]  }
 0x3ce   :  { %8036 = vmatpush1.bf16.msra.mxu0 %v18758_v36  ;;  %v18815_v36 = vld [vmem:[#allocation2 + $0x1af0] ss:$28 sps:$4 sm:$0xff]  }
 0x3cf   :  { %8173 = vmatpush1.bf16.msra.mxu1 %v18755_v61  ;;  %8037 = vmatprep.subr.bf16.mxu0 %v18766_v33  ;;  %v18820_v61 = vld [vmem:[#allocation2 + $0x1ce4] ss:$28 sps:$4 sm:$0xff]   ;;  %v18823_v33 = vld [vmem:[#allocation2 + $0x1b2c] ss:$28 sps:$4 sm:$0xff]  }
 0x3d0   :  { %8183 = vmatprep.subr.bf16.mxu1 %v18763_v37  ;;  %v18818_v37 = vld [vmem:[#allocation2 + $0x1ce0] ss:$28 sps:$4 sm:$0xff]  }
 0x3d2   :  { %8175 = vmatmul.mubr.bf16.vlgmr.msra.gmra.mrb[36].mxu1 %v20756_v8  ;;  %8038 = vmatpush1.bf16.msra.mxu0 %v18764_v44  ;;  %v18821_v44 = vld [vmem:[#allocation2 + $0x1b28] ss:$28 sps:$4 sm:$0xff]  }
 0x3d3   :  { %8184 = vmatpush1.bf16.msra.mxu1 %v18761_v43  ;;  %8039 = vmatprep.subr.bf16.mxu0 %v18772_v46  ;;  %v18826_v43 = vld [vmem:[#allocation2 + $0x1d1c] ss:$28 sps:$4 sm:$0xff]   ;;  %v18829_v46 = vld [vmem:[#allocation2 + $0x1b64] ss:$28 sps:$4 sm:$0xff]  }
 0x3d4   :  { %8185 = vmatprep.subr.bf16.mxu1 %v18769_v45  ;;  %8215 = vmatprep.mubr.bf16.mxu1 %v20767_v35  ;;  %v18824_v45 = vld [vmem:[#allocation2 + $0x1d18] ss:$28 sps:$4 sm:$0xff]  }
 0x3d6   :  { %8040 = vmatpush1.bf16.msra.mxu0 %v18770_v50  ;;  %v18827_v50 = vld [vmem:[#allocation2 + $0x1b60] ss:$28 sps:$4 sm:$0xff]  }
 0x3d7   :  { %8186 = vmatpush1.bf16.msra.mxu1 %v18767_v48  ;;  %8041 = vmatprep.subr.bf16.mxu0 %v18778_v40  ;;  %v18832_v48 = vld [vmem:[#allocation2 + $0x1d54] ss:$28 sps:$4 sm:$0xff]  }
 0x3d8   :  { %8187 = vmatprep.subr.bf16.mxu1 %v18775_v51  ;;  %v20916_v57 = vpop.f32.mrb[8].mxu0  ;;  %v18830_v40 = vld [vmem:[#allocation2 + $0x1d50] ss:$28 sps:$4 sm:$0xff]  }
 0x3d9   :  { %v5816_v60 = vmax.f32 %v20836_v38, %v20916_v57  ;;  %v20920_v62 = vpop.f32.mrb[9].mxu0  ;;  %v19254_v38 = vld [vmem:[#allocation2 + $0x2680] ss:$28 sps:$4 sm:$0xff]   ;;  %v19257_v57 = vld [vmem:[#allocation2 + $0x2308] ss:$28 sps:$4 sm:$0xff]  }
 0x3da   :  { %8042 = vmatpush1.bf16.msra.mxu0 %v18776_v54  ;;  %v5817_v63 = vmax.f32 %v20838_v39, %v20920_v62  ;;  %v5487_v1 = vpop.f32.mrb[10].mxu0  ;;  %v18835_v54 = vld [vmem:[#allocation2 + $0x1b9c] ss:$28 sps:$4 sm:$0xff]  }
 0x3db   :  { %8188 = vmatpush1.bf16.msra.mxu1 %v18773_v53  ;;  %v5488_v3 = vpop.f32.mrb[11].mxu0  ;;  %8043 = vmatprep.subr.bf16.mxu0 %v18784_v56  ;;  %v18833_v1 = vld [vmem:[#allocation2 + $0x1b98] ss:$28 sps:$4 sm:$0xff]   ;;  %v19263_v62 = vld [vmem:[#allocation2 + $0x2340] ss:$28 sps:$4 sm:$0xff]  }
 0x3dc   :  { %8189 = vmatprep.subr.bf16.mxu1 %v18781_v55  ;;  %v18841_v3 = vld [vmem:[#allocation2 + $0x1bd4] ss:$28 sps:$4 sm:$0xff]  }
 0x3dd   :  { %v19260_v39 = vld [vmem:[#allocation2 + $0x26b8] ss:$28 sps:$4 sm:$0xff]  }
 0x3de   :  { %8044 = vmatpush1.bf16.msra.mxu0 %v18782_v59 }
 0x3df   :  { %8190 = vmatpush1.bf16.msra.mxu1 %v18779_v58  ;;  %8045 = vmatprep.subr.bf16.mxu0 %v18790_v4  ;;  %v18838_v58 = vld [vmem:[#allocation2 + $0x1d8c] ss:$28 sps:$4 sm:$0xff]   ;;  %v18844_v4 = vld [vmem:[#allocation2 + $0x1dc4] ss:$28 sps:$4 sm:$0xff]  }
 0x3e0   :  { %8191 = vmatprep.subr.bf16.mxu1 %v18787_v2  ;;  %v18836_v2 = vld [vmem:[#allocation2 + $0x1d88] ss:$28 sps:$4 sm:$0xff]  }
 0x3e2   :  { %8046 = vmatpush1.bf16.msra.mxu0 %v18788_v6  ;;  %v18842_v6 = vld [vmem:[#allocation2 + $0x1dc0] ss:$28 sps:$4 sm:$0xff]  }
 0x3e3   :  { %8192 = vmatpush1.bf16.msra.mxu1 %v18785_v5  ;;  %8047 = vmatprep.subr.bf16.mxu0 %v18796_v9  ;;  %v18839_v5 = vld [vmem:[#allocation2 + $0x1bd0] ss:$28 sps:$4 sm:$0xff]   ;;  %v18850_v9 = vld [vmem:[#allocation2 + $0x1dfc] ss:$28 sps:$4 sm:$0xff]  }
 0x3e4   :  { %8193 = vmatprep.subr.bf16.mxu1 %v18793_v7  ;;  %v18847_v7 = vld [vmem:[#allocation2 + $0x1c0c] ss:$28 sps:$4 sm:$0xff]  }
 0x3e6   :  { %8048 = vmatpush1.bf16.msra.mxu0 %v18794_v11  ;;  %v18848_v11 = vld [vmem:[#allocation2 + $0x1df8] ss:$28 sps:$4 sm:$0xff]  }
 0x3e7   :  { %8194 = vmatpush1.bf16.msra.mxu1 %v18791_v10  ;;  %8049 = vmatprep.subr.bf16.mxu0 %v18802_v13  ;;  %v18845_v10 = vld [vmem:[#allocation2 + $0x1c08] ss:$28 sps:$4 sm:$0xff]   ;;  %v18856_v13 = vld [vmem:[#allocation2 + $0x1e34] ss:$28 sps:$4 sm:$0xff]  }
 0x3e8   :  { %8195 = vmatprep.subr.bf16.mxu1 %v18799_v12  ;;  %v18853_v12 = vld [vmem:[#allocation2 + $0x1c44] ss:$28 sps:$4 sm:$0xff]  }
 0x3ea   :  { %8050 = vmatpush1.bf16.msra.mxu0 %v18800_v21  ;;  %v18854_v21 = vld [vmem:[#allocation2 + $0x1e30] ss:$28 sps:$4 sm:$0xff]  }
 0x3eb   :  { %8196 = vmatpush1.bf16.msra.mxu1 %v18797_v20  ;;  %8060 = vmatprep.subr.bf16.mxu0 %v18808_v24  ;;  %v18851_v20 = vld [vmem:[#allocation2 + $0x1c40] ss:$28 sps:$4 sm:$0xff]   ;;  %v18862_v24 = vld [vmem:[#allocation2 + $0x1e6c] ss:$28 sps:$4 sm:$0xff]  }
 0x3ec   :  { %8197 = vmatprep.subr.bf16.mxu1 %v18805_v22  ;;  %v18859_v22 = vld [vmem:[#allocation2 + $0x1c7c] ss:$28 sps:$4 sm:$0xff]  }
 0x3ed   :  { %8052 = vmatmul.mubr.bf16.vlgmr.msra.gmra.mrb[28].mxu0 %v20773_v15 }
 0x3ee   :  { %8061 = vmatpush1.bf16.msra.mxu0 %v18806_v26  ;;  %8092 = vmatprep.mubr.bf16.mxu0 %v20782_v19  ;;  %v18860_v26 = vld [vmem:[#allocation2 + $0x1e68] ss:$28 sps:$4 sm:$0xff]  }
 0x3ef   :  { %8198 = vmatpush1.bf16.msra.mxu1 %v18803_v25  ;;  %8062 = vmatprep.subr.bf16.mxu0 %v18814_v30  ;;  %v18857_v25 = vld [vmem:[#allocation2 + $0x1c78] ss:$28 sps:$4 sm:$0xff]   ;;  %v18868_v30 = vld [vmem:[#allocation2 + $0x1ea4] ss:$28 sps:$4 sm:$0xff]  }
 0x3f0   :  { %8199 = vmatprep.subr.bf16.mxu1 %v18811_v29  ;;  %v18865_v29 = vld [vmem:[#allocation2 + $0x1cb4] ss:$28 sps:$4 sm:$0xff]  }
 0x3f2   :  { %8063 = vmatpush1.bf16.msra.mxu0 %v18812_v18  ;;  %v18866_v18 = vld [vmem:[#allocation2 + $0x1ea0] ss:$28 sps:$4 sm:$0xff]  }
 0x3f3   :  { %8200 = vmatpush1.bf16.msra.mxu1 %v18809_v31  ;;  %8064 = vmatprep.subr.bf16.mxu0 %v18820_v61  ;;  %v18863_v31 = vld [vmem:[#allocation2 + $0x1cb0] ss:$28 sps:$4 sm:$0xff]   ;;  %v18874_v61 = vld [vmem:[#allocation2 + $0x1edc] ss:$28 sps:$4 sm:$0xff]  }
 0x3f4   :  { %8201 = vmatprep.subr.bf16.mxu1 %v18817_v32  ;;  %v18871_v32 = vld [vmem:[#allocation2 + $0x1cec] ss:$28 sps:$4 sm:$0xff]  }
 0x3f6   :  { %8065 = vmatpush1.bf16.msra.mxu0 %v18818_v37  ;;  %v18872_v37 = vld [vmem:[#allocation2 + $0x1ed8] ss:$28 sps:$4 sm:$0xff]  }
 0x3f7   :  { %8202 = vmatpush1.bf16.msra.mxu1 %v18815_v36  ;;  %8066 = vmatprep.subr.bf16.mxu0 %v18826_v43  ;;  %v18869_v36 = vld [vmem:[#allocation2 + $0x1ce8] ss:$28 sps:$4 sm:$0xff]   ;;  %v18880_v43 = vld [vmem:[#allocation2 + $0x1f14] ss:$28 sps:$4 sm:$0xff]  }
 0x3f8   :  { %8203 = vmatprep.subr.bf16.mxu1 %v18823_v33  ;;  %v17152_v51 = vpop.f32.mrb[12].mxu0  ;;  %v18877_v33 = vld [vmem:[#allocation2 + $0x1d24] ss:$28 sps:$4 sm:$0xff]  }
 0x3f9   :  { %v17153_v53 = vpop.f32.mrb[13].mxu0 }
 0x3fa   :  { %8067 = vmatpush1.bf16.msra.mxu0 %v18824_v45  ;;  %v20926_v55 = vadd.f32 %v17153_v53, %v17152_v51  ;;  %v17155_v56 = vpop.f32.mrb[14].mxu0  ;;  %v18886_v53 = vld [vmem:[#allocation2 + $0x1f4c] ss:$28 sps:$4 sm:$0xff]  }
 0x3fb   :  { %8204 = vmatpush1.bf16.msra.mxu1 %v18821_v44  ;;  %8068 = vmatprep.subr.bf16.mxu0 %v18832_v48  ;;  %v17156_v59 = vpop.f32.mrb[15].mxu0  ;;  %v18875_v44 = vld [vmem:[#allocation2 + $0x1d20] ss:$28 sps:$4 sm:$0xff]  }
 0x3fc   :  { %8205 = vmatprep.subr.bf16.mxu1 %v18829_v46  ;;  %v18878_v46 = vld [vmem:[#allocation2 + $0x1f10] ss:$28 sps:$4 sm:$0xff]   ;;  %v18884_v59 = vld [vmem:[#allocation2 + $0x1f48] ss:$28 sps:$4 sm:$0xff]  }
 0x3fe   :  { %8069 = vmatpush1.bf16.msra.mxu0 %v18830_v40 }
 0x3ff   :  { %8206 = vmatpush1.bf16.msra.mxu1 %v18827_v50  ;;  %8070 = vmatprep.subr.bf16.mxu0 %v18838_v58  ;;  %v18883_v50 = vld [vmem:[#allocation2 + $0x1d5c] ss:$28 sps:$4 sm:$0xff]  }
 0x400   :  { %8207 = vmatprep.subr.bf16.mxu1 %v18835_v54  ;;  %v18881_v58 = vld [vmem:[#allocation2 + $0x1d58] ss:$28 sps:$4 sm:$0xff]  }
 0x402   :  { %8071 = vmatpush1.bf16.msra.mxu0 %v18836_v2  ;;  %v18892_v2 = vld [vmem:[#allocation2 + $0x1f84] ss:$28 sps:$4 sm:$0xff]  }
 0x403   :  { %8208 = vmatpush1.bf16.msra.mxu1 %v18833_v1  ;;  %8072 = vmatprep.subr.bf16.mxu0 %v18844_v4  ;;  %v18889_v1 = vld [vmem:[#allocation2 + $0x1d94] ss:$28 sps:$4 sm:$0xff]   ;;  %v18890_v4 = vld [vmem:[#allocation2 + $0x1f80] ss:$28 sps:$4 sm:$0xff]  }
 0x404   :  { %8209 = vmatprep.subr.bf16.mxu1 %v18841_v3  ;;  %v18887_v3 = vld [vmem:[#allocation2 + $0x1d90] ss:$28 sps:$4 sm:$0xff]  }
 0x406   :  { %8073 = vmatpush1.bf16.msra.mxu0 %v18842_v6  ;;  %v18898_v6 = vld [vmem:[#allocation2 + $0x1fbc] ss:$28 sps:$4 sm:$0xff]  }
 0x407   :  { %8210 = vmatpush1.bf16.msra.mxu1 %v18839_v5  ;;  %8074 = vmatprep.subr.bf16.mxu0 %v18850_v9  ;;  %v18895_v5 = vld [vmem:[#allocation2 + $0x1dcc] ss:$28 sps:$4 sm:$0xff]   ;;  %v18901_v9 = vld [vmem:[#allocation2 + $0x1e04] ss:$28 sps:$4 sm:$0xff]  }
 0x408   :  { %8211 = vmatprep.subr.bf16.mxu1 %v18847_v7  ;;  %v18893_v7 = vld [vmem:[#allocation2 + $0x1dc8] ss:$28 sps:$4 sm:$0xff]  }
 0x40a   :  { %8075 = vmatpush1.bf16.msra.mxu0 %v18848_v11  ;;  %v18899_v11 = vld [vmem:[#allocation2 + $0x1e00] ss:$28 sps:$4 sm:$0xff]  }
 0x40b   :  { %8212 = vmatpush1.bf16.msra.mxu1 %v18845_v10  ;;  %8076 = vmatprep.subr.bf16.mxu0 %v18856_v13  ;;  %v18910_v10 = vld [vmem:[#allocation2 + $0x1ff4] ss:$28 sps:$4 sm:$0xff]  }
 0x40c   :  { %8213 = vmatprep.subr.bf16.mxu1 %v18853_v12  ;;  %v18904_v12 = vld [vmem:[#allocation2 + $0x1e3c] ss:$28 sps:$4 sm:$0xff]   ;;  %v18908_v13 = vld [vmem:[#allocation2 + $0x1ff0] ss:$28 sps:$4 sm:$0xff]  }
 0x40e   :  { %8077 = vmatpush1.bf16.msra.mxu0 %v18854_v21  ;;  %v18902_v21 = vld [vmem:[#allocation2 + $0x1e38] ss:$28 sps:$4 sm:$0xff]  }
 0x40f   :  { %8214 = vmatpush1.bf16.msra.mxu1 %v18851_v20  ;;  %8078 = vmatprep.subr.bf16.mxu0 %v18862_v24  ;;  %v18916_v20 = vld [vmem:[#allocation2 + $0x1584] ss:$28 sps:$4 sm:$0xff]   ;;  %v18905_v24 = vld [vmem:[#allocation2 + $0x1e70] ss:$28 sps:$4 sm:$0xff]  }
 0x410   :  { %8224 = vmatprep.subr.bf16.mxu1 %v18859_v22  ;;  %v18907_v22 = vld [vmem:[#allocation2 + $0x1e74] ss:$28 sps:$4 sm:$0xff]  }
 0x412   :  { %8216 = vmatmul.mubr.bf16.vlgmr.msra.gmra.mrb[36].mxu1 %v20773_v15  ;;  %8079 = vmatpush1.bf16.msra.mxu0 %v18860_v26  ;;  %v18911_v26 = vld [vmem:[#allocation2 + $0x1ea8] ss:$28 sps:$4 sm:$0xff]  }
 0x413   :  { %8225 = vmatpush1.bf16.msra.mxu1 %v18857_v25  ;;  %8080 = vmatprep.subr.bf16.mxu0 %v18868_v30  ;;  %v18913_v25 = vld [vmem:[#allocation2 + $0x1eac] ss:$28 sps:$4 sm:$0xff]   ;;  %v18919_v30 = vld [vmem:[#allocation2 + $0x1ee4] ss:$28 sps:$4 sm:$0xff]  }
 0x414   :  { %8226 = vmatprep.subr.bf16.mxu1 %v18865_v29  ;;  %8256 = vmatprep.mubr.bf16.mxu1 %v20782_v19  ;;  %v18914_v29 = vld [vmem:[#allocation2 + $0x1580] ss:$28 sps:$4 sm:$0xff]  }
 0x416   :  { %8081 = vmatpush1.bf16.msra.mxu0 %v18866_v18 }
 0x417   :  { %8227 = vmatpush1.bf16.msra.mxu1 %v18863_v31  ;;  %8082 = vmatprep.subr.bf16.mxu0 %v18874_v61  ;;  %v18922_v31 = vld [vmem:[#allocation2 + $0x15bc] ss:$28 sps:$4 sm:$0xff]  }
 0x418   :  { %8228 = vmatprep.subr.bf16.mxu1 %v18871_v32  ;;  %v17174_v45 = vpop.f32.mrb[16].mxu0  ;;  %v18917_v32 = vld [vmem:[#allocation2 + $0x1ee0] ss:$28 sps:$4 sm:$0xff]   ;;  %v18920_v61 = vld [vmem:[#allocation2 + $0x15b8] ss:$28 sps:$4 sm:$0xff]  }
 0x419   :  { %v17175_v48 = vpop.f32.mrb[17].mxu0 }
 0x41a   :  { %8083 = vmatpush1.bf16.msra.mxu0 %v18872_v37  ;;  %v17176_v51 = vadd.f32 %v17175_v48, %v17174_v45  ;;  %v17177_v40 = vpop.f32.mrb[18].mxu0  ;;  %v18928_v45 = vld [vmem:[#allocation2 + $0x15f4] ss:$28 sps:$4 sm:$0xff]  }
 0x41b   :  { %8229 = vmatpush1.bf16.msra.mxu1 %v18869_v36  ;;  %8084 = vmatprep.subr.bf16.mxu0 %v18880_v43  ;;  %v17178_v54 = vpop.f32.mrb[19].mxu0  ;;  %v20938_v36 = vld [vmem:[%s21201_s0 + $0x18] ss:$0 sps:$4 sm:$0xff]   ;;  %v18931_v40 = vld [vmem:[#allocation2 + $0x1f54] ss:$28 sps:$4 sm:$0xff]  }
 0x41c   :  { %8230 = vmatprep.subr.bf16.mxu1 %v18877_v33  ;;  %v20931_v56 = vadd.f32 %v17176_v51, %v20926_v55  ;;  %v18896_v55 = vld [vmem:[#allocation2 + $0x1fb8] ss:$28 sps:$4 sm:$0xff]   ;;  %v18926_v51 = vld [vmem:[#allocation2 + $0x15f0] ss:$28 sps:$4 sm:$0xff]  }
 0x41d   :  { %v18925_v33 = vld [vmem:[#allocation2 + $0x1f1c] ss:$28 sps:$4 sm:$0xff]  }
 0x41e   :  { %8085 = vmatpush1.bf16.msra.mxu0 %v18878_v46 }
 0x41f   :  { %8231 = vmatpush1.bf16.msra.mxu1 %v18875_v44  ;;  %8086 = vmatprep.subr.bf16.mxu0 %v18886_v53  ;;  %v18934_v53 = vld [vmem:[#allocation2 + $0x162c] ss:$28 sps:$4 sm:$0xff]  }
 0x420   :  { %8232 = vmatprep.subr.bf16.mxu1 %v18883_v50  ;;  %v18923_v50 = vld [vmem:[#allocation2 + $0x1f18] ss:$28 sps:$4 sm:$0xff]  }
 0x422   :  { %8087 = vmatpush1.bf16.msra.mxu0 %v18884_v59  ;;  %v18932_v59 = vld [vmem:[#allocation2 + $0x1628] ss:$28 sps:$4 sm:$0xff]  }
 0x423   :  { %8233 = vmatpush1.bf16.msra.mxu1 %v18881_v58  ;;  %8088 = vmatprep.subr.bf16.mxu0 %v18892_v2  ;;  %v18929_v58 = vld [vmem:[#allocation2 + $0x1f50] ss:$28 sps:$4 sm:$0xff]  }
 0x424   :  { %8234 = vmatprep.subr.bf16.mxu1 %v18889_v1 }
 0x426   :  { %8089 = vmatpush1.bf16.msra.mxu0 %v18890_v4 }
 0x427   :  { %8235 = vmatpush1.bf16.msra.mxu1 %v18887_v3  ;;  %8090 = vmatprep.subr.bf16.mxu0 %v18898_v6  ;;  %v18937_v3 = vld [vmem:[#allocation2 + $0x1f8c] ss:$28 sps:$4 sm:$0xff]  }
 0x428   :  { %8236 = vmatprep.subr.bf16.mxu1 %v18895_v5 }
 0x42a   :  { %8091 = vmatpush1.bf16.msra.mxu0 %v18896_v55  ;;  %v18938_v55 = vld [vmem:[#allocation2 + $0x1660] ss:$28 sps:$4 sm:$0xff]  }
 0x42b   :  { %8237 = vmatpush1.bf16.msra.mxu1 %v18893_v7  ;;  %8101 = vmatprep.subr.bf16.mxu0 %v18910_v10  ;;  %v18935_v7 = vld [vmem:[#allocation2 + $0x1f88] ss:$28 sps:$4 sm:$0xff]   ;;  %v18946_v10 = vld [vmem:[#allocation2 + $0x169c] ss:$28 sps:$4 sm:$0xff]  }
 0x42c   :  { %8238 = vmatprep.subr.bf16.mxu1 %v18901_v9  ;;  %v18943_v9 = vld [vmem:[#allocation2 + $0x1fc4] ss:$28 sps:$4 sm:$0xff]  }
 0x42d   :  { %8093 = vmatmul.mubr.bf16.vlgmr.msra.gmra.mrb[28].mxu0 %v20790_v23 }
 0x42e   :  { %8102 = vmatpush1.bf16.msra.mxu0 %v18908_v13  ;;  %8133 = vmatprep.mubr.bf16.mxu0 %v20552_v0  ;;  %v18952_v13 = vld [vmem:[#allocation2 + $0x16d4] ss:$28 sps:$4 sm:$0xff]  }
 0x42f   :  { %8239 = vmatpush1.bf16.msra.mxu1 %v18899_v11  ;;  %8306 = vmatprep.subr.bf16.mxu0 %v18916_v20  ;;  %v18941_v11 = vld [vmem:[#allocation2 + $0x1fc0] ss:$28 sps:$4 sm:$0xff]  }
 0x430   :  { %8240 = vmatprep.subr.bf16.mxu1 %v18904_v12  ;;  %v18944_v12 = vld [vmem:[#allocation2 + $0x1698] ss:$28 sps:$4 sm:$0xff]  }
 0x431   :  { %v18949_v20 = vld [vmem:[#allocation2 + $0x1ffc] ss:$28 sps:$4 sm:$0xff]  }
 0x433   :  { %8241 = vmatpush1.bf16.msra.mxu1 %v18902_v21  ;;  %v18947_v21 = vld [vmem:[#allocation2 + $0x1ff8] ss:$28 sps:$4 sm:$0xff]  }
 0x434   :  { %8242 = vmatprep.subr.bf16.mxu1 %v18907_v22  ;;  %v18950_v22 = vld [vmem:[#allocation2 + $0x16d0] ss:$28 sps:$4 sm:$0xff]  }
 0x437   :  { %8243 = vmatpush1.bf16.msra.mxu1 %v18905_v24  ;;  %v18955_v24 = vld [vmem:[#allocation2 + $0x170c] ss:$28 sps:$4 sm:$0xff]  }
 0x438   :  { %8244 = vmatprep.subr.bf16.mxu1 %v18913_v25  ;;  %v17196_v18 = vpop.f32.mrb[20].mxu0  ;;  %v18959_v25 = vld [vmem:[#allocation2 + $0x1748] ss:$28 sps:$4 sm:$0xff]  }
 0x439   :  { %16246 = vmatmul.mubr.msk.bf16.vlgmr.msra.gmra.mrb[28].mxu0 %vm2349_vm0, %v20938_v36  ;;  %v17197_v37 = vpop.f32.mrb[21].mxu0 }
 0x43a   :  { %8307 = vmatpush1.bf16.msra.mxu0 %v18914_v29  ;;  %v17198_v43 = vadd.f32 %v17197_v37, %v17196_v18  ;;  %v17199_v44 = vpop.f32.mrb[22].mxu0  ;;  %8338 = vmatprep.mubr.bf16.mxu0 %v20752_v52  ;;  %v18958_v29 = vld [vmem:[#allocation2 + $0x1744] ss:$28 sps:$4 sm:$0xff]   ;;  %v18968_v37 = vld [vmem:[#allocation2 + $0x17b4] ss:$28 sps:$4 sm:$0xff]  }
 0x43b   :  { %8245 = vmatpush1.bf16.msra.mxu1 %v18911_v26  ;;  %8308 = vmatprep.subr.bf16.mxu0 %v18922_v31  ;;  %v17200_v46 = vpop.f32.mrb[23].mxu0  ;;  %v18953_v26 = vld [vmem:[#allocation2 + $0x1708] ss:$28 sps:$4 sm:$0xff]   ;;  %v18963_v31 = vld [vmem:[#allocation2 + $0x177c] ss:$28 sps:$4 sm:$0xff]  }
 0x43c   :  { %8246 = vmatprep.subr.bf16.mxu1 %v18919_v30  ;;  %v5769_v48 = vadd.f32 %v17198_v43, %v20931_v56  ;;  %v18940_v56 = vld [vmem:[#allocation2 + $0x1664] ss:$28 sps:$4 sm:$0xff]   ;;  %v18966_v43 = vld [vmem:[#allocation2 + $0x17b0] ss:$28 sps:$4 sm:$0xff]   ;;  %v18969_v44 = vld [vmem:[#allocation2 + $0x17b8] ss:$28 sps:$4 sm:$0xff]  }
 0x43d   :  { %v18956_v30 = vld [vmem:[#allocation2 + $0x1740] ss:$28 sps:$4 sm:$0xff]   ;;  %v18960_v18 = vld [vmem:[#allocation2 + $0x1588] ss:$28 sps:$4 sm:$0xff]   ;;  %v18970_v46 = vld [vmem:[#allocation2 + $0x15f8] ss:$28 sps:$4 sm:$0xff]  }
 0x43e   :  { %8309 = vmatpush1.bf16.msra.mxu0 %v18920_v61  ;;  %v18964_v61 = vld [vmem:[#allocation2 + $0x1780] ss:$28 sps:$4 sm:$0xff]  }
 0x43f   :  { %8247 = vmatpush1.bf16.msra.mxu1 %v18917_v32  ;;  %8310 = vmatprep.subr.bf16.mxu0 %v18928_v45  ;;  %v18961_v32 = vld [vmem:[#allocation2 + $0x1778] ss:$28 sps:$4 sm:$0xff]   ;;  %v18973_v45 = vld [vmem:[#allocation2 + $0x17ec] ss:$28 sps:$4 sm:$0xff]  }
 0x440   :  { %8248 = vmatprep.subr.bf16.mxu1 %v18925_v33  ;;  %v5808_v54 = vpop.f32.mrb[24].mxu0  ;;  %v18965_v33 = vld [vmem:[#allocation2 + $0x15c0] ss:$28 sps:$4 sm:$0xff]  }
 0x441   :  { %v20944_v1 = vadd.f32 %v5808_v54, %v5769_v48  ;;  %v17390_v2 = vpop.f32.mrb[25].mxu0  ;;  %v18971_v48 = vld [vmem:[#allocation2 + $0x17e8] ss:$28 sps:$4 sm:$0xff]  }
 0x442   :  { %8311 = vmatpush1.bf16.msra.mxu0 %v18926_v51  ;;  %v5811_v4 = vpop.f32.mrb[26].mxu0  ;;  %v18978_v51 = vld [vmem:[#allocation2 + $0x1824] ss:$28 sps:$4 sm:$0xff]  }
 0x443   :  { %8249 = vmatpush1.bf16.msra.mxu1 %v18923_v50  ;;  %v5820_v5 = vmax.f32 %v20866_v16, %v20944_v1  ;;  %8312 = vmatprep.subr.bf16.mxu0 %v18934_v53  ;;  %v17391_v6 = vpop.f32.mrb[27].mxu0  ;;  %v18974_v50 = vld [vmem:[#allocation2 + $0x17f0] ss:$28 sps:$4 sm:$0xff]   ;;  %v18976_v2 = vld [vmem:[#allocation2 + $0x1820] ss:$28 sps:$4 sm:$0xff]  }
 0x444   :  { %8250 = vmatprep.subr.bf16.mxu1 %v18931_v40  ;;  %v18983_v4 = vld [vmem:[#allocation2 + $0x185c] ss:$28 sps:$4 sm:$0xff]   ;;  %v18980_v6 = vld [vmem:[#allocation2 + $0x1668] ss:$28 sps:$4 sm:$0xff]  }
 0x445   :  { %v19418_v16 = vld [vmem:[#allocation2 + $0x218c] ss:$28 sps:$4 sm:$0xff]  }
 0x446   :  { %8313 = vmatpush1.bf16.msra.mxu0 %v18932_v59  ;;  %v18975_v59 = vld [vmem:[#allocation2 + $0x1630] ss:$28 sps:$4 sm:$0xff]  }
 0x447   :  { %8251 = vmatpush1.bf16.msra.mxu1 %v18929_v58  ;;  %8314 = vmatprep.subr.bf16.mxu0 %v18940_v56  ;;  %v18979_v56 = vld [vmem:[#allocation2 + $0x1828] ss:$28 sps:$4 sm:$0xff]  }
 0x448   :  { %8252 = vmatprep.subr.bf16.mxu1 %v18937_v3  ;;  %v19421_v1 = vld [vmem:[#allocation2 + $0x292c] ss:$28 sps:$4 sm:$0xff]  }
 0x44a   :  { %8315 = vmatpush1.bf16.msra.mxu0 %v18938_v55  ;;  %v18984_v55 = vld [vmem:[#allocation2 + $0x1860] ss:$28 sps:$4 sm:$0xff]  }
 0x44b   :  { %8253 = vmatpush1.bf16.msra.mxu1 %v18935_v7  ;;  %8316 = vmatprep.subr.bf16.mxu0 %v18946_v10  ;;  %v18981_v7 = vld [vmem:[#allocation2 + $0x1858] ss:$28 sps:$4 sm:$0xff]   ;;  %v18985_v10 = vld [vmem:[#allocation2 + $0x16a0] ss:$28 sps:$4 sm:$0xff]  }
 0x44c   :  { %8254 = vmatprep.subr.bf16.mxu1 %v18943_v9  ;;  %v18988_v9 = vld [vmem:[#allocation2 + $0x1894] ss:$28 sps:$4 sm:$0xff]  }
 0x44e   :  { %8317 = vmatpush1.bf16.msra.mxu0 %v18944_v12  ;;  %v18989_v12 = vld [vmem:[#allocation2 + $0x1898] ss:$28 sps:$4 sm:$0xff]  }
 0x44f   :  { %8255 = vmatpush1.bf16.msra.mxu1 %v18941_v11  ;;  %8318 = vmatprep.subr.bf16.mxu0 %v18952_v13  ;;  %v18986_v11 = vld [vmem:[#allocation2 + $0x1890] ss:$28 sps:$4 sm:$0xff]  }
 0x450   :  { %8265 = vmatprep.subr.bf16.mxu1 %v18949_v20  ;;  %v18993_v13 = vld [vmem:[#allocation2 + $0x18cc] ss:$28 sps:$4 sm:$0xff]   ;;  %v18990_v20 = vld [vmem:[#allocation2 + $0x16d8] ss:$28 sps:$4 sm:$0xff]  }
 0x452   :  { %8257 = vmatmul.mubr.bf16.vlgmr.msra.gmra.mrb[36].mxu1 %v20790_v23  ;;  %8319 = vmatpush1.bf16.msra.mxu0 %v18950_v22  ;;  %v18994_v22 = vld [vmem:[#allocation2 + $0x18d0] ss:$28 sps:$4 sm:$0xff]  }
 0x453   :  { %8266 = vmatpush1.bf16.msra.mxu1 %v18947_v21  ;;  %8320 = vmatprep.subr.bf16.mxu0 %v18955_v24  ;;  %v18991_v21 = vld [vmem:[#allocation2 + $0x18c8] ss:$28 sps:$4 sm:$0xff]  }
 0x454   :  { %8297 = vmatprep.mubr.bf16.mxu1 %v20552_v0  ;;  %17204 = vmatprep.subr.bf16.mxu1 %v18959_v25  ;;  %v18998_v24 = vld [vmem:[#allocation2 + $0x1904] ss:$28 sps:$4 sm:$0xff]   ;;  %v18995_v25 = vld [vmem:[#allocation2 + $0x1710] ss:$28 sps:$4 sm:$0xff]  }
 0x456   :  { %8321 = vmatpush1.bf16.msra.mxu0 %v18953_v26  ;;  %v18996_v26 = vld [vmem:[#allocation2 + $0x1900] ss:$28 sps:$4 sm:$0xff]  }
 0x457   :  { %8322 = vmatprep.subr.bf16.mxu0 %v18958_v29  ;;  %v18999_v29 = vld [vmem:[#allocation2 + $0x1ac8] ss:$28 sps:$4 sm:$0xff]  }
 0x45a   :  { %8323 = vmatpush1.bf16.msra.mxu0 %v18956_v30  ;;  %v19003_v30 = vld [vmem:[#allocation2 + $0x193c] ss:$28 sps:$4 sm:$0xff]  }
 0x45b   :  { %8324 = vmatprep.subr.bf16.mxu0 %v18963_v31  ;;  %v19000_v31 = vld [vmem:[#allocation2 + $0x1908] ss:$28 sps:$4 sm:$0xff]  }
 0x45e   :  { %16247 = vmatmul.mubr.msk.bf16.vlgmr.msra.gmra.mrb[36].mxu1 %vm2349_vm0, %v20938_v36  ;;  %8325 = vmatpush1.bf16.msra.mxu0 %v18961_v32  ;;  %v19004_v32 = vld [vmem:[#allocation2 + $0x1b00] ss:$28 sps:$4 sm:$0xff]  }
 0x45f   :  { %17205 = vmatpush3.bf16.msra.mxu1 %v18960_v18  ;;  %8326 = vmatprep.subr.bf16.mxu0 %v18968_v37  ;;  %v19001_v18 = vld [vmem:[#allocation2 + $0x1938] ss:$28 sps:$4 sm:$0xff]   ;;  %v19005_v37 = vld [vmem:[#allocation2 + $0x1940] ss:$28 sps:$4 sm:$0xff]  }
 0x460   :  { %17206 = vmatprep.subr.bf16.mxu1 %v18964_v61  ;;  %8502 = vmatprep.mubr.bf16.mxu1 %v20752_v52  ;;  %v19008_v61 = vld [vmem:[#allocation2 + $0x1974] ss:$28 sps:$4 sm:$0xff]  }
 0x462   :  { %8327 = vmatpush1.bf16.msra.mxu0 %v18966_v43  ;;  %v19009_v43 = vld [vmem:[#allocation2 + $0x1b38] ss:$28 sps:$4 sm:$0xff]  }
 0x463   :  { %17207 = vmatpush3.bf16.msra.mxu1 %v18965_v33  ;;  %8328 = vmatprep.subr.bf16.mxu0 %v18973_v45  ;;  %v19006_v33 = vld [vmem:[#allocation2 + $0x1970] ss:$28 sps:$4 sm:$0xff]   ;;  %v19010_v45 = vld [vmem:[#allocation2 + $0x1978] ss:$28 sps:$4 sm:$0xff]  }
 0x464   :  { %17208 = vmatprep.subr.bf16.mxu1 %v18969_v44  ;;  %v19013_v44 = vld [vmem:[#allocation2 + $0x19ac] ss:$28 sps:$4 sm:$0xff]  }
 0x465   :  { %v20953_v40 = vpop.f32.mrb[32].mxu1 }
 0x466   :  { %v5818_v36 = vmax.f32 %v20876_v41, %v20953_v40  ;;  %v20957_v53 = vpop.f32.mrb[33].mxu1  ;;  %8329 = vmatpush1.bf16.msra.mxu0 %v18971_v48  ;;  %v19014_v48 = vld [vmem:[#allocation2 + $0x1b70] ss:$28 sps:$4 sm:$0xff]   ;;  %v19490_v41 = vld [vmem:[#allocation2 + $0x2498] ss:$28 sps:$4 sm:$0xff]  }
 0x467   :  { %17209 = vmatpush3.bf16.msra.mxu1 %v18970_v46  ;;  %v5819_v54 = vmax.f32 %v20879_v42, %v20957_v53  ;;  %v5651_v58 = vpop.f32.mrb[34].mxu1  ;;  %8330 = vmatprep.subr.bf16.mxu0 %v18978_v51  ;;  %v19011_v46 = vld [vmem:[#allocation2 + $0x19a8] ss:$28 sps:$4 sm:$0xff]   ;;  %v19015_v51 = vld [vmem:[#allocation2 + $0x19b0] ss:$28 sps:$4 sm:$0xff]  }
 0x468   :  { %v5652_v3 = vpop.f32.mrb[35].mxu1  ;;  %17210 = vmatprep.subr.bf16.mxu1 %v18974_v50  ;;  %v19018_v50 = vld [vmem:[#allocation2 + $0x19e4] ss:$28 sps:$4 sm:$0xff]   ;;  %v19495_v42 = vld [vmem:[#allocation2 + $0x24d0] ss:$28 sps:$4 sm:$0xff]  }
 0x469   :  { %v19016_v58 = vld [vmem:[#allocation2 + $0x19e0] ss:$28 sps:$4 sm:$0xff]   ;;  %v19020_v3 = vld [vmem:[#allocation2 + $0x19e8] ss:$28 sps:$4 sm:$0xff]   ;;  %v19499_v53 = vld [vmem:[#allocation2 + $0x2158] ss:$28 sps:$4 sm:$0xff]  }
 0x46a   :  { %8331 = vmatpush1.bf16.msra.mxu0 %v18976_v2  ;;  %v19023_v2 = vld [vmem:[#allocation2 + $0x1a1c] ss:$28 sps:$4 sm:$0xff]  }
 0x46b   :  { %17211 = vmatpush3.bf16.msra.mxu1 %v18975_v59  ;;  %8332 = vmatprep.subr.bf16.mxu0 %v18983_v4  ;;  %v19019_v59 = vld [vmem:[#allocation2 + $0x1ba8] ss:$28 sps:$4 sm:$0xff]   ;;  %v19024_v4 = vld [vmem:[#allocation2 + $0x1be0] ss:$28 sps:$4 sm:$0xff]  }
 0x46c   :  { %17212 = vmatprep.subr.bf16.mxu1 %v18979_v56  ;;  %v19021_v56 = vld [vmem:[#allocation2 + $0x1a18] ss:$28 sps:$4 sm:$0xff]   ;;  %v19494_v40 = vld [vmem:[#allocation2 + $0x2120] ss:$28 sps:$4 sm:$0xff]  }
 0x46e   :  { %8333 = vmatpush1.bf16.msra.mxu0 %v18981_v7  ;;  %v19025_v7 = vld [vmem:[#allocation2 + $0x1a20] ss:$28 sps:$4 sm:$0xff]  }
 0x46f   :  { %17213 = vmatpush3.bf16.msra.mxu1 %v18980_v6  ;;  %8334 = vmatprep.subr.bf16.mxu0 %v18988_v9  ;;  %v19028_v6 = vld [vmem:[#allocation2 + $0x1a54] ss:$28 sps:$4 sm:$0xff]  }
 0x470   :  { %17214 = vmatprep.subr.bf16.mxu1 %v18984_v55  ;;  %v19026_v55 = vld [vmem:[#allocation2 + $0x1a50] ss:$28 sps:$4 sm:$0xff]   ;;  %v19029_v9 = vld [vmem:[#allocation2 + $0x1c18] ss:$28 sps:$4 sm:$0xff]  }
 0x472   :  { %8335 = vmatpush1.bf16.msra.mxu0 %v18986_v11  ;;  %v19030_v11 = vld [vmem:[#allocation2 + $0x1a58] ss:$28 sps:$4 sm:$0xff]  }
 0x473   :  { %17215 = vmatpush3.bf16.msra.mxu1 %v18985_v10  ;;  %8336 = vmatprep.subr.bf16.mxu0 %v18993_v13  ;;  %v19033_v10 = vld [vmem:[#allocation2 + $0x1a8c] ss:$28 sps:$4 sm:$0xff]  }
 0x474   :  { %17216 = vmatprep.subr.bf16.mxu1 %v18989_v12  ;;  %v19031_v12 = vld [vmem:[#allocation2 + $0x1a88] ss:$28 sps:$4 sm:$0xff]   ;;  %v19034_v13 = vld [vmem:[#allocation2 + $0x1c50] ss:$28 sps:$4 sm:$0xff]  }
 0x476   :  { %8337 = vmatpush1.bf16.msra.mxu0 %v18991_v21  ;;  %v19035_v21 = vld [vmem:[#allocation2 + $0x1a90] ss:$28 sps:$4 sm:$0xff]  }
 0x477   :  { %17217 = vmatpush3.bf16.msra.mxu1 %v18990_v20  ;;  %8347 = vmatprep.subr.bf16.mxu0 %v18998_v24  ;;  %v19038_v20 = vld [vmem:[#allocation2 + $0x1ac4] ss:$28 sps:$4 sm:$0xff]  }
 0x478   :  { %17218 = vmatprep.subr.bf16.mxu1 %v18994_v22  ;;  %v19036_v22 = vld [vmem:[#allocation2 + $0x1ac0] ss:$28 sps:$4 sm:$0xff]   ;;  %v19039_v24 = vld [vmem:[#allocation2 + $0x1e48] ss:$28 sps:$4 sm:$0xff]  }
 0x479   :  { %8339 = vmatmul.mubr.bf16.vlgmr.msra.gmra.mrb[32].mxu0 %v20756_v8 }
 0x47a   :  { %8348 = vmatpush1.bf16.msra.mxu0 %v18996_v26  ;;  %8379 = vmatprep.mubr.bf16.mxu0 %v20767_v35  ;;  %v19040_v26 = vld [vmem:[#allocation2 + $0x1c88] ss:$28 sps:$4 sm:$0xff]  }
 0x47b   :  { %17219 = vmatpush3.bf16.msra.mxu1 %v18995_v25  ;;  %8349 = vmatprep.subr.bf16.mxu0 %v19003_v30  ;;  %v19043_v25 = vld [vmem:[#allocation2 + $0x1afc] ss:$28 sps:$4 sm:$0xff]  }
 0x47c   :  { %17226 = vmatprep.subr.bf16.mxu1 %v18999_v29  ;;  %v19041_v29 = vld [vmem:[#allocation2 + $0x1af8] ss:$28 sps:$4 sm:$0xff]   ;;  %v19044_v30 = vld [vmem:[#allocation2 + $0x1e80] ss:$28 sps:$4 sm:$0xff]  }
 0x47e   :  { %8503 = vmatmul.mubr.bf16.vlgmr.msra.gmra.mrb[40].mxu1 %v20756_v8  ;;  %8350 = vmatpush1.bf16.msra.mxu0 %v19001_v18  ;;  %v19045_v18 = vld [vmem:[#allocation2 + $0x1cc0] ss:$28 sps:$4 sm:$0xff]  }
 0x47f   :  { %17227 = vmatpush3.bf16.msra.mxu1 %v19000_v31  ;;  %8351 = vmatprep.subr.bf16.mxu0 %v19008_v61  ;;  %v19048_v31 = vld [vmem:[#allocation2 + $0x1b34] ss:$28 sps:$4 sm:$0xff]  }
 0x480   :  { %17228 = vmatprep.subr.bf16.mxu1 %v19004_v32  ;;  %8542 = vmatprep.mubr.bf16.mxu1 %v20767_v35  ;;  %v19046_v32 = vld [vmem:[#allocation2 + $0x1b30] ss:$28 sps:$4 sm:$0xff]   ;;  %v19049_v61 = vld [vmem:[#allocation2 + $0x1eb8] ss:$28 sps:$4 sm:$0xff]  }
 0x482   :  { %8352 = vmatpush1.bf16.msra.mxu0 %v19006_v33  ;;  %v19050_v33 = vld [vmem:[#allocation2 + $0x1cf8] ss:$28 sps:$4 sm:$0xff]  }
 0x483   :  { %17229 = vmatpush3.bf16.msra.mxu1 %v19005_v37  ;;  %8353 = vmatprep.subr.bf16.mxu0 %v19013_v44  ;;  %v19053_v37 = vld [vmem:[#allocation2 + $0x1b6c] ss:$28 sps:$4 sm:$0xff]  }
 0x484   :  { %17230 = vmatprep.subr.bf16.mxu1 %v19009_v43  ;;  %v19051_v43 = vld [vmem:[#allocation2 + $0x1b68] ss:$28 sps:$4 sm:$0xff]   ;;  %v19054_v44 = vld [vmem:[#allocation2 + $0x1ef0] ss:$28 sps:$4 sm:$0xff]  }
 0x486   :  { %8354 = vmatpush1.bf16.msra.mxu0 %v19011_v46  ;;  %v19055_v46 = vld [vmem:[#allocation2 + $0x1d30] ss:$28 sps:$4 sm:$0xff]  }
 0x487   :  { %17231 = vmatpush3.bf16.msra.mxu1 %v19010_v45  ;;  %8355 = vmatprep.subr.bf16.mxu0 %v19018_v50  ;;  %v19058_v45 = vld [vmem:[#allocation2 + $0x1ba4] ss:$28 sps:$4 sm:$0xff]  }
 0x488   :  { %17232 = vmatprep.subr.bf16.mxu1 %v19014_v48  ;;  %v19056_v48 = vld [vmem:[#allocation2 + $0x1ba0] ss:$28 sps:$4 sm:$0xff]   ;;  %v19059_v50 = vld [vmem:[#allocation2 + $0x1f28] ss:$28 sps:$4 sm:$0xff]  }
 0x48a   :  { %8356 = vmatpush1.bf16.msra.mxu0 %v19016_v58  ;;  %v19060_v58 = vld [vmem:[#allocation2 + $0x1d68] ss:$28 sps:$4 sm:$0xff]  }
 0x48b   :  { %17233 = vmatpush3.bf16.msra.mxu1 %v19015_v51  ;;  %8357 = vmatprep.subr.bf16.mxu0 %v19023_v2  ;;  %v19063_v51 = vld [vmem:[#allocation2 + $0x1bdc] ss:$28 sps:$4 sm:$0xff]  }
 0x48c   :  { %17234 = vmatprep.subr.bf16.mxu1 %v19019_v59  ;;  %v19061_v59 = vld [vmem:[#allocation2 + $0x1bd8] ss:$28 sps:$4 sm:$0xff]   ;;  %v19064_v2 = vld [vmem:[#allocation2 + $0x1f60] ss:$28 sps:$4 sm:$0xff]  }
 0x48e   :  { %8358 = vmatpush1.bf16.msra.mxu0 %v19021_v56  ;;  %v19065_v56 = vld [vmem:[#allocation2 + $0x1da0] ss:$28 sps:$4 sm:$0xff]  }
 0x48f   :  { %17235 = vmatpush3.bf16.msra.mxu1 %v19020_v3  ;;  %8359 = vmatprep.subr.bf16.mxu0 %v19028_v6  ;;  %v19068_v3 = vld [vmem:[#allocation2 + $0x1c14] ss:$28 sps:$4 sm:$0xff]  }
 0x490   :  { %17236 = vmatprep.subr.bf16.mxu1 %v19024_v4  ;;  %v19066_v4 = vld [vmem:[#allocation2 + $0x1c10] ss:$28 sps:$4 sm:$0xff]   ;;  %v19069_v6 = vld [vmem:[#allocation2 + $0x1f98] ss:$28 sps:$4 sm:$0xff]  }
 0x492   :  { %8360 = vmatpush1.bf16.msra.mxu0 %v19026_v55  ;;  %v19070_v55 = vld [vmem:[#allocation2 + $0x1dd8] ss:$28 sps:$4 sm:$0xff]  }
 0x493   :  { %17237 = vmatpush3.bf16.msra.mxu1 %v19025_v7  ;;  %8361 = vmatprep.subr.bf16.mxu0 %v19033_v10  ;;  %v19073_v7 = vld [vmem:[#allocation2 + $0x1c4c] ss:$28 sps:$4 sm:$0xff]  }
 0x494   :  { %17238 = vmatprep.subr.bf16.mxu1 %v19029_v9  ;;  %v19071_v9 = vld [vmem:[#allocation2 + $0x1c48] ss:$28 sps:$4 sm:$0xff]   ;;  %v19074_v10 = vld [vmem:[#allocation2 + $0x1fd0] ss:$28 sps:$4 sm:$0xff]  }
 0x496   :  { %8362 = vmatpush1.bf16.msra.mxu0 %v19031_v12  ;;  %v19075_v12 = vld [vmem:[#allocation2 + $0x1e10] ss:$28 sps:$4 sm:$0xff]  }
 0x497   :  { %17239 = vmatpush3.bf16.msra.mxu1 %v19030_v11  ;;  %8363 = vmatprep.subr.bf16.mxu0 %v19038_v20  ;;  %v19078_v11 = vld [vmem:[#allocation2 + $0x1c84] ss:$28 sps:$4 sm:$0xff]   ;;  %v19082_v20 = vld [vmem:[#allocation2 + $0x1cbc] ss:$28 sps:$4 sm:$0xff]  }
 0x498   :  { %17240 = vmatprep.subr.bf16.mxu1 %v19034_v13  ;;  %v19076_v13 = vld [vmem:[#allocation2 + $0x1c80] ss:$28 sps:$4 sm:$0xff]  }
 0x49a   :  { %8364 = vmatpush1.bf16.msra.mxu0 %v19036_v22  ;;  %v19080_v22 = vld [vmem:[#allocation2 + $0x1cb8] ss:$28 sps:$4 sm:$0xff]  }
 0x49b   :  { %17241 = vmatpush3.bf16.msra.mxu1 %v19035_v21  ;;  %8365 = vmatprep.subr.bf16.mxu0 %v19043_v25  ;;  %v19079_v21 = vld [vmem:[#allocation2 + $0x2008] ss:$28 sps:$4 sm:$0xff]  }
 0x49c   :  { %17248 = vmatprep.subr.bf16.mxu1 %v19039_v24  ;;  %v19085_v24 = vld [vmem:[#allocation2 + $0x1cf4] ss:$28 sps:$4 sm:$0xff]   ;;  %v19088_v25 = vld [vmem:[#allocation2 + $0x202c] ss:$28 sps:$4 sm:$0xff]  }
 0x49e   :  { %8543 = vmatmul.mubr.bf16.vlgmr.msra.gmra.mrb[44].mxu1 %v20773_v15  ;;  %8366 = vmatpush1.bf16.msra.mxu0 %v19041_v29  ;;  %v19091_v29 = vld [vmem:[#allocation2 + $0x1d2c] ss:$28 sps:$4 sm:$0xff]  }
 0x49f   :  { %17249 = vmatpush3.bf16.msra.mxu1 %v19040_v26  ;;  %8367 = vmatprep.subr.bf16.mxu0 %v19048_v31  ;;  %v19083_v26 = vld [vmem:[#allocation2 + $0x1cf0] ss:$28 sps:$4 sm:$0xff]   ;;  %v19089_v31 = vld [vmem:[#allocation2 + $0x1d28] ss:$28 sps:$4 sm:$0xff]  }
 0x4a0   :  { %17250 = vmatprep.subr.bf16.mxu1 %v19044_v30  ;;  %8582 = vmatprep.mubr.bf16.mxu1 %v20782_v19  ;;  %v19086_v30 = vld [vmem:[#allocation2 + $0x2028] ss:$28 sps:$4 sm:$0xff]  }
 0x4a2   :  { %8368 = vmatpush1.bf16.msra.mxu0 %v19046_v32  ;;  %v19097_v32 = vld [vmem:[#allocation2 + $0x1d64] ss:$28 sps:$4 sm:$0xff]  }
 0x4a3   :  { %17251 = vmatpush3.bf16.msra.mxu1 %v19045_v18  ;;  %8369 = vmatprep.subr.bf16.mxu0 %v19053_v37  ;;  %v19094_v18 = vld [vmem:[#allocation2 + $0x2064] ss:$28 sps:$4 sm:$0xff]  }
 0x4a4   :  { %17252 = vmatprep.subr.bf16.mxu1 %v19049_v61  ;;  %v20976_v61 = vld [vmem:[%s21201_s0 + $0x18] ss:$0 sps:$4 sm:$0xff]   ;;  %v19092_v37 = vld [vmem:[#allocation2 + $0x2060] ss:$28 sps:$4 sm:$0xff]  }
 0x4a6   :  { %8370 = vmatpush1.bf16.msra.mxu0 %v19051_v43  ;;  %v19100_v43 = vld [vmem:[#allocation2 + $0x209c] ss:$28 sps:$4 sm:$0xff]  }
 0x4a7   :  { %17253 = vmatpush3.bf16.msra.mxu1 %v19050_v33  ;;  %8371 = vmatprep.subr.bf16.mxu0 %v19058_v45  ;;  %v19095_v33 = vld [vmem:[#allocation2 + $0x1d60] ss:$28 sps:$4 sm:$0xff]   ;;  %v19098_v45 = vld [vmem:[#allocation2 + $0x2098] ss:$28 sps:$4 sm:$0xff]  }
 0x4a8   :  { %17254 = vmatprep.subr.bf16.mxu1 %v19054_v44  ;;  %v19103_v44 = vld [vmem:[#allocation2 + $0x1d9c] ss:$28 sps:$4 sm:$0xff]  }
 0x4aa   :  { %8372 = vmatpush1.bf16.msra.mxu0 %v19056_v48  ;;  %v19106_v48 = vld [vmem:[#allocation2 + $0x20d4] ss:$28 sps:$4 sm:$0xff]  }
 0x4ab   :  { %17255 = vmatpush3.bf16.msra.mxu1 %v19055_v46  ;;  %8373 = vmatprep.subr.bf16.mxu0 %v19063_v51  ;;  %v19101_v46 = vld [vmem:[#allocation2 + $0x1d98] ss:$28 sps:$4 sm:$0xff]   ;;  %v19104_v51 = vld [vmem:[#allocation2 + $0x20d0] ss:$28 sps:$4 sm:$0xff]  }
 0x4ac   :  { %17256 = vmatprep.subr.bf16.mxu1 %v19059_v50  ;;  %v19109_v50 = vld [vmem:[#allocation2 + $0x1dd4] ss:$28 sps:$4 sm:$0xff]  }
 0x4ae   :  { %8374 = vmatpush1.bf16.msra.mxu0 %v19061_v59  ;;  %v19112_v59 = vld [vmem:[#allocation2 + $0x210c] ss:$28 sps:$4 sm:$0xff]  }
 0x4af   :  { %17257 = vmatpush3.bf16.msra.mxu1 %v19060_v58  ;;  %8375 = vmatprep.subr.bf16.mxu0 %v19068_v3  ;;  %v19107_v58 = vld [vmem:[#allocation2 + $0x1dd0] ss:$28 sps:$4 sm:$0xff]   ;;  %v19110_v3 = vld [vmem:[#allocation2 + $0x2108] ss:$28 sps:$4 sm:$0xff]  }
 0x4b0   :  { %17258 = vmatprep.subr.bf16.mxu1 %v19064_v2  ;;  %v19115_v2 = vld [vmem:[#allocation2 + $0x1e0c] ss:$28 sps:$4 sm:$0xff]  }
 0x4b2   :  { %8376 = vmatpush1.bf16.msra.mxu0 %v19066_v4  ;;  %v19118_v4 = vld [vmem:[#allocation2 + $0x2144] ss:$28 sps:$4 sm:$0xff]  }
 0x4b3   :  { %17259 = vmatpush3.bf16.msra.mxu1 %v19065_v56  ;;  %8377 = vmatprep.subr.bf16.mxu0 %v19073_v7  ;;  %v19113_v56 = vld [vmem:[#allocation2 + $0x1e08] ss:$28 sps:$4 sm:$0xff]   ;;  %v19116_v7 = vld [vmem:[#allocation2 + $0x2140] ss:$28 sps:$4 sm:$0xff]  }
 0x4b4   :  { %17260 = vmatprep.subr.bf16.mxu1 %v19069_v6  ;;  %v19121_v6 = vld [vmem:[#allocation2 + $0x1e44] ss:$28 sps:$4 sm:$0xff]  }
 0x4b6   :  { %8378 = vmatpush1.bf16.msra.mxu0 %v19071_v9  ;;  %v19124_v9 = vld [vmem:[#allocation2 + $0x217c] ss:$28 sps:$4 sm:$0xff]  }
 0x4b7   :  { %17261 = vmatpush3.bf16.msra.mxu1 %v19070_v55  ;;  %8388 = vmatprep.subr.bf16.mxu0 %v19078_v11  ;;  %v19119_v55 = vld [vmem:[#allocation2 + $0x1e40] ss:$28 sps:$4 sm:$0xff]   ;;  %v19122_v11 = vld [vmem:[#allocation2 + $0x2178] ss:$28 sps:$4 sm:$0xff]  }
 0x4b8   :  { %17262 = vmatprep.subr.bf16.mxu1 %v19074_v10  ;;  %v19127_v10 = vld [vmem:[#allocation2 + $0x1e7c] ss:$28 sps:$4 sm:$0xff]  }
 0x4b9   :  { %8380 = vmatmul.mubr.bf16.vlgmr.msra.gmra.mrb[32].mxu0 %v20773_v15 }
 0x4ba   :  { %8389 = vmatpush1.bf16.msra.mxu0 %v19076_v13  ;;  %8420 = vmatprep.mubr.bf16.mxu0 %v20782_v19  ;;  %v19130_v13 = vld [vmem:[#allocation2 + $0x21b4] ss:$28 sps:$4 sm:$0xff]  }
 0x4bb   :  { %17263 = vmatpush3.bf16.msra.mxu1 %v19075_v12  ;;  %8390 = vmatprep.subr.bf16.mxu0 %v19082_v20  ;;  %v19125_v12 = vld [vmem:[#allocation2 + $0x1e78] ss:$28 sps:$4 sm:$0xff]  }
 0x4bc   :  { %17392 = vmatprep.subr.bf16.mxu1 %v20553_v34  ;;  %v19133_v20 = vld [vmem:[#allocation2 + $0x1eb4] ss:$28 sps:$4 sm:$0xff]  }
 0x4be   :  { %8583 = vmatmul.mubr.bf16.vlgmr.msra.gmra.mrb[48].mxu1 %v20790_v23  ;;  %8391 = vmatpush1.bf16.msra.mxu0 %v19080_v22  ;;  %v19131_v22 = vld [vmem:[#allocation2 + $0x1eb0] ss:$28 sps:$4 sm:$0xff]  }
 0x4bf   :  { %17393 = vmatpush3.bf16.msra.mxu1 %v19079_v21  ;;  %8392 = vmatprep.subr.bf16.mxu0 %v19085_v24  ;;  %v19128_v21 = vld [vmem:[#allocation2 + $0x21b0] ss:$28 sps:$4 sm:$0xff]  }
 0x4c0   :  { %17394 = vmatprep.mubr.msk.bf16.mxu1 %vm20554_vm1, %v20553_v34  ;;  %10794 = vmatprep.subr.bf16.mxu1 %v19088_v25  ;;  %v19136_v24 = vld [vmem:[#allocation2 + $0x21ec] ss:$28 sps:$4 sm:$0xff]  }
 0x4c1   :  { %v19139_v25 = vld [vmem:[#allocation2 + $0x1eec] ss:$28 sps:$4 sm:$0xff]  }
 0x4c2   :  { %8393 = vmatpush1.bf16.msra.mxu0 %v19083_v26  ;;  %v19134_v26 = vld [vmem:[#allocation2 + $0x21e8] ss:$28 sps:$4 sm:$0xff]  }
 0x4c3   :  { %8394 = vmatprep.subr.bf16.mxu0 %v19091_v29  ;;  %v19137_v29 = vld [vmem:[#allocation2 + $0x1ee8] ss:$28 sps:$4 sm:$0xff]  }
 0x4c6   :  { %17395 = vmatmul.mubr.msk.bf16.vlgmr.msra.gmra.mrb[52].mxu1 %vm2349_vm0, %v20976_v61  ;;  %8395 = vmatpush1.bf16.msra.mxu0 %v19089_v31  ;;  %v19145_v31 = vld [vmem:[#allocation2 + $0x1f24] ss:$28 sps:$4 sm:$0xff]  }
 0x4c7   :  { %10795 = vmatpush1.bf16.msra.mxu1 %v19086_v30  ;;  %8396 = vmatprep.subr.bf16.mxu0 %v19097_v32  ;;  %v19142_v30 = vld [vmem:[#allocation2 + $0x2224] ss:$28 sps:$4 sm:$0xff]  }
 0x4c8   :  { %10796 = vmatprep.subr.bf16.mxu1 %v19094_v18  ;;  %10826 = vmatprep.mubr.bf16.mxu1 %v20752_v52  ;;  %v19140_v18 = vld [vmem:[#allocation2 + $0x2220] ss:$28 sps:$4 sm:$0xff]  }
 0x4c9   :  { %v19143_v32 = vld [vmem:[#allocation2 + $0x1f20] ss:$28 sps:$4 sm:$0xff]  }
 0x4ca   :  { %8397 = vmatpush1.bf16.msra.mxu0 %v19095_v33  ;;  %v19151_v33 = vld [vmem:[#allocation2 + $0x1f5c] ss:$28 sps:$4 sm:$0xff]  }
 0x4cb   :  { %10797 = vmatpush1.bf16.msra.mxu1 %v19092_v37  ;;  %8398 = vmatprep.subr.bf16.mxu0 %v19103_v44  ;;  %v19148_v37 = vld [vmem:[#allocation2 + $0x225c] ss:$28 sps:$4 sm:$0xff]  }
 0x4cc   :  { %10798 = vmatprep.subr.bf16.mxu1 %v19100_v43  ;;  %v19146_v43 = vld [vmem:[#allocation2 + $0x2258] ss:$28 sps:$4 sm:$0xff]  }
 0x4cd   :  { %v19149_v44 = vld [vmem:[#allocation2 + $0x1f58] ss:$28 sps:$4 sm:$0xff]  }
 0x4ce   :  { %8399 = vmatpush1.bf16.msra.mxu0 %v19101_v46  ;;  %v19157_v46 = vld [vmem:[#allocation2 + $0x1f94] ss:$28 sps:$4 sm:$0xff]  }
 0x4cf   :  { %10799 = vmatpush1.bf16.msra.mxu1 %v19098_v45  ;;  %8400 = vmatprep.subr.bf16.mxu0 %v19109_v50  ;;  %v19154_v45 = vld [vmem:[#allocation2 + $0x2294] ss:$28 sps:$4 sm:$0xff]  }
 0x4d0   :  { %10800 = vmatprep.subr.bf16.mxu1 %v19106_v48  ;;  %v19152_v48 = vld [vmem:[#allocation2 + $0x2290] ss:$28 sps:$4 sm:$0xff]  }
 0x4d1   :  { %v19155_v50 = vld [vmem:[#allocation2 + $0x1f90] ss:$28 sps:$4 sm:$0xff]  }
 0x4d2   :  { %8401 = vmatpush1.bf16.msra.mxu0 %v19107_v58  ;;  %v19163_v58 = vld [vmem:[#allocation2 + $0x1fcc] ss:$28 sps:$4 sm:$0xff]  }
 0x4d3   :  { %10801 = vmatpush1.bf16.msra.mxu1 %v19104_v51  ;;  %8402 = vmatprep.subr.bf16.mxu0 %v19115_v2  ;;  %v19160_v51 = vld [vmem:[#allocation2 + $0x22cc] ss:$28 sps:$4 sm:$0xff]  }
 0x4d4   :  { %10802 = vmatprep.subr.bf16.mxu1 %v19112_v59  ;;  %v19158_v59 = vld [vmem:[#allocation2 + $0x22c8] ss:$28 sps:$4 sm:$0xff]  }
 0x4d5   :  { %v19161_v2 = vld [vmem:[#allocation2 + $0x1fc8] ss:$28 sps:$4 sm:$0xff]  }
 0x4d6   :  { %8403 = vmatpush1.bf16.msra.mxu0 %v19113_v56  ;;  %v19175_v56 = vld [vmem:[#allocation2 + $0x2004] ss:$28 sps:$4 sm:$0xff]  }
 0x4d7   :  { %10803 = vmatpush1.bf16.msra.mxu1 %v19110_v3  ;;  %8404 = vmatprep.subr.bf16.mxu0 %v19121_v6  ;;  %v19166_v3 = vld [vmem:[#allocation2 + $0x2304] ss:$28 sps:$4 sm:$0xff]  }
 0x4d8   :  { %10804 = vmatprep.subr.bf16.mxu1 %v19118_v4  ;;  %v19164_v4 = vld [vmem:[#allocation2 + $0x2300] ss:$28 sps:$4 sm:$0xff]  }
 0x4d9   :  { %v19173_v6 = vld [vmem:[#allocation2 + $0x2000] ss:$28 sps:$4 sm:$0xff]  }
 0x4da   :  { %8405 = vmatpush1.bf16.msra.mxu0 %v19119_v55  ;;  %v19181_v55 = vld [vmem:[#allocation2 + $0x2034] ss:$28 sps:$4 sm:$0xff]  }
 0x4db   :  { %10805 = vmatpush1.bf16.msra.mxu1 %v19116_v7  ;;  %8406 = vmatprep.subr.bf16.mxu0 %v19127_v10  ;;  %v19169_v7 = vld [vmem:[#allocation2 + $0x233c] ss:$28 sps:$4 sm:$0xff]   ;;  %v19172_v10 = vld [vmem:[#allocation2 + $0x2374] ss:$28 sps:$4 sm:$0xff]  }
 0x4dc   :  { %10806 = vmatprep.subr.bf16.mxu1 %v19124_v9  ;;  %v19167_v9 = vld [vmem:[#allocation2 + $0x2338] ss:$28 sps:$4 sm:$0xff]  }
 0x4de   :  { %8407 = vmatpush1.bf16.msra.mxu0 %v19125_v12  ;;  %v19178_v12 = vld [vmem:[#allocation2 + $0x23ac] ss:$28 sps:$4 sm:$0xff]  }
 0x4df   :  { %10807 = vmatpush1.bf16.msra.mxu1 %v19122_v11  ;;  %8408 = vmatprep.subr.bf16.mxu0 %v19133_v20  ;;  %v19170_v11 = vld [vmem:[#allocation2 + $0x2370] ss:$28 sps:$4 sm:$0xff]  }
 0x4e0   :  { %10808 = vmatprep.subr.bf16.mxu1 %v19130_v13  ;;  %v19176_v13 = vld [vmem:[#allocation2 + $0x23a8] ss:$28 sps:$4 sm:$0xff]   ;;  %v19179_v20 = vld [vmem:[#allocation2 + $0x2030] ss:$28 sps:$4 sm:$0xff]  }
 0x4e2   :  { %8409 = vmatpush1.bf16.msra.mxu0 %v19131_v22  ;;  %v19187_v22 = vld [vmem:[#allocation2 + $0x206c] ss:$28 sps:$4 sm:$0xff]  }
 0x4e3   :  { %10809 = vmatpush1.bf16.msra.mxu1 %v19128_v21  ;;  %8410 = vmatprep.subr.bf16.mxu0 %v19139_v25  ;;  %v19184_v21 = vld [vmem:[#allocation2 + $0x23e4] ss:$28 sps:$4 sm:$0xff]  }
 0x4e4   :  { %10810 = vmatprep.subr.bf16.mxu1 %v19136_v24  ;;  %v19182_v24 = vld [vmem:[#allocation2 + $0x23e0] ss:$28 sps:$4 sm:$0xff]   ;;  %v19185_v25 = vld [vmem:[#allocation2 + $0x2068] ss:$28 sps:$4 sm:$0xff]  }
 0x4e6   :  { %8411 = vmatpush1.bf16.msra.mxu0 %v19137_v29  ;;  %v19193_v29 = vld [vmem:[#allocation2 + $0x20a4] ss:$28 sps:$4 sm:$0xff]  }
 0x4e7   :  { %10811 = vmatpush1.bf16.msra.mxu1 %v19134_v26  ;;  %8412 = vmatprep.subr.bf16.mxu0 %v19145_v31  ;;  %v19190_v26 = vld [vmem:[#allocation2 + $0x241c] ss:$28 sps:$4 sm:$0xff]  }
 0x4e8   :  { %10812 = vmatprep.subr.bf16.mxu1 %v19142_v30  ;;  %v19188_v30 = vld [vmem:[#allocation2 + $0x2418] ss:$28 sps:$4 sm:$0xff]   ;;  %v19191_v31 = vld [vmem:[#allocation2 + $0x20a0] ss:$28 sps:$4 sm:$0xff]  }
 0x4ea   :  { %8413 = vmatpush1.bf16.msra.mxu0 %v19143_v32  ;;  %v19199_v32 = vld [vmem:[#allocation2 + $0x20dc] ss:$28 sps:$4 sm:$0xff]  }
 0x4eb   :  { %10813 = vmatpush1.bf16.msra.mxu1 %v19140_v18  ;;  %8414 = vmatprep.subr.bf16.mxu0 %v19151_v33  ;;  %v19196_v18 = vld [vmem:[#allocation2 + $0x2454] ss:$28 sps:$4 sm:$0xff]  }
 0x4ec   :  { %10814 = vmatprep.subr.bf16.mxu1 %v19148_v37 }
 0x4ee   :  { %8415 = vmatpush1.bf16.msra.mxu0 %v19149_v44 }
 0x4ef   :  { %10815 = vmatpush1.bf16.msra.mxu1 %v19146_v43  ;;  %8416 = vmatprep.subr.bf16.mxu0 %v19157_v46 }
 0x4f0   :  { %10816 = vmatprep.subr.bf16.mxu1 %v19154_v45  ;;  %v19194_v45 = vld [vmem:[#allocation2 + $0x2450] ss:$28 sps:$4 sm:$0xff]  }
 0x4f2   :  { %8417 = vmatpush1.bf16.msra.mxu0 %v19155_v50 }
 0x4f3   :  { %10817 = vmatpush1.bf16.msra.mxu1 %v19152_v48  ;;  %8418 = vmatprep.subr.bf16.mxu0 %v19163_v58  ;;  %v19197_v48 = vld [vmem:[#allocation2 + $0x20d8] ss:$28 sps:$4 sm:$0xff]  }
 0x4f4   :  { %10818 = vmatprep.subr.bf16.mxu1 %v19160_v51  ;;  %v19202_v51 = vld [vmem:[#allocation2 + $0x248c] ss:$28 sps:$4 sm:$0xff]   ;;  %v19205_v58 = vld [vmem:[#allocation2 + $0x2114] ss:$28 sps:$4 sm:$0xff]  }
 0x4f6   :  { %8419 = vmatpush1.bf16.msra.mxu0 %v19161_v2  ;;  %v19217_v2 = vld [vmem:[#allocation2 + $0x2184] ss:$28 sps:$4 sm:$0xff]  }
 0x4f7   :  { %10819 = vmatpush1.bf16.msra.mxu1 %v19158_v59  ;;  %8429 = vmatprep.subr.bf16.mxu0 %v19175_v56  ;;  %v19211_v59 = vld [vmem:[#allocation2 + $0x214c] ss:$28 sps:$4 sm:$0xff]   ;;  %v19215_v56 = vld [vmem:[#allocation2 + $0x2180] ss:$28 sps:$4 sm:$0xff]  }
 0x4f8   :  { %10820 = vmatprep.subr.bf16.mxu1 %v19166_v3  ;;  %v19212_v3 = vld [vmem:[#allocation2 + $0x24f8] ss:$28 sps:$4 sm:$0xff]  }
 0x4f9   :  { %8421 = vmatmul.mubr.bf16.vlgmr.msra.gmra.mrb[32].mxu0 %v20790_v23 }
 0x4fa   :  { %8430 = vmatpush1.bf16.msra.mxu0 %v19173_v6  ;;  %8461 = vmatprep.mubr.bf16.mxu0 %v20552_v0  ;;  %v19223_v6 = vld [vmem:[#allocation2 + $0x21bc] ss:$28 sps:$4 sm:$0xff]  }
 0x4fb   :  { %10821 = vmatpush1.bf16.msra.mxu1 %v19164_v4  ;;  %10958 = vmatprep.subr.bf16.mxu0 %v19181_v55  ;;  %v19220_v4 = vld [vmem:[#allocation2 + $0x2534] ss:$28 sps:$4 sm:$0xff]  }
 0x4fc   :  { %10822 = vmatprep.subr.bf16.mxu1 %v19169_v7  ;;  %v19218_v7 = vld [vmem:[#allocation2 + $0x2530] ss:$28 sps:$4 sm:$0xff]   ;;  %v19221_v55 = vld [vmem:[#allocation2 + $0x21b8] ss:$28 sps:$4 sm:$0xff]  }
 0x4ff   :  { %10823 = vmatpush1.bf16.msra.mxu1 %v19167_v9  ;;  %v19226_v9 = vld [vmem:[#allocation2 + $0x256c] ss:$28 sps:$4 sm:$0xff]  }
 0x500   :  { %10824 = vmatprep.subr.bf16.mxu1 %v19172_v10  ;;  %v19229_v10 = vld [vmem:[#allocation2 + $0x21f4] ss:$28 sps:$4 sm:$0xff]  }
 0x503   :  { %10825 = vmatpush1.bf16.msra.mxu1 %v19170_v11  ;;  %v19224_v11 = vld [vmem:[#allocation2 + $0x2568] ss:$28 sps:$4 sm:$0xff]  }
 0x504   :  { %10835 = vmatprep.subr.bf16.mxu1 %v19178_v12  ;;  %v19227_v12 = vld [vmem:[#allocation2 + $0x21f0] ss:$28 sps:$4 sm:$0xff]  }
 0x505   :  { %16248 = vmatmul.mubr.msk.bf16.vlgmr.msra.gmra.mrb[32].mxu0 %vm2349_vm0, %v20976_v61 }
 0x506   :  { %10827 = vmatmul.mubr.bf16.vlgmr.msra.gmra.mrb[56].mxu1 %v20756_v8  ;;  %10959 = vmatpush1.bf16.msra.mxu0 %v19179_v20  ;;  %v19235_v20 = vld [vmem:[#allocation2 + $0x222c] ss:$28 sps:$4 sm:$0xff]  }
 0x507   :  { %10836 = vmatpush1.bf16.msra.mxu1 %v19176_v13  ;;  %10960 = vmatprep.subr.bf16.mxu0 %v19187_v22  ;;  %v19232_v13 = vld [vmem:[#allocation2 + $0x25a4] ss:$28 sps:$4 sm:$0xff]  }
 0x508   :  { %10837 = vmatprep.subr.bf16.mxu1 %v19184_v21  ;;  %10867 = vmatprep.mubr.bf16.mxu1 %v20767_v35  ;;  %v19230_v21 = vld [vmem:[#allocation2 + $0x25a0] ss:$28 sps:$4 sm:$0xff]   ;;  %v19233_v22 = vld [vmem:[#allocation2 + $0x2228] ss:$28 sps:$4 sm:$0xff]  }
 0x509   :  { %10990 = vmatprep.mubr.bf16.mxu0 %v20752_v52 }
 0x50a   :  { %10961 = vmatpush1.bf16.msra.mxu0 %v19185_v25  ;;  %v19241_v25 = vld [vmem:[#allocation2 + $0x2264] ss:$28 sps:$4 sm:$0xff]  }
 0x50b   :  { %10838 = vmatpush1.bf16.msra.mxu1 %v19182_v24  ;;  %10962 = vmatprep.subr.bf16.mxu0 %v19193_v29  ;;  %v19238_v24 = vld [vmem:[#allocation2 + $0x25dc] ss:$28 sps:$4 sm:$0xff]  }
 0x50c   :  { %10839 = vmatprep.subr.bf16.mxu1 %v19190_v26  ;;  %v8135_v37 = vpop.f32.mrb[28].mxu0  ;;  %v19236_v26 = vld [vmem:[#allocation2 + $0x25d8] ss:$28 sps:$4 sm:$0xff]   ;;  %v19239_v29 = vld [vmem:[#allocation2 + $0x2260] ss:$28 sps:$4 sm:$0xff]  }
 0x50d   :  { %v20991_v33 = vmax.f32 %v5814_v28, %v8135_v37  ;;  %v8137_v43 = vpop.f32.mrb[29].mxu0  ;;  %v19208_v28 = vld [vmem:[#allocation2 + $0x24c4] ss:$28 sps:$4 sm:$0xff]   ;;  %v19250_v37 = vld [vmem:[#allocation2 + $0x264c] ss:$28 sps:$4 sm:$0xff]  }
 0x50e   :  { %10963 = vmatpush1.bf16.msra.mxu0 %v19191_v31  ;;  %v20996_v44 = vmax.f32 %v5815_v49, %v8137_v43  ;;  %v8139_v46 = vpop.f32.mrb[30].mxu0  ;;  %v19214_v49 = vld [vmem:[#allocation2 + $0x24fc] ss:$28 sps:$4 sm:$0xff]   ;;  %v19253_v43 = vld [vmem:[#allocation2 + $0x22d4] ss:$28 sps:$4 sm:$0xff]  }
 0x50f   :  { %10840 = vmatpush1.bf16.msra.mxu1 %v19188_v30  ;;  %v8140_v50 = vpop.f32.mrb[31].mxu0  ;;  %10964 = vmatprep.subr.bf16.mxu0 %v19199_v32  ;;  %v19244_v30 = vld [vmem:[#allocation2 + $0x2614] ss:$28 sps:$4 sm:$0xff]   ;;  %v19247_v31 = vld [vmem:[#allocation2 + $0x229c] ss:$28 sps:$4 sm:$0xff]  }
 0x510   :  { %10841 = vmatprep.subr.bf16.mxu1 %v19196_v18  ;;  %v19242_v18 = vld [vmem:[#allocation2 + $0x2610] ss:$28 sps:$4 sm:$0xff]   ;;  %v19245_v32 = vld [vmem:[#allocation2 + $0x2298] ss:$28 sps:$4 sm:$0xff]  }
 0x512   :  { %10965 = vmatpush1.bf16.msra.mxu0 %v19197_v48 }
 0x513   :  { %10842 = vmatpush1.bf16.msra.mxu1 %v19194_v45  ;;  %10966 = vmatprep.subr.bf16.mxu0 %v19205_v58  ;;  %v19248_v58 = vld [vmem:[#allocation2 + $0x2648] ss:$28 sps:$4 sm:$0xff]  }
 0x514   :  { %10843 = vmatprep.subr.bf16.mxu1 %v19202_v51 }
 0x516   :  { %10967 = vmatpush1.bf16.msra.mxu0 %v19203_v27 }
 0x517   :  { %10844 = vmatpush1.bf16.msra.mxu1 %v19200_v14  ;;  %10968 = vmatprep.subr.bf16.mxu0 %v19211_v59  ;;  %v19251_v14 = vld [vmem:[#allocation2 + $0x22d0] ss:$28 sps:$4 sm:$0xff]  }
 0x518   :  { %10845 = vmatprep.subr.bf16.mxu1 %v19208_v28  ;;  %v19256_v28 = vld [vmem:[#allocation2 + $0x2684] ss:$28 sps:$4 sm:$0xff]   ;;  %v19259_v59 = vld [vmem:[#allocation2 + $0x230c] ss:$28 sps:$4 sm:$0xff]  }
 0x51a   :  { %10969 = vmatpush1.bf16.msra.mxu0 %v19209_v47  ;;  %v19271_v47 = vld [vmem:[#allocation2 + $0x237c] ss:$28 sps:$4 sm:$0xff]  }
 0x51b   :  { %10846 = vmatpush1.bf16.msra.mxu1 %v19206_v17  ;;  %10970 = vmatprep.subr.bf16.mxu0 %v19217_v2  ;;  %v19265_v17 = vld [vmem:[#allocation2 + $0x2344] ss:$28 sps:$4 sm:$0xff]   ;;  %v19269_v2 = vld [vmem:[#allocation2 + $0x2378] ss:$28 sps:$4 sm:$0xff]  }
 0x51c   :  { %10847 = vmatprep.subr.bf16.mxu1 %v19214_v49  ;;  %v19266_v49 = vld [vmem:[#allocation2 + $0x26f0] ss:$28 sps:$4 sm:$0xff]  }
 0x51e   :  { %10971 = vmatpush1.bf16.msra.mxu0 %v19215_v56  ;;  %v19277_v56 = vld [vmem:[#allocation2 + $0x23b4] ss:$28 sps:$4 sm:$0xff]  }
 0x51f   :  { %10848 = vmatpush1.bf16.msra.mxu1 %v19212_v3  ;;  %10972 = vmatprep.subr.bf16.mxu0 %v19223_v6  ;;  %v19274_v3 = vld [vmem:[#allocation2 + $0x272c] ss:$28 sps:$4 sm:$0xff]  }
 0x520   :  { %10849 = vmatprep.subr.bf16.mxu1 %v19220_v4  ;;  %v19272_v4 = vld [vmem:[#allocation2 + $0x2728] ss:$28 sps:$4 sm:$0xff]   ;;  %v19275_v6 = vld [vmem:[#allocation2 + $0x23b0] ss:$28 sps:$4 sm:$0xff]  }
 0x522   :  { %10973 = vmatpush1.bf16.msra.mxu0 %v19221_v55  ;;  %v19283_v55 = vld [vmem:[#allocation2 + $0x23ec] ss:$28 sps:$4 sm:$0xff]  }
 0x523   :  { %10850 = vmatpush1.bf16.msra.mxu1 %v19218_v7  ;;  %10974 = vmatprep.subr.bf16.mxu0 %v19229_v10  ;;  %v19280_v7 = vld [vmem:[#allocation2 + $0x2764] ss:$28 sps:$4 sm:$0xff]  }
 0x524   :  { %10851 = vmatprep.subr.bf16.mxu1 %v19226_v9  ;;  %v19278_v9 = vld [vmem:[#allocation2 + $0x2760] ss:$28 sps:$4 sm:$0xff]   ;;  %v19281_v10 = vld [vmem:[#allocation2 + $0x23e8] ss:$28 sps:$4 sm:$0xff]  }
 0x526   :  { %10975 = vmatpush1.bf16.msra.mxu0 %v19227_v12  ;;  %v19289_v12 = vld [vmem:[#allocation2 + $0x2424] ss:$28 sps:$4 sm:$0xff]  }
 0x527   :  { %10852 = vmatpush1.bf16.msra.mxu1 %v19224_v11  ;;  %10976 = vmatprep.subr.bf16.mxu0 %v19235_v20  ;;  %v19286_v11 = vld [vmem:[#allocation2 + $0x279c] ss:$28 sps:$4 sm:$0xff]  }
 0x528   :  { %10853 = vmatprep.subr.bf16.mxu1 %v19232_v13  ;;  %v19284_v13 = vld [vmem:[#allocation2 + $0x2798] ss:$28 sps:$4 sm:$0xff]   ;;  %v19287_v20 = vld [vmem:[#allocation2 + $0x2420] ss:$28 sps:$4 sm:$0xff]  }
 0x52a   :  { %10977 = vmatpush1.bf16.msra.mxu0 %v19233_v22  ;;  %v19295_v22 = vld [vmem:[#allocation2 + $0x245c] ss:$28 sps:$4 sm:$0xff]  }
 0x52b   :  { %10854 = vmatpush1.bf16.msra.mxu1 %v19230_v21  ;;  %10978 = vmatprep.subr.bf16.mxu0 %v19241_v25  ;;  %v19292_v21 = vld [vmem:[#allocation2 + $0x27d4] ss:$28 sps:$4 sm:$0xff]  }
 0x52c   :  { %10855 = vmatprep.subr.bf16.mxu1 %v19238_v24  ;;  %v19290_v24 = vld [vmem:[#allocation2 + $0x27d0] ss:$28 sps:$4 sm:$0xff]   ;;  %v19293_v25 = vld [vmem:[#allocation2 + $0x2458] ss:$28 sps:$4 sm:$0xff]  }
 0x52e   :  { %10979 = vmatpush1.bf16.msra.mxu0 %v19239_v29  ;;  %v19301_v29 = vld [vmem:[#allocation2 + $0x2494] ss:$28 sps:$4 sm:$0xff]  }
 0x52f   :  { %10856 = vmatpush1.bf16.msra.mxu1 %v19236_v26  ;;  %10980 = vmatprep.subr.bf16.mxu0 %v19247_v31  ;;  %v19298_v26 = vld [vmem:[#allocation2 + $0x280c] ss:$28 sps:$4 sm:$0xff]  }
 0x530   :  { %10857 = vmatprep.subr.bf16.mxu1 %v19244_v30 }
 0x531   :  { %v8299_v45 = vpop.f32.mrb[36].mxu1 }
 0x532   :  { %v21001_v46 = vmax.f32 %v5816_v60, %v8299_v45  ;;  %v8301_v48 = vpop.f32.mrb[37].mxu1  ;;  %10981 = vmatpush1.bf16.msra.mxu0 %v19245_v32  ;;  %v19262_v60 = vld [vmem:[#allocation2 + $0x26bc] ss:$28 sps:$4 sm:$0xff]  }
 0x533   :  { %10858 = vmatpush1.bf16.msra.mxu1 %v19242_v18  ;;  %v21006_v50 = vmax.f32 %v5817_v63, %v8301_v48  ;;  %v8303_v51 = vpop.f32.mrb[38].mxu1  ;;  %10982 = vmatprep.subr.bf16.mxu0 %v19253_v43  ;;  %v19268_v63 = vld [vmem:[#allocation2 + $0x26f4] ss:$28 sps:$4 sm:$0xff]   ;;  %v19304_v48 = vld [vmem:[#allocation2 + $0x2844] ss:$28 sps:$4 sm:$0xff]  }
 0x534   :  { %v8304_v27 = vpop.f32.mrb[39].mxu1  ;;  %10859 = vmatprep.subr.bf16.mxu1 %v19250_v37  ;;  %v19296_v37 = vld [vmem:[#allocation2 + $0x2808] ss:$28 sps:$4 sm:$0xff]   ;;  %v19299_v43 = vld [vmem:[#allocation2 + $0x2490] ss:$28 sps:$4 sm:$0xff]  }
 0x535   :  { %v19307_v51 = vld [vmem:[#allocation2 + $0x24cc] ss:$28 sps:$4 sm:$0xff]   ;;  %v19310_v27 = vld [vmem:[#allocation2 + $0x287c] ss:$28 sps:$4 sm:$0xff]  }
 0x536   :  { %10983 = vmatpush1.bf16.msra.mxu0 %v19251_v14  ;;  %v19305_v14 = vld [vmem:[#allocation2 + $0x24c8] ss:$28 sps:$4 sm:$0xff]  }
 0x537   :  { %10860 = vmatpush1.bf16.msra.mxu1 %v19248_v58  ;;  %10984 = vmatprep.subr.bf16.mxu0 %v19259_v59  ;;  %v19302_v58 = vld [vmem:[#allocation2 + $0x2840] ss:$28 sps:$4 sm:$0xff]   ;;  %v19308_v59 = vld [vmem:[#allocation2 + $0x2878] ss:$28 sps:$4 sm:$0xff]  }
 0x538   :  { %10861 = vmatprep.subr.bf16.mxu1 %v19256_v28  ;;  %v19313_v28 = vld [vmem:[#allocation2 + $0x2504] ss:$28 sps:$4 sm:$0xff]  }
 0x53a   :  { %10985 = vmatpush1.bf16.msra.mxu0 %v19257_v57  ;;  %v19316_v57 = vld [vmem:[#allocation2 + $0x28b4] ss:$28 sps:$4 sm:$0xff]  }
 0x53b   :  { %10862 = vmatpush1.bf16.msra.mxu1 %v19254_v38  ;;  %10986 = vmatprep.subr.bf16.mxu0 %v19265_v17  ;;  %v19311_v38 = vld [vmem:[#allocation2 + $0x2500] ss:$28 sps:$4 sm:$0xff]   ;;  %v19314_v17 = vld [vmem:[#allocation2 + $0x28b0] ss:$28 sps:$4 sm:$0xff]  }
 0x53c   :  { %10863 = vmatprep.subr.bf16.mxu1 %v19262_v60  ;;  %v19319_v60 = vld [vmem:[#allocation2 + $0x253c] ss:$28 sps:$4 sm:$0xff]  }
 0x53e   :  { %10987 = vmatpush1.bf16.msra.mxu0 %v19263_v62  ;;  %v19322_v62 = vld [vmem:[#allocation2 + $0x28ec] ss:$28 sps:$4 sm:$0xff]  }
 0x53f   :  { %10864 = vmatpush1.bf16.msra.mxu1 %v19260_v39  ;;  %10988 = vmatprep.subr.bf16.mxu0 %v19271_v47  ;;  %v19317_v39 = vld [vmem:[#allocation2 + $0x2538] ss:$28 sps:$4 sm:$0xff]   ;;  %v19320_v47 = vld [vmem:[#allocation2 + $0x28e8] ss:$28 sps:$4 sm:$0xff]  }
 0x540   :  { %10865 = vmatprep.subr.bf16.mxu1 %v19268_v63  ;;  %v19325_v63 = vld [vmem:[#allocation2 + $0x2574] ss:$28 sps:$4 sm:$0xff]  }
 0x542   :  { %10989 = vmatpush1.bf16.msra.mxu0 %v19269_v2  ;;  %v19328_v2 = vld [vmem:[#allocation2 + $0x2924] ss:$28 sps:$4 sm:$0xff]  }
 0x543   :  { %10866 = vmatpush1.bf16.msra.mxu1 %v19266_v49  ;;  %10999 = vmatprep.subr.bf16.mxu0 %v19277_v56  ;;  %v19323_v49 = vld [vmem:[#allocation2 + $0x2570] ss:$28 sps:$4 sm:$0xff]   ;;  %v19326_v56 = vld [vmem:[#allocation2 + $0x2920] ss:$28 sps:$4 sm:$0xff]  }
 0x544   :  { %10876 = vmatprep.subr.bf16.mxu1 %v19274_v3  ;;  %v19331_v3 = vld [vmem:[#allocation2 + $0x25ac] ss:$28 sps:$4 sm:$0xff]  }
 0x545   :  { %10991 = vmatmul.mubr.bf16.vlgmr.msra.gmra.mrb[36].mxu0 %v20756_v8 }
 0x546   :  { %10868 = vmatmul.mubr.bf16.vlgmr.msra.gmra.mrb[56].mxu1 %v20773_v15  ;;  %11000 = vmatpush1.bf16.msra.mxu0 %v19275_v6  ;;  %v19334_v6 = vld [vmem:[#allocation2 + $0x295c] ss:$28 sps:$4 sm:$0xff]  }
 0x547   :  { %10877 = vmatpush1.bf16.msra.mxu1 %v19272_v4  ;;  %11001 = vmatprep.subr.bf16.mxu0 %v19283_v55  ;;  %v19329_v4 = vld [vmem:[#allocation2 + $0x25a8] ss:$28 sps:$4 sm:$0xff]   ;;  %v19332_v55 = vld [vmem:[#allocation2 + $0x2958] ss:$28 sps:$4 sm:$0xff]  }
 0x548   :  { %10878 = vmatprep.subr.bf16.mxu1 %v19280_v7  ;;  %10908 = vmatprep.mubr.bf16.mxu1 %v20782_v19  ;;  %v19337_v7 = vld [vmem:[#allocation2 + $0x25e4] ss:$28 sps:$4 sm:$0xff]  }
 0x549   :  { %11031 = vmatprep.mubr.bf16.mxu0 %v20767_v35 }
 0x54a   :  { %11002 = vmatpush1.bf16.msra.mxu0 %v19281_v10  ;;  %v19340_v10 = vld [vmem:[#allocation2 + $0x2994] ss:$28 sps:$4 sm:$0xff]  }
 0x54b   :  { %10879 = vmatpush1.bf16.msra.mxu1 %v19278_v9  ;;  %11003 = vmatprep.subr.bf16.mxu0 %v19289_v12  ;;  %v19335_v9 = vld [vmem:[#allocation2 + $0x25e0] ss:$28 sps:$4 sm:$0xff]   ;;  %v19338_v12 = vld [vmem:[#allocation2 + $0x2990] ss:$28 sps:$4 sm:$0xff]  }
 0x54c   :  { %10880 = vmatprep.subr.bf16.mxu1 %v19286_v11  ;;  %v19343_v11 = vld [vmem:[#allocation2 + $0x261c] ss:$28 sps:$4 sm:$0xff]  }
 0x54e   :  { %11004 = vmatpush1.bf16.msra.mxu0 %v19287_v20  ;;  %v19346_v20 = vld [vmem:[#allocation2 + $0x29cc] ss:$28 sps:$4 sm:$0xff]  }
 0x54f   :  { %10881 = vmatpush1.bf16.msra.mxu1 %v19284_v13  ;;  %11005 = vmatprep.subr.bf16.mxu0 %v19295_v22  ;;  %v19341_v13 = vld [vmem:[#allocation2 + $0x2618] ss:$28 sps:$4 sm:$0xff]  }
 0x550   :  { %10882 = vmatprep.subr.bf16.mxu1 %v19292_v21  ;;  %v19349_v21 = vld [vmem:[#allocation2 + $0x2654] ss:$28 sps:$4 sm:$0xff]  }
 0x551   :  { %v17220_v30 = vpop.f32.mrb[40].mxu1 }
 0x552   :  { %v17221_v31 = vpop.f32.mrb[41].mxu1  ;;  %11006 = vmatpush1.bf16.msra.mxu0 %v19293_v25 }
 0x553   :  { %v21012_v18 = vadd.f32 %v17221_v31, %v17220_v30  ;;  %10883 = vmatpush1.bf16.msra.mxu1 %v19290_v24  ;;  %v17223_v32 = vpop.f32.mrb[42].mxu1  ;;  %11007 = vmatprep.subr.bf16.mxu0 %v19301_v29  ;;  %v19344_v29 = vld [vmem:[#allocation2 + $0x29c8] ss:$28 sps:$4 sm:$0xff]   ;;  %v19347_v30 = vld [vmem:[#allocation2 + $0x2650] ss:$28 sps:$4 sm:$0xff]  }
 0x554   :  { %v17224_v45 = vpop.f32.mrb[43].mxu1  ;;  %10884 = vmatprep.subr.bf16.mxu1 %v19298_v26  ;;  %v19352_v32 = vld [vmem:[#allocation2 + $0x2a04] ss:$28 sps:$4 sm:$0xff]  }
 0x555   :  { %v19350_v45 = vld [vmem:[#allocation2 + $0x2a00] ss:$28 sps:$4 sm:$0xff]  }
 0x556   :  { %11008 = vmatpush1.bf16.msra.mxu0 %v19299_v43 }
 0x557   :  { %10885 = vmatpush1.bf16.msra.mxu1 %v19296_v37  ;;  %11009 = vmatprep.subr.bf16.mxu0 %v19307_v51  ;;  %v19355_v37 = vld [vmem:[#allocation2 + $0x268c] ss:$28 sps:$4 sm:$0xff]   ;;  %v19358_v51 = vld [vmem:[#allocation2 + $0x2a3c] ss:$28 sps:$4 sm:$0xff]  }
 0x558   :  { %10886 = vmatprep.subr.bf16.mxu1 %v19304_v48  ;;  %v19353_v48 = vld [vmem:[#allocation2 + $0x2688] ss:$28 sps:$4 sm:$0xff]  }
 0x55a   :  { %11010 = vmatpush1.bf16.msra.mxu0 %v19305_v14  ;;  %v19356_v14 = vld [vmem:[#allocation2 + $0x2a38] ss:$28 sps:$4 sm:$0xff]  }
 0x55b   :  { %10887 = vmatpush1.bf16.msra.mxu1 %v19302_v58  ;;  %11011 = vmatprep.subr.bf16.mxu0 %v19313_v28  ;;  %v19361_v58 = vld [vmem:[#allocation2 + $0x26c4] ss:$28 sps:$4 sm:$0xff]   ;;  %v19364_v28 = vld [vmem:[#allocation2 + $0x2a74] ss:$28 sps:$4 sm:$0xff]  }
 0x55c   :  { %10888 = vmatprep.subr.bf16.mxu1 %v19310_v27  ;;  %v19359_v27 = vld [vmem:[#allocation2 + $0x26c0] ss:$28 sps:$4 sm:$0xff]  }
 0x55e   :  { %11012 = vmatpush1.bf16.msra.mxu0 %v19311_v38  ;;  %v19365_v38 = vld [vmem:[#allocation2 + $0x26f8] ss:$28 sps:$4 sm:$0xff]  }
 0x55f   :  { %10889 = vmatpush1.bf16.msra.mxu1 %v19308_v59  ;;  %11013 = vmatprep.subr.bf16.mxu0 %v19319_v60  ;;  %v19367_v59 = vld [vmem:[#allocation2 + $0x26fc] ss:$28 sps:$4 sm:$0xff]   ;;  %v19373_v60 = vld [vmem:[#allocation2 + $0x2734] ss:$28 sps:$4 sm:$0xff]  }
 0x560   :  { %10890 = vmatprep.subr.bf16.mxu1 %v19316_v57  ;;  %v19370_v57 = vld [vmem:[#allocation2 + $0x2aac] ss:$28 sps:$4 sm:$0xff]  }
 0x562   :  { %11014 = vmatpush1.bf16.msra.mxu0 %v19317_v39  ;;  %v19371_v39 = vld [vmem:[#allocation2 + $0x2730] ss:$28 sps:$4 sm:$0xff]  }
 0x563   :  { %10891 = vmatpush1.bf16.msra.mxu1 %v19314_v17  ;;  %11015 = vmatprep.subr.bf16.mxu0 %v19325_v63  ;;  %v19368_v17 = vld [vmem:[#allocation2 + $0x2aa8] ss:$28 sps:$4 sm:$0xff]   ;;  %v19382_v63 = vld [vmem:[#allocation2 + $0x203c] ss:$28 sps:$4 sm:$0xff]  }
 0x564   :  { %10892 = vmatprep.subr.bf16.mxu1 %v19322_v62  ;;  %v19376_v62 = vld [vmem:[#allocation2 + $0x276c] ss:$28 sps:$4 sm:$0xff]  }
 0x566   :  { %11016 = vmatpush1.bf16.msra.mxu0 %v19323_v49  ;;  %v19379_v49 = vld [vmem:[#allocation2 + $0x27a4] ss:$28 sps:$4 sm:$0xff]  }
 0x567   :  { %10893 = vmatpush1.bf16.msra.mxu1 %v19320_v47  ;;  %11017 = vmatprep.subr.bf16.mxu0 %v19331_v3  ;;  %v19374_v47 = vld [vmem:[#allocation2 + $0x2768] ss:$28 sps:$4 sm:$0xff]   ;;  %v19385_v3 = vld [vmem:[#allocation2 + $0x27dc] ss:$28 sps:$4 sm:$0xff]  }
 0x568   :  { %10894 = vmatprep.subr.bf16.mxu1 %v19328_v2  ;;  %v19377_v2 = vld [vmem:[#allocation2 + $0x27a0] ss:$28 sps:$4 sm:$0xff]  }
 0x56a   :  { %11018 = vmatpush1.bf16.msra.mxu0 %v19329_v4  ;;  %v19383_v4 = vld [vmem:[#allocation2 + $0x27d8] ss:$28 sps:$4 sm:$0xff]  }
 0x56b   :  { %10895 = vmatpush1.bf16.msra.mxu1 %v19326_v56  ;;  %11019 = vmatprep.subr.bf16.mxu0 %v19337_v7  ;;  %v19380_v56 = vld [vmem:[#allocation2 + $0x2038] ss:$28 sps:$4 sm:$0xff]  }
 0x56c   :  { %10896 = vmatprep.subr.bf16.mxu1 %v19334_v6  ;;  %v19388_v6 = vld [vmem:[#allocation2 + $0x2074] ss:$28 sps:$4 sm:$0xff]  }
 0x56d   :  { %v19391_v7 = vld [vmem:[#allocation2 + $0x2814] ss:$28 sps:$4 sm:$0xff]  }
 0x56e   :  { %11020 = vmatpush1.bf16.msra.mxu0 %v19335_v9 }
 0x56f   :  { %10897 = vmatpush1.bf16.msra.mxu1 %v19332_v55  ;;  %11021 = vmatprep.subr.bf16.mxu0 %v19343_v11 }
 0x570   :  { %10898 = vmatprep.subr.bf16.mxu1 %v19340_v10 }
 0x571   :  { %v17242_v22 = vpop.f32.mrb[44].mxu1 }
 0x572   :  { %v17243_v24 = vpop.f32.mrb[45].mxu1  ;;  %11022 = vmatpush1.bf16.msra.mxu0 %v19341_v13  ;;  %v19389_v13 = vld [vmem:[#allocation2 + $0x2810] ss:$28 sps:$4 sm:$0xff]  }
 0x573   :  { %v17244_v25 = vadd.f32 %v17243_v24, %v17242_v22  ;;  %10899 = vmatpush1.bf16.msra.mxu1 %v19338_v12  ;;  %v17245_v26 = vpop.f32.mrb[46].mxu1  ;;  %11023 = vmatprep.subr.bf16.mxu0 %v19349_v21  ;;  %v19386_v12 = vld [vmem:[#allocation2 + $0x2070] ss:$28 sps:$4 sm:$0xff]  }
 0x574   :  { %v17246_v31 = vpop.f32.mrb[47].mxu1  ;;  %10900 = vmatprep.subr.bf16.mxu1 %v19346_v20  ;;  %v19394_v21 = vld [vmem:[#allocation2 + $0x20ac] ss:$28 sps:$4 sm:$0xff]   ;;  %v19400_v26 = vld [vmem:[#allocation2 + $0x20e4] ss:$28 sps:$4 sm:$0xff]  }
 0x575   :  { %v21015_v43 = vadd.f32 %v17244_v25, %v21012_v18  ;;  %v19362_v18 = vld [vmem:[#allocation2 + $0x2a70] ss:$28 sps:$4 sm:$0xff]   ;;  %v19392_v25 = vld [vmem:[#allocation2 + $0x20a8] ss:$28 sps:$4 sm:$0xff]  }
 0x576   :  { %11024 = vmatpush1.bf16.msra.mxu0 %v19347_v30  ;;  %v19397_v22 = vld [vmem:[#allocation2 + $0x284c] ss:$28 sps:$4 sm:$0xff]  }
 0x577   :  { %10901 = vmatpush1.bf16.msra.mxu1 %v19344_v29  ;;  %11025 = vmatprep.subr.bf16.mxu0 %v19355_v37  ;;  %v19403_v29 = vld [vmem:[#allocation2 + $0x2884] ss:$28 sps:$4 sm:$0xff]  }
 0x578   :  { %10902 = vmatprep.subr.bf16.mxu1 %v19352_v32 }
 0x57a   :  { %11026 = vmatpush1.bf16.msra.mxu0 %v19353_v48  ;;  %v19401_v48 = vld [vmem:[#allocation2 + $0x2880] ss:$28 sps:$4 sm:$0xff]  }
 0x57b   :  { %10903 = vmatpush1.bf16.msra.mxu1 %v19350_v45  ;;  %11027 = vmatprep.subr.bf16.mxu0 %v19361_v58  ;;  %v19398_v45 = vld [vmem:[#allocation2 + $0x20e0] ss:$28 sps:$4 sm:$0xff]  }
 0x57c   :  { %10904 = vmatprep.subr.bf16.mxu1 %v19358_v51  ;;  %v19406_v58 = vld [vmem:[#allocation2 + $0x211c] ss:$28 sps:$4 sm:$0xff]  }
 0x57e   :  { %11028 = vmatpush1.bf16.msra.mxu0 %v19359_v27  ;;  %v19404_v27 = vld [vmem:[#allocation2 + $0x2118] ss:$28 sps:$4 sm:$0xff]  }
 0x57f   :  { %10905 = vmatpush1.bf16.msra.mxu1 %v19356_v14  ;;  %11029 = vmatprep.subr.bf16.mxu0 %v19367_v59  ;;  %v19409_v14 = vld [vmem:[#allocation2 + $0x28bc] ss:$28 sps:$4 sm:$0xff]   ;;  %v19412_v59 = vld [vmem:[#allocation2 + $0x2154] ss:$28 sps:$4 sm:$0xff]  }
 0x580   :  { %10906 = vmatprep.subr.bf16.mxu1 %v19364_v28  ;;  %v19407_v28 = vld [vmem:[#allocation2 + $0x28b8] ss:$28 sps:$4 sm:$0xff]  }
 0x582   :  { %11030 = vmatpush1.bf16.msra.mxu0 %v19365_v38  ;;  %v19410_v38 = vld [vmem:[#allocation2 + $0x2150] ss:$28 sps:$4 sm:$0xff]  }
 0x583   :  { %10907 = vmatpush1.bf16.msra.mxu1 %v19362_v18  ;;  %11040 = vmatprep.subr.bf16.mxu0 %v19373_v60  ;;  %v19415_v18 = vld [vmem:[#allocation2 + $0x28f4] ss:$28 sps:$4 sm:$0xff]   ;;  %v19419_v60 = vld [vmem:[#allocation2 + $0x2928] ss:$28 sps:$4 sm:$0xff]  }
 0x584   :  { %10917 = vmatprep.subr.bf16.mxu1 %v19370_v57  ;;  %v19413_v57 = vld [vmem:[#allocation2 + $0x28f0] ss:$28 sps:$4 sm:$0xff]  }
 0x585   :  { %11032 = vmatmul.mubr.bf16.vlgmr.msra.gmra.mrb[36].mxu0 %v20773_v15 }
 0x586   :  { %10909 = vmatmul.mubr.bf16.vlgmr.msra.gmra.mrb[56].mxu1 %v20790_v23  ;;  %11041 = vmatpush1.bf16.msra.mxu0 %v19371_v39  ;;  %v19427_v39 = vld [vmem:[#allocation2 + $0x2964] ss:$28 sps:$4 sm:$0xff]  }
 0x587   :  { %10918 = vmatpush1.bf16.msra.mxu1 %v19368_v17  ;;  %11042 = vmatprep.subr.bf16.mxu0 %v19376_v62  ;;  %v19424_v17 = vld [vmem:[#allocation2 + $0x21c4] ss:$28 sps:$4 sm:$0xff]  }
 0x588   :  { %10949 = vmatprep.mubr.bf16.mxu1 %v20552_v0  ;;  %11122 = vmatprep.subr.bf16.mxu1 %v19382_v63  ;;  %v19422_v62 = vld [vmem:[#allocation2 + $0x21c0] ss:$28 sps:$4 sm:$0xff]  }
 0x589   :  { %11072 = vmatprep.mubr.bf16.mxu0 %v20782_v19  ;;  %v19425_v63 = vld [vmem:[#allocation2 + $0x2960] ss:$28 sps:$4 sm:$0xff]  }
 0x58a   :  { %11043 = vmatpush1.bf16.msra.mxu0 %v19374_v47  ;;  %v19430_v47 = vld [vmem:[#allocation2 + $0x21fc] ss:$28 sps:$4 sm:$0xff]  }
 0x58b   :  { %11044 = vmatprep.subr.bf16.mxu0 %v19379_v49  ;;  %v19433_v49 = vld [vmem:[#allocation2 + $0x299c] ss:$28 sps:$4 sm:$0xff]  }
 0x58e   :  { %11045 = vmatpush1.bf16.msra.mxu0 %v19377_v2  ;;  %v19428_v2 = vld [vmem:[#allocation2 + $0x21f8] ss:$28 sps:$4 sm:$0xff]  }
 0x58f   :  { %11046 = vmatprep.subr.bf16.mxu0 %v19385_v3  ;;  %v19431_v3 = vld [vmem:[#allocation2 + $0x2998] ss:$28 sps:$4 sm:$0xff]  }
 0x591   :  { %v17264_v55 = vpop.f32.mrb[48].mxu1 }
 0x592   :  { %16593 = vmatmul.mubr.msk.bf16.vlgmr.msra.gmra.mrb[56].mxu1 %vm2349_vm0, %v20976_v61  ;;  %v17265_v9 = vpop.f32.mrb[49].mxu1  ;;  %11047 = vmatpush1.bf16.msra.mxu0 %v19383_v4  ;;  %v19395_v61 = vld [vmem:[#allocation2 + $0x2848] ss:$28 sps:$4 sm:$0xff]   ;;  %v19439_v4 = vld [vmem:[#allocation2 + $0x29d4] ss:$28 sps:$4 sm:$0xff]  }
 0x593   :  { %11123 = vmatpush1.bf16.msra.mxu1 %v19380_v56  ;;  %v17266_v10 = vadd.f32 %v17265_v9, %v17264_v55  ;;  %v17267_v11 = vpop.f32.mrb[50].mxu1  ;;  %11048 = vmatprep.subr.bf16.mxu0 %v19391_v7  ;;  %v19436_v56 = vld [vmem:[#allocation2 + $0x2234] ss:$28 sps:$4 sm:$0xff]   ;;  %v19442_v55 = vld [vmem:[#allocation2 + $0x226c] ss:$28 sps:$4 sm:$0xff]  }
 0x594   :  { %v17268_v20 = vpop.f32.mrb[51].mxu1  ;;  %11124 = vmatprep.subr.bf16.mxu1 %v19388_v6  ;;  %11154 = vmatprep.mubr.bf16.mxu1 %v20752_v52  ;;  %v19434_v6 = vld [vmem:[#allocation2 + $0x2230] ss:$28 sps:$4 sm:$0xff]   ;;  %v19443_v11 = vld [vmem:[#allocation2 + $0x2a08] ss:$28 sps:$4 sm:$0xff]  }
 0x595   :  { %v8585_v24 = vadd.f32 %v17266_v10, %v21015_v43  ;;  %v19437_v7 = vld [vmem:[#allocation2 + $0x29d0] ss:$28 sps:$4 sm:$0xff]   ;;  %v19440_v10 = vld [vmem:[#allocation2 + $0x2268] ss:$28 sps:$4 sm:$0xff]   ;;  %v19446_v20 = vld [vmem:[#allocation2 + $0x22a0] ss:$28 sps:$4 sm:$0xff]  }
 0x596   :  { %11049 = vmatpush1.bf16.msra.mxu0 %v19389_v13  ;;  %v19445_v9 = vld [vmem:[#allocation2 + $0x2a0c] ss:$28 sps:$4 sm:$0xff]   ;;  %v19451_v13 = vld [vmem:[#allocation2 + $0x2a44] ss:$28 sps:$4 sm:$0xff]  }
 0x597   :  { %11125 = vmatpush1.bf16.msra.mxu1 %v19386_v12  ;;  %11050 = vmatprep.subr.bf16.mxu0 %v19397_v22  ;;  %v19448_v12 = vld [vmem:[#allocation2 + $0x22a4] ss:$28 sps:$4 sm:$0xff]   ;;  %v19454_v22 = vld [vmem:[#allocation2 + $0x22dc] ss:$28 sps:$4 sm:$0xff]  }
 0x598   :  { %11126 = vmatprep.subr.bf16.mxu1 %v19394_v21  ;;  %v19449_v21 = vld [vmem:[#allocation2 + $0x2a40] ss:$28 sps:$4 sm:$0xff]  }
 0x599   :  { %v8624_v30 = vpop.f32.mrb[52].mxu1 }
 0x59a   :  { %v8625_v31 = vadd.f32 %v8624_v30, %v8585_v24  ;;  %v17396_v32 = vpop.f32.mrb[53].mxu1  ;;  %11051 = vmatpush1.bf16.msra.mxu0 %v19395_v61  ;;  %v19457_v24 = vld [vmem:[#allocation2 + $0x2a7c] ss:$28 sps:$4 sm:$0xff]   ;;  %v19458_v30 = vld [vmem:[#allocation2 + $0x2310] ss:$28 sps:$4 sm:$0xff]  }
 0x59b   :  { %11127 = vmatpush1.bf16.msra.mxu1 %v19392_v25  ;;  %v8627_v37 = vpop.f32.mrb[54].mxu1  ;;  %11052 = vmatprep.subr.bf16.mxu0 %v19403_v29  ;;  %v19452_v25 = vld [vmem:[#allocation2 + $0x22d8] ss:$28 sps:$4 sm:$0xff]   ;;  %v19463_v32 = vld [vmem:[#allocation2 + $0x234c] ss:$28 sps:$4 sm:$0xff]  }
 0x59c   :  { %v21028_v43 = vmax.f32 %v5820_v5, %v8625_v31  ;;  %v17397_v51 = vpop.f32.mrb[55].mxu1  ;;  %11128 = vmatprep.subr.bf16.mxu1 %v19400_v26  ;;  %v19416_v5 = vld [vmem:[#allocation2 + $0x2188] ss:$28 sps:$4 sm:$0xff]   ;;  %v19455_v61 = vld [vmem:[#allocation2 + $0x2a78] ss:$28 sps:$4 sm:$0xff]  }
 0x59d   :  { %v19460_v26 = vld [vmem:[#allocation2 + $0x2314] ss:$28 sps:$4 sm:$0xff]   ;;  %v19473_v37 = vld [vmem:[#allocation2 + $0x2200] ss:$28 sps:$4 sm:$0xff]  }
 0x59e   :  { %11053 = vmatpush1.bf16.msra.mxu0 %v19401_v48  ;;  %v19469_v29 = vld [vmem:[#allocation2 + $0x2ab4] ss:$28 sps:$4 sm:$0xff]   ;;  %v19466_v48 = vld [vmem:[#allocation2 + $0x2384] ss:$28 sps:$4 sm:$0xff]  }
 0x59f   :  { %11129 = vmatpush1.bf16.msra.mxu1 %v19398_v45  ;;  %11054 = vmatprep.subr.bf16.mxu0 %v19409_v14  ;;  %v19467_v31 = vld [vmem:[#allocation2 + $0x2ab0] ss:$28 sps:$4 sm:$0xff]   ;;  %v19461_v45 = vld [vmem:[#allocation2 + $0x2348] ss:$28 sps:$4 sm:$0xff]   ;;  %v19464_v51 = vld [vmem:[#allocation2 + $0x2380] ss:$28 sps:$4 sm:$0xff]  }
 0x5a0   :  { %11130 = vmatprep.subr.bf16.mxu1 %v19406_v58  ;;  %v19472_v58 = vld [vmem:[#allocation2 + $0x23bc] ss:$28 sps:$4 sm:$0xff]  }
 0x5a1   :  { %v19470_v14 = vld [vmem:[#allocation2 + $0x23b8] ss:$28 sps:$4 sm:$0xff]  }
 0x5a2   :  { %11055 = vmatpush1.bf16.msra.mxu0 %v19407_v28  ;;  %v19477_v28 = vld [vmem:[#allocation2 + $0x23f4] ss:$28 sps:$4 sm:$0xff]  }
 0x5a3   :  { %11131 = vmatpush1.bf16.msra.mxu1 %v19404_v27  ;;  %11056 = vmatprep.subr.bf16.mxu0 %v19415_v18  ;;  %v19474_v27 = vld [vmem:[#allocation2 + $0x2040] ss:$28 sps:$4 sm:$0xff]   ;;  %v21036_v18 = vld [vmem:[%s21201_s0 + $0x18] ss:$0 sps:$4 sm:$0xff]  }
 0x5a4   :  { %11132 = vmatprep.subr.bf16.mxu1 %v19412_v59  ;;  %v19478_v59 = vld [vmem:[#allocation2 + $0x2238] ss:$28 sps:$4 sm:$0xff]  }
 0x5a6   :  { %11057 = vmatpush1.bf16.msra.mxu0 %v19413_v57  ;;  %v19479_v57 = vld [vmem:[#allocation2 + $0x2078] ss:$28 sps:$4 sm:$0xff]  }
 0x5a7   :  { %11133 = vmatpush1.bf16.msra.mxu1 %v19410_v38  ;;  %11058 = vmatprep.subr.bf16.mxu0 %v19421_v1  ;;  %v19475_v38 = vld [vmem:[#allocation2 + $0x23f0] ss:$28 sps:$4 sm:$0xff]  }
 0x5a8   :  { %11134 = vmatprep.subr.bf16.mxu1 %v19418_v16  ;;  %v19482_v16 = vld [vmem:[#allocation2 + $0x242c] ss:$28 sps:$4 sm:$0xff]  }
 0x5a9   :  { %v19483_v1 = vld [vmem:[#allocation2 + $0x2270] ss:$28 sps:$4 sm:$0xff]  }
 0x5aa   :  { %11059 = vmatpush1.bf16.msra.mxu0 %v19419_v60  ;;  %v19484_v60 = vld [vmem:[#allocation2 + $0x20b0] ss:$28 sps:$4 sm:$0xff]  }
 0x5ab   :  { %11135 = vmatpush1.bf16.msra.mxu1 %v19416_v5  ;;  %11060 = vmatprep.subr.bf16.mxu0 %v19427_v39  ;;  %v19480_v5 = vld [vmem:[#allocation2 + $0x2428] ss:$28 sps:$4 sm:$0xff]  }
 0x5ac   :  { %11136 = vmatprep.subr.bf16.mxu1 %v19424_v17  ;;  %v19487_v17 = vld [vmem:[#allocation2 + $0x2464] ss:$28 sps:$4 sm:$0xff]  }
 0x5ad   :  { %v19488_v39 = vld [vmem:[#allocation2 + $0x22a8] ss:$28 sps:$4 sm:$0xff]  }
 0x5ae   :  { %11061 = vmatpush1.bf16.msra.mxu0 %v19425_v63 }
 0x5af   :  { %11137 = vmatpush1.bf16.msra.mxu1 %v19422_v62  ;;  %11062 = vmatprep.subr.bf16.mxu0 %v19433_v49  ;;  %v19485_v49 = vld [vmem:[#allocation2 + $0x2460] ss:$28 sps:$4 sm:$0xff]  }
 0x5b0   :  { %11138 = vmatprep.subr.bf16.mxu1 %v19430_v47 }
 0x5b2   :  { %11063 = vmatpush1.bf16.msra.mxu0 %v19431_v3  ;;  %v19489_v3 = vld [vmem:[#allocation2 + $0x20e8] ss:$28 sps:$4 sm:$0xff]  }
 0x5b3   :  { %11139 = vmatpush1.bf16.msra.mxu1 %v19428_v2  ;;  %11064 = vmatprep.subr.bf16.mxu0 %v19439_v4  ;;  %v19492_v4 = vld [vmem:[#allocation2 + $0x249c] ss:$28 sps:$4 sm:$0xff]  }
 0x5b4   :  { %11140 = vmatprep.subr.bf16.mxu1 %v19436_v56 }
 0x5b6   :  { %11065 = vmatpush1.bf16.msra.mxu0 %v19437_v7  ;;  %v19498_v7 = vld [vmem:[#allocation2 + $0x2318] ss:$28 sps:$4 sm:$0xff]  }
 0x5b7   :  { %11141 = vmatpush1.bf16.msra.mxu1 %v19434_v6  ;;  %11066 = vmatprep.subr.bf16.mxu0 %v19445_v9  ;;  %v19493_v6 = vld [vmem:[#allocation2 + $0x22e0] ss:$28 sps:$4 sm:$0xff]   ;;  %v19500_v9 = vld [vmem:[#allocation2 + $0x2508] ss:$28 sps:$4 sm:$0xff]  }
 0x5b8   :  { %11142 = vmatprep.subr.bf16.mxu1 %v19442_v55  ;;  %v19503_v55 = vld [vmem:[#allocation2 + $0x2350] ss:$28 sps:$4 sm:$0xff]  }
 0x5ba   :  { %11067 = vmatpush1.bf16.msra.mxu0 %v19443_v11  ;;  %v19507_v11 = vld [vmem:[#allocation2 + $0x2544] ss:$28 sps:$4 sm:$0xff]  }
 0x5bb   :  { %11143 = vmatpush1.bf16.msra.mxu1 %v19440_v10  ;;  %11068 = vmatprep.subr.bf16.mxu0 %v19451_v13  ;;  %v19504_v10 = vld [vmem:[#allocation2 + $0x2190] ss:$28 sps:$4 sm:$0xff]   ;;  %v19505_v13 = vld [vmem:[#allocation2 + $0x2540] ss:$28 sps:$4 sm:$0xff]  }
 0x5bc   :  { %11144 = vmatprep.subr.bf16.mxu1 %v19448_v12  ;;  %v19508_v12 = vld [vmem:[#allocation2 + $0x2388] ss:$28 sps:$4 sm:$0xff]  }
 0x5be   :  { %11069 = vmatpush1.bf16.msra.mxu0 %v19449_v21  ;;  %v19512_v21 = vld [vmem:[#allocation2 + $0x257c] ss:$28 sps:$4 sm:$0xff]  }
 0x5bf   :  { %11145 = vmatpush1.bf16.msra.mxu1 %v19446_v20  ;;  %11070 = vmatprep.subr.bf16.mxu0 %v19457_v24  ;;  %v19509_v20 = vld [vmem:[#allocation2 + $0x21c8] ss:$28 sps:$4 sm:$0xff]   ;;  %v19510_v24 = vld [vmem:[#allocation2 + $0x2578] ss:$28 sps:$4 sm:$0xff]  }
 0x5c0   :  { %11146 = vmatprep.subr.bf16.mxu1 %v19454_v22  ;;  %v19513_v22 = vld [vmem:[#allocation2 + $0x2580] ss:$28 sps:$4 sm:$0xff]  }
 0x5c2   :  { %11071 = vmatpush1.bf16.msra.mxu0 %v19455_v61  ;;  %v19517_v61 = vld [vmem:[#allocation2 + $0x25b4] ss:$28 sps:$4 sm:$0xff]  }
 0x5c3   :  { %11147 = vmatpush1.bf16.msra.mxu1 %v19452_v25  ;;  %11081 = vmatprep.subr.bf16.mxu0 %v19469_v29  ;;  %v19514_v25 = vld [vmem:[#allocation2 + $0x23c0] ss:$28 sps:$4 sm:$0xff]   ;;  %v19515_v29 = vld [vmem:[#allocation2 + $0x25b0] ss:$28 sps:$4 sm:$0xff]  }
 0x5c4   :  { %11148 = vmatprep.subr.bf16.mxu1 %v19460_v26  ;;  %v19518_v26 = vld [vmem:[#allocation2 + $0x25b8] ss:$28 sps:$4 sm:$0xff]  }
 0x5c5   :  { %11073 = vmatmul.mubr.bf16.vlgmr.msra.gmra.mrb[36].mxu0 %v20790_v23 }
 0x5c6   :  { %11082 = vmatpush1.bf16.msra.mxu0 %v19467_v31  ;;  %11113 = vmatprep.mubr.bf16.mxu0 %v20552_v0  ;;  %v19522_v31 = vld [vmem:[#allocation2 + $0x25ec] ss:$28 sps:$4 sm:$0xff]  }
 0x5c7   :  { %11149 = vmatpush1.bf16.msra.mxu1 %v19458_v30  ;;  %17272 = vmatprep.subr.bf16.mxu0 %v19473_v37  ;;  %v19519_v30 = vld [vmem:[#allocation2 + $0x23f8] ss:$28 sps:$4 sm:$0xff]   ;;  %v19520_v37 = vld [vmem:[#allocation2 + $0x25e8] ss:$28 sps:$4 sm:$0xff]  }
 0x5c8   :  { %11150 = vmatprep.subr.bf16.mxu1 %v19463_v32  ;;  %v19523_v32 = vld [vmem:[#allocation2 + $0x25f0] ss:$28 sps:$4 sm:$0xff]  }
 0x5cb   :  { %11151 = vmatpush1.bf16.msra.mxu1 %v19461_v45  ;;  %v19524_v45 = vld [vmem:[#allocation2 + $0x2430] ss:$28 sps:$4 sm:$0xff]  }
 0x5cc   :  { %11152 = vmatprep.subr.bf16.mxu1 %v19466_v48  ;;  %v19527_v48 = vld [vmem:[#allocation2 + $0x2624] ss:$28 sps:$4 sm:$0xff]  }
 0x5cf   :  { %11153 = vmatpush1.bf16.msra.mxu1 %v19464_v51  ;;  %v19528_v51 = vld [vmem:[#allocation2 + $0x2628] ss:$28 sps:$4 sm:$0xff]  }
 0x5d0   :  { %11163 = vmatprep.subr.bf16.mxu1 %v19472_v58  ;;  %v19529_v58 = vld [vmem:[#allocation2 + $0x2468] ss:$28 sps:$4 sm:$0xff]  }
 0x5d1   :  { %16594 = vmatmul.mubr.msk.bf16.vlgmr.msra.gmra.mrb[36].mxu0 %vm2349_vm0, %v21036_v18 }
 0x5d2   :  { %11155 = vmatmul.mubr.bf16.vlgmr.msra.gmra.mrb[60].mxu1 %v20756_v8  ;;  %17273 = vmatpush3.bf16.msra.mxu0 %v19474_v27  ;;  %v19533_v27 = vld [vmem:[#allocation2 + $0x2660] ss:$28 sps:$4 sm:$0xff]  }
 0x5d3   :  { %11164 = vmatpush1.bf16.msra.mxu1 %v19470_v14  ;;  %17274 = vmatprep.subr.bf16.mxu0 %v19478_v59  ;;  %v19532_v14 = vld [vmem:[#allocation2 + $0x265c] ss:$28 sps:$4 sm:$0xff]   ;;  %v19537_v59 = vld [vmem:[#allocation2 + $0x2694] ss:$28 sps:$4 sm:$0xff]  }
 0x5d4   :  { %11165 = vmatprep.subr.bf16.mxu1 %v19477_v28  ;;  %11318 = vmatprep.mubr.bf16.mxu0 %v20752_v52  ;;  %v19530_v28 = vld [vmem:[#allocation2 + $0x2658] ss:$28 sps:$4 sm:$0xff]  }
 0x5d5   :  { %11195 = vmatprep.mubr.bf16.mxu1 %v20767_v35 }
 0x5d6   :  { %17275 = vmatpush3.bf16.msra.mxu0 %v19479_v57  ;;  %v19535_v57 = vld [vmem:[#allocation2 + $0x2690] ss:$28 sps:$4 sm:$0xff]  }
 0x5d7   :  { %11166 = vmatpush1.bf16.msra.mxu1 %v19475_v38  ;;  %17276 = vmatprep.subr.bf16.mxu0 %v19483_v1  ;;  %v19538_v38 = vld [vmem:[#allocation2 + $0x2698] ss:$28 sps:$4 sm:$0xff]   ;;  %v19542_v1 = vld [vmem:[#allocation2 + $0x26cc] ss:$28 sps:$4 sm:$0xff]  }
 0x5d8   :  { %11167 = vmatprep.subr.bf16.mxu1 %v19482_v16  ;;  %v8463_v62 = vpop.f32.mrb[32].mxu0  ;;  %v19539_v16 = vld [vmem:[#allocation2 + $0x24d8] ss:$28 sps:$4 sm:$0xff]  }
 0x5d9   :  { %v21045_v63 = vmax.f32 %v5818_v36, %v8463_v62  ;;  %v8465_v47 = vpop.f32.mrb[33].mxu0  ;;  %v19497_v36 = vld [vmem:[#allocation2 + $0x24d4] ss:$28 sps:$4 sm:$0xff]   ;;  %v19548_v62 = vld [vmem:[#allocation2 + $0x2708] ss:$28 sps:$4 sm:$0xff]  }
 0x5da   :  { %17277 = vmatpush3.bf16.msra.mxu0 %v19484_v60  ;;  %v21050_v52 = vmax.f32 %v5819_v54, %v8465_v47  ;;  %v8467_v2 = vpop.f32.mrb[34].mxu0  ;;  %v19502_v54 = vld [vmem:[#allocation2 + $0x250c] ss:$28 sps:$4 sm:$0xff]   ;;  %v19545_v47 = vld [vmem:[#allocation2 + $0x2700] ss:$28 sps:$4 sm:$0xff]  }
 0x5db   :  { %11168 = vmatpush1.bf16.msra.mxu1 %v19480_v5  ;;  %v8468_v56 = vpop.f32.mrb[35].mxu0  ;;  %17278 = vmatprep.subr.bf16.mxu0 %v19488_v39  ;;  %v19543_v5 = vld [vmem:[#allocation2 + $0x26d0] ss:$28 sps:$4 sm:$0xff]   ;;  %v19540_v60 = vld [vmem:[#allocation2 + $0x26c8] ss:$28 sps:$4 sm:$0xff]  }
 0x5dc   :  { %11169 = vmatprep.subr.bf16.mxu1 %v19487_v17  ;;  %v19544_v17 = vld [vmem:[#allocation2 + $0x2510] ss:$28 sps:$4 sm:$0xff]   ;;  %v19547_v39 = vld [vmem:[#allocation2 + $0x2704] ss:$28 sps:$4 sm:$0xff]   ;;  %v19552_v2 = vld [vmem:[#allocation2 + $0x273c] ss:$28 sps:$4 sm:$0xff]  }
 0x5dd   :  { %v19550_v56 = vld [vmem:[#allocation2 + $0x2738] ss:$28 sps:$4 sm:$0xff]  }
 0x5de   :  { %17279 = vmatpush3.bf16.msra.mxu0 %v19489_v3  ;;  %v19553_v3 = vld [vmem:[#allocation2 + $0x2900] ss:$28 sps:$4 sm:$0xff]  }
 0x5df   :  { %11170 = vmatpush1.bf16.msra.mxu1 %v19485_v49  ;;  %17280 = vmatprep.subr.bf16.mxu0 %v19493_v6  ;;  %v19549_v49 = vld [vmem:[#allocation2 + $0x2548] ss:$28 sps:$4 sm:$0xff]   ;;  %v19557_v6 = vld [vmem:[#allocation2 + $0x2774] ss:$28 sps:$4 sm:$0xff]  }
 0x5e0   :  { %11171 = vmatprep.subr.bf16.mxu1 %v19492_v4  ;;  %v19554_v4 = vld [vmem:[#allocation2 + $0x2740] ss:$28 sps:$4 sm:$0xff]  }
 0x5e2   :  { %17281 = vmatpush3.bf16.msra.mxu0 %v19494_v40  ;;  %v19555_v40 = vld [vmem:[#allocation2 + $0x2770] ss:$28 sps:$4 sm:$0xff]  }
 0x5e3   :  { %11172 = vmatpush1.bf16.msra.mxu1 %v19490_v41  ;;  %17282 = vmatprep.subr.bf16.mxu0 %v19498_v7  ;;  %v19558_v41 = vld [vmem:[#allocation2 + $0x2938] ss:$28 sps:$4 sm:$0xff]   ;;  %v19562_v7 = vld [vmem:[#allocation2 + $0x27ac] ss:$28 sps:$4 sm:$0xff]  }
 0x5e4   :  { %11173 = vmatprep.subr.bf16.mxu1 %v19497_v36  ;;  %v19559_v36 = vld [vmem:[#allocation2 + $0x2778] ss:$28 sps:$4 sm:$0xff]  }
 0x5e6   :  { %17283 = vmatpush3.bf16.msra.mxu0 %v19499_v53  ;;  %v19560_v53 = vld [vmem:[#allocation2 + $0x27a8] ss:$28 sps:$4 sm:$0xff]  }
 0x5e7   :  { %11174 = vmatpush1.bf16.msra.mxu1 %v19495_v42  ;;  %17284 = vmatprep.subr.bf16.mxu0 %v19503_v55  ;;  %v19563_v42 = vld [vmem:[#allocation2 + $0x2970] ss:$28 sps:$4 sm:$0xff]   ;;  %v19567_v55 = vld [vmem:[#allocation2 + $0x27e4] ss:$28 sps:$4 sm:$0xff]  }
 0x5e8   :  { %11175 = vmatprep.subr.bf16.mxu1 %v19502_v54  ;;  %v19564_v54 = vld [vmem:[#allocation2 + $0x27b0] ss:$28 sps:$4 sm:$0xff]  }
 0x5ea   :  { %17285 = vmatpush3.bf16.msra.mxu0 %v19504_v10  ;;  %v19569_v10 = vld [vmem:[#allocation2 + $0x27e8] ss:$28 sps:$4 sm:$0xff]  }
 0x5eb   :  { %11176 = vmatpush1.bf16.msra.mxu1 %v19500_v9  ;;  %17286 = vmatprep.subr.bf16.mxu0 %v19508_v12  ;;  %v19565_v9 = vld [vmem:[#allocation2 + $0x27e0] ss:$28 sps:$4 sm:$0xff]  }
 0x5ec   :  { %11177 = vmatprep.subr.bf16.mxu1 %v19507_v11  ;;  %v19572_v11 = vld [vmem:[#allocation2 + $0x281c] ss:$28 sps:$4 sm:$0xff]  }
 0x5ed   :  { %v19573_v12 = vld [vmem:[#allocation2 + $0x29e0] ss:$28 sps:$4 sm:$0xff]  }
 0x5ee   :  { %17287 = vmatpush3.bf16.msra.mxu0 %v19509_v20  ;;  %v19577_v20 = vld [vmem:[#allocation2 + $0x2854] ss:$28 sps:$4 sm:$0xff]  }
 0x5ef   :  { %11178 = vmatpush1.bf16.msra.mxu1 %v19505_v13  ;;  %17294 = vmatprep.subr.bf16.mxu0 %v19513_v22  ;;  %v19570_v13 = vld [vmem:[#allocation2 + $0x2818] ss:$28 sps:$4 sm:$0xff]   ;;  %v19575_v22 = vld [vmem:[#allocation2 + $0x2850] ss:$28 sps:$4 sm:$0xff]  }
 0x5f0   :  { %11179 = vmatprep.subr.bf16.mxu1 %v19512_v21  ;;  %v19578_v21 = vld [vmem:[#allocation2 + $0x2a18] ss:$28 sps:$4 sm:$0xff]  }
 0x5f1   :  { %11319 = vmatmul.mubr.bf16.vlgmr.msra.gmra.mrb[40].mxu0 %v20756_v8  ;;  %v19525_v8 = vld [vmem:[#allocation2 + $0x2620] ss:$28 sps:$4 sm:$0xff]  }
 0x5f2   :  { %17295 = vmatpush3.bf16.msra.mxu0 %v19514_v25  ;;  %11358 = vmatprep.mubr.bf16.mxu0 %v20767_v35  ;;  %v19534_v35 = vld [vmem:[#allocation2 + $0x24a0] ss:$28 sps:$4 sm:$0xff]   ;;  %v19582_v25 = vld [vmem:[#allocation2 + $0x288c] ss:$28 sps:$4 sm:$0xff]  }
 0x5f3   :  { %11180 = vmatpush1.bf16.msra.mxu1 %v19510_v24  ;;  %17296 = vmatprep.subr.bf16.mxu0 %v19518_v26  ;;  %v19579_v24 = vld [vmem:[#allocation2 + $0x2858] ss:$28 sps:$4 sm:$0xff]   ;;  %v19580_v26 = vld [vmem:[#allocation2 + $0x2888] ss:$28 sps:$4 sm:$0xff]  }
 0x5f4   :  { %11181 = vmatprep.subr.bf16.mxu1 %v19517_v61  ;;  %v19583_v61 = vld [vmem:[#allocation2 + $0x2a50] ss:$28 sps:$4 sm:$0xff]  }
 0x5f6   :  { %17297 = vmatpush3.bf16.msra.mxu0 %v19519_v30  ;;  %v19587_v30 = vld [vmem:[#allocation2 + $0x28c4] ss:$28 sps:$4 sm:$0xff]  }
 0x5f7   :  { %11182 = vmatpush1.bf16.msra.mxu1 %v19515_v29  ;;  %17298 = vmatprep.subr.bf16.mxu0 %v19523_v32  ;;  %v19584_v29 = vld [vmem:[#allocation2 + $0x2890] ss:$28 sps:$4 sm:$0xff]   ;;  %v19585_v32 = vld [vmem:[#allocation2 + $0x28c0] ss:$28 sps:$4 sm:$0xff]  }
 0x5f8   :  { %11183 = vmatprep.subr.bf16.mxu1 %v19522_v31  ;;  %v19588_v31 = vld [vmem:[#allocation2 + $0x2a88] ss:$28 sps:$4 sm:$0xff]  }
 0x5fa   :  { %17299 = vmatpush3.bf16.msra.mxu0 %v19524_v45  ;;  %v19592_v45 = vld [vmem:[#allocation2 + $0x28fc] ss:$28 sps:$4 sm:$0xff]  }
 0x5fb   :  { %11184 = vmatpush1.bf16.msra.mxu1 %v19520_v37  ;;  %17300 = vmatprep.subr.bf16.mxu0 %v19528_v51  ;;  %v19589_v37 = vld [vmem:[#allocation2 + $0x28c8] ss:$28 sps:$4 sm:$0xff]   ;;  %v19596_v51 = vld [vmem:[#allocation2 + $0x2ac0] ss:$28 sps:$4 sm:$0xff]  }
 0x5fc   :  { %11185 = vmatprep.subr.bf16.mxu1 %v19527_v48  ;;  %v19590_v48 = vld [vmem:[#allocation2 + $0x28f8] ss:$28 sps:$4 sm:$0xff]  }
 0x5fe   :  { %17301 = vmatpush3.bf16.msra.mxu0 %v19529_v58  ;;  %v19602_v58 = vld [vmem:[#allocation6 + $0x4] ss:$8 sps:$4 sm:$0xff]  }
 0x5ff   :  { %11186 = vmatpush1.bf16.msra.mxu1 %v19525_v8  ;;  %17302 = vmatprep.subr.bf16.mxu0 %v19533_v27  ;;  %v19595_v8 = vld [vmem:[#allocation2 + $0x2934] ss:$28 sps:$4 sm:$0xff]   ;;  %v19599_v27 = vld [vmem:[#allocation2 + $0x296c] ss:$28 sps:$4 sm:$0xff]  }
 0x600   :  { %11187 = vmatprep.subr.bf16.mxu1 %v19532_v14  ;;  %v19593_v14 = vld [vmem:[#allocation2 + $0x2930] ss:$28 sps:$4 sm:$0xff]  }
 0x602   :  { %17303 = vmatpush3.bf16.msra.mxu0 %v19534_v35  ;;  %v19600_v35 = vld [vmem:[#allocation6] ss:$8 sps:$4 sm:$0xff]  }
 0x603   :  { %11188 = vmatpush1.bf16.msra.mxu1 %v19530_v28  ;;  %17304 = vmatprep.subr.bf16.mxu0 %v19538_v38  ;;  %v19597_v28 = vld [vmem:[#allocation2 + $0x2968] ss:$28 sps:$4 sm:$0xff]  }
 0x604   :  { %11189 = vmatprep.subr.bf16.mxu1 %v19537_v59  ;;  %v19605_v59 = vld [vmem:[#allocation2 + $0x29a4] ss:$28 sps:$4 sm:$0xff]  }
 0x605   :  { %v19608_v38 = vld [vmem:[#allocation6 + $0x14] ss:$8 sps:$4 sm:$0xff]  }
 0x606   :  { %17305 = vmatpush3.bf16.msra.mxu0 %v19539_v16  ;;  %v19606_v16 = vld [vmem:[#allocation6 + $0x10] ss:$8 sps:$4 sm:$0xff]  }
 0x607   :  { %11190 = vmatpush1.bf16.msra.mxu1 %v19535_v57  ;;  %17306 = vmatprep.subr.bf16.mxu0 %v19543_v5  ;;  %v19603_v57 = vld [vmem:[#allocation2 + $0x29a0] ss:$28 sps:$4 sm:$0xff]   ;;  %v19614_v5 = vld [vmem:[#allocation6 + $0x24] ss:$8 sps:$4 sm:$0xff]  }
 0x608   :  { %11191 = vmatprep.subr.bf16.mxu1 %v19542_v1  ;;  %v19611_v1 = vld [vmem:[#allocation2 + $0x29dc] ss:$28 sps:$4 sm:$0xff]  }
 0x60a   :  { %17307 = vmatpush3.bf16.msra.mxu0 %v19544_v17  ;;  %v19612_v17 = vld [vmem:[#allocation6 + $0x20] ss:$8 sps:$4 sm:$0xff]  }
 0x60b   :  { %11192 = vmatpush1.bf16.msra.mxu1 %v19540_v60  ;;  %17308 = vmatprep.subr.bf16.mxu0 %v19548_v62  ;;  %v19609_v60 = vld [vmem:[#allocation2 + $0x29d8] ss:$28 sps:$4 sm:$0xff]   ;;  %v19620_v62 = vld [vmem:[#allocation6 + $0x34] ss:$8 sps:$4 sm:$0xff]  }
 0x60c   :  { %11193 = vmatprep.subr.bf16.mxu1 %v19547_v39  ;;  %v19617_v39 = vld [vmem:[#allocation2 + $0x2a14] ss:$28 sps:$4 sm:$0xff]  }
 0x60e   :  { %17309 = vmatpush3.bf16.msra.mxu0 %v19549_v49  ;;  %v19618_v49 = vld [vmem:[#allocation6 + $0x30] ss:$8 sps:$4 sm:$0xff]  }
 0x60f   :  { %11194 = vmatpush1.bf16.msra.mxu1 %v19545_v47  ;;  %17316 = vmatprep.subr.bf16.mxu0 %v19553_v3  ;;  %v19615_v47 = vld [vmem:[#allocation2 + $0x2a10] ss:$28 sps:$4 sm:$0xff]  }
 0x610   :  { %11204 = vmatprep.subr.bf16.mxu1 %v19552_v2  ;;  %v19623_v2 = vld [vmem:[#allocation2 + $0x2a4c] ss:$28 sps:$4 sm:$0xff]  }
 0x611   :  { %11359 = vmatmul.mubr.bf16.vlgmr.msra.gmra.mrb[44].mxu0 %v20773_v15  ;;  %v19626_v3 = vld [vmem:[#allocation6 + $0x44] ss:$8 sps:$4 sm:$0xff]  }
 0x612   :  { %11196 = vmatmul.mubr.bf16.vlgmr.msra.gmra.mrb[60].mxu1 %v20773_v15  ;;  %17317 = vmatpush3.bf16.msra.mxu0 %v19554_v4  ;;  %v19568_v15 = vld [vmem:[#allocation2 + $0x29a8] ss:$28 sps:$4 sm:$0xff]  }
 0x613   :  { %11205 = vmatpush1.bf16.msra.mxu1 %v19550_v56  ;;  %17318 = vmatprep.subr.bf16.mxu0 %v19558_v41  ;;  %v19621_v56 = vld [vmem:[#allocation2 + $0x2a48] ss:$28 sps:$4 sm:$0xff]  }
 0x614   :  { %11206 = vmatprep.subr.bf16.mxu1 %v19557_v6  ;;  %11398 = vmatprep.mubr.bf16.mxu0 %v20782_v19  ;;  %v19624_v4 = vld [vmem:[#allocation6 + $0x40] ss:$8 sps:$4 sm:$0xff]   ;;  %v19629_v6 = vld [vmem:[#allocation2 + $0x2a84] ss:$28 sps:$4 sm:$0xff]  }
 0x615   :  { %11236 = vmatprep.mubr.bf16.mxu1 %v20782_v19  ;;  %v19574_v19 = vld [vmem:[#allocation2 + $0x2820] ss:$28 sps:$4 sm:$0xff]  }
 0x616   :  { %17319 = vmatpush3.bf16.msra.mxu0 %v19559_v36  ;;  %v19632_v41 = vld [vmem:[#allocation6 + $0x54] ss:$8 sps:$4 sm:$0xff]   ;;  %v19630_v36 = vld [vmem:[#allocation6 + $0x50] ss:$8 sps:$4 sm:$0xff]  }
 0x617   :  { %11207 = vmatpush1.bf16.msra.mxu1 %v19555_v40  ;;  %17320 = vmatprep.subr.bf16.mxu0 %v19563_v42  ;;  %v19627_v40 = vld [vmem:[#allocation2 + $0x2a80] ss:$28 sps:$4 sm:$0xff]   ;;  %v19638_v42 = vld [vmem:[#allocation6 + $0x64] ss:$8 sps:$4 sm:$0xff]  }
 0x618   :  { %11208 = vmatprep.subr.bf16.mxu1 %v19562_v7  ;;  %v19635_v7 = vld [vmem:[#allocation2 + $0x2abc] ss:$28 sps:$4 sm:$0xff]  }
 0x61a   :  { %17321 = vmatpush3.bf16.msra.mxu0 %v19564_v54  ;;  %v19636_v54 = vld [vmem:[#allocation6 + $0x60] ss:$8 sps:$4 sm:$0xff]  }
 0x61b   :  { %11209 = vmatpush1.bf16.msra.mxu1 %v19560_v53  ;;  %17322 = vmatprep.subr.bf16.mxu0 %v19568_v15  ;;  %v19633_v53 = vld [vmem:[#allocation2 + $0x2ab8] ss:$28 sps:$4 sm:$0xff]  }
 0x61c   :  { %11210 = vmatprep.subr.bf16.mxu1 %v19567_v55  ;;  %v19641_v55 = vld [vmem:[#allocation6 + $0x74] ss:$8 sps:$4 sm:$0xff]   ;;  %v19647_v15 = vld [vmem:[#allocation6 + $0x364] ss:$8 sps:$4 sm:$0xff]  }
 0x61e   :  { %17323 = vmatpush3.bf16.msra.mxu0 %v19569_v10  ;;  %v19644_v10 = vld [vmem:[#allocation6 + $0x84] ss:$8 sps:$4 sm:$0xff]  }
 0x61f   :  { %11211 = vmatpush1.bf16.msra.mxu1 %v19565_v9  ;;  %17324 = vmatprep.subr.bf16.mxu0 %v19573_v12  ;;  %v19639_v9 = vld [vmem:[#allocation6 + $0x70] ss:$8 sps:$4 sm:$0xff]   ;;  %v19650_v12 = vld [vmem:[#allocation6 + $0x94] ss:$8 sps:$4 sm:$0xff]  }
 0x620   :  { %11212 = vmatprep.subr.bf16.mxu1 %v19572_v11  ;;  %v19642_v11 = vld [vmem:[#allocation6 + $0x80] ss:$8 sps:$4 sm:$0xff]  }
 0x622   :  { %17325 = vmatpush3.bf16.msra.mxu0 %v19574_v19  ;;  %v19645_v19 = vld [vmem:[#allocation6 + $0x360] ss:$8 sps:$4 sm:$0xff]  }
 0x623   :  { %11213 = vmatpush1.bf16.msra.mxu1 %v19570_v13  ;;  %17326 = vmatprep.subr.bf16.mxu0 %v19578_v21  ;;  %v11455_v13 = vlaneseq  ;;  %v19653_v21 = vld [vmem:[#allocation6 + $0x374] ss:$8 sps:$4 sm:$0xff]  }
 0x624   :  { %11214 = vmatprep.subr.bf16.mxu1 %v19577_v20  ;;  %v19648_v20 = vld [vmem:[#allocation6 + $0x90] ss:$8 sps:$4 sm:$0xff]  }
 0x626   :  { %17327 = vmatpush3.bf16.msra.mxu0 %v19579_v24  ;;  %v19651_v24 = vld [vmem:[#allocation6 + $0x370] ss:$8 sps:$4 sm:$0xff]  }
 0x627   :  { %11215 = vmatpush1.bf16.msra.mxu1 %v19575_v22  ;;  %17328 = vmatprep.subr.bf16.mxu0 %v19583_v61  ;;  %v19656_v22 = vld [vmem:[#allocation6 + $0xa4] ss:$8 sps:$4 sm:$0xff]  }
 0x628   :  { %11216 = vmatprep.subr.bf16.mxu1 %v19582_v25  ;;  %v19654_v25 = vld [vmem:[#allocation6 + $0xa0] ss:$8 sps:$4 sm:$0xff]   ;;  %v19659_v61 = vld [vmem:[#allocation6 + $0x384] ss:$8 sps:$4 sm:$0xff]  }
 0x62a   :  { %17329 = vmatpush3.bf16.msra.mxu0 %v19584_v29 }
 0x62b   :  { %11217 = vmatpush1.bf16.msra.mxu1 %v19580_v26  ;;  %17330 = vmatprep.subr.bf16.mxu0 %v19588_v31  ;;  %v19662_v26 = vld [vmem:[#allocation6 + $0xb4] ss:$8 sps:$4 sm:$0xff]   ;;  %v19657_v31 = vld [vmem:[#allocation6 + $0x380] ss:$8 sps:$4 sm:$0xff]  }
 0x62c   :  { %11218 = vmatprep.subr.bf16.mxu1 %v19587_v30  ;;  %v21071_v30 = vld [vmem:[#allocation4] sm:$0x7f] }
 0x62e   :  { %17331 = vmatpush3.bf16.msra.mxu0 %v19589_v37  ;;  %v19665_v37 = vld [vmem:[#allocation6 + $0x394] ss:$8 sps:$4 sm:$0xff]  }
 0x62f   :  { %11219 = vmatpush1.bf16.msra.mxu1 %v19585_v32  ;;  %17398 = vmatprep.subr.bf16.mxu0 %v20553_v34  ;;  %v19660_v32 = vld [vmem:[#allocation6 + $0xb0] ss:$8 sps:$4 sm:$0xff]  }
 0x630   :  { %11220 = vmatprep.subr.bf16.mxu1 %v19592_v45 }
 0x631   :  { %11399 = vmatmul.mubr.bf16.vlgmr.msra.gmra.mrb[48].mxu0 %v20790_v23 }
 0x632   :  { %17399 = vmatpush3.bf16.msra.mxu0 %v19596_v51  ;;  %17400 = vmatprep.mubr.msk.bf16.mxu0 %vm20554_vm1, %v20553_v34 }
 0x633   :  { %11221 = vmatpush1.bf16.msra.mxu1 %v19590_v48  ;;  %12163 = vmatprep.subr.bf16.mxu0 %v19602_v58 }
 0x634   :  { %11222 = vmatprep.subr.bf16.mxu1 %v19595_v8 }
 0x637   :  { %11223 = vmatpush1.bf16.msra.mxu1 %v19593_v14 }
 0x638   :  { %11224 = vmatprep.subr.bf16.mxu1 %v19599_v27  ;;  %v19663_v27 = vld [vmem:[#allocation6 + $0x390] ss:$8 sps:$4 sm:$0xff]  }
 0x639   :  { %17401 = vmatmul.mubr.msk.bf16.vlgmr.msra.gmra.mrb[52].mxu0 %vm2349_vm0, %v21036_v18 }
 0x63a   :  { %12164 = vmatpush1.bf16.msra.mxu0 %v19600_v35 }
 0x63b   :  { %11225 = vmatpush1.bf16.msra.mxu1 %v19597_v28  ;;  %12165 = vmatprep.subr.bf16.mxu0 %v19608_v38  ;;  %v19666_v28 = vld [vmem:[#allocation6 + $0xc0] ss:$8 sps:$4 sm:$0xff]   ;;  %v19671_v38 = vld [vmem:[#allocation6 + $0x3a4] ss:$8 sps:$4 sm:$0xff]  }
 0x63c   :  { %11226 = vmatprep.subr.bf16.mxu1 %v19605_v59 }
 0x63e   :  { %12166 = vmatpush1.bf16.msra.mxu0 %v19606_v16 }
 0x63f   :  { %11227 = vmatpush1.bf16.msra.mxu1 %v19603_v57  ;;  %12167 = vmatprep.subr.bf16.mxu0 %v19614_v5  ;;  %v19674_v57 = vld [vmem:[#allocation6 + $0xd4] ss:$8 sps:$4 sm:$0xff]   ;;  %v19672_v5 = vld [vmem:[#allocation6 + $0xd0] ss:$8 sps:$4 sm:$0xff]  }
 0x640   :  { %11228 = vmatprep.subr.bf16.mxu1 %v19611_v1 }
 0x642   :  { %12168 = vmatpush1.bf16.msra.mxu0 %v19612_v17  ;;  %v19677_v17 = vld [vmem:[#allocation6 + $0x3b4] ss:$8 sps:$4 sm:$0xff]  }
 0x643   :  { %11229 = vmatpush1.bf16.msra.mxu1 %v19609_v60  ;;  %12169 = vmatprep.subr.bf16.mxu0 %v19620_v62  ;;  %v19675_v62 = vld [vmem:[#allocation6 + $0x3b0] ss:$8 sps:$4 sm:$0xff]  }
 0x644   :  { %11230 = vmatprep.subr.bf16.mxu1 %v19617_v39  ;;  %v19680_v39 = vld [vmem:[#allocation6 + $0xe4] ss:$8 sps:$4 sm:$0xff]  }
 0x646   :  { %12170 = vmatpush1.bf16.msra.mxu0 %v19618_v49 }
 0x647   :  { %11231 = vmatpush1.bf16.msra.mxu1 %v19615_v47  ;;  %12171 = vmatprep.subr.bf16.mxu0 %v19626_v3  ;;  %v19678_v47 = vld [vmem:[#allocation6 + $0xe0] ss:$8 sps:$4 sm:$0xff]   ;;  %v19686_v3 = vld [vmem:[#allocation6 + $0xf4] ss:$8 sps:$4 sm:$0xff]  }
 0x648   :  { %11232 = vmatprep.subr.bf16.mxu1 %v19623_v2  ;;  %v19683_v2 = vld [vmem:[#allocation6 + $0x3c4] ss:$8 sps:$4 sm:$0xff]  }
 0x64a   :  { %12172 = vmatpush1.bf16.msra.mxu0 %v19624_v4  ;;  %v19684_v4 = vld [vmem:[#allocation6 + $0xf0] ss:$8 sps:$4 sm:$0xff]  }
 0x64b   :  { %11233 = vmatpush1.bf16.msra.mxu1 %v19621_v56  ;;  %12173 = vmatprep.subr.bf16.mxu0 %v19632_v41  ;;  %v19681_v56 = vld [vmem:[#allocation6 + $0x3c0] ss:$8 sps:$4 sm:$0xff]   ;;  %v19689_v41 = vld [vmem:[#allocation6 + $0x3d4] ss:$8 sps:$4 sm:$0xff]  }
 0x64c   :  { %11234 = vmatprep.subr.bf16.mxu1 %v19629_v6 }
 0x64e   :  { %12174 = vmatpush1.bf16.msra.mxu0 %v19630_v36  ;;  %v19687_v36 = vld [vmem:[#allocation6 + $0x3d0] ss:$8 sps:$4 sm:$0xff]  }
 0x64f   :  { %11235 = vmatpush1.bf16.msra.mxu1 %v19627_v40  ;;  %12175 = vmatprep.subr.bf16.mxu0 %v19638_v42  ;;  %v19692_v40 = vld [vmem:[#allocation6 + $0x104] ss:$8 sps:$4 sm:$0xff]  }
 0x650   :  { %11245 = vmatprep.subr.bf16.mxu1 %v19635_v7  ;;  %v19690_v7 = vld [vmem:[#allocation6 + $0x100] ss:$8 sps:$4 sm:$0xff]  }
 0x652   :  { %11237 = vmatmul.mubr.bf16.vlgmr.msra.gmra.mrb[60].mxu1 %v20790_v23  ;;  %12176 = vmatpush1.bf16.msra.mxu0 %v19636_v54  ;;  %v21066_v23 = vshrl.u32 %v11455_v13, 7  ;;  %v19698_v54 = vld [vmem:[#allocation6 + $0x114] ss:$8 sps:$4 sm:$0xff]   ;;  %v19707_v13 = vld [vmem:[#allocation6 + $0x404] ss:$8 sps:$4 sm:$0xff]  }
 0x653   :  { %11246 = vmatpush1.bf16.msra.mxu1 %v19633_v53  ;;  %12177 = vmatprep.subr.bf16.mxu0 %v19641_v55  ;;  %v19695_v53 = vld [vmem:[#allocation6 + $0x3e4] ss:$8 sps:$4 sm:$0xff]   ;;  %v19693_v55 = vld [vmem:[#allocation6 + $0x3e0] ss:$8 sps:$4 sm:$0xff]  }
 0x654   :  { %11277 = vmatprep.mubr.bf16.mxu1 %v20552_v0  ;;  %12976 = vmatprep.subr.bf16.mxu1 %v19647_v15  ;;  %v11461_v29 = vsub.s32 1, %v21066_v23  ;;  %v11457_v35 = vsub.s32 0, %v21066_v23  ;;  %v19696_v15 = vld [vmem:[#allocation6 + $0x110] ss:$8 sps:$4 sm:$0xff]  }
 0x656   :  { %12178 = vmatpush1.bf16.msra.mxu0 %v19639_v9  ;;  %v11462_v48 = vrot.slane %v21071_v30, %v11461_v29  ;;  %v19701_v9 = vld [vmem:[#allocation6 + $0x3f4] ss:$8 sps:$4 sm:$0xff]  }
 0x657   :  { %12179 = vmatprep.subr.bf16.mxu0 %v19644_v10  ;;  %v19704_v10 = vld [vmem:[#allocation6 + $0x124] ss:$8 sps:$4 sm:$0xff]  }
 0x65a   :  { %12180 = vmatpush1.bf16.msra.mxu0 %v19642_v11  ;;  %v19699_v11 = vld [vmem:[#allocation6 + $0x3f0] ss:$8 sps:$4 sm:$0xff]  }
 0x65b   :  { %12181 = vmatprep.subr.bf16.mxu0 %v19650_v12  ;;  %v19702_v12 = vld [vmem:[#allocation6 + $0x120] ss:$8 sps:$4 sm:$0xff]  }
 0x65e   :  { %16595 = vmatmul.mubr.msk.bf16.vlgmr.msra.gmra.mrb[60].mxu1 %vm2349_vm0, %v21036_v18  ;;  %12182 = vmatpush1.bf16.msra.mxu0 %v19648_v20  ;;  %v19668_v18 = vld [vmem:[#allocation6 + $0xc4] ss:$8 sps:$4 sm:$0xff]   ;;  %v19705_v20 = vld [vmem:[#allocation6 + $0x400] ss:$8 sps:$4 sm:$0xff]  }
 0x65f   :  { %12977 = vmatpush1.bf16.msra.mxu1 %v19645_v19  ;;  %12183 = vmatprep.subr.bf16.mxu0 %v19656_v22  ;;  %v19710_v19 = vld [vmem:[#allocation6 + $0x134] ss:$8 sps:$4 sm:$0xff]  }
 0x660   :  { %12978 = vmatprep.subr.bf16.mxu1 %v19653_v21  ;;  %v19708_v21 = vld [vmem:[#allocation6 + $0x130] ss:$8 sps:$4 sm:$0xff]   ;;  %v19713_v22 = vld [vmem:[#allocation6 + $0x414] ss:$8 sps:$4 sm:$0xff]  }
 0x662   :  { %12184 = vmatpush1.bf16.msra.mxu0 %v19654_v25  ;;  %v19711_v25 = vld [vmem:[#allocation6 + $0x410] ss:$8 sps:$4 sm:$0xff]  }
 0x663   :  { %12979 = vmatpush1.bf16.msra.mxu1 %v19651_v24  ;;  %12185 = vmatprep.subr.bf16.mxu0 %v19662_v26  ;;  %v19716_v24 = vld [vmem:[#allocation6 + $0x144] ss:$8 sps:$4 sm:$0xff]  }
 0x664   :  { %12980 = vmatprep.subr.bf16.mxu1 %v19659_v61  ;;  %v19714_v61 = vld [vmem:[#allocation6 + $0x140] ss:$8 sps:$4 sm:$0xff]   ;;  %v19719_v26 = vld [vmem:[#allocation6 + $0x424] ss:$8 sps:$4 sm:$0xff]  }
 0x665   :  { %v10951_v45 = vpop.f32.mrb[56].mxu1 }
 0x666   :  { %v11446_v51 = vmax.f32 %v20991_v33, %v10951_v45  ;;  %v10953_v8 = vpop.f32.mrb[57].mxu1  ;;  %12186 = vmatpush1.bf16.msra.mxu0 %v19660_v32  ;;  %v19669_v33 = vld [vmem:[#allocation6 + $0x3a0] ss:$8 sps:$4 sm:$0xff]   ;;  %v19728_v45 = vld [vmem:[#allocation6 + $0x164] ss:$8 sps:$4 sm:$0xff]  }
 0x667   :  { %12981 = vmatpush1.bf16.msra.mxu1 %v19657_v31  ;;  %v11447_v58 = vmax.f32 %v20996_v44, %v10953_v8  ;;  %v10955_v14 = vpop.f32.mrb[58].mxu1  ;;  %12187 = vmatprep.subr.bf16.mxu0 %v19668_v18  ;;  %v11458_v44 = vrot.slane %v21071_v30, %v11457_v35  ;;  %v19722_v31 = vld [vmem:[#allocation6 + $0x154] ss:$8 sps:$4 sm:$0xff]   ;;  %v19717_v32 = vld [vmem:[#allocation6 + $0x420] ss:$8 sps:$4 sm:$0xff]  }
 0x668   :  { %v10956_v59 = vpop.f32.mrb[59].mxu1  ;;  %12982 = vmatprep.subr.bf16.mxu1 %v19665_v37  ;;  %v19720_v37 = vld [vmem:[#allocation6 + $0x150] ss:$8 sps:$4 sm:$0xff]   ;;  %v19725_v18 = vld [vmem:[#allocation6 + $0x434] ss:$8 sps:$4 sm:$0xff]  }
 0x669   :  { %v11491_v16 = vadd.f32 %v11462_v48, %v11447_v58  ;;  %v11490_v49 = vadd.f32 %v11458_v44, %v11446_v51  ;;  %v19723_v48 = vld [vmem:[#allocation6 + $0x430] ss:$8 sps:$4 sm:$0xff]   ;;  %v19726_v51 = vld [vmem:[#allocation6 + $0x160] ss:$8 sps:$4 sm:$0xff]   ;;  %v19731_v8 = vld [vmem:[#allocation6 + $0x444] ss:$8 sps:$4 sm:$0xff]  }
 0x66a   :  { %12188 = vmatpush1.bf16.msra.mxu0 %v19666_v28  ;;  %v19734_v58 = vld [vmem:[#allocation6 + $0x174] ss:$8 sps:$4 sm:$0xff]   ;;  %v19729_v14 = vld [vmem:[#allocation6 + $0x440] ss:$8 sps:$4 sm:$0xff]   ;;  %v19740_v59 = vld [vmem:[#allocation6 + $0x184] ss:$8 sps:$4 sm:$0xff]  }
 0x66b   :  { %v11498_v1 = vmax.f32 %v11491_v16, 0.0  ;;  %12983 = vmatpush1.bf16.msra.mxu1 %v19663_v27  ;;  %12189 = vmatprep.subr.bf16.mxu0 %v19674_v57  ;;  %v11497_v6 = vmax.f32 %v11490_v49, 0.0  ;;  %v19732_v27 = vld [vmem:[#allocation6 + $0x170] ss:$8 sps:$4 sm:$0xff]   ;;  %v19737_v28 = vld [vmem:[#allocation6 + $0x454] ss:$8 sps:$4 sm:$0xff]  }
 0x66c   :  { %12984 = vmatprep.subr.bf16.mxu1 %v19671_v38  ;;  %v19735_v38 = vld [vmem:[#allocation6 + $0x450] ss:$8 sps:$4 sm:$0xff]   ;;  %v19738_v57 = vld [vmem:[#allocation6 + $0x180] ss:$8 sps:$4 sm:$0xff]   ;;  %v19743_v16 = vld [vmem:[#allocation6 + $0x464] ss:$8 sps:$4 sm:$0xff]  }
 0x66d   :  { %v21082_v60 = vpack.c.bf16 %v11498_v1, %v11498_v1  ;;  %v21086_v42 = vpack.c.bf16 %v11497_v6, %v11497_v6  ;;  %v19746_v1 = vld [vmem:[#allocation6 + $0x194] ss:$8 sps:$4 sm:$0xff]   ;;  %v19764_v6 = vld [vmem:[#allocation6 + $0x1c4] ss:$8 sps:$4 sm:$0xff]  }
 0x66e   :  { %12190 = vmatpush1.bf16.msra.mxu0 %v19672_v5  ;;  %v19744_v5 = vld [vmem:[#allocation6 + $0x190] ss:$8 sps:$4 sm:$0xff]   ;;  %v19749_v44 = vld [vmem:[#allocation6 + $0x474] ss:$8 sps:$4 sm:$0xff]  }
 0x66f   :  { %12985 = vmatpush1.bf16.msra.mxu1 %v19669_v33  ;;  %12195 = vmatprep.mubr.bf16.mxu0 %v21082_v60  ;;  %v19741_v33 = vld [vmem:[#allocation6 + $0x460] ss:$8 sps:$4 sm:$0xff]   ;;  %v19758_v49 = vld [vmem:[#allocation6 + $0x1b4] ss:$8 sps:$4 sm:$0xff]  }
 0x670   :  { %13008 = vmatprep.mubr.bf16.mxu1 %v21082_v60  ;;  %12986 = vmatprep.subr.bf16.mxu1 %v19677_v17  ;;  %v19752_v17 = vld [vmem:[#allocation6 + $0x1a4] ss:$8 sps:$4 sm:$0xff]  }
 0x671   :  { %12191 = vmatprep.subr.bf16.mxu0 %v19680_v39  ;;  %v19747_v39 = vld [vmem:[#allocation6 + $0x470] ss:$8 sps:$4 sm:$0xff]  }
 0x672   :  { %12192 = vmatpush1.bf16.msra.mxu0 %v19678_v47  ;;  %v19755_v47 = vld [vmem:[#allocation6 + $0x484] ss:$8 sps:$4 sm:$0xff]  }
 0x673   :  { %12987 = vmatpush1.bf16.msra.mxu1 %v19675_v62  ;;  %12193 = vmatprep.subr.bf16.mxu0 %v19686_v3  ;;  %v19750_v62 = vld [vmem:[#allocation6 + $0x1a0] ss:$8 sps:$4 sm:$0xff]  }
 0x674   :  { %12988 = vmatprep.subr.bf16.mxu1 %v19683_v2  ;;  %v11469_v2 = vsub.s32 3, %v21066_v23  ;;  %v19753_v3 = vld [vmem:[#allocation6 + $0x480] ss:$8 sps:$4 sm:$0xff]  }
 0x676   :  { %12194 = vmatpush1.bf16.msra.mxu0 %v19684_v4  ;;  %v19761_v4 = vld [vmem:[#allocation6 + $0x494] ss:$8 sps:$4 sm:$0xff]  }
 0x677   :  { %12989 = vmatpush1.bf16.msra.mxu1 %v19681_v56  ;;  %12204 = vmatprep.subr.bf16.mxu0 %v19692_v40  ;;  %v19756_v56 = vld [vmem:[#allocation6 + $0x1b0] ss:$8 sps:$4 sm:$0xff]   ;;  %v11470_v40 = vrot.slane %v21071_v30, %v11469_v2 }
 0x678   :  { %12990 = vmatprep.subr.bf16.mxu1 %v19689_v41 }
 0x679   :  { %12196 = vmatmul.mubr.bf16.vlgmr.msra.gmra.mrb[56].mxu0 %v21086_v42 }
 0x67a   :  { %12205 = vmatpush1.bf16.msra.mxu0 %v19690_v7 }
 0x67b   :  { %12991 = vmatpush1.bf16.msra.mxu1 %v19687_v36  ;;  %12206 = vmatprep.subr.bf16.mxu0 %v19698_v54  ;;  %v19759_v54 = vld [vmem:[#allocation6 + $0x490] ss:$8 sps:$4 sm:$0xff]  }
 0x67c   :  { %12992 = vmatprep.subr.bf16.mxu1 %v19695_v53 }
 0x67e   :  { %12207 = vmatpush1.bf16.msra.mxu0 %v19696_v15  ;;  %v19762_v15 = vld [vmem:[#allocation6 + $0x1c0] ss:$8 sps:$4 sm:$0xff]  }
 0x67f   :  { %12993 = vmatpush1.bf16.msra.mxu1 %v19693_v55  ;;  %12208 = vmatprep.subr.bf16.mxu0 %v19704_v10 }
 0x680   :  { %12994 = vmatprep.subr.bf16.mxu1 %v19701_v9  ;;  %v11465_v9 = vsub.s32 2, %v21066_v23 }
 0x682   :  { %12209 = vmatpush1.bf16.msra.mxu0 %v19702_v12  ;;  %v19770_v12 = vld [vmem:[#allocation6 + $0x1d4] ss:$8 sps:$4 sm:$0xff]  }
 0x683   :  { %12995 = vmatpush1.bf16.msra.mxu1 %v19699_v11  ;;  %12210 = vmatprep.subr.bf16.mxu0 %v19710_v19  ;;  %v19767_v11 = vld [vmem:[#allocation6 + $0x4a4] ss:$8 sps:$4 sm:$0xff]  }
 0x684   :  { %12996 = vmatprep.subr.bf16.mxu1 %v19707_v13 }
 0x686   :  { %12211 = vmatpush1.bf16.msra.mxu0 %v19708_v21  ;;  %v11466_v21 = vrot.slane %v21071_v30, %v11465_v9  ;;  %v19846_v9 = vld [vmem:[#allocation6 + $0x260] ss:$8 sps:$4 sm:$0xff]  }
 0x687   :  { %12997 = vmatpush1.bf16.msra.mxu1 %v19705_v20  ;;  %12212 = vmatprep.subr.bf16.mxu0 %v19716_v24  ;;  %v19768_v20 = vld [vmem:[#allocation6 + $0x1d0] ss:$8 sps:$4 sm:$0xff]   ;;  %v19776_v24 = vld [vmem:[#allocation6 + $0x1e4] ss:$8 sps:$4 sm:$0xff]  }
 0x688   :  { %12998 = vmatprep.subr.bf16.mxu1 %v19713_v22 }
 0x68a   :  { %12213 = vmatpush1.bf16.msra.mxu0 %v19714_v61  ;;  %v19774_v61 = vld [vmem:[#allocation6 + $0x1e0] ss:$8 sps:$4 sm:$0xff]  }
 0x68b   :  { %12999 = vmatpush1.bf16.msra.mxu1 %v19711_v25  ;;  %12214 = vmatprep.subr.bf16.mxu0 %v19722_v31  ;;  %v19771_v25 = vld [vmem:[#allocation6 + $0x4b0] ss:$8 sps:$4 sm:$0xff]   ;;  %v19779_v31 = vld [vmem:[#allocation6 + $0x4c4] ss:$8 sps:$4 sm:$0xff]  }
 0x68c   :  { %13000 = vmatprep.subr.bf16.mxu1 %v19719_v26 }
 0x68e   :  { %12215 = vmatpush1.bf16.msra.mxu0 %v19720_v37  ;;  %v19777_v37 = vld [vmem:[#allocation6 + $0x4c0] ss:$8 sps:$4 sm:$0xff]  }
 0x68f   :  { %13001 = vmatpush1.bf16.msra.mxu1 %v19717_v32  ;;  %12216 = vmatprep.subr.bf16.mxu0 %v19728_v45  ;;  %v19782_v32 = vld [vmem:[#allocation6 + $0x1f4] ss:$8 sps:$4 sm:$0xff]  }
 0x690   :  { %13002 = vmatprep.subr.bf16.mxu1 %v19725_v18  ;;  %v19780_v18 = vld [vmem:[#allocation6 + $0x1f0] ss:$8 sps:$4 sm:$0xff]  }
 0x692   :  { %12217 = vmatpush1.bf16.msra.mxu0 %v19726_v51  ;;  %v19812_v51 = vld [vmem:[#allocation6 + $0x204] ss:$8 sps:$4 sm:$0xff]  }
 0x693   :  { %13003 = vmatpush1.bf16.msra.mxu1 %v19723_v48  ;;  %12218 = vmatprep.subr.bf16.mxu0 %v19734_v58  ;;  %v19785_v48 = vld [vmem:[#allocation6 + $0x4d4] ss:$8 sps:$4 sm:$0xff]   ;;  %v19810_v58 = vld [vmem:[#allocation6 + $0x200] ss:$8 sps:$4 sm:$0xff]  }
 0x694   :  { %13004 = vmatprep.subr.bf16.mxu1 %v19731_v8  ;;  %v19783_v8 = vld [vmem:[#allocation6 + $0x4d0] ss:$8 sps:$4 sm:$0xff]  }
 0x696   :  { %12219 = vmatpush1.bf16.msra.mxu0 %v19732_v27  ;;  %v19788_v27 = vld [vmem:[#allocation6 + $0x4e4] ss:$8 sps:$4 sm:$0xff]  }
 0x697   :  { %13005 = vmatpush1.bf16.msra.mxu1 %v19729_v14  ;;  %12220 = vmatprep.subr.bf16.mxu0 %v19740_v59  ;;  %v19786_v59 = vld [vmem:[#allocation6 + $0x4e0] ss:$8 sps:$4 sm:$0xff]  }
 0x698   :  { %13006 = vmatprep.subr.bf16.mxu1 %v19737_v28  ;;  %v19818_v28 = vld [vmem:[#allocation6 + $0x214] ss:$8 sps:$4 sm:$0xff]  }
 0x69a   :  { %12221 = vmatpush1.bf16.msra.mxu0 %v19738_v57  ;;  %v19791_v57 = vld [vmem:[#allocation6 + $0x4f4] ss:$8 sps:$4 sm:$0xff]  }
 0x69b   :  { %13007 = vmatpush1.bf16.msra.mxu1 %v19735_v38  ;;  %12222 = vmatprep.subr.bf16.mxu0 %v19746_v1  ;;  %v19816_v38 = vld [vmem:[#allocation6 + $0x210] ss:$8 sps:$4 sm:$0xff]  }
 0x69c   :  { %13017 = vmatprep.subr.bf16.mxu1 %v19743_v16  ;;  %v19824_v16 = vld [vmem:[#allocation6 + $0x224] ss:$8 sps:$4 sm:$0xff]   ;;  %v19789_v1 = vld [vmem:[#allocation6 + $0x4f0] ss:$8 sps:$4 sm:$0xff]  }
 0x69e   :  { %13009 = vmatmul.mubr.bf16.vlgmr.msra.gmra.mrb[64].mxu1 %v21086_v42  ;;  %12223 = vmatpush1.bf16.msra.mxu0 %v19744_v5  ;;  %v19794_v5 = vld [vmem:[#allocation6 + $0x504] ss:$8 sps:$4 sm:$0xff]  }
 0x69f   :  { %13018 = vmatpush1.bf16.msra.mxu1 %v19741_v33  ;;  %12224 = vmatprep.subr.bf16.mxu0 %v19752_v17  ;;  %v19822_v33 = vld [vmem:[#allocation6 + $0x220] ss:$8 sps:$4 sm:$0xff]  }
 0x6a0   :  { %13019 = vmatprep.subr.bf16.mxu1 %v19749_v44  ;;  %v19830_v44 = vld [vmem:[#allocation6 + $0x234] ss:$8 sps:$4 sm:$0xff]   ;;  %v19792_v17 = vld [vmem:[#allocation6 + $0x500] ss:$8 sps:$4 sm:$0xff]  }
 0x6a2   :  { %12225 = vmatpush1.bf16.msra.mxu0 %v19750_v62  ;;  %v19797_v62 = vld [vmem:[#allocation6 + $0x514] ss:$8 sps:$4 sm:$0xff]  }
 0x6a3   :  { %13020 = vmatpush1.bf16.msra.mxu1 %v19747_v39  ;;  %12226 = vmatprep.subr.bf16.mxu0 %v19758_v49  ;;  %v19828_v39 = vld [vmem:[#allocation6 + $0x230] ss:$8 sps:$4 sm:$0xff]  }
 0x6a4   :  { %13021 = vmatprep.subr.bf16.mxu1 %v19755_v47  ;;  %v11115_v41 = vpop.f32.mrb[36].mxu0  ;;  %v19836_v47 = vld [vmem:[#allocation6 + $0x244] ss:$8 sps:$4 sm:$0xff]  }
 0x6a5   :  { %v11448_v36 = vmax.f32 %v21001_v46, %v11115_v41  ;;  %v11117_v7 = vpop.f32.mrb[37].mxu0  ;;  %v19765_v46 = vld [vmem:[#allocation6 + $0x4a0] ss:$8 sps:$4 sm:$0xff]   ;;  %v19800_v41 = vld [vmem:[#allocation6 + $0x524] ss:$8 sps:$4 sm:$0xff]  }
 0x6a6   :  { %12227 = vmatpush1.bf16.msra.mxu0 %v19756_v56  ;;  %v11449_v53 = vmax.f32 %v21006_v50, %v11117_v7  ;;  %v11119_v55 = vpop.f32.mrb[38].mxu0  ;;  %v19773_v50 = vld [vmem:[#allocation6 + $0x4b4] ss:$8 sps:$4 sm:$0xff]   ;;  %v19798_v7 = vld [vmem:[#allocation6 + $0x520] ss:$8 sps:$4 sm:$0xff]  }
 0x6a7   :  { %13022 = vmatpush1.bf16.msra.mxu1 %v19753_v3  ;;  %v11120_v10 = vpop.f32.mrb[39].mxu0  ;;  %12228 = vmatprep.subr.bf16.mxu0 %v19764_v6  ;;  %v11492_v26 = vadd.f32 %v11466_v21, %v11448_v36  ;;  %v19795_v3 = vld [vmem:[#allocation6 + $0x510] ss:$8 sps:$4 sm:$0xff]   ;;  %v19834_v6 = vld [vmem:[#allocation6 + $0x240] ss:$8 sps:$4 sm:$0xff]  }
 0x6a8   :  { %13023 = vmatprep.subr.bf16.mxu1 %v19761_v4  ;;  %v11493_v13 = vadd.f32 %v11470_v40, %v11449_v53  ;;  %v19842_v36 = vld [vmem:[#allocation6 + $0x254] ss:$8 sps:$4 sm:$0xff]   ;;  %v19840_v53 = vld [vmem:[#allocation6 + $0x250] ss:$8 sps:$4 sm:$0xff]   ;;  %v19848_v55 = vld [vmem:[#allocation6 + $0x264] ss:$8 sps:$4 sm:$0xff]  }
 0x6a9   :  { %v11499_v45 = vmax.f32 %v11492_v26, 0.0  ;;  %v19806_v10 = vld [vmem:[#allocation6 + $0x544] ss:$8 sps:$4 sm:$0xff]   ;;  %v19858_v21 = vld [vmem:[#allocation6 + $0x280] ss:$8 sps:$4 sm:$0xff]  }
 0x6aa   :  { %v11500_v19 = vmax.f32 %v11493_v13, 0.0  ;;  %12229 = vmatpush1.bf16.msra.mxu0 %v19762_v15  ;;  %v19801_v15 = vld [vmem:[#allocation6 + $0x530] ss:$8 sps:$4 sm:$0xff]   ;;  %v19821_v26 = vld [vmem:[#allocation6 + $0x574] ss:$8 sps:$4 sm:$0xff]  }
 0x6ab   :  { %13024 = vmatpush1.bf16.msra.mxu1 %v19759_v54  ;;  %12230 = vmatprep.subr.bf16.mxu0 %v19770_v12  ;;  %v21100_v14 = vpack.c.bf16 %v11499_v45, %v11499_v45  ;;  %v19803_v54 = vld [vmem:[#allocation6 + $0x534] ss:$8 sps:$4 sm:$0xff]   ;;  %v19804_v12 = vld [vmem:[#allocation6 + $0x540] ss:$8 sps:$4 sm:$0xff]   ;;  %v19852_v13 = vld [vmem:[#allocation6 + $0x270] ss:$8 sps:$4 sm:$0xff]  }
 0x6ac   :  { %13025 = vmatprep.subr.bf16.mxu1 %v19767_v11  ;;  %v21096_v22 = vpack.c.bf16 %v11500_v19, %v11500_v19  ;;  %v19854_v11 = vld [vmem:[#allocation6 + $0x274] ss:$8 sps:$4 sm:$0xff]  }
 0x6ad   :  { %v19809_v19 = vld [vmem:[#allocation6 + $0x554] ss:$8 sps:$4 sm:$0xff]  }
 0x6ae   :  { %12231 = vmatpush1.bf16.msra.mxu0 %v19768_v20  ;;  %12236 = vmatprep.mubr.bf16.mxu0 %v21096_v22  ;;  %v19807_v20 = vld [vmem:[#allocation6 + $0x550] ss:$8 sps:$4 sm:$0xff]   ;;  %v19878_v45 = vld [vmem:[#allocation6 + $0x2b4] ss:$8 sps:$4 sm:$0xff]  }
 0x6af   :  { %13026 = vmatpush1.bf16.msra.mxu1 %v19765_v46  ;;  %13049 = vmatprep.mubr.bf16.mxu1 %v21096_v22  ;;  %v19860_v46 = vld [vmem:[#allocation6 + $0x284] ss:$8 sps:$4 sm:$0xff]  }
 0x6b0   :  { %13027 = vmatprep.subr.bf16.mxu1 %v19773_v50  ;;  %12232 = vmatprep.subr.bf16.mxu0 %v19776_v24  ;;  %v19815_v50 = vld [vmem:[#allocation6 + $0x564] ss:$8 sps:$4 sm:$0xff]   ;;  %v19866_v24 = vld [vmem:[#allocation6 + $0x294] ss:$8 sps:$4 sm:$0xff]  }
 0x6b2   :  { %12233 = vmatpush1.bf16.msra.mxu0 %v19774_v61  ;;  %v19864_v61 = vld [vmem:[#allocation6 + $0x290] ss:$8 sps:$4 sm:$0xff]  }
 0x6b3   :  { %13028 = vmatpush1.bf16.msra.mxu1 %v19771_v25  ;;  %12234 = vmatprep.subr.bf16.mxu0 %v19782_v32  ;;  %v19813_v25 = vld [vmem:[#allocation6 + $0x560] ss:$8 sps:$4 sm:$0xff]   ;;  %v19819_v32 = vld [vmem:[#allocation6 + $0x570] ss:$8 sps:$4 sm:$0xff]  }
 0x6b4   :  { %13029 = vmatprep.subr.bf16.mxu1 %v19779_v31  ;;  %v19872_v31 = vld [vmem:[#allocation6 + $0x2a4] ss:$8 sps:$4 sm:$0xff]  }
 0x6b6   :  { %12235 = vmatpush1.bf16.msra.mxu0 %v19780_v18  ;;  %v19827_v18 = vld [vmem:[#allocation6 + $0x584] ss:$8 sps:$4 sm:$0xff]  }
 0x6b7   :  { %13030 = vmatpush1.bf16.msra.mxu1 %v19777_v37  ;;  %12245 = vmatprep.subr.bf16.mxu0 %v19812_v51  ;;  %v19870_v37 = vld [vmem:[#allocation6 + $0x2a0] ss:$8 sps:$4 sm:$0xff]   ;;  %v19876_v51 = vld [vmem:[#allocation6 + $0x2b0] ss:$8 sps:$4 sm:$0xff]  }
 0x6b8   :  { %13031 = vmatprep.subr.bf16.mxu1 %v19785_v48  ;;  %v19825_v48 = vld [vmem:[#allocation6 + $0x580] ss:$8 sps:$4 sm:$0xff]  }
 0x6b9   :  { %12237 = vmatmul.mubr.bf16.vlgmr.msra.gmra.mrb[56].mxu0 %v21100_v14 }
 0x6ba   :  { %12246 = vmatpush1.bf16.msra.mxu0 %v19810_v58  ;;  %v19884_v58 = vld [vmem:[#allocation6 + $0x2c4] ss:$8 sps:$4 sm:$0xff]  }
 0x6bb   :  { %13032 = vmatpush1.bf16.msra.mxu1 %v19783_v8  ;;  %12247 = vmatprep.subr.bf16.mxu0 %v19818_v28  ;;  %v19833_v8 = vld [vmem:[#allocation6 + $0x594] ss:$8 sps:$4 sm:$0xff]  }
 0x6bc   :  { %13033 = vmatprep.subr.bf16.mxu1 %v19788_v27 }
 0x6be   :  { %12248 = vmatpush1.bf16.msra.mxu0 %v19816_v38 }
 0x6bf   :  { %13034 = vmatpush1.bf16.msra.mxu1 %v19786_v59  ;;  %12249 = vmatprep.subr.bf16.mxu0 %v19824_v16  ;;  %v19882_v16 = vld [vmem:[#allocation6 + $0x2c0] ss:$8 sps:$4 sm:$0xff]  }
 0x6c0   :  { %13035 = vmatprep.subr.bf16.mxu1 %v19791_v57  ;;  %v19831_v57 = vld [vmem:[#allocation6 + $0x590] ss:$8 sps:$4 sm:$0xff]  }
 0x6c2   :  { %12250 = vmatpush1.bf16.msra.mxu0 %v19822_v33  ;;  %v19839_v33 = vld [vmem:[#allocation6 + $0x5a4] ss:$8 sps:$4 sm:$0xff]  }
 0x6c3   :  { %13036 = vmatpush1.bf16.msra.mxu1 %v19789_v1  ;;  %12251 = vmatprep.subr.bf16.mxu0 %v19830_v44 }
 0x6c4   :  { %13037 = vmatprep.subr.bf16.mxu1 %v19794_v5  ;;  %v17288_v49 = vpop.f32.mrb[40].mxu0  ;;  %v19890_v5 = vld [vmem:[#allocation6 + $0x2d4] ss:$8 sps:$4 sm:$0xff]  }
 0x6c5   :  { %v17289_v2 = vpop.f32.mrb[41].mxu0 }
 0x6c6   :  { %v21103_v56 = vadd.f32 %v17289_v2, %v17288_v49  ;;  %v17291_v4 = vpop.f32.mrb[42].mxu0  ;;  %12252 = vmatpush1.bf16.msra.mxu0 %v19828_v39  ;;  %v19888_v39 = vld [vmem:[#allocation6 + $0x2d0] ss:$8 sps:$4 sm:$0xff]   ;;  %v19894_v2 = vld [vmem:[#allocation6 + $0x2e0] ss:$8 sps:$4 sm:$0xff]  }
 0x6c7   :  { %13038 = vmatpush1.bf16.msra.mxu1 %v19792_v17  ;;  %v17292_v40 = vpop.f32.mrb[43].mxu0  ;;  %12253 = vmatprep.subr.bf16.mxu0 %v19836_v47  ;;  %v19837_v17 = vld [vmem:[#allocation6 + $0x5a0] ss:$8 sps:$4 sm:$0xff]   ;;  %v19896_v47 = vld [vmem:[#allocation6 + $0x2e4] ss:$8 sps:$4 sm:$0xff]  }
 0x6c8   :  { %13039 = vmatprep.subr.bf16.mxu1 %v19797_v62  ;;  %v19845_v62 = vld [vmem:[#allocation6 + $0x5b4] ss:$8 sps:$4 sm:$0xff]   ;;  %v19843_v49 = vld [vmem:[#allocation6 + $0x5b0] ss:$8 sps:$4 sm:$0xff]   ;;  %v19908_v40 = vld [vmem:[#allocation6 + $0x304] ss:$8 sps:$4 sm:$0xff]  }
 0x6c9   :  { %v19902_v4 = vld [vmem:[#allocation6 + $0x2f4] ss:$8 sps:$4 sm:$0xff]  }
 0x6ca   :  { %12254 = vmatpush1.bf16.msra.mxu0 %v19834_v6  ;;  %v19849_v6 = vld [vmem:[#allocation6 + $0x5c0] ss:$8 sps:$4 sm:$0xff]  }
 0x6cb   :  { %13040 = vmatpush1.bf16.msra.mxu1 %v19795_v3  ;;  %12255 = vmatprep.subr.bf16.mxu0 %v19842_v36  ;;  %v19851_v3 = vld [vmem:[#allocation6 + $0x5c4] ss:$8 sps:$4 sm:$0xff]   ;;  %v19855_v36 = vld [vmem:[#allocation6 + $0x5d0] ss:$8 sps:$4 sm:$0xff]  }
 0x6cc   :  { %13041 = vmatprep.subr.bf16.mxu1 %v19800_v41  ;;  %v19857_v41 = vld [vmem:[#allocation6 + $0x5d4] ss:$8 sps:$4 sm:$0xff]  }
 0x6ce   :  { %12256 = vmatpush1.bf16.msra.mxu0 %v19840_v53  ;;  %v19861_v53 = vld [vmem:[#allocation6 + $0x5e0] ss:$8 sps:$4 sm:$0xff]  }
 0x6cf   :  { %13042 = vmatpush1.bf16.msra.mxu1 %v19798_v7  ;;  %12257 = vmatprep.subr.bf16.mxu0 %v19848_v55  ;;  %v19863_v7 = vld [vmem:[#allocation6 + $0x5e4] ss:$8 sps:$4 sm:$0xff]   ;;  %v19867_v55 = vld [vmem:[#allocation6 + $0x5f0] ss:$8 sps:$4 sm:$0xff]  }
 0x6d0   :  { %13043 = vmatprep.subr.bf16.mxu1 %v19803_v54  ;;  %v19869_v54 = vld [vmem:[#allocation6 + $0x5f4] ss:$8 sps:$4 sm:$0xff]  }
 0x6d2   :  { %12258 = vmatpush1.bf16.msra.mxu0 %v19846_v9  ;;  %v19873_v9 = vld [vmem:[#allocation6 + $0x600] ss:$8 sps:$4 sm:$0xff]  }
 0x6d3   :  { %13044 = vmatpush1.bf16.msra.mxu1 %v19801_v15  ;;  %12259 = vmatprep.subr.bf16.mxu0 %v19854_v11  ;;  %v19875_v15 = vld [vmem:[#allocation6 + $0x604] ss:$8 sps:$4 sm:$0xff]  }
 0x6d4   :  { %13045 = vmatprep.subr.bf16.mxu1 %v19806_v10  ;;  %v19881_v10 = vld [vmem:[#allocation6 + $0x614] ss:$8 sps:$4 sm:$0xff]  }
 0x6d6   :  { %12260 = vmatpush1.bf16.msra.mxu0 %v19852_v13 }
 0x6d7   :  { %13046 = vmatpush1.bf16.msra.mxu1 %v19804_v12  ;;  %12261 = vmatprep.subr.bf16.mxu0 %v19860_v46  ;;  %v19879_v46 = vld [vmem:[#allocation6 + $0x610] ss:$8 sps:$4 sm:$0xff]  }
 0x6d8   :  { %13047 = vmatprep.subr.bf16.mxu1 %v19809_v19 }
 0x6da   :  { %12262 = vmatpush1.bf16.msra.mxu0 %v19858_v21  ;;  %v19887_v21 = vld [vmem:[#allocation6 + $0x624] ss:$8 sps:$4 sm:$0xff]  }
 0x6db   :  { %13048 = vmatpush1.bf16.msra.mxu1 %v19807_v20  ;;  %12263 = vmatprep.subr.bf16.mxu0 %v19866_v24  ;;  %v19885_v24 = vld [vmem:[#allocation6 + $0x620] ss:$8 sps:$4 sm:$0xff]  }
 0x6dc   :  { %13058 = vmatprep.subr.bf16.mxu1 %v19815_v50 }
 0x6de   :  { %13050 = vmatmul.mubr.bf16.vlgmr.msra.gmra.mrb[64].mxu1 %v21100_v14  ;;  %12264 = vmatpush1.bf16.msra.mxu0 %v19864_v61 }
 0x6df   :  { %13059 = vmatpush1.bf16.msra.mxu1 %v19813_v25  ;;  %12265 = vmatprep.subr.bf16.mxu0 %v19872_v31  ;;  %v19893_v25 = vld [vmem:[#allocation6 + $0x634] ss:$8 sps:$4 sm:$0xff]  }
 0x6e0   :  { %13060 = vmatprep.subr.bf16.mxu1 %v19821_v26 }
 0x6e2   :  { %12266 = vmatpush1.bf16.msra.mxu0 %v19870_v37 }
 0x6e3   :  { %13061 = vmatpush1.bf16.msra.mxu1 %v19819_v32  ;;  %12267 = vmatprep.subr.bf16.mxu0 %v19878_v45  ;;  %v19891_v32 = vld [vmem:[#allocation6 + $0x630] ss:$8 sps:$4 sm:$0xff]   ;;  %v19899_v45 = vld [vmem:[#allocation6 + $0x644] ss:$8 sps:$4 sm:$0xff]  }
 0x6e4   :  { %13062 = vmatprep.subr.bf16.mxu1 %v19827_v18  ;;  %v17310_v27 = vpop.f32.mrb[44].mxu0 }
 0x6e5   :  { %v17311_v28 = vpop.f32.mrb[45].mxu0 }
 0x6e6   :  { %v17312_v59 = vadd.f32 %v17311_v28, %v17310_v27  ;;  %v17313_v38 = vpop.f32.mrb[46].mxu0  ;;  %12268 = vmatpush1.bf16.msra.mxu0 %v19876_v51  ;;  %v19897_v51 = vld [vmem:[#allocation6 + $0x640] ss:$8 sps:$4 sm:$0xff]   ;;  %v19911_v27 = vld [vmem:[#allocation6 + $0x664] ss:$8 sps:$4 sm:$0xff]   ;;  %v11473_v28 = vsub.s32 4, %v21066_v23 }
 0x6e7   :  { %13063 = vmatpush1.bf16.msra.mxu1 %v19825_v48  ;;  %v17314_v1 = vpop.f32.mrb[47].mxu0  ;;  %12269 = vmatprep.subr.bf16.mxu0 %v19884_v58  ;;  %v19903_v58 = vld [vmem:[#allocation6 + $0x650] ss:$8 sps:$4 sm:$0xff]  }
 0x6e8   :  { %13064 = vmatprep.subr.bf16.mxu1 %v19833_v8  ;;  %v11361_v44 = vadd.f32 %v17312_v59, %v21103_v56  ;;  %v19900_v56 = vld [vmem:[#allocation6 + $0x2f0] ss:$8 sps:$4 sm:$0xff]   ;;  %v19905_v8 = vld [vmem:[#allocation6 + $0x654] ss:$8 sps:$4 sm:$0xff]   ;;  %v11477_v59 = vsub.s32 5, %v21066_v23  ;;  %v11474_v38 = vrot.slane %v21071_v30, %v11473_v28 }
 0x6e9   :  { %v19962_v28 = vld [vmem:[#allocation6 + $0x6f4] ss:$8 sps:$4 sm:$0xff]  }
 0x6ea   :  { %12270 = vmatpush1.bf16.msra.mxu0 %v19882_v16  ;;  %v11478_v16 = vrot.slane %v21071_v30, %v11477_v59  ;;  %v19965_v59 = vld [vmem:[#allocation6 + $0xa54] ss:$8 sps:$4 sm:$0xff]  }
 0x6eb   :  { %13065 = vmatpush1.bf16.msra.mxu1 %v19831_v57  ;;  %12271 = vmatprep.subr.bf16.mxu0 %v19890_v5 }
 0x6ec   :  { %13066 = vmatprep.subr.bf16.mxu1 %v19839_v33 }
 0x6ee   :  { %12272 = vmatpush1.bf16.msra.mxu0 %v19888_v39 }
 0x6ef   :  { %13067 = vmatpush1.bf16.msra.mxu1 %v19837_v17  ;;  %12273 = vmatprep.subr.bf16.mxu0 %v19896_v47 }
 0x6f0   :  { %13068 = vmatprep.subr.bf16.mxu1 %v19845_v62 }
 0x6f2   :  { %12274 = vmatpush1.bf16.msra.mxu0 %v19894_v2 }
 0x6f3   :  { %13069 = vmatpush1.bf16.msra.mxu1 %v19843_v49  ;;  %12275 = vmatprep.subr.bf16.mxu0 %v19902_v4  ;;  %v19909_v4 = vld [vmem:[#allocation6 + $0x660] ss:$8 sps:$4 sm:$0xff]  }
 0x6f4   :  { %13070 = vmatprep.subr.bf16.mxu1 %v19851_v3  ;;  %v19906_v3 = vld [vmem:[#allocation6 + $0x300] ss:$8 sps:$4 sm:$0xff]  }
 0x6f6   :  { %12276 = vmatpush1.bf16.msra.mxu0 %v19900_v56  ;;  %v19914_v56 = vld [vmem:[#allocation6 + $0x314] ss:$8 sps:$4 sm:$0xff]  }
 0x6f7   :  { %13071 = vmatpush1.bf16.msra.mxu1 %v19849_v6  ;;  %12286 = vmatprep.subr.bf16.mxu0 %v19908_v40  ;;  %v19920_v40 = vld [vmem:[#allocation6 + $0x324] ss:$8 sps:$4 sm:$0xff]  }
 0x6f8   :  { %13072 = vmatprep.subr.bf16.mxu1 %v19857_v41  ;;  %v19917_v41 = vld [vmem:[#allocation6 + $0x674] ss:$8 sps:$4 sm:$0xff]  }
 0x6fb   :  { %13073 = vmatpush1.bf16.msra.mxu1 %v19855_v36  ;;  %v19923_v36 = vld [vmem:[#allocation6 + $0x684] ss:$8 sps:$4 sm:$0xff]  }
 0x6fc   :  { %13074 = vmatprep.subr.bf16.mxu1 %v19863_v7  ;;  %v19918_v7 = vld [vmem:[#allocation6 + $0x320] ss:$8 sps:$4 sm:$0xff]  }
 0x6ff   :  { %13075 = vmatpush1.bf16.msra.mxu1 %v19861_v53  ;;  %v19921_v53 = vld [vmem:[#allocation6 + $0x680] ss:$8 sps:$4 sm:$0xff]  }
 0x700   :  { %13076 = vmatprep.subr.bf16.mxu1 %v19869_v54  ;;  %v11481_v54 = vsub.s32 6, %v21066_v23  ;;  %v20289_v23 = vld [vmem:[#allocation12 + $0x38] sm:$0xff]  }
 0x703   :  { %13077 = vmatpush1.bf16.msra.mxu1 %v19867_v55  ;;  %v19926_v55 = vld [vmem:[#allocation6 + $0x334] ss:$8 sps:$4 sm:$0xff]  }
 0x704   :  { %13078 = vmatprep.subr.bf16.mxu1 %v19875_v15  ;;  %v17332_v11 = vpop.f32.mrb[48].mxu0  ;;  %v19929_v15 = vld [vmem:[#allocation6 + $0x694] ss:$8 sps:$4 sm:$0xff]  }
 0x705   :  { %v17333_v12 = vpop.f32.mrb[49].mxu0 }
 0x706   :  { %v17334_v13 = vadd.f32 %v17333_v12, %v17332_v11  ;;  %v17335_v19 = vpop.f32.mrb[50].mxu0  ;;  %v11482_v11 = vrot.slane %v21071_v30, %v11481_v54  ;;  %v19932_v12 = vld [vmem:[#allocation6 + $0x344] ss:$8 sps:$4 sm:$0xff]   ;;  %v19939_v30 = vld [vmem:[#allocation6 + $0x6b0] ss:$8 sps:$4 sm:$0xff]  }
 0x707   :  { %13079 = vmatpush1.bf16.msra.mxu1 %v19873_v9  ;;  %v17336_v20 = vpop.f32.mrb[51].mxu0  ;;  %v19924_v9 = vld [vmem:[#allocation6 + $0x330] ss:$8 sps:$4 sm:$0xff]   ;;  %v19930_v19 = vld [vmem:[#allocation6 + $0x340] ss:$8 sps:$4 sm:$0xff]  }
 0x708   :  { %13080 = vmatprep.subr.bf16.mxu1 %v19881_v10  ;;  %v11401_v50 = vadd.f32 %v17334_v13, %v11361_v44  ;;  %v19927_v10 = vld [vmem:[#allocation6 + $0x690] ss:$8 sps:$4 sm:$0xff]   ;;  %v19935_v13 = vld [vmem:[#allocation6 + $0x6a4] ss:$8 sps:$4 sm:$0xff]   ;;  %v20001_v54 = vld [vmem:[#allocation6 + $0xab4] ss:$8 sps:$4 sm:$0xff]  }
 0x70b   :  { %13081 = vmatpush1.bf16.msra.mxu1 %v19879_v46  ;;  %v19933_v46 = vld [vmem:[#allocation6 + $0x6a0] ss:$8 sps:$4 sm:$0xff]  }
 0x70c   :  { %13082 = vmatprep.subr.bf16.mxu1 %v19887_v21  ;;  %v11440_v61 = vpop.f32.mrb[52].mxu0  ;;  %v19938_v21 = vld [vmem:[#allocation6 + $0x354] ss:$8 sps:$4 sm:$0xff]  }
 0x70d   :  { %v21107_v26 = vadd.f32 %v11440_v61, %v11401_v50  ;;  %v17402_v31 = vpop.f32.mrb[53].mxu0  ;;  %v19941_v50 = vld [vmem:[#allocation6 + $0x6b4] ss:$8 sps:$4 sm:$0xff]   ;;  %v19944_v61 = vld [vmem:[#allocation6 + $0x6c4] ss:$8 sps:$4 sm:$0xff]  }
 0x70e   :  { %v11443_v37 = vpop.f32.mrb[54].mxu0  ;;  %v19947_v31 = vld [vmem:[#allocation6 + $0xa24] ss:$8 sps:$4 sm:$0xff]  }
 0x70f   :  { %13083 = vmatpush1.bf16.msra.mxu1 %v19885_v24  ;;  %v11452_v18 = vmax.f32 %v21028_v43, %v21107_v26  ;;  %v17403_v48 = vpop.f32.mrb[55].mxu0  ;;  %v19936_v24 = vld [vmem:[#allocation6 + $0x350] ss:$8 sps:$4 sm:$0xff]   ;;  %v19945_v43 = vld [vmem:[#allocation6 + $0xa20] ss:$8 sps:$4 sm:$0xff]  }
 0x710   :  { %13084 = vmatprep.subr.bf16.mxu1 %v19893_v25  ;;  %v19950_v26 = vld [vmem:[#allocation6 + $0x6d4] ss:$8 sps:$4 sm:$0xff]   ;;  %v19951_v48 = vld [vmem:[#allocation6 + $0xa30] ss:$8 sps:$4 sm:$0xff]  }
 0x711   :  { %v11496_v20 = vadd.f32 %v11482_v11, %v11452_v18  ;;  %v19953_v18 = vld [vmem:[#allocation6 + $0xa34] ss:$8 sps:$4 sm:$0xff]   ;;  %v20002_v11 = vld [vmem:[#allocation6 + $0x760] ss:$8 sps:$4 sm:$0xff]  }
 0x713   :  { %13085 = vmatpush1.bf16.msra.mxu1 %v19891_v32  ;;  %v11503_v25 = vmax.f32 %v11496_v20, 0.0  ;;  %v19942_v32 = vld [vmem:[#allocation6 + $0x6c0] ss:$8 sps:$4 sm:$0xff]   ;;  %v20011_v20 = vld [vmem:[#allocation6 + $0xad0] ss:$8 sps:$4 sm:$0xff]  }
 0x714   :  { %13086 = vmatprep.subr.bf16.mxu1 %v19899_v45  ;;  %v19948_v45 = vld [vmem:[#allocation6 + $0x6d0] ss:$8 sps:$4 sm:$0xff]  }
 0x715   :  { %v21132_v37 = vpack.c.bf16 %v11503_v25, %v11503_v25  ;;  %v20022_v25 = vld [vmem:[#allocation6 + $0x794] ss:$8 sps:$4 sm:$0xff]  }
 0x717   :  { %13087 = vmatpush1.bf16.msra.mxu1 %v19897_v51  ;;  %v19956_v51 = vld [vmem:[#allocation6 + $0x6e4] ss:$8 sps:$4 sm:$0xff]  }
 0x718   :  { %13088 = vmatprep.subr.bf16.mxu1 %v19905_v8  ;;  %v19959_v8 = vld [vmem:[#allocation6 + $0xa44] ss:$8 sps:$4 sm:$0xff]  }
 0x71b   :  { %13089 = vmatpush1.bf16.msra.mxu1 %v19903_v58  ;;  %v19954_v58 = vld [vmem:[#allocation6 + $0x6e0] ss:$8 sps:$4 sm:$0xff]  }
 0x71c   :  { %13099 = vmatprep.subr.bf16.mxu1 %v19911_v27  ;;  %v19957_v27 = vld [vmem:[#allocation6 + $0xa40] ss:$8 sps:$4 sm:$0xff]  }
 0x731   :  { %v11279_v57 = vpop.f32.mrb[60].mxu1 }
 0x732   :  { %v11450_v1 = vmax.f32 %v21045_v63, %v11279_v57  ;;  %v11281_v33 = vpop.f32.mrb[61].mxu1  ;;  %v19912_v63 = vld [vmem:[#allocation6 + $0x310] ss:$8 sps:$4 sm:$0xff]  }
 0x733   :  { %v11451_v5 = vmax.f32 %v21050_v52, %v11281_v33  ;;  %v11283_v44 = vpop.f32.mrb[62].mxu1  ;;  %v19915_v52 = vld [vmem:[#allocation6 + $0x670] ss:$8 sps:$4 sm:$0xff]   ;;  %v19969_v33 = vld [vmem:[#allocation6 + $0xa60] ss:$8 sps:$4 sm:$0xff]  }
 0x734   :  { %v11494_v17 = vadd.f32 %v11474_v38, %v11450_v1  ;;  %v11284_v39 = vpop.f32.mrb[63].mxu1  ;;  %v19960_v38 = vld [vmem:[#allocation6 + $0x6f0] ss:$8 sps:$4 sm:$0xff]   ;;  %v19966_v1 = vld [vmem:[#allocation6 + $0x700] ss:$8 sps:$4 sm:$0xff]  }
 0x735   :  { %v11495_v62 = vadd.f32 %v11478_v16, %v11451_v5  ;;  %v19963_v57 = vld [vmem:[#allocation6 + $0xa50] ss:$8 sps:$4 sm:$0xff]   ;;  %v19968_v16 = vld [vmem:[#allocation6 + $0x704] ss:$8 sps:$4 sm:$0xff]   ;;  %v19974_v5 = vld [vmem:[#allocation6 + $0x714] ss:$8 sps:$4 sm:$0xff]  }
 0x736   :  { %v11501_v47 = vmax.f32 %v11494_v17, 0.0  ;;  %v19977_v44 = vld [vmem:[#allocation6 + $0xa74] ss:$8 sps:$4 sm:$0xff]   ;;  %v19972_v17 = vld [vmem:[#allocation6 + $0x710] ss:$8 sps:$4 sm:$0xff]  }
 0x737   :  { %v11502_v49 = vmax.f32 %v11495_v62, 0.0  ;;  %v19975_v39 = vld [vmem:[#allocation6 + $0xa70] ss:$8 sps:$4 sm:$0xff]   ;;  %v19980_v62 = vld [vmem:[#allocation6 + $0x724] ss:$8 sps:$4 sm:$0xff]  }
 0x738   :  { %v21119_v6 = vpack.c.bf16 %v11501_v47, %v11501_v47  ;;  %v19983_v47 = vld [vmem:[#allocation6 + $0xa84] ss:$8 sps:$4 sm:$0xff]  }
 0x739   :  { %v21117_v2 = vpack.c.bf16 %v11502_v49, %v11502_v49  ;;  %v19978_v49 = vld [vmem:[#allocation6 + $0x720] ss:$8 sps:$4 sm:$0xff]  }
 0x73b   :  { %12277 = vmatprep.mubr.bf16.mxu0 %v21117_v2  ;;  %13090 = vmatprep.mubr.bf16.mxu1 %v21117_v2 }
 0x73c   :  { %12278 = vmatmul.mubr.bf16.vlgmr.msra.gmra.mrb[56].mxu0 %v21119_v6  ;;  %13091 = vmatmul.mubr.bf16.vlgmr.msra.gmra.mrb[64].mxu1 %v21119_v6 }
 0x73d   :  { %12287 = vmatpush1.bf16.msra.mxu0 %v19906_v3  ;;  %13100 = vmatpush1.bf16.msra.mxu1 %v19909_v4  ;;  %v19981_v3 = vld [vmem:[#allocation6 + $0xa80] ss:$8 sps:$4 sm:$0xff]   ;;  %v19986_v4 = vld [vmem:[#allocation6 + $0x734] ss:$8 sps:$4 sm:$0xff]  }
 0x73e   :  { %12288 = vmatprep.subr.bf16.mxu0 %v19914_v56  ;;  %13101 = vmatprep.subr.bf16.mxu1 %v19917_v41  ;;  %v19989_v56 = vld [vmem:[#allocation6 + $0xa94] ss:$8 sps:$4 sm:$0xff]   ;;  %v19984_v41 = vld [vmem:[#allocation6 + $0x730] ss:$8 sps:$4 sm:$0xff]  }
 0x73f   :  { %12318 = vmatprep.mubr.bf16.mxu0 %v20552_v0  ;;  %13131 = vmatprep.mubr.bf16.mxu1 %v20552_v0 }
 0x741   :  { %12289 = vmatpush1.bf16.msra.mxu0 %v19912_v63  ;;  %13102 = vmatpush1.bf16.msra.mxu1 %v19915_v52  ;;  %v19987_v63 = vld [vmem:[#allocation6 + $0xa90] ss:$8 sps:$4 sm:$0xff]   ;;  %v19992_v52 = vld [vmem:[#allocation6 + $0x744] ss:$8 sps:$4 sm:$0xff]  }
 0x742   :  { %12290 = vmatprep.subr.bf16.mxu0 %v19920_v40  ;;  %13103 = vmatprep.subr.bf16.mxu1 %v19923_v36  ;;  %v19995_v40 = vld [vmem:[#allocation6 + $0xaa4] ss:$8 sps:$4 sm:$0xff]   ;;  %v19990_v36 = vld [vmem:[#allocation6 + $0x740] ss:$8 sps:$4 sm:$0xff]  }
 0x745   :  { %12291 = vmatpush1.bf16.msra.mxu0 %v19918_v7  ;;  %13104 = vmatpush1.bf16.msra.mxu1 %v19921_v53  ;;  %v19993_v7 = vld [vmem:[#allocation6 + $0xaa0] ss:$8 sps:$4 sm:$0xff]   ;;  %v19998_v53 = vld [vmem:[#allocation6 + $0x754] ss:$8 sps:$4 sm:$0xff]  }
 0x746   :  { %12292 = vmatprep.subr.bf16.mxu0 %v19926_v55  ;;  %13105 = vmatprep.subr.bf16.mxu1 %v19929_v15  ;;  %v19996_v55 = vld [vmem:[#allocation6 + $0x750] ss:$8 sps:$4 sm:$0xff]  }
 0x747   :  { %v19999_v15 = vld [vmem:[#allocation6 + $0xab0] ss:$8 sps:$4 sm:$0xff]  }
 0x749   :  { %12293 = vmatpush1.bf16.msra.mxu0 %v19924_v9  ;;  %13106 = vmatpush1.bf16.msra.mxu1 %v19927_v10  ;;  %v20004_v9 = vld [vmem:[#allocation6 + $0x764] ss:$8 sps:$4 sm:$0xff]  }
 0x74a   :  { %12294 = vmatprep.subr.bf16.mxu0 %v19932_v12  ;;  %13107 = vmatprep.subr.bf16.mxu1 %v19935_v13  ;;  %v20007_v10 = vld [vmem:[#allocation6 + $0xac4] ss:$8 sps:$4 sm:$0xff]   ;;  %v20005_v12 = vld [vmem:[#allocation6 + $0xac0] ss:$8 sps:$4 sm:$0xff]   ;;  %v20010_v13 = vld [vmem:[#allocation6 + $0x774] ss:$8 sps:$4 sm:$0xff]  }
 0x74d   :  { %12295 = vmatpush1.bf16.msra.mxu0 %v19930_v19  ;;  %13108 = vmatpush1.bf16.msra.mxu1 %v19933_v46  ;;  %v20013_v19 = vld [vmem:[#allocation6 + $0xad4] ss:$8 sps:$4 sm:$0xff]   ;;  %v20008_v46 = vld [vmem:[#allocation6 + $0x770] ss:$8 sps:$4 sm:$0xff]  }
 0x74e   :  { %12296 = vmatprep.subr.bf16.mxu0 %v19938_v21  ;;  %13109 = vmatprep.subr.bf16.mxu1 %v19941_v50  ;;  %v20016_v21 = vld [vmem:[#allocation6 + $0x784] ss:$8 sps:$4 sm:$0xff]  }
 0x74f   :  { %v20019_v50 = vld [vmem:[#allocation6 + $0xae4] ss:$8 sps:$4 sm:$0xff]  }
 0x751   :  { %12297 = vmatpush1.bf16.msra.mxu0 %v19936_v24  ;;  %13110 = vmatpush1.bf16.msra.mxu1 %v19939_v30  ;;  %v20014_v24 = vld [vmem:[#allocation6 + $0x780] ss:$8 sps:$4 sm:$0xff]  }
 0x752   :  { %13791 = vmatprep.subr.bf16.mxu0 %v19944_v61  ;;  %14606 = vmatprep.subr.bf16.mxu1 %v19947_v31  ;;  %v20017_v30 = vld [vmem:[#allocation6 + $0xae0] ss:$8 sps:$4 sm:$0xff]   ;;  %v20025_v61 = vld [vmem:[#allocation6 + $0xaf4] ss:$8 sps:$4 sm:$0xff]   ;;  %v20020_v31 = vld [vmem:[#allocation6 + $0x790] ss:$8 sps:$4 sm:$0xff]  }
 0x754   :  { %16705 = vmatmul.mubr.msk.bf16.vlgmr.msra.gmra.mrb[56].mxu0 %vm12159_vm2, %v21132_v37  ;;  %16814 = vmatmul.mubr.msk.bf16.vlgmr.msra.gmra.mrb[64].mxu1 %vm12159_vm2, %v21132_v37 }
 0x755   :  { %13792 = vmatpush1.bf16.msra.mxu0 %v19942_v32  ;;  %13823 = vmatprep.mubr.bf16.mxu0 %v21082_v60  ;;  %v20023_v32 = vld [vmem:[#allocation6 + $0xaf0] ss:$8 sps:$4 sm:$0xff]  }
 0x756   :  { %14607 = vmatpush1.bf16.msra.mxu1 %v19945_v43  ;;  %14638 = vmatprep.mubr.bf16.mxu1 %v21082_v60  ;;  %v19971_v60 = vld [vmem:[#allocation6 + $0xa64] ss:$8 sps:$4 sm:$0xff]  }
 0x757   :  { %13793 = vmatprep.subr.bf16.mxu0 %v19950_v26  ;;  %14608 = vmatprep.subr.bf16.mxu1 %v19953_v18  ;;  %v20028_v43 = vld [vmem:[#allocation6 + $0x7a4] ss:$8 sps:$4 sm:$0xff]   ;;  %v20026_v18 = vld [vmem:[#allocation6 + $0x7a0] ss:$8 sps:$4 sm:$0xff]  }
 0x758   :  { %v20031_v26 = vld [vmem:[#allocation6 + $0xb04] ss:$8 sps:$4 sm:$0xff]  }
 0x759   :  { %13794 = vmatpush1.bf16.msra.mxu0 %v19948_v45  ;;  %v20029_v45 = vld [vmem:[#allocation6 + $0xb00] ss:$8 sps:$4 sm:$0xff]  }
 0x75a   :  { %14609 = vmatpush1.bf16.msra.mxu1 %v19951_v48  ;;  %13795 = vmatprep.subr.bf16.mxu0 %v19956_v51  ;;  %v20034_v48 = vld [vmem:[#allocation6 + $0x7b4] ss:$8 sps:$4 sm:$0xff]  }
 0x75b   :  { %14610 = vmatprep.subr.bf16.mxu1 %v19959_v8  ;;  %v20037_v51 = vld [vmem:[#allocation6 + $0xb14] ss:$8 sps:$4 sm:$0xff]   ;;  %v20032_v8 = vld [vmem:[#allocation6 + $0x7b0] ss:$8 sps:$4 sm:$0xff]  }
 0x75d   :  { %13796 = vmatpush1.bf16.msra.mxu0 %v19954_v58  ;;  %v20035_v58 = vld [vmem:[#allocation6 + $0xb10] ss:$8 sps:$4 sm:$0xff]  }
 0x75e   :  { %14611 = vmatpush1.bf16.msra.mxu1 %v19957_v27  ;;  %13797 = vmatprep.subr.bf16.mxu0 %v19962_v28  ;;  %v20040_v27 = vld [vmem:[#allocation6 + $0x7c4] ss:$8 sps:$4 sm:$0xff]  }
 0x75f   :  { %14612 = vmatprep.subr.bf16.mxu1 %v19965_v59  ;;  %v20043_v28 = vld [vmem:[#allocation6 + $0xb24] ss:$8 sps:$4 sm:$0xff]   ;;  %v20038_v59 = vld [vmem:[#allocation6 + $0x7c0] ss:$8 sps:$4 sm:$0xff]  }
 0x761   :  { %13798 = vmatpush1.bf16.msra.mxu0 %v19960_v38  ;;  %v20041_v38 = vld [vmem:[#allocation6 + $0xb20] ss:$8 sps:$4 sm:$0xff]  }
 0x762   :  { %14613 = vmatpush1.bf16.msra.mxu1 %v19963_v57  ;;  %13799 = vmatprep.subr.bf16.mxu0 %v19968_v16  ;;  %v20046_v57 = vld [vmem:[#allocation6 + $0x7d4] ss:$8 sps:$4 sm:$0xff]  }
 0x763   :  { %14614 = vmatprep.subr.bf16.mxu1 %v19971_v60  ;;  %v20049_v16 = vld [vmem:[#allocation6 + $0xb34] ss:$8 sps:$4 sm:$0xff]   ;;  %v20044_v60 = vld [vmem:[#allocation6 + $0x7d0] ss:$8 sps:$4 sm:$0xff]  }
 0x765   :  { %13800 = vmatpush1.bf16.msra.mxu0 %v19966_v1  ;;  %v20047_v1 = vld [vmem:[#allocation6 + $0xb30] ss:$8 sps:$4 sm:$0xff]  }
 0x766   :  { %14615 = vmatpush1.bf16.msra.mxu1 %v19969_v33  ;;  %13801 = vmatprep.subr.bf16.mxu0 %v19974_v5  ;;  %v20052_v33 = vld [vmem:[#allocation6 + $0x7e4] ss:$8 sps:$4 sm:$0xff]  }
 0x767   :  { %14616 = vmatprep.subr.bf16.mxu1 %v19977_v44  ;;  %v20055_v5 = vld [vmem:[#allocation6 + $0xb44] ss:$8 sps:$4 sm:$0xff]   ;;  %v20050_v44 = vld [vmem:[#allocation6 + $0x7e0] ss:$8 sps:$4 sm:$0xff]  }
 0x769   :  { %13802 = vmatpush1.bf16.msra.mxu0 %v19972_v17  ;;  %v20053_v17 = vld [vmem:[#allocation6 + $0xb40] ss:$8 sps:$4 sm:$0xff]  }
 0x76a   :  { %14617 = vmatpush1.bf16.msra.mxu1 %v19975_v39  ;;  %13803 = vmatprep.subr.bf16.mxu0 %v19980_v62  ;;  %v20058_v39 = vld [vmem:[#allocation6 + $0x7f4] ss:$8 sps:$4 sm:$0xff]   ;;  %v20056_v62 = vld [vmem:[#allocation6 + $0x7f0] ss:$8 sps:$4 sm:$0xff]  }
 0x76b   :  { %14618 = vmatprep.subr.bf16.mxu1 %v19983_v47  ;;  %v20059_v47 = vld [vmem:[#allocation6 + $0xb50] ss:$8 sps:$4 sm:$0xff]  }
 0x76d   :  { %13804 = vmatpush1.bf16.msra.mxu0 %v19978_v49  ;;  %v20064_v49 = vld [vmem:[#allocation6 + $0x804] ss:$8 sps:$4 sm:$0xff]  }
 0x76e   :  { %14619 = vmatpush1.bf16.msra.mxu1 %v19981_v3  ;;  %13805 = vmatprep.subr.bf16.mxu0 %v19986_v4  ;;  %v20067_v3 = vld [vmem:[#allocation6 + $0xb64] ss:$8 sps:$4 sm:$0xff]   ;;  %v20065_v4 = vld [vmem:[#allocation6 + $0xb60] ss:$8 sps:$4 sm:$0xff]  }
 0x76f   :  { %14620 = vmatprep.subr.bf16.mxu1 %v19989_v56  ;;  %v20070_v56 = vld [vmem:[#allocation6 + $0x814] ss:$8 sps:$4 sm:$0xff]  }
 0x771   :  { %13806 = vmatpush1.bf16.msra.mxu0 %v19984_v41  ;;  %v20073_v41 = vld [vmem:[#allocation6 + $0xb74] ss:$8 sps:$4 sm:$0xff]  }
 0x772   :  { %14621 = vmatpush1.bf16.msra.mxu1 %v19987_v63  ;;  %13807 = vmatprep.subr.bf16.mxu0 %v19992_v52  ;;  %v20068_v63 = vld [vmem:[#allocation6 + $0x810] ss:$8 sps:$4 sm:$0xff]  }
 0x773   :  { %14622 = vmatprep.subr.bf16.mxu1 %v19995_v40  ;;  %v20071_v52 = vld [vmem:[#allocation6 + $0xb70] ss:$8 sps:$4 sm:$0xff]   ;;  %v20076_v40 = vld [vmem:[#allocation6 + $0x824] ss:$8 sps:$4 sm:$0xff]  }
 0x775   :  { %13808 = vmatpush1.bf16.msra.mxu0 %v19990_v36  ;;  %v20079_v36 = vld [vmem:[#allocation6 + $0xb84] ss:$8 sps:$4 sm:$0xff]  }
 0x776   :  { %14623 = vmatpush1.bf16.msra.mxu1 %v19993_v7  ;;  %13809 = vmatprep.subr.bf16.mxu0 %v19998_v53  ;;  %v20074_v7 = vld [vmem:[#allocation6 + $0x820] ss:$8 sps:$4 sm:$0xff]  }
 0x777   :  { %14624 = vmatprep.subr.bf16.mxu1 %v20001_v54  ;;  %v20077_v53 = vld [vmem:[#allocation6 + $0xb80] ss:$8 sps:$4 sm:$0xff]   ;;  %v20082_v54 = vld [vmem:[#allocation6 + $0x834] ss:$8 sps:$4 sm:$0xff]  }
 0x779   :  { %13810 = vmatpush1.bf16.msra.mxu0 %v19996_v55  ;;  %v20085_v55 = vld [vmem:[#allocation6 + $0xb94] ss:$8 sps:$4 sm:$0xff]  }
 0x77a   :  { %14625 = vmatpush1.bf16.msra.mxu1 %v19999_v15  ;;  %13811 = vmatprep.subr.bf16.mxu0 %v20004_v9  ;;  %v20080_v15 = vld [vmem:[#allocation6 + $0x830] ss:$8 sps:$4 sm:$0xff]  }
 0x77b   :  { %14626 = vmatprep.subr.bf16.mxu1 %v20007_v10  ;;  %v20083_v9 = vld [vmem:[#allocation6 + $0xb90] ss:$8 sps:$4 sm:$0xff]   ;;  %v20088_v10 = vld [vmem:[#allocation6 + $0x844] ss:$8 sps:$4 sm:$0xff]  }
 0x77d   :  { %13812 = vmatpush1.bf16.msra.mxu0 %v20002_v11  ;;  %v20091_v11 = vld [vmem:[#allocation6 + $0xba4] ss:$8 sps:$4 sm:$0xff]  }
 0x77e   :  { %14627 = vmatpush1.bf16.msra.mxu1 %v20005_v12  ;;  %13813 = vmatprep.subr.bf16.mxu0 %v20010_v13  ;;  %v20086_v12 = vld [vmem:[#allocation6 + $0x840] ss:$8 sps:$4 sm:$0xff]  }
 0x77f   :  { %14628 = vmatprep.subr.bf16.mxu1 %v20013_v19  ;;  %v20089_v13 = vld [vmem:[#allocation6 + $0xba0] ss:$8 sps:$4 sm:$0xff]   ;;  %v20094_v19 = vld [vmem:[#allocation6 + $0x854] ss:$8 sps:$4 sm:$0xff]  }
 0x781   :  { %13814 = vmatpush1.bf16.msra.mxu0 %v20008_v46  ;;  %v20097_v46 = vld [vmem:[#allocation6 + $0xbb4] ss:$8 sps:$4 sm:$0xff]  }
 0x782   :  { %14629 = vmatpush1.bf16.msra.mxu1 %v20011_v20  ;;  %13815 = vmatprep.subr.bf16.mxu0 %v20016_v21  ;;  %v20092_v20 = vld [vmem:[#allocation6 + $0x850] ss:$8 sps:$4 sm:$0xff]  }
 0x783   :  { %14630 = vmatprep.subr.bf16.mxu1 %v20019_v50  ;;  %v20095_v21 = vld [vmem:[#allocation6 + $0xbb0] ss:$8 sps:$4 sm:$0xff]   ;;  %v20100_v50 = vld [vmem:[#allocation6 + $0x864] ss:$8 sps:$4 sm:$0xff]  }
 0x785   :  { %13816 = vmatpush1.bf16.msra.mxu0 %v20014_v24  ;;  %v20103_v24 = vld [vmem:[#allocation6 + $0xbc4] ss:$8 sps:$4 sm:$0xff]  }
 0x786   :  { %14631 = vmatpush1.bf16.msra.mxu1 %v20017_v30  ;;  %13817 = vmatprep.subr.bf16.mxu0 %v20022_v25  ;;  %v20098_v30 = vld [vmem:[#allocation6 + $0x860] ss:$8 sps:$4 sm:$0xff]  }
 0x787   :  { %14632 = vmatprep.subr.bf16.mxu1 %v20025_v61  ;;  %v20101_v25 = vld [vmem:[#allocation6 + $0xbc0] ss:$8 sps:$4 sm:$0xff]   ;;  %v20106_v61 = vld [vmem:[#allocation6 + $0x874] ss:$8 sps:$4 sm:$0xff]  }
 0x789   :  { %13818 = vmatpush1.bf16.msra.mxu0 %v20020_v31  ;;  %v20109_v31 = vld [vmem:[#allocation6 + $0xbd4] ss:$8 sps:$4 sm:$0xff]  }
 0x78a   :  { %14633 = vmatpush1.bf16.msra.mxu1 %v20023_v32  ;;  %13819 = vmatprep.subr.bf16.mxu0 %v20028_v43  ;;  %v20104_v32 = vld [vmem:[#allocation6 + $0x870] ss:$8 sps:$4 sm:$0xff]  }
 0x78b   :  { %14634 = vmatprep.subr.bf16.mxu1 %v20031_v26  ;;  %v20107_v43 = vld [vmem:[#allocation6 + $0xbd0] ss:$8 sps:$4 sm:$0xff]   ;;  %v20112_v26 = vld [vmem:[#allocation6 + $0x884] ss:$8 sps:$4 sm:$0xff]  }
 0x78d   :  { %13820 = vmatpush1.bf16.msra.mxu0 %v20026_v18  ;;  %v20115_v18 = vld [vmem:[#allocation6 + $0xbe4] ss:$8 sps:$4 sm:$0xff]  }
 0x78e   :  { %14635 = vmatpush1.bf16.msra.mxu1 %v20029_v45  ;;  %13821 = vmatprep.subr.bf16.mxu0 %v20034_v48  ;;  %v20110_v45 = vld [vmem:[#allocation6 + $0x880] ss:$8 sps:$4 sm:$0xff]  }
 0x78f   :  { %14636 = vmatprep.subr.bf16.mxu1 %v20037_v51  ;;  %v20113_v48 = vld [vmem:[#allocation6 + $0xbe0] ss:$8 sps:$4 sm:$0xff]   ;;  %v20118_v51 = vld [vmem:[#allocation6 + $0x894] ss:$8 sps:$4 sm:$0xff]  }
 0x791   :  { %13822 = vmatpush1.bf16.msra.mxu0 %v20032_v8  ;;  %v20121_v8 = vld [vmem:[#allocation6 + $0xbf4] ss:$8 sps:$4 sm:$0xff]  }
 0x792   :  { %14637 = vmatpush1.bf16.msra.mxu1 %v20035_v58  ;;  %13832 = vmatprep.subr.bf16.mxu0 %v20040_v27  ;;  %v20116_v58 = vld [vmem:[#allocation6 + $0x890] ss:$8 sps:$4 sm:$0xff]  }
 0x793   :  { %14647 = vmatprep.subr.bf16.mxu1 %v20043_v28  ;;  %v20119_v27 = vld [vmem:[#allocation6 + $0xbf0] ss:$8 sps:$4 sm:$0xff]   ;;  %v20124_v28 = vld [vmem:[#allocation6 + $0x8a4] ss:$8 sps:$4 sm:$0xff]  }
 0x794   :  { %13824 = vmatmul.mubr.bf16.vlgmr.msra.gmra.mrb[60].mxu0 %v21086_v42 }
 0x795   :  { %14639 = vmatmul.mubr.bf16.vlgmr.msra.gmra.mrb[68].mxu1 %v21086_v42  ;;  %13833 = vmatpush1.bf16.msra.mxu0 %v20038_v59  ;;  %v20061_v42 = vld [vmem:[#allocation6 + $0xb54] ss:$8 sps:$4 sm:$0xff]   ;;  %v20127_v59 = vld [vmem:[#allocation6 + $0xc04] ss:$8 sps:$4 sm:$0xff]  }
 0x796   :  { %13864 = vmatprep.mubr.bf16.mxu0 %v21096_v22  ;;  %14648 = vmatpush1.bf16.msra.mxu1 %v20041_v38  ;;  %v20122_v38 = vld [vmem:[#allocation6 + $0x8a0] ss:$8 sps:$4 sm:$0xff]  }
 0x797   :  { %14679 = vmatprep.mubr.bf16.mxu1 %v21096_v22  ;;  %13834 = vmatprep.subr.bf16.mxu0 %v20046_v57  ;;  %v20062_v22 = vld [vmem:[#allocation6 + $0x800] ss:$8 sps:$4 sm:$0xff]  }
 0x798   :  { %14649 = vmatprep.subr.bf16.mxu1 %v20049_v16  ;;  %v20125_v57 = vld [vmem:[#allocation6 + $0xc00] ss:$8 sps:$4 sm:$0xff]   ;;  %v20130_v16 = vld [vmem:[#allocation6 + $0x8b4] ss:$8 sps:$4 sm:$0xff]  }
 0x799   :  { %13835 = vmatpush1.bf16.msra.mxu0 %v20044_v60  ;;  %v20133_v60 = vld [vmem:[#allocation6 + $0xc14] ss:$8 sps:$4 sm:$0xff]  }
 0x79a   :  { %14650 = vmatpush1.bf16.msra.mxu1 %v20047_v1  ;;  %13836 = vmatprep.subr.bf16.mxu0 %v20052_v33  ;;  %v20128_v1 = vld [vmem:[#allocation6 + $0x8b0] ss:$8 sps:$4 sm:$0xff]  }
 0x79b   :  { %14651 = vmatprep.subr.bf16.mxu1 %v20055_v5  ;;  %v20131_v33 = vld [vmem:[#allocation6 + $0xc10] ss:$8 sps:$4 sm:$0xff]   ;;  %v20136_v5 = vld [vmem:[#allocation6 + $0x8c4] ss:$8 sps:$4 sm:$0xff]  }
 0x79d   :  { %13837 = vmatpush1.bf16.msra.mxu0 %v20050_v44  ;;  %v20139_v44 = vld [vmem:[#allocation6 + $0xc24] ss:$8 sps:$4 sm:$0xff]  }
 0x79e   :  { %14652 = vmatpush1.bf16.msra.mxu1 %v20053_v17  ;;  %13838 = vmatprep.subr.bf16.mxu0 %v20058_v39  ;;  %v20134_v17 = vld [vmem:[#allocation6 + $0x8c0] ss:$8 sps:$4 sm:$0xff]  }
 0x79f   :  { %14653 = vmatprep.subr.bf16.mxu1 %v20061_v42  ;;  %v20137_v39 = vld [vmem:[#allocation6 + $0xc20] ss:$8 sps:$4 sm:$0xff]   ;;  %v20142_v42 = vld [vmem:[#allocation6 + $0x8d4] ss:$8 sps:$4 sm:$0xff]  }
 0x7a1   :  { %13839 = vmatpush1.bf16.msra.mxu0 %v20056_v62  ;;  %v20145_v62 = vld [vmem:[#allocation6 + $0xc34] ss:$8 sps:$4 sm:$0xff]  }
 0x7a2   :  { %14654 = vmatpush1.bf16.msra.mxu1 %v20059_v47  ;;  %13840 = vmatprep.subr.bf16.mxu0 %v20064_v49  ;;  %v20140_v47 = vld [vmem:[#allocation6 + $0x8d0] ss:$8 sps:$4 sm:$0xff]  }
 0x7a3   :  { %14655 = vmatprep.subr.bf16.mxu1 %v20067_v3  ;;  %v20143_v49 = vld [vmem:[#allocation6 + $0xc30] ss:$8 sps:$4 sm:$0xff]   ;;  %v20148_v3 = vld [vmem:[#allocation6 + $0x8e4] ss:$8 sps:$4 sm:$0xff]  }
 0x7a5   :  { %13841 = vmatpush1.bf16.msra.mxu0 %v20062_v22  ;;  %v20151_v22 = vld [vmem:[#allocation6 + $0xc44] ss:$8 sps:$4 sm:$0xff]  }
 0x7a6   :  { %14656 = vmatpush1.bf16.msra.mxu1 %v20065_v4  ;;  %13842 = vmatprep.subr.bf16.mxu0 %v20070_v56  ;;  %v20146_v4 = vld [vmem:[#allocation6 + $0x8e0] ss:$8 sps:$4 sm:$0xff]  }
 0x7a7   :  { %14657 = vmatprep.subr.bf16.mxu1 %v20073_v41  ;;  %v20149_v56 = vld [vmem:[#allocation6 + $0xc40] ss:$8 sps:$4 sm:$0xff]   ;;  %v20154_v41 = vld [vmem:[#allocation6 + $0x8f4] ss:$8 sps:$4 sm:$0xff]  }
 0x7a9   :  { %13843 = vmatpush1.bf16.msra.mxu0 %v20068_v63  ;;  %v20152_v63 = vld [vmem:[#allocation6 + $0x8f0] ss:$8 sps:$4 sm:$0xff]  }
 0x7aa   :  { %14658 = vmatpush1.bf16.msra.mxu1 %v20071_v52  ;;  %13844 = vmatprep.subr.bf16.mxu0 %v20076_v40  ;;  %v20155_v52 = vld [vmem:[#allocation6 + $0xc50] ss:$8 sps:$4 sm:$0xff]   ;;  %v20160_v40 = vld [vmem:[#allocation6 + $0x904] ss:$8 sps:$4 sm:$0xff]  }
 0x7ab   :  { %14659 = vmatprep.subr.bf16.mxu1 %v20079_v36  ;;  %v20163_v36 = vld [vmem:[#allocation6 + $0xc64] ss:$8 sps:$4 sm:$0xff]  }
 0x7ad   :  { %13845 = vmatpush1.bf16.msra.mxu0 %v20074_v7  ;;  %v20161_v7 = vld [vmem:[#allocation6 + $0xc60] ss:$8 sps:$4 sm:$0xff]  }
 0x7ae   :  { %14660 = vmatpush1.bf16.msra.mxu1 %v20077_v53  ;;  %13846 = vmatprep.subr.bf16.mxu0 %v20082_v54  ;;  %v20166_v53 = vld [vmem:[#allocation6 + $0x914] ss:$8 sps:$4 sm:$0xff]  }
 0x7af   :  { %14661 = vmatprep.subr.bf16.mxu1 %v20085_v55  ;;  %v20169_v54 = vld [vmem:[#allocation6 + $0xc74] ss:$8 sps:$4 sm:$0xff]   ;;  %v20164_v55 = vld [vmem:[#allocation6 + $0x910] ss:$8 sps:$4 sm:$0xff]  }
 0x7b1   :  { %13847 = vmatpush1.bf16.msra.mxu0 %v20080_v15  ;;  %v20167_v15 = vld [vmem:[#allocation6 + $0xc70] ss:$8 sps:$4 sm:$0xff]  }
 0x7b2   :  { %14662 = vmatpush1.bf16.msra.mxu1 %v20083_v9  ;;  %13848 = vmatprep.subr.bf16.mxu0 %v20088_v10  ;;  %v20172_v9 = vld [vmem:[#allocation6 + $0x924] ss:$8 sps:$4 sm:$0xff]  }
 0x7b3   :  { %14663 = vmatprep.subr.bf16.mxu1 %v20091_v11  ;;  %v20175_v10 = vld [vmem:[#allocation6 + $0xc84] ss:$8 sps:$4 sm:$0xff]   ;;  %v20170_v11 = vld [vmem:[#allocation6 + $0x920] ss:$8 sps:$4 sm:$0xff]  }
 0x7b5   :  { %13849 = vmatpush1.bf16.msra.mxu0 %v20086_v12  ;;  %v20173_v12 = vld [vmem:[#allocation6 + $0xc80] ss:$8 sps:$4 sm:$0xff]  }
 0x7b6   :  { %14664 = vmatpush1.bf16.msra.mxu1 %v20089_v13  ;;  %13850 = vmatprep.subr.bf16.mxu0 %v20094_v19  ;;  %v20178_v13 = vld [vmem:[#allocation6 + $0x934] ss:$8 sps:$4 sm:$0xff]  }
 0x7b7   :  { %14665 = vmatprep.subr.bf16.mxu1 %v20097_v46  ;;  %v20181_v19 = vld [vmem:[#allocation6 + $0xc94] ss:$8 sps:$4 sm:$0xff]   ;;  %v20176_v46 = vld [vmem:[#allocation6 + $0x930] ss:$8 sps:$4 sm:$0xff]  }
 0x7b9   :  { %13851 = vmatpush1.bf16.msra.mxu0 %v20092_v20  ;;  %v20179_v20 = vld [vmem:[#allocation6 + $0xc90] ss:$8 sps:$4 sm:$0xff]  }
 0x7ba   :  { %14666 = vmatpush1.bf16.msra.mxu1 %v20095_v21  ;;  %13852 = vmatprep.subr.bf16.mxu0 %v20100_v50  ;;  %v20184_v21 = vld [vmem:[#allocation6 + $0x944] ss:$8 sps:$4 sm:$0xff]  }
 0x7bb   :  { %14667 = vmatprep.subr.bf16.mxu1 %v20103_v24  ;;  %v20187_v50 = vld [vmem:[#allocation6 + $0xca4] ss:$8 sps:$4 sm:$0xff]   ;;  %v20182_v24 = vld [vmem:[#allocation6 + $0x940] ss:$8 sps:$4 sm:$0xff]  }
 0x7bd   :  { %13853 = vmatpush1.bf16.msra.mxu0 %v20098_v30  ;;  %v20185_v30 = vld [vmem:[#allocation6 + $0xca0] ss:$8 sps:$4 sm:$0xff]  }
 0x7be   :  { %14668 = vmatpush1.bf16.msra.mxu1 %v20101_v25  ;;  %13854 = vmatprep.subr.bf16.mxu0 %v20106_v61  ;;  %v20190_v25 = vld [vmem:[#allocation6 + $0x954] ss:$8 sps:$4 sm:$0xff]  }
 0x7bf   :  { %14669 = vmatprep.subr.bf16.mxu1 %v20109_v31  ;;  %v20193_v61 = vld [vmem:[#allocation6 + $0xcb4] ss:$8 sps:$4 sm:$0xff]   ;;  %v20188_v31 = vld [vmem:[#allocation6 + $0x950] ss:$8 sps:$4 sm:$0xff]  }
 0x7c1   :  { %13855 = vmatpush1.bf16.msra.mxu0 %v20104_v32  ;;  %v20191_v32 = vld [vmem:[#allocation6 + $0xcb0] ss:$8 sps:$4 sm:$0xff]  }
 0x7c2   :  { %14670 = vmatpush1.bf16.msra.mxu1 %v20107_v43  ;;  %13856 = vmatprep.subr.bf16.mxu0 %v20112_v26  ;;  %v20196_v43 = vld [vmem:[#allocation6 + $0x964] ss:$8 sps:$4 sm:$0xff]  }
 0x7c3   :  { %14671 = vmatprep.subr.bf16.mxu1 %v20115_v18  ;;  %v20199_v26 = vld [vmem:[#allocation6 + $0xcc4] ss:$8 sps:$4 sm:$0xff]   ;;  %v20194_v18 = vld [vmem:[#allocation6 + $0x960] ss:$8 sps:$4 sm:$0xff]  }
 0x7c5   :  { %13857 = vmatpush1.bf16.msra.mxu0 %v20110_v45  ;;  %v20197_v45 = vld [vmem:[#allocation6 + $0xcc0] ss:$8 sps:$4 sm:$0xff]  }
 0x7c6   :  { %14672 = vmatpush1.bf16.msra.mxu1 %v20113_v48  ;;  %13858 = vmatprep.subr.bf16.mxu0 %v20118_v51  ;;  %v20202_v48 = vld [vmem:[#allocation6 + $0x974] ss:$8 sps:$4 sm:$0xff]  }
 0x7c7   :  { %14673 = vmatprep.subr.bf16.mxu1 %v20121_v8  ;;  %v20205_v51 = vld [vmem:[#allocation6 + $0xcd4] ss:$8 sps:$4 sm:$0xff]   ;;  %v20200_v8 = vld [vmem:[#allocation6 + $0x970] ss:$8 sps:$4 sm:$0xff]  }
 0x7c9   :  { %13859 = vmatpush1.bf16.msra.mxu0 %v20116_v58  ;;  %v20203_v58 = vld [vmem:[#allocation6 + $0xcd0] ss:$8 sps:$4 sm:$0xff]  }
 0x7ca   :  { %14674 = vmatpush1.bf16.msra.mxu1 %v20119_v27  ;;  %13860 = vmatprep.subr.bf16.mxu0 %v20124_v28  ;;  %v20208_v27 = vld [vmem:[#allocation6 + $0x984] ss:$8 sps:$4 sm:$0xff]  }
 0x7cb   :  { %14675 = vmatprep.subr.bf16.mxu1 %v20127_v59  ;;  %v20211_v28 = vld [vmem:[#allocation6 + $0xce4] ss:$8 sps:$4 sm:$0xff]   ;;  %v20206_v59 = vld [vmem:[#allocation6 + $0x980] ss:$8 sps:$4 sm:$0xff]  }
 0x7cd   :  { %13861 = vmatpush1.bf16.msra.mxu0 %v20122_v38  ;;  %v20209_v38 = vld [vmem:[#allocation6 + $0xce0] ss:$8 sps:$4 sm:$0xff]  }
 0x7ce   :  { %14676 = vmatpush1.bf16.msra.mxu1 %v20125_v57  ;;  %13862 = vmatprep.subr.bf16.mxu0 %v20130_v16  ;;  %v20214_v57 = vld [vmem:[#allocation6 + $0x994] ss:$8 sps:$4 sm:$0xff]  }
 0x7cf   :  { %14677 = vmatprep.subr.bf16.mxu1 %v20133_v60  ;;  %v20217_v16 = vld [vmem:[#allocation6 + $0xcf4] ss:$8 sps:$4 sm:$0xff]   ;;  %v20212_v60 = vld [vmem:[#allocation6 + $0x990] ss:$8 sps:$4 sm:$0xff]  }
 0x7d1   :  { %13863 = vmatpush1.bf16.msra.mxu0 %v20128_v1  ;;  %v20215_v1 = vld [vmem:[#allocation6 + $0xcf0] ss:$8 sps:$4 sm:$0xff]  }
 0x7d2   :  { %14678 = vmatpush1.bf16.msra.mxu1 %v20131_v33  ;;  %13873 = vmatprep.subr.bf16.mxu0 %v20136_v5  ;;  %v20220_v33 = vld [vmem:[#allocation6 + $0x9a4] ss:$8 sps:$4 sm:$0xff]  }
 0x7d3   :  { %14688 = vmatprep.subr.bf16.mxu1 %v20139_v44  ;;  %v20223_v5 = vld [vmem:[#allocation6 + $0xd04] ss:$8 sps:$4 sm:$0xff]   ;;  %v20218_v44 = vld [vmem:[#allocation6 + $0x9a0] ss:$8 sps:$4 sm:$0xff]  }
 0x7d4   :  { %13865 = vmatmul.mubr.bf16.vlgmr.msra.gmra.mrb[60].mxu0 %v21100_v14 }
 0x7d5   :  { %14680 = vmatmul.mubr.bf16.vlgmr.msra.gmra.mrb[68].mxu1 %v21100_v14  ;;  %13874 = vmatpush1.bf16.msra.mxu0 %v20134_v17  ;;  %v20157_v14 = vld [vmem:[#allocation6 + $0xc54] ss:$8 sps:$4 sm:$0xff]   ;;  %v20221_v17 = vld [vmem:[#allocation6 + $0xd00] ss:$8 sps:$4 sm:$0xff]  }
 0x7d6   :  { %13905 = vmatprep.mubr.bf16.mxu0 %v21117_v2  ;;  %14689 = vmatpush1.bf16.msra.mxu1 %v20137_v39  ;;  %v20226_v39 = vld [vmem:[#allocation6 + $0x9b4] ss:$8 sps:$4 sm:$0xff]  }
 0x7d7   :  { %14720 = vmatprep.mubr.bf16.mxu1 %v21117_v2  ;;  %13875 = vmatprep.subr.bf16.mxu0 %v20142_v42  ;;  %v20158_v2 = vld [vmem:[#allocation6 + $0x900] ss:$8 sps:$4 sm:$0xff]   ;;  %v20229_v42 = vld [vmem:[#allocation6 + $0xd14] ss:$8 sps:$4 sm:$0xff]  }
 0x7d8   :  { %14690 = vmatprep.subr.bf16.mxu1 %v20145_v62  ;;  %v20224_v62 = vld [vmem:[#allocation6 + $0x9b0] ss:$8 sps:$4 sm:$0xff]  }
 0x7d9   :  { %13876 = vmatpush1.bf16.msra.mxu0 %v20140_v47  ;;  %v20227_v47 = vld [vmem:[#allocation6 + $0xd10] ss:$8 sps:$4 sm:$0xff]  }
 0x7da   :  { %14691 = vmatpush1.bf16.msra.mxu1 %v20143_v49  ;;  %13877 = vmatprep.subr.bf16.mxu0 %v20148_v3  ;;  %v20232_v49 = vld [vmem:[#allocation6 + $0x9c4] ss:$8 sps:$4 sm:$0xff]  }
 0x7db   :  { %14692 = vmatprep.subr.bf16.mxu1 %v20151_v22  ;;  %v20235_v3 = vld [vmem:[#allocation6 + $0xd24] ss:$8 sps:$4 sm:$0xff]   ;;  %v20230_v22 = vld [vmem:[#allocation6 + $0x9c0] ss:$8 sps:$4 sm:$0xff]  }
 0x7dd   :  { %13878 = vmatpush1.bf16.msra.mxu0 %v20146_v4  ;;  %v20233_v4 = vld [vmem:[#allocation6 + $0xd20] ss:$8 sps:$4 sm:$0xff]  }
 0x7de   :  { %14693 = vmatpush1.bf16.msra.mxu1 %v20149_v56  ;;  %13879 = vmatprep.subr.bf16.mxu0 %v20154_v41  ;;  %v20238_v56 = vld [vmem:[#allocation6 + $0x9d4] ss:$8 sps:$4 sm:$0xff]  }
 0x7df   :  { %14694 = vmatprep.subr.bf16.mxu1 %v20157_v14  ;;  %v20241_v41 = vld [vmem:[#allocation6 + $0xd34] ss:$8 sps:$4 sm:$0xff]   ;;  %v20236_v14 = vld [vmem:[#allocation6 + $0x9d0] ss:$8 sps:$4 sm:$0xff]  }
 0x7e1   :  { %13880 = vmatpush1.bf16.msra.mxu0 %v20152_v63  ;;  %v20239_v63 = vld [vmem:[#allocation6 + $0xd30] ss:$8 sps:$4 sm:$0xff]  }
 0x7e2   :  { %14695 = vmatpush1.bf16.msra.mxu1 %v20155_v52  ;;  %13881 = vmatprep.subr.bf16.mxu0 %v20160_v40  ;;  %v20244_v52 = vld [vmem:[#allocation6 + $0x9e4] ss:$8 sps:$4 sm:$0xff]  }
 0x7e3   :  { %14696 = vmatprep.subr.bf16.mxu1 %v20163_v36  ;;  %v20247_v40 = vld [vmem:[#allocation6 + $0xd44] ss:$8 sps:$4 sm:$0xff]   ;;  %v20242_v36 = vld [vmem:[#allocation6 + $0x9e0] ss:$8 sps:$4 sm:$0xff]  }
 0x7e5   :  { %13882 = vmatpush1.bf16.msra.mxu0 %v20158_v2  ;;  %v20245_v2 = vld [vmem:[#allocation6 + $0xd40] ss:$8 sps:$4 sm:$0xff]  }
 0x7e6   :  { %14697 = vmatpush1.bf16.msra.mxu1 %v20161_v7  ;;  %13883 = vmatprep.subr.bf16.mxu0 %v20166_v53  ;;  %v20250_v7 = vld [vmem:[#allocation6 + $0x9f4] ss:$8 sps:$4 sm:$0xff]   ;;  %v20248_v53 = vld [vmem:[#allocation6 + $0x9f0] ss:$8 sps:$4 sm:$0xff]  }
 0x7e7   :  { %14698 = vmatprep.subr.bf16.mxu1 %v20169_v54  ;;  %v20251_v54 = vld [vmem:[#allocation6 + $0xd50] ss:$8 sps:$4 sm:$0xff]  }
 0x7e9   :  { %13884 = vmatpush1.bf16.msra.mxu0 %v20164_v55  ;;  %v20256_v55 = vld [vmem:[#allocation6 + $0xa04] ss:$8 sps:$4 sm:$0xff]  }
 0x7ea   :  { %14699 = vmatpush1.bf16.msra.mxu1 %v20167_v15  ;;  %13885 = vmatprep.subr.bf16.mxu0 %v20172_v9  ;;  %v20259_v15 = vld [vmem:[#allocation6 + $0xd64] ss:$8 sps:$4 sm:$0xff]   ;;  %v20254_v9 = vld [vmem:[#allocation6 + $0xa00] ss:$8 sps:$4 sm:$0xff]  }
 0x7eb   :  { %14700 = vmatprep.subr.bf16.mxu1 %v20175_v10  ;;  %v20262_v10 = vld [vmem:[#allocation6 + $0xa14] ss:$8 sps:$4 sm:$0xff]  }
 0x7ed   :  { %13886 = vmatpush1.bf16.msra.mxu0 %v20170_v11  ;;  %v20265_v11 = vld [vmem:[#allocation6 + $0xd74] ss:$8 sps:$4 sm:$0xff]  }
 0x7ee   :  { %14701 = vmatpush1.bf16.msra.mxu1 %v20173_v12  ;;  %13887 = vmatprep.subr.bf16.mxu0 %v20178_v13  ;;  %v20260_v12 = vld [vmem:[#allocation6 + $0xa10] ss:$8 sps:$4 sm:$0xff]  }
 0x7ef   :  { %14702 = vmatprep.subr.bf16.mxu1 %v20181_v19  ;;  %v20263_v13 = vld [vmem:[#allocation6 + $0xd70] ss:$8 sps:$4 sm:$0xff]   ;;  %v20266_v19 = vld [vmem:[#allocation9 + $0x40] sm:$0xff]  }
 0x7f1   :  { %13888 = vmatpush1.bf16.msra.mxu0 %v20176_v46 }
 0x7f2   :  { %14703 = vmatpush1.bf16.msra.mxu1 %v20179_v20  ;;  %13889 = vmatprep.subr.bf16.mxu0 %v20184_v21 }
 0x7f3   :  { %14704 = vmatprep.subr.bf16.mxu1 %v20187_v50 }
 0x7f5   :  { %13890 = vmatpush1.bf16.msra.mxu0 %v20182_v24 }
 0x7f6   :  { %14705 = vmatpush1.bf16.msra.mxu1 %v20185_v30  ;;  %13891 = vmatprep.subr.bf16.mxu0 %v20190_v25 }
 0x7f7   :  { %14706 = vmatprep.subr.bf16.mxu1 %v20193_v61 }
 0x7f9   :  { %13892 = vmatpush1.bf16.msra.mxu0 %v20188_v31  ;;  %v20267_v31 = vld [vmem:[#allocation9] sm:$0xff]  }
 0x7fa   :  { %14707 = vmatpush1.bf16.msra.mxu1 %v20191_v32  ;;  %13893 = vmatprep.subr.bf16.mxu0 %v20196_v43 }
 0x7fb   :  { %14708 = vmatprep.subr.bf16.mxu1 %v20199_v26  ;;  %v20268_v26 = vld [vmem:[#allocation9 + $0x48] sm:$0xff]  }
 0x7fd   :  { %13894 = vmatpush1.bf16.msra.mxu0 %v20194_v18  ;;  %v20269_v18 = vld [vmem:[#allocation9 + $0x8] sm:$0xff]  }
 0x7fe   :  { %14709 = vmatpush1.bf16.msra.mxu1 %v20197_v45  ;;  %13895 = vmatprep.subr.bf16.mxu0 %v20202_v48  ;;  %v20270_v45 = vld [vmem:[#allocation9 + $0x50] sm:$0xff]  }
 0x7ff   :  { %14710 = vmatprep.subr.bf16.mxu1 %v20205_v51  ;;  %v20271_v48 = vld [vmem:[#allocation9 + $0x10] sm:$0xff]   ;;  %v20272_v51 = vld [vmem:[#allocation9 + $0x58] sm:$0xff]  }
 0x801   :  { %13896 = vmatpush1.bf16.msra.mxu0 %v20200_v8  ;;  %v20273_v8 = vld [vmem:[#allocation9 + $0x18] sm:$0xff]  }
 0x802   :  { %14711 = vmatpush1.bf16.msra.mxu1 %v20203_v58  ;;  %13897 = vmatprep.subr.bf16.mxu0 %v20208_v27  ;;  %v20274_v58 = vld [vmem:[#allocation9 + $0x60] sm:$0xff]  }
 0x803   :  { %14712 = vmatprep.subr.bf16.mxu1 %v20211_v28  ;;  %v20275_v27 = vld [vmem:[#allocation9 + $0x20] sm:$0xff]   ;;  %v20277_v28 = vld [vmem:[#allocation9 + $0x28] sm:$0xff]  }
 0x805   :  { %13898 = vmatpush1.bf16.msra.mxu0 %v20206_v59  ;;  %v20278_v59 = vld [vmem:[#allocation9 + $0x70] sm:$0xff]  }
 0x806   :  { %14713 = vmatpush1.bf16.msra.mxu1 %v20209_v38  ;;  %13899 = vmatprep.subr.bf16.mxu0 %v20214_v57  ;;  %v20279_v38 = vld [vmem:[#allocation9 + $0x30] sm:$0xff]   ;;  %v20280_v57 = vld [vmem:[#allocation9 + $0x78] sm:$0xff]  }
 0x807   :  { %14714 = vmatprep.subr.bf16.mxu1 %v20217_v16  ;;  %v20281_v16 = vld [vmem:[#allocation9 + $0x38] sm:$0xff]  }
 0x809   :  { %13900 = vmatpush1.bf16.msra.mxu0 %v20212_v60  ;;  %v20282_v60 = vld [vmem:[#allocation12] sm:$0xff]  }
 0x80a   :  { %14715 = vmatpush1.bf16.msra.mxu1 %v20215_v1  ;;  %13901 = vmatprep.subr.bf16.mxu0 %v20220_v33  ;;  %v20283_v1 = vld [vmem:[#allocation12 + $0x8] sm:$0xff]   ;;  %v20284_v33 = vld [vmem:[#allocation12 + $0x10] sm:$0xff]  }
 0x80b   :  { %14716 = vmatprep.subr.bf16.mxu1 %v20223_v5  ;;  %v20285_v5 = vld [vmem:[#allocation12 + $0x18] sm:$0xff]  }
 0x80d   :  { %13902 = vmatpush1.bf16.msra.mxu0 %v20218_v44  ;;  %v20286_v44 = vld [vmem:[#allocation12 + $0x20] sm:$0xff]  }
 0x80e   :  { %14717 = vmatpush1.bf16.msra.mxu1 %v20221_v17  ;;  %13903 = vmatprep.subr.bf16.mxu0 %v20226_v39  ;;  %v20287_v17 = vld [vmem:[#allocation12 + $0x28] sm:$0xff]   ;;  %v14772_v39 = vld [vmem:[#allocation7] sm:$0x3] }
 0x80f   :  { %14718 = vmatprep.subr.bf16.mxu1 %v20229_v42 }
 0x811   :  { %13904 = vmatpush1.bf16.msra.mxu0 %v20224_v62 }
 0x812   :  { %14719 = vmatpush1.bf16.msra.mxu1 %v20227_v47  ;;  %13914 = vmatprep.subr.bf16.mxu0 %v20232_v49  ;;  %v14777_v49 = vrot.slane %v14772_v39, %v11457_v35 }
 0x813   :  { %14729 = vmatprep.subr.bf16.mxu1 %v20235_v3 }
 0x814   :  { %13906 = vmatmul.mubr.bf16.vlgmr.msra.gmra.mrb[60].mxu0 %v21119_v6 }
 0x815   :  { %14721 = vmatmul.mubr.bf16.vlgmr.msra.gmra.mrb[68].mxu1 %v21119_v6  ;;  %13915 = vmatpush1.bf16.msra.mxu0 %v20230_v22  ;;  %v20253_v6 = vld [vmem:[#allocation6 + $0xd54] ss:$8 sps:$4 sm:$0xff]  }
 0x816   :  { %14730 = vmatpush1.bf16.msra.mxu1 %v20233_v4  ;;  %13916 = vmatprep.subr.bf16.mxu0 %v20238_v56  ;;  %v14781_v56 = vrot.slane %v14772_v39, %v11461_v29  ;;  %v20290_v29 = vld [vmem:[#allocation15] sm:$0xff]  }
 0x817   :  { %14731 = vmatprep.subr.bf16.mxu1 %v20241_v41  ;;  %13946 = vmatprep.mubr.bf16.mxu0 %v20552_v0 }
 0x818   :  { %14761 = vmatprep.mubr.bf16.mxu1 %v20552_v0  ;;  %v20257_v0 = vld [vmem:[#allocation6 + $0xd60] ss:$8 sps:$4 sm:$0xff]  }
 0x819   :  { %13917 = vmatpush1.bf16.msra.mxu0 %v20236_v14 }
 0x81a   :  { %14732 = vmatpush1.bf16.msra.mxu1 %v20239_v63  ;;  %13918 = vmatprep.subr.bf16.mxu0 %v20244_v52 }
 0x81b   :  { %14733 = vmatprep.subr.bf16.mxu1 %v20247_v40 }
 0x81d   :  { %13919 = vmatpush1.bf16.msra.mxu0 %v20242_v36 }
 0x81e   :  { %14734 = vmatpush1.bf16.msra.mxu1 %v20245_v2  ;;  %13920 = vmatprep.subr.bf16.mxu0 %v20250_v7 }
 0x81f   :  { %14735 = vmatprep.subr.bf16.mxu1 %v20253_v6 }
 0x821   :  { %13921 = vmatpush1.bf16.msra.mxu0 %v20248_v53 }
 0x822   :  { %14736 = vmatpush1.bf16.msra.mxu1 %v20251_v54  ;;  %13922 = vmatprep.subr.bf16.mxu0 %v20256_v55  ;;  %v20288_v55 = vld [vmem:[#allocation12 + $0x30] sm:$0xff]  }
 0x823   :  { %14737 = vmatprep.subr.bf16.mxu1 %v20259_v15  ;;  %v20291_v15 = vld [vmem:[#allocation15 + $0x8] sm:$0xff]  }
 0x825   :  { %13923 = vmatpush1.bf16.msra.mxu0 %v20254_v9  ;;  %v20292_v9 = vld [vmem:[#allocation15 + $0x10] sm:$0xff]  }
 0x826   :  { %14738 = vmatpush1.bf16.msra.mxu1 %v20257_v0  ;;  %13924 = vmatprep.subr.bf16.mxu0 %v20262_v10  ;;  %v20293_v0 = vld [vmem:[#allocation15 + $0x18] sm:$0xff]   ;;  %v20294_v10 = vld [vmem:[#allocation15 + $0x20] sm:$0xff]  }
 0x827   :  { %v21152_v46 = vpop.f32.mrb[56].mxu0  ;;  %v21154_v20 = vpop.f32.mrb[64].mxu1  ;;  %14739 = vmatprep.subr.bf16.mxu1 %v20265_v11  ;;  %v20295_v11 = vld [vmem:[#allocation15 + $0x28] sm:$0xff]  }
 0x828   :  { %v13140_v21 = vmax.f32 %v21152_v46, %v21154_v20  ;;  %v21158_v50 = vpop.f32.mrb[57].mxu0  ;;  %v21160_v24 = vpop.f32.mrb[65].mxu1 }
 0x829   :  { %v13141_v30 = vmax.f32 %v21158_v50, %v21160_v24  ;;  %v12324_v25 = vpop.f32.mrb[58].mxu0  ;;  %v13137_v61 = vpop.f32.mrb[66].mxu1  ;;  %13925 = vmatpush1.bf16.msra.mxu0 %v20260_v12 }
 0x82a   :  { %14740 = vmatpush1.bf16.msra.mxu1 %v20263_v13  ;;  %v12325_v32 = vpop.f32.mrb[59].mxu0  ;;  %v13138_v43 = vpop.f32.mrb[67].mxu1  ;;  %17340 = vmatprep.subr.bf16.mxu0 %v20266_v19  ;;  %v17033_v13 = vld [vmem:[#allocation10] ss:$0 sm:$0xff]  ;;  %v20296_v25 = vld [vmem:[#allocation15 + $0x30] sm:$0xff]  }
 0x82b   :  { %17404 = vmatprep.subr.bf16.mxu1 %v20553_v34  ;;  %v20297_v61 = vld [vmem:[#allocation15 + $0x38] sm:$0xff]  }
 0x82c   :  { %16923 = vmatmul.mubr.msk.bf16.vlgmr.msra.gmra.mrb[60].mxu0 %vm12159_vm2, %v21132_v37 }
 0x82d   :  { %17032 = vmatmul.mubr.msk.bf16.vlgmr.msra.gmra.mrb[68].mxu1 %vm12159_vm2, %v21132_v37  ;;  %17341 = vmatpush3.bf16.msra.mxu0 %v20267_v31  ;;  %v20276_v37 = vld [vmem:[#allocation9 + $0x68] sm:$0xff]   ;;  %v17050_v31 = vld [vmem:[#allocation13] ss:$0 sm:$0xff] }
 0x82e   :  { %17342 = vmatprep.subr.bf16.mxu0 %v20268_v26  ;;  %17420 = vmatprep.mubr.msk.bf16.mxu1 %vm20554_vm1, %v20553_v34 }
 0x82f   :  { %17405 = vmatpush3.bf16.msra.mxu1 %v20282_v60 }
 0x830   :  { %17406 = vmatprep.subr.bf16.mxu1 %v20553_v34 }
 0x831   :  { %17343 = vmatpush3.bf16.msra.mxu0 %v20269_v18 }
 0x832   :  { %17344 = vmatprep.subr.bf16.mxu0 %v20270_v45 }
 0x833   :  { %17407 = vmatpush3.bf16.msra.mxu1 %v20283_v1 }
 0x834   :  { %17408 = vmatprep.subr.bf16.mxu1 %v20553_v34 }
 0x835   :  { %17345 = vmatpush3.bf16.msra.mxu0 %v20271_v48 }
 0x836   :  { %17346 = vmatprep.subr.bf16.mxu0 %v20272_v51 }
 0x837   :  { %17409 = vmatpush3.bf16.msra.mxu1 %v20284_v33 }
 0x838   :  { %17410 = vmatprep.subr.bf16.mxu1 %v20553_v34 }
 0x839   :  { %17347 = vmatpush3.bf16.msra.mxu0 %v20273_v8  ;;  %v17059_v8 = vld [vmem:[#allocation16] ss:$0 sm:$0xff] }
 0x83a   :  { %17348 = vmatprep.subr.bf16.mxu0 %v20274_v58 }
 0x83b   :  { %17411 = vmatpush3.bf16.msra.mxu1 %v20285_v5 }
 0x83c   :  { %17412 = vmatprep.subr.bf16.mxu1 %v20553_v34 }
 0x83d   :  { %17349 = vmatpush3.bf16.msra.mxu0 %v20275_v27 }
 0x83e   :  { %17350 = vmatprep.subr.bf16.mxu0 %v20276_v37 }
 0x83f   :  { %17413 = vmatpush3.bf16.msra.mxu1 %v20286_v44 }
 0x840   :  { %17414 = vmatprep.subr.bf16.mxu1 %v20553_v34 }
 0x841   :  { %17351 = vmatpush3.bf16.msra.mxu0 %v20277_v28 }
 0x842   :  { %17352 = vmatprep.subr.bf16.mxu0 %v20278_v59 }
 0x843   :  { %17415 = vmatpush3.bf16.msra.mxu1 %v20287_v17 }
 0x844   :  { %17416 = vmatprep.subr.bf16.mxu1 %v20553_v34 }
 0x845   :  { %17353 = vmatpush3.bf16.msra.mxu0 %v20279_v38 }
 0x846   :  { %17354 = vmatprep.subr.bf16.mxu0 %v20280_v57 }
 0x847   :  { %17417 = vmatpush3.bf16.msra.mxu1 %v20288_v55 }
 0x848   :  { %17418 = vmatprep.subr.bf16.mxu1 %v20553_v34 }
 0x849   :  { %17355 = vmatpush3.bf16.msra.mxu0 %v20281_v16 }
 0x84a   :  { %17424 = vmatprep.subr.bf16.mxu0 %v20553_v34 }
 0x84b   :  { %17419 = vmatpush3.bf16.msra.mxu1 %v20289_v23 }
 0x8ff   :  { %v13948_v42 = vpop.f32.mrb[60].mxu0 }
 0x900   :  { %v13955_v62 = vmax.f32 %v13140_v21, %v13948_v42  ;;  %v14763_v47 = vpop.f32.mrb[68].mxu1  ;;  %v13950_v3 = vpop.f32.mrb[61].mxu0 }
 0x901   :  { %v13956_v22 = vmax.f32 %v13141_v30, %v13950_v3  ;;  %v14765_v4 = vpop.f32.mrb[69].mxu1  ;;  %v13952_v41 = vpop.f32.mrb[62].mxu0 }
 0x902   :  { %v14770_v14 = vmax.f32 %v13955_v62, %v14763_v47  ;;  %v14767_v63 = vpop.f32.mrb[70].mxu1  ;;  %v13953_v52 = vpop.f32.mrb[63].mxu0 }
 0x903   :  { %v14771_v40 = vmax.f32 %v13956_v22, %v14765_v4  ;;  %v14768_v36 = vpop.f32.mrb[71].mxu1 }
 0x904   :  { %v14784_v2 = vadd.f32 %v14777_v49, %v14770_v14 }
 0x905   :  { %v14785_v7 = vadd.f32 %v14781_v56, %v14771_v40 }
 0x906   :  { %v14786_v6 = vmax.f32 %v14784_v2, 0.0 }
 0x907   :  { %v14787_v53 = vmax.f32 %v14785_v7, 0.0 }
 0x908   :  { %v14788_v54 = vpack.c.bf16 %v14786_v6, %v14786_v6 }
 0x909   :  { %v14789_v35 = vpack.c.bf16 %v14787_v53, %v14787_v53 }
 0x90b   :  { %14957 = vmatprep.mubr.bf16.mxu0 %v14789_v35 }
 0x90c   :  { %14958 = vmatmul.mubr.bf16.vlgmr.msra.gmra.mrb[64].mxu0 %v14788_v54 }
 0x90d   :  { %17440 = vmatprep.mubr.msk.bf16.mxu0 %vm20554_vm1, %v20553_v34  ;;  %17425 = vmatpush3.bf16.msra.mxu0 %v20290_v29 }
 0x90e   :  { %17426 = vmatprep.subr.bf16.mxu0 %v20553_v34 }
 0x911   :  { %17427 = vmatpush3.bf16.msra.mxu0 %v20291_v15 }
 0x912   :  { %17428 = vmatprep.subr.bf16.mxu0 %v20553_v34 }
 0x915   :  { %17429 = vmatpush3.bf16.msra.mxu0 %v20292_v9 }
 0x916   :  { %17430 = vmatprep.subr.bf16.mxu0 %v20553_v34 }
 0x919   :  { %17431 = vmatpush3.bf16.msra.mxu0 %v20293_v0 }
 0x91a   :  { %17432 = vmatprep.subr.bf16.mxu0 %v20553_v34 }
 0x91d   :  { %17433 = vmatpush3.bf16.msra.mxu0 %v20294_v10 }
 0x91e   :  { %17434 = vmatprep.subr.bf16.mxu0 %v20553_v34 }
 0x921   :  { %17435 = vmatpush3.bf16.msra.mxu0 %v20295_v11 }
 0x922   :  { %17436 = vmatprep.subr.bf16.mxu0 %v20553_v34 }
 0x925   :  { %17437 = vmatpush3.bf16.msra.mxu0 %v20296_v25 }
 0x926   :  { %17438 = vmatprep.subr.bf16.mxu0 %v20553_v34 }
 0x929   :  { %17439 = vmatpush3.bf16.msra.mxu0 %v20297_v61 }
 0x9df   :  { %v17356_v12 = vpop.f32.mrb[64].mxu0 }
 0x9e0   :  { %v17357_v19 = vpop.f32.mrb[65].mxu0 }
 0x9e1   :  { %v17358_v46 = vadd.f32 %v17357_v19, %v17356_v12  ;;  %v17359_v20 = vpop.f32.mrb[66].mxu0 }
 0x9e2   :  { %v17360_v21 = vpop.f32.mrb[67].mxu0 }
 0x9e3   :  { %v14960_v50 = vadd.f32 %v17358_v46, %v17033_v13 }
 0x9e5   :  { %v14965_v24 = vmax.f32 %v14960_v50, 0.0 }
 0x9e7   :  { %v14966_v30 = vpack.c.bf16 %v14965_v24, %v14965_v24 }
 0x9e9   :  { %17421 = vmatmul.mubr.bf16.vlgmr.msra.gmra.mrb[72].mxu1 %v14966_v30 }
 0xabc   :  { %v15072_v32 = vpop.f32.mrb[72].mxu1 }
 0xabd   :  { %v15073_v43 = vadd.f32 %v17050_v31, %v15072_v32  ;;  %v17422_v26 = vpop.f32.mrb[73].mxu1 }
 0xabe   :  { %v15075_v18 = vpop.f32.mrb[74].mxu1 }
 0xabf   :  { %v15078_v45 = vmax.f32 %v15073_v43, 0.0  ;;  %v17423_v48 = vpop.f32.mrb[75].mxu1 }
 0xac1   :  { %v15079_v51 = vpack.c.bf16 %v15078_v45, %v15078_v45 }
 0xac3   :  { %17441 = vmatmul.mubr.bf16.vlgmr.msra.gmra.mrb[68].mxu0 %v15079_v51 }
 0xb96   :  { %v15185_v58 = vpop.f32.mrb[68].mxu0 }
 0xb97   :  { %v15186_v27 = vadd.f32 %v17059_v8, %v15185_v58  ;;  %v17442_v37 = vpop.f32.mrb[69].mxu0 }
 0xb98   :  { %v15188_v28 = vpop.f32.mrb[70].mxu0 }
 0xb99   :  { %15191 = vst [vmem:[%s21212_s11] sm:$0xff] %v15186_v27  ;;  %v17443_v34 = vpop.f32.mrb[71].mxu0 }
 0xb9a   :  { %15196 = vsyncpa [#allocation3], 1 }
 0xb9b   :  { %15197 = vsyncpa [#allocation5], 1 }
 0xb9c   :  { %15198 = vsyncpa [#allocation8], 1 }
 0xb9d   :  { %15199 = vsyncpa [#allocation11], 1 }
 0xb9e   :  { %15200 = vsyncpa [#allocation14], 1 }
 0xb9f   :  { %15201 = vsyncpa [#allocation17], 1 }

</bundles_post_ra>
